<compile_context>
chip_gen: v7x
topology: tpu7x:2x2x1
jax: 0.10.0
libtpu: 0.0.40
codegen_flags: <defaults>
</compile_context>

<pallas_src>
import functools

import jax
import jax.numpy as jnp
from jax.experimental import pallas as pl
from jax.experimental.pallas import tpu as pltpu

VMEM_SPEC = pl.BlockSpec(memory_space=pltpu.MemorySpace.VMEM)


# --------------------------- in-kernel helpers ------------------------------ #
def _dot(a, b):
    return jnp.dot(a, b, preferred_element_type=jnp.float32)


def _lstm_direction(x, w_ih_t, w_hh_t, b, hidden, reverse):
    """One direction of one LSTM layer, fully unrolled (N is static & tiny).

    PyTorch gate order (i, f, g, o); b = b_ih + b_hh.  The input projection for
    all timesteps is a single (N, 4H) matmul; each unrolled step only does the
    (1, H) @ (H, 4H) recurrent matmul + gate nonlinearities.  Outputs are
    collected as values and stored once by the caller (full-tile store).
    """
    n = x.shape[0]
    xp = _dot(x, w_ih_t) + b                          # (N, 4H), shared per step
    h = jnp.zeros((1, hidden), jnp.float32)
    c = jnp.zeros((1, hidden), jnp.float32)
    outs = [None] * n
    order = range(n - 1, -1, -1) if reverse else range(n)
    for t in order:                                   # static Python unroll
        g = xp[t:t + 1, :] + _dot(h, w_hh_t)          # static slice, no copies
        i = jax.nn.sigmoid(g[:, 0:hidden])
        f = jax.nn.sigmoid(g[:, hidden:2 * hidden])
        gg = jnp.tanh(g[:, 2 * hidden:3 * hidden])
        o = jax.nn.sigmoid(g[:, 3 * hidden:4 * hidden])
        c = f * c + i * gg
        h = o * jnp.tanh(c)
        outs[t] = h
    return jnp.concatenate(outs, axis=0)              # (N, H)


def _bilstm(x, layers, hidden):
    """2-layer bidirectional LSTM.  Both directions + the fwd/bwd concat are
    done on VMEM values inside the same kernel trace (no reverse/concat copies,
    no extra launches, weights already resident)."""
    h = x
    for (w_ih_f, w_hh_f, b_f, w_ih_b, w_hh_b, b_b) in layers:
        fwd = _lstm_direction(h, w_ih_f, w_hh_f, b_f, hidden, reverse=False)
        bwd = _lstm_direction(h, w_ih_b, w_hh_b, b_b, hidden, reverse=True)
        h = jnp.concatenate([fwd, bwd], axis=1)       # (N, 2H)
    return h


def _relu_attn_gcn(x, a_norm, w_t, b, apply_relu):
    """relu -> (x + x*softmax(x, axis=0)) -> GCN (A_hat @ (X @ W) + b), fused."""
    r = jnp.maximum(x, 0.0)
    m = jnp.max(r, axis=0, keepdims=True)
    e = jnp.exp(r - m)
    p = e / jnp.sum(e, axis=0, keepdims=True)         # softmax over node axis
    y = r + r * p
    out = _dot(a_norm, _dot(y, w_t)) + b
    return jnp.maximum(out, 0.0) if apply_relu else out


# ------------------------- single fused Pallas kernel ----------------------- #
def _cellt_fused_kernel(x_ref, a_ref, lin_w_ref, lin_b_ref,
                        l1_wih_f, l1_whh_f, l1_b_f, l1_wih_b, l1_whh_b, l1_b_b,
                        l2_wih_f, l2_whh_f, l2_b_f, l2_wih_b, l2_whh_b, l2_b_b,
                        gcn_w_ref, gcn_b_ref, o_ref, *, hidden):
    a = a_ref[...]
    gcn_w = gcn_w_ref[...]
    gcn_b = gcn_b_ref[...]
    layers = (
        (l1_wih_f[...], l1_whh_f[...], l1_b_f[...],
         l1_wih_b[...], l1_whh_b[...], l1_b_b[...]),
        (l2_wih_f[...], l2_whh_f[...], l2_b_f[...],
         l2_wih_b[...], l2_whh_b[...], l2_b_b[...]),
    )

    # x = relu(Linear(x))
    x = jnp.maximum(_dot(x_ref[...], lin_w_ref[...]) + lin_b_ref[...], 0.0)

    # branch 1: BiLSTM -> relu/attention residual -> GCN(+relu) -> residual add
    x1 = _bilstm(x, layers, hidden)
    x1 = _relu_attn_gcn(x1, a, gcn_w, gcn_b, apply_relu=True)
    x = x + x1

    # branch 2: BiLSTM -> relu/attention residual -> GCN (no relu)
    x2 = _bilstm(x, layers, hidden)
    x2 = _relu_attn_gcn(x2, a, gcn_w, gcn_b, apply_relu=False)

    # dropout(p=0.5, training=False) == identity
    o_ref[...] = x2


def cellt_encoder_forward(x_c, a_norm, params, hidden):
    operands = [x_c, a_norm, params["lin_w_t"], params["lin_b"]]
    for layer in params["lstm"]:
        operands += [layer["w_ih_f"], layer["w_hh_f"], layer["b_f"],
                     layer["w_ih_b"], layer["w_hh_b"], layer["b_b"]]
    operands += [params["gcn_w_t"], params["gcn_b"]]

    z = pl.pallas_call(
        functools.partial(_cellt_fused_kernel, hidden=hidden),
        out_shape=jax.ShapeDtypeStruct(
            (x_c.shape[0], params["gcn_w_t"].shape[1]), jnp.float32),
        in_specs=[VMEM_SPEC] * len(operands),
        out_specs=VMEM_SPEC,
    )(*operands)
    return z, z


# --------------------------- pure-JAX reference ----------------------------- #
def _ref_lstm_dir(x, w_ih_t, w_hh_t, b, hidden):
    xp = x @ w_ih_t + b
    h = jnp.zeros((1, hidden), jnp.float32)
    c = jnp.zeros((1, hidden), jnp.float32)
    outs = []
    for t in range(x.shape[0]):
        g = xp[t:t + 1] + h @ w_hh_t
        i = jax.nn.sigmoid(g[:, :hidden])
        f = jax.nn.sigmoid(g[:, hidden:2 * hidden])
        gg = jnp.tanh(g[:, 2 * hidden:3 * hidden])
        o = jax.nn.sigmoid(g[:, 3 * hidden:])
        c = f * c + i * gg
        h = o * jnp.tanh(c)
        outs.append(h)
    return jnp.concatenate(outs, axis=0)


def _ref_bilstm(x, lstm_layers, hidden):
    h = x
    for layer in lstm_layers:
        fwd = _ref_lstm_dir(h, layer["w_ih_f"], layer["w_hh_f"], layer["b_f"], hidden)
        bwd = _ref_lstm_dir(h[::-1], layer["w_ih_b"], layer["w_hh_b"], layer["b_b"],
                            hidden)[::-1]
        h = jnp.concatenate([fwd, bwd], axis=1)
    return h


def _ref_forward(x_c, a_norm, params, hidden):
    def relu_attn(r):
        r = jnp.maximum(r, 0.0)
        return r + r * jax.nn.softmax(r, axis=0)

    def gcn(x, relu_after):
        y = a_norm @ (x @ params["gcn_w_t"]) + params["gcn_b"]
        return jnp.maximum(y, 0.0) if relu_after else y

    x = jnp.maximum(x_c @ params["lin_w_t"] + params["lin_b"], 0.0)
    x1 = gcn(relu_attn(_ref_bilstm(x, params["lstm"], hidden)), True)
    x = x + x1
    x2 = gcn(relu_attn(_ref_bilstm(x, params["lstm"], hidden)), False)
    return x2


# ---------------------------------- main ------------------------------------ #
if __name__ == "__main__":
    N, F, D = 8, 16, 32          # nodes, num_features, hidden_dim
    H = D // 2                   # LSTM hidden size per direction

    key = jax.random.PRNGKey(0)
    keys = jax.random.split(key, 24)

    def uinit(k, shape, fan_in):
        bound = 1.0 / (fan_in ** 0.5)
        return jax.random.uniform(k, shape, jnp.float32, -bound, bound)

    # inputs: node features + ring-graph edge_index (2, E), undirected
    x_c = jax.random.normal(keys[0], (N, F), jnp.float32)
    src = jnp.arange(N, dtype=jnp.int32)
    dst = (src + 1) % N
    edge_index_c = jnp.stack([jnp.concatenate([src, dst]), jnp.concatenate([dst, src])])

    # GCN normalized adjacency  A_hat = D^-1/2 (A + I) D^-1/2   (dense, host-side glue)
    A = jnp.zeros((N, N), jnp.float32).at[edge_index_c[1], edge_index_c[0]].set(1.0)
    A = A + jnp.eye(N, dtype=jnp.float32)
    deg = A.sum(axis=1)
    dinv = 1.0 / jnp.sqrt(deg)
    a_norm = dinv[:, None] * A * dinv[None, :]

    # deterministic parameters (weights pre-transposed for x @ W_t layout)
    params = {
        "lin_w_t": uinit(keys[1], (F, D), F),
        "lin_b": uinit(keys[2], (1, D), F),
    }
    lstm_layers = []
    in_dim = D
    ki = 3
    for _layer in range(2):                      # num_layers=2, bidirectional
        lp = {}
        for d in ("f", "b"):
            w_ih = uinit(keys[ki], (4 * H, in_dim), H); ki += 1
            w_hh = uinit(keys[ki], (4 * H, H), H); ki += 1
            b_ih = uinit(keys[ki], (4 * H,), H); ki += 1
            b_hh = uinit(keys[ki], (4 * H,), H); ki += 1
            lp["w_ih_" + d] = w_ih.T
            lp["w_hh_" + d] = w_hh.T
            lp["b_" + d] = (b_ih + b_hh).reshape(1, 4 * H)
        lstm_layers.append(lp)
        in_dim = 2 * H
    params["lstm"] = lstm_layers
    params["gcn_w_t"] = uinit(keys[ki], (D, D), D); ki += 1
    params["gcn_b"] = uinit(keys[ki], (1, D), D); ki += 1

    # run fused Pallas forward (single kernel launch)
    Z, Z_c = cellt_encoder_forward(x_c, a_norm, params, H)
    jax.block_until_ready((Z, Z_c))

    # correctness check vs pure-JAX reference
    Z_ref = _ref_forward(x_c, a_norm, params, H)
    assert Z.shape == (N, D) and Z_c.shape == (N, D)
    assert jnp.allclose(Z, Z_ref, atol=2e-2, rtol=2e-2), float(jnp.abs(Z - Z_ref).max())
    assert jnp.array_equal(Z, Z_c)

    print("KERNEL_OK")
</pallas_src>

<mosaic_0001>
module attributes {stable_mosaic.version = 11 : i64} {
  func.func @_cellt_fused_kernel(%arg0: memref<8x16xf32, #tpu.memory_space<vmem>>, %arg1: memref<8x8xf32, #tpu.memory_space<vmem>>, %arg2: memref<16x32xf32, #tpu.memory_space<vmem>>, %arg3: memref<1x32xf32, #tpu.memory_space<vmem>>, %arg4: memref<32x64xf32, #tpu.memory_space<vmem>>, %arg5: memref<16x64xf32, #tpu.memory_space<vmem>>, %arg6: memref<1x64xf32, #tpu.memory_space<vmem>>, %arg7: memref<32x64xf32, #tpu.memory_space<vmem>>, %arg8: memref<16x64xf32, #tpu.memory_space<vmem>>, %arg9: memref<1x64xf32, #tpu.memory_space<vmem>>, %arg10: memref<32x64xf32, #tpu.memory_space<vmem>>, %arg11: memref<16x64xf32, #tpu.memory_space<vmem>>, %arg12: memref<1x64xf32, #tpu.memory_space<vmem>>, %arg13: memref<32x64xf32, #tpu.memory_space<vmem>>, %arg14: memref<16x64xf32, #tpu.memory_space<vmem>>, %arg15: memref<1x64xf32, #tpu.memory_space<vmem>>, %arg16: memref<32x32xf32, #tpu.memory_space<vmem>>, %arg17: memref<1x32xf32, #tpu.memory_space<vmem>>, %arg18: memref<8x32xf32, #tpu.memory_space<vmem>>) attributes {dimension_semantics = [], scalar_prefetch = 0 : i64, scratch_operands = 0 : i64, tpu.core_type = #tpu.core_type<tc>} {
    %c0 = arith.constant 0 : index
    %c0_0 = arith.constant 0 : index
    %0 = vector.load %arg1[%c0, %c0_0] : memref<8x8xf32, #tpu.memory_space<vmem>>, vector<8x8xf32>
    %c0_1 = arith.constant 0 : index
    %c0_2 = arith.constant 0 : index
    %1 = vector.load %arg16[%c0_1, %c0_2] : memref<32x32xf32, #tpu.memory_space<vmem>>, vector<32x32xf32>
    %c0_3 = arith.constant 0 : index
    %c0_4 = arith.constant 0 : index
    %2 = vector.load %arg17[%c0_3, %c0_4] : memref<1x32xf32, #tpu.memory_space<vmem>>, vector<1x32xf32>
    %c0_5 = arith.constant 0 : index
    %c0_6 = arith.constant 0 : index
    %3 = vector.load %arg4[%c0_5, %c0_6] : memref<32x64xf32, #tpu.memory_space<vmem>>, vector<32x64xf32>
    %c0_7 = arith.constant 0 : index
    %c0_8 = arith.constant 0 : index
    %4 = vector.load %arg5[%c0_7, %c0_8] : memref<16x64xf32, #tpu.memory_space<vmem>>, vector<16x64xf32>
    %c0_9 = arith.constant 0 : index
    %c0_10 = arith.constant 0 : index
    %5 = vector.load %arg6[%c0_9, %c0_10] : memref<1x64xf32, #tpu.memory_space<vmem>>, vector<1x64xf32>
    %c0_11 = arith.constant 0 : index
    %c0_12 = arith.constant 0 : index
    %6 = vector.load %arg7[%c0_11, %c0_12] : memref<32x64xf32, #tpu.memory_space<vmem>>, vector<32x64xf32>
    %c0_13 = arith.constant 0 : index
    %c0_14 = arith.constant 0 : index
    %7 = vector.load %arg8[%c0_13, %c0_14] : memref<16x64xf32, #tpu.memory_space<vmem>>, vector<16x64xf32>
    %c0_15 = arith.constant 0 : index
    %c0_16 = arith.constant 0 : index
    %8 = vector.load %arg9[%c0_15, %c0_16] : memref<1x64xf32, #tpu.memory_space<vmem>>, vector<1x64xf32>
    %c0_17 = arith.constant 0 : index
    %c0_18 = arith.constant 0 : index
    %9 = vector.load %arg10[%c0_17, %c0_18] : memref<32x64xf32, #tpu.memory_space<vmem>>, vector<32x64xf32>
    %c0_19 = arith.constant 0 : index
    %c0_20 = arith.constant 0 : index
    %10 = vector.load %arg11[%c0_19, %c0_20] : memref<16x64xf32, #tpu.memory_space<vmem>>, vector<16x64xf32>
    %c0_21 = arith.constant 0 : index
    %c0_22 = arith.constant 0 : index
    %11 = vector.load %arg12[%c0_21, %c0_22] : memref<1x64xf32, #tpu.memory_space<vmem>>, vector<1x64xf32>
    %c0_23 = arith.constant 0 : index
    %c0_24 = arith.constant 0 : index
    %12 = vector.load %arg13[%c0_23, %c0_24] : memref<32x64xf32, #tpu.memory_space<vmem>>, vector<32x64xf32>
    %c0_25 = arith.constant 0 : index
    %c0_26 = arith.constant 0 : index
    %13 = vector.load %arg14[%c0_25, %c0_26] : memref<16x64xf32, #tpu.memory_space<vmem>>, vector<16x64xf32>
    %c0_27 = arith.constant 0 : index
    %c0_28 = arith.constant 0 : index
    %14 = vector.load %arg15[%c0_27, %c0_28] : memref<1x64xf32, #tpu.memory_space<vmem>>, vector<1x64xf32>
    %c0_29 = arith.constant 0 : index
    %c0_30 = arith.constant 0 : index
    %15 = vector.load %arg0[%c0_29, %c0_30] : memref<8x16xf32, #tpu.memory_space<vmem>>, vector<8x16xf32>
    %c0_31 = arith.constant 0 : index
    %c0_32 = arith.constant 0 : index
    %16 = vector.load %arg2[%c0_31, %c0_32] : memref<16x32xf32, #tpu.memory_space<vmem>>, vector<16x32xf32>
    %cst = arith.constant dense<0.000000e+00> : vector<8x32xf32>
    %17 = tpu.matmul %15, %16, %cst {dimension_numbers = #tpu.dot_dimension_numbers<[1], [0], [0], [1], [0, 0, 1, 1], [], []>} : vector<8x16xf32>, vector<16x32xf32>, vector<8x32xf32> -> vector<8x32xf32>
    %c0_33 = arith.constant 0 : index
    %c0_34 = arith.constant 0 : index
    %18 = vector.load %arg3[%c0_33, %c0_34] : memref<1x32xf32, #tpu.memory_space<vmem>>, vector<1x32xf32>
    %19 = vector.broadcast %18 : vector<1x32xf32> to vector<8x32xf32>
    %20 = arith.addf %17, %19 : vector<8x32xf32>
    %cst_35 = arith.constant 0.000000e+00 : f32
    %21 = vector.broadcast %cst_35 : f32 to vector<8x32xf32>
    %22 = arith.maximumf %20, %21 : vector<8x32xf32>
    %cst_36 = arith.constant dense<0.000000e+00> : vector<8x64xf32>
    %23 = tpu.matmul %22, %3, %cst_36 {dimension_numbers = #tpu.dot_dimension_numbers<[1], [0], [0], [1], [0, 0, 1, 1], [], []>} : vector<8x32xf32>, vector<32x64xf32>, vector<8x64xf32> -> vector<8x64xf32>
    %24 = vector.broadcast %5 : vector<1x64xf32> to vector<8x64xf32>
    %25 = arith.addf %23, %24 : vector<8x64xf32>
    %cst_37 = arith.constant 0.000000e+00 : f32
    %26 = vector.broadcast %cst_37 : f32 to vector<1x16xf32>
    %cst_38 = arith.constant 0.000000e+00 : f32
    %27 = vector.broadcast %cst_38 : f32 to vector<1x16xf32>
    %28 = vector.extract_strided_slice %25 {offsets = [0, 0], sizes = [1, 64], strides = [1, 1]} : vector<8x64xf32> to vector<1x64xf32>
    %cst_39 = arith.constant dense<0.000000e+00> : vector<1x64xf32>
    %29 = tpu.matmul %26, %4, %cst_39 {dimension_numbers = #tpu.dot_dimension_numbers<[1], [0], [0], [1], [0, 0, 1, 1], [], []>} : vector<1x16xf32>, vector<16x64xf32>, vector<1x64xf32> -> vector<1x64xf32>
    %30 = arith.addf %28, %29 : vector<1x64xf32>
    %31 = vector.extract_strided_slice %30 {offsets = [0, 0], sizes = [1, 16], strides = [1, 1]} : vector<1x64xf32> to vector<1x16xf32>
    %32 = arith.negf %31 : vector<1x16xf32>
    %33 = math.exp %32 : vector<1x16xf32>
    %cst_40 = arith.constant 1.000000e+00 : f32
    %34 = vector.broadcast %cst_40 : f32 to vector<1x16xf32>
    %35 = arith.addf %34, %33 : vector<1x16xf32>
    %36 = arith.divf %34, %35 : vector<1x16xf32>
    %37 = vector.extract_strided_slice %30 {offsets = [0, 16], sizes = [1, 16], strides = [1, 1]} : vector<1x64xf32> to vector<1x16xf32>
    %38 = arith.negf %37 : vector<1x16xf32>
    %39 = math.exp %38 : vector<1x16xf32>
    %cst_41 = arith.constant 1.000000e+00 : f32
    %40 = vector.broadcast %cst_41 : f32 to vector<1x16xf32>
    %41 = arith.addf %40, %39 : vector<1x16xf32>
    %42 = arith.divf %40, %41 : vector<1x16xf32>
    %43 = vector.extract_strided_slice %30 {offsets = [0, 32], sizes = [1, 16], strides = [1, 1]} : vector<1x64xf32> to vector<1x16xf32>
    %44 = math.tanh %43 : vector<1x16xf32>
    %45 = vector.extract_strided_slice %30 {offsets = [0, 48], sizes = [1, 16], strides = [1, 1]} : vector<1x64xf32> to vector<1x16xf32>
    %46 = arith.negf %45 : vector<1x16xf32>
    %47 = math.exp %46 : vector<1x16xf32>
    %cst_42 = arith.constant 1.000000e+00 : f32
    %48 = vector.broadcast %cst_42 : f32 to vector<1x16xf32>
    %49 = arith.addf %48, %47 : vector<1x16xf32>
    %50 = arith.divf %48, %49 : vector<1x16xf32>
    %51 = arith.mulf %42, %27 : vector<1x16xf32>
    %52 = arith.mulf %36, %44 : vector<1x16xf32>
    %53 = arith.addf %51, %52 : vector<1x16xf32>
    %54 = math.tanh %53 : vector<1x16xf32>
    %55 = arith.mulf %50, %54 : vector<1x16xf32>
    %56 = vector.extract_strided_slice %25 {offsets = [1, 0], sizes = [1, 64], strides = [1, 1]} : vector<8x64xf32> to vector<1x64xf32>
    %cst_43 = arith.constant dense<0.000000e+00> : vector<1x64xf32>
    %57 = tpu.matmul %55, %4, %cst_43 {dimension_numbers = #tpu.dot_dimension_numbers<[1], [0], [0], [1], [0, 0, 1, 1], [], []>} : vector<1x16xf32>, vector<16x64xf32>, vector<1x64xf32> -> vector<1x64xf32>
    %58 = arith.addf %56, %57 : vector<1x64xf32>
    %59 = vector.extract_strided_slice %58 {offsets = [0, 0], sizes = [1, 16], strides = [1, 1]} : vector<1x64xf32> to vector<1x16xf32>
    %60 = arith.negf %59 : vector<1x16xf32>
    %61 = math.exp %60 : vector<1x16xf32>
    %cst_44 = arith.constant 1.000000e+00 : f32
    %62 = vector.broadcast %cst_44 : f32 to vector<1x16xf32>
    %63 = arith.addf %62, %61 : vector<1x16xf32>
    %64 = arith.divf %62, %63 : vector<1x16xf32>
    %65 = vector.extract_strided_slice %58 {offsets = [0, 16], sizes = [1, 16], strides = [1, 1]} : vector<1x64xf32> to vector<1x16xf32>
    %66 = arith.negf %65 : vector<1x16xf32>
    %67 = math.exp %66 : vector<1x16xf32>
    %cst_45 = arith.constant 1.000000e+00 : f32
    %68 = vector.broadcast %cst_45 : f32 to vector<1x16xf32>
    %69 = arith.addf %68, %67 : vector<1x16xf32>
    %70 = arith.divf %68, %69 : vector<1x16xf32>
    %71 = vector.extract_strided_slice %58 {offsets = [0, 32], sizes = [1, 16], strides = [1, 1]} : vector<1x64xf32> to vector<1x16xf32>
    %72 = math.tanh %71 : vector<1x16xf32>
    %73 = vector.extract_strided_slice %58 {offsets = [0, 48], sizes = [1, 16], strides = [1, 1]} : vector<1x64xf32> to vector<1x16xf32>
    %74 = arith.negf %73 : vector<1x16xf32>
    %75 = math.exp %74 : vector<1x16xf32>
    %cst_46 = arith.constant 1.000000e+00 : f32
    %76 = vector.broadcast %cst_46 : f32 to vector<1x16xf32>
    %77 = arith.addf %76, %75 : vector<1x16xf32>
    %78 = arith.divf %76, %77 : vector<1x16xf32>
    %79 = arith.mulf %70, %53 : vector<1x16xf32>
    %80 = arith.mulf %64, %72 : vector<1x16xf32>
    %81 = arith.addf %79, %80 : vector<1x16xf32>
    %82 = math.tanh %81 : vector<1x16xf32>
    %83 = arith.mulf %78, %82 : vector<1x16xf32>
    %84 = vector.extract_strided_slice %25 {offsets = [2, 0], sizes = [1, 64], strides = [1, 1]} : vector<8x64xf32> to vector<1x64xf32>
    %cst_47 = arith.constant dense<0.000000e+00> : vector<1x64xf32>
    %85 = tpu.matmul %83, %4, %cst_47 {dimension_numbers = #tpu.dot_dimension_numbers<[1], [0], [0], [1], [0, 0, 1, 1], [], []>} : vector<1x16xf32>, vector<16x64xf32>, vector<1x64xf32> -> vector<1x64xf32>
    %86 = arith.addf %84, %85 : vector<1x64xf32>
    %87 = vector.extract_strided_slice %86 {offsets = [0, 0], sizes = [1, 16], strides = [1, 1]} : vector<1x64xf32> to vector<1x16xf32>
    %88 = arith.negf %87 : vector<1x16xf32>
    %89 = math.exp %88 : vector<1x16xf32>
    %cst_48 = arith.constant 1.000000e+00 : f32
    %90 = vector.broadcast %cst_48 : f32 to vector<1x16xf32>
    %91 = arith.addf %90, %89 : vector<1x16xf32>
    %92 = arith.divf %90, %91 : vector<1x16xf32>
    %93 = vector.extract_strided_slice %86 {offsets = [0, 16], sizes = [1, 16], strides = [1, 1]} : vector<1x64xf32> to vector<1x16xf32>
    %94 = arith.negf %93 : vector<1x16xf32>
    %95 = math.exp %94 : vector<1x16xf32>
    %cst_49 = arith.constant 1.000000e+00 : f32
    %96 = vector.broadcast %cst_49 : f32 to vector<1x16xf32>
    %97 = arith.addf %96, %95 : vector<1x16xf32>
    %98 = arith.divf %96, %97 : vector<1x16xf32>
    %99 = vector.extract_strided_slice %86 {offsets = [0, 32], sizes = [1, 16], strides = [1, 1]} : vector<1x64xf32> to vector<1x16xf32>
    %100 = math.tanh %99 : vector<1x16xf32>
    %101 = vector.extract_strided_slice %86 {offsets = [0, 48], sizes = [1, 16], strides = [1, 1]} : vector<1x64xf32> to vector<1x16xf32>
    %102 = arith.negf %101 : vector<1x16xf32>
    %103 = math.exp %102 : vector<1x16xf32>
    %cst_50 = arith.constant 1.000000e+00 : f32
    %104 = vector.broadcast %cst_50 : f32 to vector<1x16xf32>
    %105 = arith.addf %104, %103 : vector<1x16xf32>
    %106 = arith.divf %104, %105 : vector<1x16xf32>
    %107 = arith.mulf %98, %81 : vector<1x16xf32>
    %108 = arith.mulf %92, %100 : vector<1x16xf32>
    %109 = arith.addf %107, %108 : vector<1x16xf32>
    %110 = math.tanh %109 : vector<1x16xf32>
    %111 = arith.mulf %106, %110 : vector<1x16xf32>
    %112 = vector.extract_strided_slice %25 {offsets = [3, 0], sizes = [1, 64], strides = [1, 1]} : vector<8x64xf32> to vector<1x64xf32>
    %cst_51 = arith.constant dense<0.000000e+00> : vector<1x64xf32>
    %113 = tpu.matmul %111, %4, %cst_51 {dimension_numbers = #tpu.dot_dimension_numbers<[1], [0], [0], [1], [0, 0, 1, 1], [], []>} : vector<1x16xf32>, vector<16x64xf32>, vector<1x64xf32> -> vector<1x64xf32>
    %114 = arith.addf %112, %113 : vector<1x64xf32>
    %115 = vector.extract_strided_slice %114 {offsets = [0, 0], sizes = [1, 16], strides = [1, 1]} : vector<1x64xf32> to vector<1x16xf32>
    %116 = arith.negf %115 : vector<1x16xf32>
    %117 = math.exp %116 : vector<1x16xf32>
    %cst_52 = arith.constant 1.000000e+00 : f32
    %118 = vector.broadcast %cst_52 : f32 to vector<1x16xf32>
    %119 = arith.addf %118, %117 : vector<1x16xf32>
    %120 = arith.divf %118, %119 : vector<1x16xf32>
    %121 = vector.extract_strided_slice %114 {offsets = [0, 16], sizes = [1, 16], strides = [1, 1]} : vector<1x64xf32> to vector<1x16xf32>
    %122 = arith.negf %121 : vector<1x16xf32>
    %123 = math.exp %122 : vector<1x16xf32>
    %cst_53 = arith.constant 1.000000e+00 : f32
    %124 = vector.broadcast %cst_53 : f32 to vector<1x16xf32>
    %125 = arith.addf %124, %123 : vector<1x16xf32>
    %126 = arith.divf %124, %125 : vector<1x16xf32>
    %127 = vector.extract_strided_slice %114 {offsets = [0, 32], sizes = [1, 16], strides = [1, 1]} : vector<1x64xf32> to vector<1x16xf32>
    %128 = math.tanh %127 : vector<1x16xf32>
    %129 = vector.extract_strided_slice %114 {offsets = [0, 48], sizes = [1, 16], strides = [1, 1]} : vector<1x64xf32> to vector<1x16xf32>
    %130 = arith.negf %129 : vector<1x16xf32>
    %131 = math.exp %130 : vector<1x16xf32>
    %cst_54 = arith.constant 1.000000e+00 : f32
    %132 = vector.broadcast %cst_54 : f32 to vector<1x16xf32>
    %133 = arith.addf %132, %131 : vector<1x16xf32>
    %134 = arith.divf %132, %133 : vector<1x16xf32>
    %135 = arith.mulf %126, %109 : vector<1x16xf32>
    %136 = arith.mulf %120, %128 : vector<1x16xf32>
    %137 = arith.addf %135, %136 : vector<1x16xf32>
    %138 = math.tanh %137 : vector<1x16xf32>
    %139 = arith.mulf %134, %138 : vector<1x16xf32>
    %140 = vector.extract_strided_slice %25 {offsets = [4, 0], sizes = [1, 64], strides = [1, 1]} : vector<8x64xf32> to vector<1x64xf32>
    %cst_55 = arith.constant dense<0.000000e+00> : vector<1x64xf32>
    %141 = tpu.matmul %139, %4, %cst_55 {dimension_numbers = #tpu.dot_dimension_numbers<[1], [0], [0], [1], [0, 0, 1, 1], [], []>} : vector<1x16xf32>, vector<16x64xf32>, vector<1x64xf32> -> vector<1x64xf32>
    %142 = arith.addf %140, %141 : vector<1x64xf32>
    %143 = vector.extract_strided_slice %142 {offsets = [0, 0], sizes = [1, 16], strides = [1, 1]} : vector<1x64xf32> to vector<1x16xf32>
    %144 = arith.negf %143 : vector<1x16xf32>
    %145 = math.exp %144 : vector<1x16xf32>
    %cst_56 = arith.constant 1.000000e+00 : f32
    %146 = vector.broadcast %cst_56 : f32 to vector<1x16xf32>
    %147 = arith.addf %146, %145 : vector<1x16xf32>
    %148 = arith.divf %146, %147 : vector<1x16xf32>
    %149 = vector.extract_strided_slice %142 {offsets = [0, 16], sizes = [1, 16], strides = [1, 1]} : vector<1x64xf32> to vector<1x16xf32>
    %150 = arith.negf %149 : vector<1x16xf32>
    %151 = math.exp %150 : vector<1x16xf32>
    %cst_57 = arith.constant 1.000000e+00 : f32
    %152 = vector.broadcast %cst_57 : f32 to vector<1x16xf32>
    %153 = arith.addf %152, %151 : vector<1x16xf32>
    %154 = arith.divf %152, %153 : vector<1x16xf32>
    %155 = vector.extract_strided_slice %142 {offsets = [0, 32], sizes = [1, 16], strides = [1, 1]} : vector<1x64xf32> to vector<1x16xf32>
    %156 = math.tanh %155 : vector<1x16xf32>
    %157 = vector.extract_strided_slice %142 {offsets = [0, 48], sizes = [1, 16], strides = [1, 1]} : vector<1x64xf32> to vector<1x16xf32>
    %158 = arith.negf %157 : vector<1x16xf32>
    %159 = math.exp %158 : vector<1x16xf32>
    %cst_58 = arith.constant 1.000000e+00 : f32
    %160 = vector.broadcast %cst_58 : f32 to vector<1x16xf32>
    %161 = arith.addf %160, %159 : vector<1x16xf32>
    %162 = arith.divf %160, %161 : vector<1x16xf32>
    %163 = arith.mulf %154, %137 : vector<1x16xf32>
    %164 = arith.mulf %148, %156 : vector<1x16xf32>
    %165 = arith.addf %163, %164 : vector<1x16xf32>
    %166 = math.tanh %165 : vector<1x16xf32>
    %167 = arith.mulf %162, %166 : vector<1x16xf32>
    %168 = vector.extract_strided_slice %25 {offsets = [5, 0], sizes = [1, 64], strides = [1, 1]} : vector<8x64xf32> to vector<1x64xf32>
    %cst_59 = arith.constant dense<0.000000e+00> : vector<1x64xf32>
    %169 = tpu.matmul %167, %4, %cst_59 {dimension_numbers = #tpu.dot_dimension_numbers<[1], [0], [0], [1], [0, 0, 1, 1], [], []>} : vector<1x16xf32>, vector<16x64xf32>, vector<1x64xf32> -> vector<1x64xf32>
    %170 = arith.addf %168, %169 : vector<1x64xf32>
    %171 = vector.extract_strided_slice %170 {offsets = [0, 0], sizes = [1, 16], strides = [1, 1]} : vector<1x64xf32> to vector<1x16xf32>
    %172 = arith.negf %171 : vector<1x16xf32>
    %173 = math.exp %172 : vector<1x16xf32>
    %cst_60 = arith.constant 1.000000e+00 : f32
    %174 = vector.broadcast %cst_60 : f32 to vector<1x16xf32>
    %175 = arith.addf %174, %173 : vector<1x16xf32>
    %176 = arith.divf %174, %175 : vector<1x16xf32>
    %177 = vector.extract_strided_slice %170 {offsets = [0, 16], sizes = [1, 16], strides = [1, 1]} : vector<1x64xf32> to vector<1x16xf32>
    %178 = arith.negf %177 : vector<1x16xf32>
    %179 = math.exp %178 : vector<1x16xf32>
    %cst_61 = arith.constant 1.000000e+00 : f32
    %180 = vector.broadcast %cst_61 : f32 to vector<1x16xf32>
    %181 = arith.addf %180, %179 : vector<1x16xf32>
    %182 = arith.divf %180, %181 : vector<1x16xf32>
    %183 = vector.extract_strided_slice %170 {offsets = [0, 32], sizes = [1, 16], strides = [1, 1]} : vector<1x64xf32> to vector<1x16xf32>
    %184 = math.tanh %183 : vector<1x16xf32>
    %185 = vector.extract_strided_slice %170 {offsets = [0, 48], sizes = [1, 16], strides = [1, 1]} : vector<1x64xf32> to vector<1x16xf32>
    %186 = arith.negf %185 : vector<1x16xf32>
    %187 = math.exp %186 : vector<1x16xf32>
    %cst_62 = arith.constant 1.000000e+00 : f32
    %188 = vector.broadcast %cst_62 : f32 to vector<1x16xf32>
    %189 = arith.addf %188, %187 : vector<1x16xf32>
    %190 = arith.divf %188, %189 : vector<1x16xf32>
    %191 = arith.mulf %182, %165 : vector<1x16xf32>
    %192 = arith.mulf %176, %184 : vector<1x16xf32>
    %193 = arith.addf %191, %192 : vector<1x16xf32>
    %194 = math.tanh %193 : vector<1x16xf32>
    %195 = arith.mulf %190, %194 : vector<1x16xf32>
    %196 = vector.extract_strided_slice %25 {offsets = [6, 0], sizes = [1, 64], strides = [1, 1]} : vector<8x64xf32> to vector<1x64xf32>
    %cst_63 = arith.constant dense<0.000000e+00> : vector<1x64xf32>
    %197 = tpu.matmul %195, %4, %cst_63 {dimension_numbers = #tpu.dot_dimension_numbers<[1], [0], [0], [1], [0, 0, 1, 1], [], []>} : vector<1x16xf32>, vector<16x64xf32>, vector<1x64xf32> -> vector<1x64xf32>
    %198 = arith.addf %196, %197 : vector<1x64xf32>
    %199 = vector.extract_strided_slice %198 {offsets = [0, 0], sizes = [1, 16], strides = [1, 1]} : vector<1x64xf32> to vector<1x16xf32>
    %200 = arith.negf %199 : vector<1x16xf32>
    %201 = math.exp %200 : vector<1x16xf32>
    %cst_64 = arith.constant 1.000000e+00 : f32
    %202 = vector.broadcast %cst_64 : f32 to vector<1x16xf32>
    %203 = arith.addf %202, %201 : vector<1x16xf32>
    %204 = arith.divf %202, %203 : vector<1x16xf32>
    %205 = vector.extract_strided_slice %198 {offsets = [0, 16], sizes = [1, 16], strides = [1, 1]} : vector<1x64xf32> to vector<1x16xf32>
    %206 = arith.negf %205 : vector<1x16xf32>
    %207 = math.exp %206 : vector<1x16xf32>
    %cst_65 = arith.constant 1.000000e+00 : f32
    %208 = vector.broadcast %cst_65 : f32 to vector<1x16xf32>
    %209 = arith.addf %208, %207 : vector<1x16xf32>
    %210 = arith.divf %208, %209 : vector<1x16xf32>
    %211 = vector.extract_strided_slice %198 {offsets = [0, 32], sizes = [1, 16], strides = [1, 1]} : vector<1x64xf32> to vector<1x16xf32>
    %212 = math.tanh %211 : vector<1x16xf32>
    %213 = vector.extract_strided_slice %198 {offsets = [0, 48], sizes = [1, 16], strides = [1, 1]} : vector<1x64xf32> to vector<1x16xf32>
    %214 = arith.negf %213 : vector<1x16xf32>
    %215 = math.exp %214 : vector<1x16xf32>
    %cst_66 = arith.constant 1.000000e+00 : f32
    %216 = vector.broadcast %cst_66 : f32 to vector<1x16xf32>
    %217 = arith.addf %216, %215 : vector<1x16xf32>
    %218 = arith.divf %216, %217 : vector<1x16xf32>
    %219 = arith.mulf %210, %193 : vector<1x16xf32>
    %220 = arith.mulf %204, %212 : vector<1x16xf32>
    %221 = arith.addf %219, %220 : vector<1x16xf32>
    %222 = math.tanh %221 : vector<1x16xf32>
    %223 = arith.mulf %218, %222 : vector<1x16xf32>
    %224 = vector.extract_strided_slice %25 {offsets = [7, 0], sizes = [1, 64], strides = [1, 1]} : vector<8x64xf32> to vector<1x64xf32>
    %cst_67 = arith.constant dense<0.000000e+00> : vector<1x64xf32>
    %225 = tpu.matmul %223, %4, %cst_67 {dimension_numbers = #tpu.dot_dimension_numbers<[1], [0], [0], [1], [0, 0, 1, 1], [], []>} : vector<1x16xf32>, vector<16x64xf32>, vector<1x64xf32> -> vector<1x64xf32>
    %226 = arith.addf %224, %225 : vector<1x64xf32>
    %227 = vector.extract_strided_slice %226 {offsets = [0, 0], sizes = [1, 16], strides = [1, 1]} : vector<1x64xf32> to vector<1x16xf32>
    %228 = arith.negf %227 : vector<1x16xf32>
    %229 = math.exp %228 : vector<1x16xf32>
    %cst_68 = arith.constant 1.000000e+00 : f32
    %230 = vector.broadcast %cst_68 : f32 to vector<1x16xf32>
    %231 = arith.addf %230, %229 : vector<1x16xf32>
    %232 = arith.divf %230, %231 : vector<1x16xf32>
    %233 = vector.extract_strided_slice %226 {offsets = [0, 16], sizes = [1, 16], strides = [1, 1]} : vector<1x64xf32> to vector<1x16xf32>
    %234 = arith.negf %233 : vector<1x16xf32>
    %235 = math.exp %234 : vector<1x16xf32>
    %cst_69 = arith.constant 1.000000e+00 : f32
    %236 = vector.broadcast %cst_69 : f32 to vector<1x16xf32>
    %237 = arith.addf %236, %235 : vector<1x16xf32>
    %238 = arith.divf %236, %237 : vector<1x16xf32>
    %239 = vector.extract_strided_slice %226 {offsets = [0, 32], sizes = [1, 16], strides = [1, 1]} : vector<1x64xf32> to vector<1x16xf32>
    %240 = math.tanh %239 : vector<1x16xf32>
    %241 = vector.extract_strided_slice %226 {offsets = [0, 48], sizes = [1, 16], strides = [1, 1]} : vector<1x64xf32> to vector<1x16xf32>
    %242 = arith.negf %241 : vector<1x16xf32>
    %243 = math.exp %242 : vector<1x16xf32>
    %cst_70 = arith.constant 1.000000e+00 : f32
    %244 = vector.broadcast %cst_70 : f32 to vector<1x16xf32>
    %245 = arith.addf %244, %243 : vector<1x16xf32>
    %246 = arith.divf %244, %245 : vector<1x16xf32>
    %247 = arith.mulf %238, %221 : vector<1x16xf32>
    %248 = arith.mulf %232, %240 : vector<1x16xf32>
    %249 = arith.addf %247, %248 : vector<1x16xf32>
    %250 = math.tanh %249 : vector<1x16xf32>
    %251 = arith.mulf %246, %250 : vector<1x16xf32>
    %252 = tpu.concatenate %55, %83, %111, %139, %167, %195, %223, %251 in 0 : vector<1x16xf32>, vector<1x16xf32>, vector<1x16xf32>, vector<1x16xf32>, vector<1x16xf32>, vector<1x16xf32>, vector<1x16xf32>, vector<1x16xf32> -> vector<8x16xf32>
    %cst_71 = arith.constant dense<0.000000e+00> : vector<8x64xf32>
    %253 = tpu.matmul %22, %6, %cst_71 {dimension_numbers = #tpu.dot_dimension_numbers<[1], [0], [0], [1], [0, 0, 1, 1], [], []>} : vector<8x32xf32>, vector<32x64xf32>, vector<8x64xf32> -> vector<8x64xf32>
    %254 = vector.broadcast %8 : vector<1x64xf32> to vector<8x64xf32>
    %255 = arith.addf %253, %254 : vector<8x64xf32>
    %cst_72 = arith.constant 0.000000e+00 : f32
    %256 = vector.broadcast %cst_72 : f32 to vector<1x16xf32>
    %cst_73 = arith.constant 0.000000e+00 : f32
    %257 = vector.broadcast %cst_73 : f32 to vector<1x16xf32>
    %258 = vector.extract_strided_slice %255 {offsets = [7, 0], sizes = [1, 64], strides = [1, 1]} : vector<8x64xf32> to vector<1x64xf32>
    %cst_74 = arith.constant dense<0.000000e+00> : vector<1x64xf32>
    %259 = tpu.matmul %256, %7, %cst_74 {dimension_numbers = #tpu.dot_dimension_numbers<[1], [0], [0], [1], [0, 0, 1, 1], [], []>} : vector<1x16xf32>, vector<16x64xf32>, vector<1x64xf32> -> vector<1x64xf32>
    %260 = arith.addf %258, %259 : vector<1x64xf32>
    %261 = vector.extract_strided_slice %260 {offsets = [0, 0], sizes = [1, 16], strides = [1, 1]} : vector<1x64xf32> to vector<1x16xf32>
    %262 = arith.negf %261 : vector<1x16xf32>
    %263 = math.exp %262 : vector<1x16xf32>
    %cst_75 = arith.constant 1.000000e+00 : f32
    %264 = vector.broadcast %cst_75 : f32 to vector<1x16xf32>
    %265 = arith.addf %264, %263 : vector<1x16xf32>
    %266 = arith.divf %264, %265 : vector<1x16xf32>
    %267 = vector.extract_strided_slice %260 {offsets = [0, 16], sizes = [1, 16], strides = [1, 1]} : vector<1x64xf32> to vector<1x16xf32>
    %268 = arith.negf %267 : vector<1x16xf32>
    %269 = math.exp %268 : vector<1x16xf32>
    %cst_76 = arith.constant 1.000000e+00 : f32
    %270 = vector.broadcast %cst_76 : f32 to vector<1x16xf32>
    %271 = arith.addf %270, %269 : vector<1x16xf32>
    %272 = arith.divf %270, %271 : vector<1x16xf32>
    %273 = vector.extract_strided_slice %260 {offsets = [0, 32], sizes = [1, 16], strides = [1, 1]} : vector<1x64xf32> to vector<1x16xf32>
    %274 = math.tanh %273 : vector<1x16xf32>
    %275 = vector.extract_strided_slice %260 {offsets = [0, 48], sizes = [1, 16], strides = [1, 1]} : vector<1x64xf32> to vector<1x16xf32>
    %276 = arith.negf %275 : vector<1x16xf32>
    %277 = math.exp %276 : vector<1x16xf32>
    %cst_77 = arith.constant 1.000000e+00 : f32
    %278 = vector.broadcast %cst_77 : f32 to vector<1x16xf32>
    %279 = arith.addf %278, %277 : vector<1x16xf32>
    %280 = arith.divf %278, %279 : vector<1x16xf32>
    %281 = arith.mulf %272, %257 : vector<1x16xf32>
    %282 = arith.mulf %266, %274 : vector<1x16xf32>
    %283 = arith.addf %281, %282 : vector<1x16xf32>
    %284 = math.tanh %283 : vector<1x16xf32>
    %285 = arith.mulf %280, %284 : vector<1x16xf32>
    %286 = vector.extract_strided_slice %255 {offsets = [6, 0], sizes = [1, 64], strides = [1, 1]} : vector<8x64xf32> to vector<1x64xf32>
    %cst_78 = arith.constant dense<0.000000e+00> : vector<1x64xf32>
    %287 = tpu.matmul %285, %7, %cst_78 {dimension_numbers = #tpu.dot_dimension_numbers<[1], [0], [0], [1], [0, 0, 1, 1], [], []>} : vector<1x16xf32>, vector<16x64xf32>, vector<1x64xf32> -> vector<1x64xf32>
    %288 = arith.addf %286, %287 : vector<1x64xf32>
    %289 = vector.extract_strided_slice %288 {offsets = [0, 0], sizes = [1, 16], strides = [1, 1]} : vector<1x64xf32> to vector<1x16xf32>
    %290 = arith.negf %289 : vector<1x16xf32>
    %291 = math.exp %290 : vector<1x16xf32>
    %cst_79 = arith.constant 1.000000e+00 : f32
    %292 = vector.broadcast %cst_79 : f32 to vector<1x16xf32>
    %293 = arith.addf %292, %291 : vector<1x16xf32>
    %294 = arith.divf %292, %293 : vector<1x16xf32>
    %295 = vector.extract_strided_slice %288 {offsets = [0, 16], sizes = [1, 16], strides = [1, 1]} : vector<1x64xf32> to vector<1x16xf32>
    %296 = arith.negf %295 : vector<1x16xf32>
    %297 = math.exp %296 : vector<1x16xf32>
    %cst_80 = arith.constant 1.000000e+00 : f32
    %298 = vector.broadcast %cst_80 : f32 to vector<1x16xf32>
    %299 = arith.addf %298, %297 : vector<1x16xf32>
    %300 = arith.divf %298, %299 : vector<1x16xf32>
    %301 = vector.extract_strided_slice %288 {offsets = [0, 32], sizes = [1, 16], strides = [1, 1]} : vector<1x64xf32> to vector<1x16xf32>
    %302 = math.tanh %301 : vector<1x16xf32>
    %303 = vector.extract_strided_slice %288 {offsets = [0, 48], sizes = [1, 16], strides = [1, 1]} : vector<1x64xf32> to vector<1x16xf32>
    %304 = arith.negf %303 : vector<1x16xf32>
    %305 = math.exp %304 : vector<1x16xf32>
    %cst_81 = arith.constant 1.000000e+00 : f32
    %306 = vector.broadcast %cst_81 : f32 to vector<1x16xf32>
    %307 = arith.addf %306, %305 : vector<1x16xf32>
    %308 = arith.divf %306, %307 : vector<1x16xf32>
    %309 = arith.mulf %300, %283 : vector<1x16xf32>
    %310 = arith.mulf %294, %302 : vector<1x16xf32>
    %311 = arith.addf %309, %310 : vector<1x16xf32>
    %312 = math.tanh %311 : vector<1x16xf32>
    %313 = arith.mulf %308, %312 : vector<1x16xf32>
    %314 = vector.extract_strided_slice %255 {offsets = [5, 0], sizes = [1, 64], strides = [1, 1]} : vector<8x64xf32> to vector<1x64xf32>
    %cst_82 = arith.constant dense<0.000000e+00> : vector<1x64xf32>
    %315 = tpu.matmul %313, %7, %cst_82 {dimension_numbers = #tpu.dot_dimension_numbers<[1], [0], [0], [1], [0, 0, 1, 1], [], []>} : vector<1x16xf32>, vector<16x64xf32>, vector<1x64xf32> -> vector<1x64xf32>
    %316 = arith.addf %314, %315 : vector<1x64xf32>
    %317 = vector.extract_strided_slice %316 {offsets = [0, 0], sizes = [1, 16], strides = [1, 1]} : vector<1x64xf32> to vector<1x16xf32>
    %318 = arith.negf %317 : vector<1x16xf32>
    %319 = math.exp %318 : vector<1x16xf32>
    %cst_83 = arith.constant 1.000000e+00 : f32
    %320 = vector.broadcast %cst_83 : f32 to vector<1x16xf32>
    %321 = arith.addf %320, %319 : vector<1x16xf32>
    %322 = arith.divf %320, %321 : vector<1x16xf32>
    %323 = vector.extract_strided_slice %316 {offsets = [0, 16], sizes = [1, 16], strides = [1, 1]} : vector<1x64xf32> to vector<1x16xf32>
    %324 = arith.negf %323 : vector<1x16xf32>
    %325 = math.exp %324 : vector<1x16xf32>
    %cst_84 = arith.constant 1.000000e+00 : f32
    %326 = vector.broadcast %cst_84 : f32 to vector<1x16xf32>
    %327 = arith.addf %326, %325 : vector<1x16xf32>
    %328 = arith.divf %326, %327 : vector<1x16xf32>
    %329 = vector.extract_strided_slice %316 {offsets = [0, 32], sizes = [1, 16], strides = [1, 1]} : vector<1x64xf32> to vector<1x16xf32>
    %330 = math.tanh %329 : vector<1x16xf32>
    %331 = vector.extract_strided_slice %316 {offsets = [0, 48], sizes = [1, 16], strides = [1, 1]} : vector<1x64xf32> to vector<1x16xf32>
    %332 = arith.negf %331 : vector<1x16xf32>
    %333 = math.exp %332 : vector<1x16xf32>
    %cst_85 = arith.constant 1.000000e+00 : f32
    %334 = vector.broadcast %cst_85 : f32 to vector<1x16xf32>
    %335 = arith.addf %334, %333 : vector<1x16xf32>
    %336 = arith.divf %334, %335 : vector<1x16xf32>
    %337 = arith.mulf %328, %311 : vector<1x16xf32>
    %338 = arith.mulf %322, %330 : vector<1x16xf32>
    %339 = arith.addf %337, %338 : vector<1x16xf32>
    %340 = math.tanh %339 : vector<1x16xf32>
    %341 = arith.mulf %336, %340 : vector<1x16xf32>
    %342 = vector.extract_strided_slice %255 {offsets = [4, 0], sizes = [1, 64], strides = [1, 1]} : vector<8x64xf32> to vector<1x64xf32>
    %cst_86 = arith.constant dense<0.000000e+00> : vector<1x64xf32>
    %343 = tpu.matmul %341, %7, %cst_86 {dimension_numbers = #tpu.dot_dimension_numbers<[1], [0], [0], [1], [0, 0, 1, 1], [], []>} : vector<1x16xf32>, vector<16x64xf32>, vector<1x64xf32> -> vector<1x64xf32>
    %344 = arith.addf %342, %343 : vector<1x64xf32>
    %345 = vector.extract_strided_slice %344 {offsets = [0, 0], sizes = [1, 16], strides = [1, 1]} : vector<1x64xf32> to vector<1x16xf32>
    %346 = arith.negf %345 : vector<1x16xf32>
    %347 = math.exp %346 : vector<1x16xf32>
    %cst_87 = arith.constant 1.000000e+00 : f32
    %348 = vector.broadcast %cst_87 : f32 to vector<1x16xf32>
    %349 = arith.addf %348, %347 : vector<1x16xf32>
    %350 = arith.divf %348, %349 : vector<1x16xf32>
    %351 = vector.extract_strided_slice %344 {offsets = [0, 16], sizes = [1, 16], strides = [1, 1]} : vector<1x64xf32> to vector<1x16xf32>
    %352 = arith.negf %351 : vector<1x16xf32>
    %353 = math.exp %352 : vector<1x16xf32>
    %cst_88 = arith.constant 1.000000e+00 : f32
    %354 = vector.broadcast %cst_88 : f32 to vector<1x16xf32>
    %355 = arith.addf %354, %353 : vector<1x16xf32>
    %356 = arith.divf %354, %355 : vector<1x16xf32>
    %357 = vector.extract_strided_slice %344 {offsets = [0, 32], sizes = [1, 16], strides = [1, 1]} : vector<1x64xf32> to vector<1x16xf32>
    %358 = math.tanh %357 : vector<1x16xf32>
    %359 = vector.extract_strided_slice %344 {offsets = [0, 48], sizes = [1, 16], strides = [1, 1]} : vector<1x64xf32> to vector<1x16xf32>
    %360 = arith.negf %359 : vector<1x16xf32>
    %361 = math.exp %360 : vector<1x16xf32>
    %cst_89 = arith.constant 1.000000e+00 : f32
    %362 = vector.broadcast %cst_89 : f32 to vector<1x16xf32>
    %363 = arith.addf %362, %361 : vector<1x16xf32>
    %364 = arith.divf %362, %363 : vector<1x16xf32>
    %365 = arith.mulf %356, %339 : vector<1x16xf32>
    %366 = arith.mulf %350, %358 : vector<1x16xf32>
    %367 = arith.addf %365, %366 : vector<1x16xf32>
    %368 = math.tanh %367 : vector<1x16xf32>
    %369 = arith.mulf %364, %368 : vector<1x16xf32>
    %370 = vector.extract_strided_slice %255 {offsets = [3, 0], sizes = [1, 64], strides = [1, 1]} : vector<8x64xf32> to vector<1x64xf32>
    %cst_90 = arith.constant dense<0.000000e+00> : vector<1x64xf32>
    %371 = tpu.matmul %369, %7, %cst_90 {dimension_numbers = #tpu.dot_dimension_numbers<[1], [0], [0], [1], [0, 0, 1, 1], [], []>} : vector<1x16xf32>, vector<16x64xf32>, vector<1x64xf32> -> vector<1x64xf32>
    %372 = arith.addf %370, %371 : vector<1x64xf32>
    %373 = vector.extract_strided_slice %372 {offsets = [0, 0], sizes = [1, 16], strides = [1, 1]} : vector<1x64xf32> to vector<1x16xf32>
    %374 = arith.negf %373 : vector<1x16xf32>
    %375 = math.exp %374 : vector<1x16xf32>
    %cst_91 = arith.constant 1.000000e+00 : f32
    %376 = vector.broadcast %cst_91 : f32 to vector<1x16xf32>
    %377 = arith.addf %376, %375 : vector<1x16xf32>
    %378 = arith.divf %376, %377 : vector<1x16xf32>
    %379 = vector.extract_strided_slice %372 {offsets = [0, 16], sizes = [1, 16], strides = [1, 1]} : vector<1x64xf32> to vector<1x16xf32>
    %380 = arith.negf %379 : vector<1x16xf32>
    %381 = math.exp %380 : vector<1x16xf32>
    %cst_92 = arith.constant 1.000000e+00 : f32
    %382 = vector.broadcast %cst_92 : f32 to vector<1x16xf32>
    %383 = arith.addf %382, %381 : vector<1x16xf32>
    %384 = arith.divf %382, %383 : vector<1x16xf32>
    %385 = vector.extract_strided_slice %372 {offsets = [0, 32], sizes = [1, 16], strides = [1, 1]} : vector<1x64xf32> to vector<1x16xf32>
    %386 = math.tanh %385 : vector<1x16xf32>
    %387 = vector.extract_strided_slice %372 {offsets = [0, 48], sizes = [1, 16], strides = [1, 1]} : vector<1x64xf32> to vector<1x16xf32>
    %388 = arith.negf %387 : vector<1x16xf32>
    %389 = math.exp %388 : vector<1x16xf32>
    %cst_93 = arith.constant 1.000000e+00 : f32
    %390 = vector.broadcast %cst_93 : f32 to vector<1x16xf32>
    %391 = arith.addf %390, %389 : vector<1x16xf32>
    %392 = arith.divf %390, %391 : vector<1x16xf32>
    %393 = arith.mulf %384, %367 : vector<1x16xf32>
    %394 = arith.mulf %378, %386 : vector<1x16xf32>
    %395 = arith.addf %393, %394 : vector<1x16xf32>
    %396 = math.tanh %395 : vector<1x16xf32>
    %397 = arith.mulf %392, %396 : vector<1x16xf32>
    %398 = vector.extract_strided_slice %255 {offsets = [2, 0], sizes = [1, 64], strides = [1, 1]} : vector<8x64xf32> to vector<1x64xf32>
    %cst_94 = arith.constant dense<0.000000e+00> : vector<1x64xf32>
    %399 = tpu.matmul %397, %7, %cst_94 {dimension_numbers = #tpu.dot_dimension_numbers<[1], [0], [0], [1], [0, 0, 1, 1], [], []>} : vector<1x16xf32>, vector<16x64xf32>, vector<1x64xf32> -> vector<1x64xf32>
    %400 = arith.addf %398, %399 : vector<1x64xf32>
    %401 = vector.extract_strided_slice %400 {offsets = [0, 0], sizes = [1, 16], strides = [1, 1]} : vector<1x64xf32> to vector<1x16xf32>
    %402 = arith.negf %401 : vector<1x16xf32>
    %403 = math.exp %402 : vector<1x16xf32>
    %cst_95 = arith.constant 1.000000e+00 : f32
    %404 = vector.broadcast %cst_95 : f32 to vector<1x16xf32>
    %405 = arith.addf %404, %403 : vector<1x16xf32>
    %406 = arith.divf %404, %405 : vector<1x16xf32>
    %407 = vector.extract_strided_slice %400 {offsets = [0, 16], sizes = [1, 16], strides = [1, 1]} : vector<1x64xf32> to vector<1x16xf32>
    %408 = arith.negf %407 : vector<1x16xf32>
    %409 = math.exp %408 : vector<1x16xf32>
    %cst_96 = arith.constant 1.000000e+00 : f32
    %410 = vector.broadcast %cst_96 : f32 to vector<1x16xf32>
    %411 = arith.addf %410, %409 : vector<1x16xf32>
    %412 = arith.divf %410, %411 : vector<1x16xf32>
    %413 = vector.extract_strided_slice %400 {offsets = [0, 32], sizes = [1, 16], strides = [1, 1]} : vector<1x64xf32> to vector<1x16xf32>
    %414 = math.tanh %413 : vector<1x16xf32>
    %415 = vector.extract_strided_slice %400 {offsets = [0, 48], sizes = [1, 16], strides = [1, 1]} : vector<1x64xf32> to vector<1x16xf32>
    %416 = arith.negf %415 : vector<1x16xf32>
    %417 = math.exp %416 : vector<1x16xf32>
    %cst_97 = arith.constant 1.000000e+00 : f32
    %418 = vector.broadcast %cst_97 : f32 to vector<1x16xf32>
    %419 = arith.addf %418, %417 : vector<1x16xf32>
    %420 = arith.divf %418, %419 : vector<1x16xf32>
    %421 = arith.mulf %412, %395 : vector<1x16xf32>
    %422 = arith.mulf %406, %414 : vector<1x16xf32>
    %423 = arith.addf %421, %422 : vector<1x16xf32>
    %424 = math.tanh %423 : vector<1x16xf32>
    %425 = arith.mulf %420, %424 : vector<1x16xf32>
    %426 = vector.extract_strided_slice %255 {offsets = [1, 0], sizes = [1, 64], strides = [1, 1]} : vector<8x64xf32> to vector<1x64xf32>
    %cst_98 = arith.constant dense<0.000000e+00> : vector<1x64xf32>
    %427 = tpu.matmul %425, %7, %cst_98 {dimension_numbers = #tpu.dot_dimension_numbers<[1], [0], [0], [1], [0, 0, 1, 1], [], []>} : vector<1x16xf32>, vector<16x64xf32>, vector<1x64xf32> -> vector<1x64xf32>
    %428 = arith.addf %426, %427 : vector<1x64xf32>
    %429 = vector.extract_strided_slice %428 {offsets = [0, 0], sizes = [1, 16], strides = [1, 1]} : vector<1x64xf32> to vector<1x16xf32>
    %430 = arith.negf %429 : vector<1x16xf32>
    %431 = math.exp %430 : vector<1x16xf32>
    %cst_99 = arith.constant 1.000000e+00 : f32
    %432 = vector.broadcast %cst_99 : f32 to vector<1x16xf32>
    %433 = arith.addf %432, %431 : vector<1x16xf32>
    %434 = arith.divf %432, %433 : vector<1x16xf32>
    %435 = vector.extract_strided_slice %428 {offsets = [0, 16], sizes = [1, 16], strides = [1, 1]} : vector<1x64xf32> to vector<1x16xf32>
    %436 = arith.negf %435 : vector<1x16xf32>
    %437 = math.exp %436 : vector<1x16xf32>
    %cst_100 = arith.constant 1.000000e+00 : f32
    %438 = vector.broadcast %cst_100 : f32 to vector<1x16xf32>
    %439 = arith.addf %438, %437 : vector<1x16xf32>
    %440 = arith.divf %438, %439 : vector<1x16xf32>
    %441 = vector.extract_strided_slice %428 {offsets = [0, 32], sizes = [1, 16], strides = [1, 1]} : vector<1x64xf32> to vector<1x16xf32>
    %442 = math.tanh %441 : vector<1x16xf32>
    %443 = vector.extract_strided_slice %428 {offsets = [0, 48], sizes = [1, 16], strides = [1, 1]} : vector<1x64xf32> to vector<1x16xf32>
    %444 = arith.negf %443 : vector<1x16xf32>
    %445 = math.exp %444 : vector<1x16xf32>
    %cst_101 = arith.constant 1.000000e+00 : f32
    %446 = vector.broadcast %cst_101 : f32 to vector<1x16xf32>
    %447 = arith.addf %446, %445 : vector<1x16xf32>
    %448 = arith.divf %446, %447 : vector<1x16xf32>
    %449 = arith.mulf %440, %423 : vector<1x16xf32>
    %450 = arith.mulf %434, %442 : vector<1x16xf32>
    %451 = arith.addf %449, %450 : vector<1x16xf32>
    %452 = math.tanh %451 : vector<1x16xf32>
    %453 = arith.mulf %448, %452 : vector<1x16xf32>
    %454 = vector.extract_strided_slice %255 {offsets = [0, 0], sizes = [1, 64], strides = [1, 1]} : vector<8x64xf32> to vector<1x64xf32>
    %cst_102 = arith.constant dense<0.000000e+00> : vector<1x64xf32>
    %455 = tpu.matmul %453, %7, %cst_102 {dimension_numbers = #tpu.dot_dimension_numbers<[1], [0], [0], [1], [0, 0, 1, 1], [], []>} : vector<1x16xf32>, vector<16x64xf32>, vector<1x64xf32> -> vector<1x64xf32>
    %456 = arith.addf %454, %455 : vector<1x64xf32>
    %457 = vector.extract_strided_slice %456 {offsets = [0, 0], sizes = [1, 16], strides = [1, 1]} : vector<1x64xf32> to vector<1x16xf32>
    %458 = arith.negf %457 : vector<1x16xf32>
    %459 = math.exp %458 : vector<1x16xf32>
    %cst_103 = arith.constant 1.000000e+00 : f32
    %460 = vector.broadcast %cst_103 : f32 to vector<1x16xf32>
    %461 = arith.addf %460, %459 : vector<1x16xf32>
    %462 = arith.divf %460, %461 : vector<1x16xf32>
    %463 = vector.extract_strided_slice %456 {offsets = [0, 16], sizes = [1, 16], strides = [1, 1]} : vector<1x64xf32> to vector<1x16xf32>
    %464 = arith.negf %463 : vector<1x16xf32>
    %465 = math.exp %464 : vector<1x16xf32>
    %cst_104 = arith.constant 1.000000e+00 : f32
    %466 = vector.broadcast %cst_104 : f32 to vector<1x16xf32>
    %467 = arith.addf %466, %465 : vector<1x16xf32>
    %468 = arith.divf %466, %467 : vector<1x16xf32>
    %469 = vector.extract_strided_slice %456 {offsets = [0, 32], sizes = [1, 16], strides = [1, 1]} : vector<1x64xf32> to vector<1x16xf32>
    %470 = math.tanh %469 : vector<1x16xf32>
    %471 = vector.extract_strided_slice %456 {offsets = [0, 48], sizes = [1, 16], strides = [1, 1]} : vector<1x64xf32> to vector<1x16xf32>
    %472 = arith.negf %471 : vector<1x16xf32>
    %473 = math.exp %472 : vector<1x16xf32>
    %cst_105 = arith.constant 1.000000e+00 : f32
    %474 = vector.broadcast %cst_105 : f32 to vector<1x16xf32>
    %475 = arith.addf %474, %473 : vector<1x16xf32>
    %476 = arith.divf %474, %475 : vector<1x16xf32>
    %477 = arith.mulf %468, %451 : vector<1x16xf32>
    %478 = arith.mulf %462, %470 : vector<1x16xf32>
    %479 = arith.addf %477, %478 : vector<1x16xf32>
    %480 = math.tanh %479 : vector<1x16xf32>
    %481 = arith.mulf %476, %480 : vector<1x16xf32>
    %482 = tpu.concatenate %481, %453, %425, %397, %369, %341, %313, %285 in 0 : vector<1x16xf32>, vector<1x16xf32>, vector<1x16xf32>, vector<1x16xf32>, vector<1x16xf32>, vector<1x16xf32>, vector<1x16xf32>, vector<1x16xf32> -> vector<8x16xf32>
    %483 = tpu.concatenate %252, %482 in 1 : vector<8x16xf32>, vector<8x16xf32> -> vector<8x32xf32>
    %cst_106 = arith.constant dense<0.000000e+00> : vector<8x64xf32>
    %484 = tpu.matmul %483, %9, %cst_106 {dimension_numbers = #tpu.dot_dimension_numbers<[1], [0], [0], [1], [0, 0, 1, 1], [], []>} : vector<8x32xf32>, vector<32x64xf32>, vector<8x64xf32> -> vector<8x64xf32>
    %485 = vector.broadcast %11 : vector<1x64xf32> to vector<8x64xf32>
    %486 = arith.addf %484, %485 : vector<8x64xf32>
    %cst_107 = arith.constant 0.000000e+00 : f32
    %487 = vector.broadcast %cst_107 : f32 to vector<1x16xf32>
    %cst_108 = arith.constant 0.000000e+00 : f32
    %488 = vector.broadcast %cst_108 : f32 to vector<1x16xf32>
    %489 = vector.extract_strided_slice %486 {offsets = [0, 0], sizes = [1, 64], strides = [1, 1]} : vector<8x64xf32> to vector<1x64xf32>
    %cst_109 = arith.constant dense<0.000000e+00> : vector<1x64xf32>
    %490 = tpu.matmul %487, %10, %cst_109 {dimension_numbers = #tpu.dot_dimension_numbers<[1], [0], [0], [1], [0, 0, 1, 1], [], []>} : vector<1x16xf32>, vector<16x64xf32>, vector<1x64xf32> -> vector<1x64xf32>
    %491 = arith.addf %489, %490 : vector<1x64xf32>
    %492 = vector.extract_strided_slice %491 {offsets = [0, 0], sizes = [1, 16], strides = [1, 1]} : vector<1x64xf32> to vector<1x16xf32>
    %493 = arith.negf %492 : vector<1x16xf32>
    %494 = math.exp %493 : vector<1x16xf32>
    %cst_110 = arith.constant 1.000000e+00 : f32
    %495 = vector.broadcast %cst_110 : f32 to vector<1x16xf32>
    %496 = arith.addf %495, %494 : vector<1x16xf32>
    %497 = arith.divf %495, %496 : vector<1x16xf32>
    %498 = vector.extract_strided_slice %491 {offsets = [0, 16], sizes = [1, 16], strides = [1, 1]} : vector<1x64xf32> to vector<1x16xf32>
    %499 = arith.negf %498 : vector<1x16xf32>
    %500 = math.exp %499 : vector<1x16xf32>
    %cst_111 = arith.constant 1.000000e+00 : f32
    %501 = vector.broadcast %cst_111 : f32 to vector<1x16xf32>
    %502 = arith.addf %501, %500 : vector<1x16xf32>
    %503 = arith.divf %501, %502 : vector<1x16xf32>
    %504 = vector.extract_strided_slice %491 {offsets = [0, 32], sizes = [1, 16], strides = [1, 1]} : vector<1x64xf32> to vector<1x16xf32>
    %505 = math.tanh %504 : vector<1x16xf32>
    %506 = vector.extract_strided_slice %491 {offsets = [0, 48], sizes = [1, 16], strides = [1, 1]} : vector<1x64xf32> to vector<1x16xf32>
    %507 = arith.negf %506 : vector<1x16xf32>
    %508 = math.exp %507 : vector<1x16xf32>
    %cst_112 = arith.constant 1.000000e+00 : f32
    %509 = vector.broadcast %cst_112 : f32 to vector<1x16xf32>
    %510 = arith.addf %509, %508 : vector<1x16xf32>
    %511 = arith.divf %509, %510 : vector<1x16xf32>
    %512 = arith.mulf %503, %488 : vector<1x16xf32>
    %513 = arith.mulf %497, %505 : vector<1x16xf32>
    %514 = arith.addf %512, %513 : vector<1x16xf32>
    %515 = math.tanh %514 : vector<1x16xf32>
    %516 = arith.mulf %511, %515 : vector<1x16xf32>
    %517 = vector.extract_strided_slice %486 {offsets = [1, 0], sizes = [1, 64], strides = [1, 1]} : vector<8x64xf32> to vector<1x64xf32>
    %cst_113 = arith.constant dense<0.000000e+00> : vector<1x64xf32>
    %518 = tpu.matmul %516, %10, %cst_113 {dimension_numbers = #tpu.dot_dimension_numbers<[1], [0], [0], [1], [0, 0, 1, 1], [], []>} : vector<1x16xf32>, vector<16x64xf32>, vector<1x64xf32> -> vector<1x64xf32>
    %519 = arith.addf %517, %518 : vector<1x64xf32>
    %520 = vector.extract_strided_slice %519 {offsets = [0, 0], sizes = [1, 16], strides = [1, 1]} : vector<1x64xf32> to vector<1x16xf32>
    %521 = arith.negf %520 : vector<1x16xf32>
    %522 = math.exp %521 : vector<1x16xf32>
    %cst_114 = arith.constant 1.000000e+00 : f32
    %523 = vector.broadcast %cst_114 : f32 to vector<1x16xf32>
    %524 = arith.addf %523, %522 : vector<1x16xf32>
    %525 = arith.divf %523, %524 : vector<1x16xf32>
    %526 = vector.extract_strided_slice %519 {offsets = [0, 16], sizes = [1, 16], strides = [1, 1]} : vector<1x64xf32> to vector<1x16xf32>
    %527 = arith.negf %526 : vector<1x16xf32>
    %528 = math.exp %527 : vector<1x16xf32>
    %cst_115 = arith.constant 1.000000e+00 : f32
    %529 = vector.broadcast %cst_115 : f32 to vector<1x16xf32>
    %530 = arith.addf %529, %528 : vector<1x16xf32>
    %531 = arith.divf %529, %530 : vector<1x16xf32>
    %532 = vector.extract_strided_slice %519 {offsets = [0, 32], sizes = [1, 16], strides = [1, 1]} : vector<1x64xf32> to vector<1x16xf32>
    %533 = math.tanh %532 : vector<1x16xf32>
    %534 = vector.extract_strided_slice %519 {offsets = [0, 48], sizes = [1, 16], strides = [1, 1]} : vector<1x64xf32> to vector<1x16xf32>
    %535 = arith.negf %534 : vector<1x16xf32>
    %536 = math.exp %535 : vector<1x16xf32>
    %cst_116 = arith.constant 1.000000e+00 : f32
    %537 = vector.broadcast %cst_116 : f32 to vector<1x16xf32>
    %538 = arith.addf %537, %536 : vector<1x16xf32>
    %539 = arith.divf %537, %538 : vector<1x16xf32>
    %540 = arith.mulf %531, %514 : vector<1x16xf32>
    %541 = arith.mulf %525, %533 : vector<1x16xf32>
    %542 = arith.addf %540, %541 : vector<1x16xf32>
    %543 = math.tanh %542 : vector<1x16xf32>
    %544 = arith.mulf %539, %543 : vector<1x16xf32>
    %545 = vector.extract_strided_slice %486 {offsets = [2, 0], sizes = [1, 64], strides = [1, 1]} : vector<8x64xf32> to vector<1x64xf32>
    %cst_117 = arith.constant dense<0.000000e+00> : vector<1x64xf32>
    %546 = tpu.matmul %544, %10, %cst_117 {dimension_numbers = #tpu.dot_dimension_numbers<[1], [0], [0], [1], [0, 0, 1, 1], [], []>} : vector<1x16xf32>, vector<16x64xf32>, vector<1x64xf32> -> vector<1x64xf32>
    %547 = arith.addf %545, %546 : vector<1x64xf32>
    %548 = vector.extract_strided_slice %547 {offsets = [0, 0], sizes = [1, 16], strides = [1, 1]} : vector<1x64xf32> to vector<1x16xf32>
    %549 = arith.negf %548 : vector<1x16xf32>
    %550 = math.exp %549 : vector<1x16xf32>
    %cst_118 = arith.constant 1.000000e+00 : f32
    %551 = vector.broadcast %cst_118 : f32 to vector<1x16xf32>
    %552 = arith.addf %551, %550 : vector<1x16xf32>
    %553 = arith.divf %551, %552 : vector<1x16xf32>
    %554 = vector.extract_strided_slice %547 {offsets = [0, 16], sizes = [1, 16], strides = [1, 1]} : vector<1x64xf32> to vector<1x16xf32>
    %555 = arith.negf %554 : vector<1x16xf32>
    %556 = math.exp %555 : vector<1x16xf32>
    %cst_119 = arith.constant 1.000000e+00 : f32
    %557 = vector.broadcast %cst_119 : f32 to vector<1x16xf32>
    %558 = arith.addf %557, %556 : vector<1x16xf32>
    %559 = arith.divf %557, %558 : vector<1x16xf32>
    %560 = vector.extract_strided_slice %547 {offsets = [0, 32], sizes = [1, 16], strides = [1, 1]} : vector<1x64xf32> to vector<1x16xf32>
    %561 = math.tanh %560 : vector<1x16xf32>
    %562 = vector.extract_strided_slice %547 {offsets = [0, 48], sizes = [1, 16], strides = [1, 1]} : vector<1x64xf32> to vector<1x16xf32>
    %563 = arith.negf %562 : vector<1x16xf32>
    %564 = math.exp %563 : vector<1x16xf32>
    %cst_120 = arith.constant 1.000000e+00 : f32
    %565 = vector.broadcast %cst_120 : f32 to vector<1x16xf32>
    %566 = arith.addf %565, %564 : vector<1x16xf32>
    %567 = arith.divf %565, %566 : vector<1x16xf32>
    %568 = arith.mulf %559, %542 : vector<1x16xf32>
    %569 = arith.mulf %553, %561 : vector<1x16xf32>
    %570 = arith.addf %568, %569 : vector<1x16xf32>
    %571 = math.tanh %570 : vector<1x16xf32>
    %572 = arith.mulf %567, %571 : vector<1x16xf32>
    %573 = vector.extract_strided_slice %486 {offsets = [3, 0], sizes = [1, 64], strides = [1, 1]} : vector<8x64xf32> to vector<1x64xf32>
    %cst_121 = arith.constant dense<0.000000e+00> : vector<1x64xf32>
    %574 = tpu.matmul %572, %10, %cst_121 {dimension_numbers = #tpu.dot_dimension_numbers<[1], [0], [0], [1], [0, 0, 1, 1], [], []>} : vector<1x16xf32>, vector<16x64xf32>, vector<1x64xf32> -> vector<1x64xf32>
    %575 = arith.addf %573, %574 : vector<1x64xf32>
    %576 = vector.extract_strided_slice %575 {offsets = [0, 0], sizes = [1, 16], strides = [1, 1]} : vector<1x64xf32> to vector<1x16xf32>
    %577 = arith.negf %576 : vector<1x16xf32>
    %578 = math.exp %577 : vector<1x16xf32>
    %cst_122 = arith.constant 1.000000e+00 : f32
    %579 = vector.broadcast %cst_122 : f32 to vector<1x16xf32>
    %580 = arith.addf %579, %578 : vector<1x16xf32>
    %581 = arith.divf %579, %580 : vector<1x16xf32>
    %582 = vector.extract_strided_slice %575 {offsets = [0, 16], sizes = [1, 16], strides = [1, 1]} : vector<1x64xf32> to vector<1x16xf32>
    %583 = arith.negf %582 : vector<1x16xf32>
    %584 = math.exp %583 : vector<1x16xf32>
    %cst_123 = arith.constant 1.000000e+00 : f32
    %585 = vector.broadcast %cst_123 : f32 to vector<1x16xf32>
    %586 = arith.addf %585, %584 : vector<1x16xf32>
    %587 = arith.divf %585, %586 : vector<1x16xf32>
    %588 = vector.extract_strided_slice %575 {offsets = [0, 32], sizes = [1, 16], strides = [1, 1]} : vector<1x64xf32> to vector<1x16xf32>
    %589 = math.tanh %588 : vector<1x16xf32>
    %590 = vector.extract_strided_slice %575 {offsets = [0, 48], sizes = [1, 16], strides = [1, 1]} : vector<1x64xf32> to vector<1x16xf32>
    %591 = arith.negf %590 : vector<1x16xf32>
    %592 = math.exp %591 : vector<1x16xf32>
    %cst_124 = arith.constant 1.000000e+00 : f32
    %593 = vector.broadcast %cst_124 : f32 to vector<1x16xf32>
    %594 = arith.addf %593, %592 : vector<1x16xf32>
    %595 = arith.divf %593, %594 : vector<1x16xf32>
    %596 = arith.mulf %587, %570 : vector<1x16xf32>
    %597 = arith.mulf %581, %589 : vector<1x16xf32>
    %598 = arith.addf %596, %597 : vector<1x16xf32>
    %599 = math.tanh %598 : vector<1x16xf32>
    %600 = arith.mulf %595, %599 : vector<1x16xf32>
    %601 = vector.extract_strided_slice %486 {offsets = [4, 0], sizes = [1, 64], strides = [1, 1]} : vector<8x64xf32> to vector<1x64xf32>
    %cst_125 = arith.constant dense<0.000000e+00> : vector<1x64xf32>
    %602 = tpu.matmul %600, %10, %cst_125 {dimension_numbers = #tpu.dot_dimension_numbers<[1], [0], [0], [1], [0, 0, 1, 1], [], []>} : vector<1x16xf32>, vector<16x64xf32>, vector<1x64xf32> -> vector<1x64xf32>
    %603 = arith.addf %601, %602 : vector<1x64xf32>
    %604 = vector.extract_strided_slice %603 {offsets = [0, 0], sizes = [1, 16], strides = [1, 1]} : vector<1x64xf32> to vector<1x16xf32>
    %605 = arith.negf %604 : vector<1x16xf32>
    %606 = math.exp %605 : vector<1x16xf32>
    %cst_126 = arith.constant 1.000000e+00 : f32
    %607 = vector.broadcast %cst_126 : f32 to vector<1x16xf32>
    %608 = arith.addf %607, %606 : vector<1x16xf32>
    %609 = arith.divf %607, %608 : vector<1x16xf32>
    %610 = vector.extract_strided_slice %603 {offsets = [0, 16], sizes = [1, 16], strides = [1, 1]} : vector<1x64xf32> to vector<1x16xf32>
    %611 = arith.negf %610 : vector<1x16xf32>
    %612 = math.exp %611 : vector<1x16xf32>
    %cst_127 = arith.constant 1.000000e+00 : f32
    %613 = vector.broadcast %cst_127 : f32 to vector<1x16xf32>
    %614 = arith.addf %613, %612 : vector<1x16xf32>
    %615 = arith.divf %613, %614 : vector<1x16xf32>
    %616 = vector.extract_strided_slice %603 {offsets = [0, 32], sizes = [1, 16], strides = [1, 1]} : vector<1x64xf32> to vector<1x16xf32>
    %617 = math.tanh %616 : vector<1x16xf32>
    %618 = vector.extract_strided_slice %603 {offsets = [0, 48], sizes = [1, 16], strides = [1, 1]} : vector<1x64xf32> to vector<1x16xf32>
    %619 = arith.negf %618 : vector<1x16xf32>
    %620 = math.exp %619 : vector<1x16xf32>
    %cst_128 = arith.constant 1.000000e+00 : f32
    %621 = vector.broadcast %cst_128 : f32 to vector<1x16xf32>
    %622 = arith.addf %621, %620 : vector<1x16xf32>
    %623 = arith.divf %621, %622 : vector<1x16xf32>
    %624 = arith.mulf %615, %598 : vector<1x16xf32>
    %625 = arith.mulf %609, %617 : vector<1x16xf32>
    %626 = arith.addf %624, %625 : vector<1x16xf32>
    %627 = math.tanh %626 : vector<1x16xf32>
    %628 = arith.mulf %623, %627 : vector<1x16xf32>
    %629 = vector.extract_strided_slice %486 {offsets = [5, 0], sizes = [1, 64], strides = [1, 1]} : vector<8x64xf32> to vector<1x64xf32>
    %cst_129 = arith.constant dense<0.000000e+00> : vector<1x64xf32>
    %630 = tpu.matmul %628, %10, %cst_129 {dimension_numbers = #tpu.dot_dimension_numbers<[1], [0], [0], [1], [0, 0, 1, 1], [], []>} : vector<1x16xf32>, vector<16x64xf32>, vector<1x64xf32> -> vector<1x64xf32>
    %631 = arith.addf %629, %630 : vector<1x64xf32>
    %632 = vector.extract_strided_slice %631 {offsets = [0, 0], sizes = [1, 16], strides = [1, 1]} : vector<1x64xf32> to vector<1x16xf32>
    %633 = arith.negf %632 : vector<1x16xf32>
    %634 = math.exp %633 : vector<1x16xf32>
    %cst_130 = arith.constant 1.000000e+00 : f32
    %635 = vector.broadcast %cst_130 : f32 to vector<1x16xf32>
    %636 = arith.addf %635, %634 : vector<1x16xf32>
    %637 = arith.divf %635, %636 : vector<1x16xf32>
    %638 = vector.extract_strided_slice %631 {offsets = [0, 16], sizes = [1, 16], strides = [1, 1]} : vector<1x64xf32> to vector<1x16xf32>
    %639 = arith.negf %638 : vector<1x16xf32>
    %640 = math.exp %639 : vector<1x16xf32>
    %cst_131 = arith.constant 1.000000e+00 : f32
    %641 = vector.broadcast %cst_131 : f32 to vector<1x16xf32>
    %642 = arith.addf %641, %640 : vector<1x16xf32>
    %643 = arith.divf %641, %642 : vector<1x16xf32>
    %644 = vector.extract_strided_slice %631 {offsets = [0, 32], sizes = [1, 16], strides = [1, 1]} : vector<1x64xf32> to vector<1x16xf32>
    %645 = math.tanh %644 : vector<1x16xf32>
    %646 = vector.extract_strided_slice %631 {offsets = [0, 48], sizes = [1, 16], strides = [1, 1]} : vector<1x64xf32> to vector<1x16xf32>
    %647 = arith.negf %646 : vector<1x16xf32>
    %648 = math.exp %647 : vector<1x16xf32>
    %cst_132 = arith.constant 1.000000e+00 : f32
    %649 = vector.broadcast %cst_132 : f32 to vector<1x16xf32>
    %650 = arith.addf %649, %648 : vector<1x16xf32>
    %651 = arith.divf %649, %650 : vector<1x16xf32>
    %652 = arith.mulf %643, %626 : vector<1x16xf32>
    %653 = arith.mulf %637, %645 : vector<1x16xf32>
    %654 = arith.addf %652, %653 : vector<1x16xf32>
    %655 = math.tanh %654 : vector<1x16xf32>
    %656 = arith.mulf %651, %655 : vector<1x16xf32>
    %657 = vector.extract_strided_slice %486 {offsets = [6, 0], sizes = [1, 64], strides = [1, 1]} : vector<8x64xf32> to vector<1x64xf32>
    %cst_133 = arith.constant dense<0.000000e+00> : vector<1x64xf32>
    %658 = tpu.matmul %656, %10, %cst_133 {dimension_numbers = #tpu.dot_dimension_numbers<[1], [0], [0], [1], [0, 0, 1, 1], [], []>} : vector<1x16xf32>, vector<16x64xf32>, vector<1x64xf32> -> vector<1x64xf32>
    %659 = arith.addf %657, %658 : vector<1x64xf32>
    %660 = vector.extract_strided_slice %659 {offsets = [0, 0], sizes = [1, 16], strides = [1, 1]} : vector<1x64xf32> to vector<1x16xf32>
    %661 = arith.negf %660 : vector<1x16xf32>
    %662 = math.exp %661 : vector<1x16xf32>
    %cst_134 = arith.constant 1.000000e+00 : f32
    %663 = vector.broadcast %cst_134 : f32 to vector<1x16xf32>
    %664 = arith.addf %663, %662 : vector<1x16xf32>
    %665 = arith.divf %663, %664 : vector<1x16xf32>
    %666 = vector.extract_strided_slice %659 {offsets = [0, 16], sizes = [1, 16], strides = [1, 1]} : vector<1x64xf32> to vector<1x16xf32>
    %667 = arith.negf %666 : vector<1x16xf32>
    %668 = math.exp %667 : vector<1x16xf32>
    %cst_135 = arith.constant 1.000000e+00 : f32
    %669 = vector.broadcast %cst_135 : f32 to vector<1x16xf32>
    %670 = arith.addf %669, %668 : vector<1x16xf32>
    %671 = arith.divf %669, %670 : vector<1x16xf32>
    %672 = vector.extract_strided_slice %659 {offsets = [0, 32], sizes = [1, 16], strides = [1, 1]} : vector<1x64xf32> to vector<1x16xf32>
    %673 = math.tanh %672 : vector<1x16xf32>
    %674 = vector.extract_strided_slice %659 {offsets = [0, 48], sizes = [1, 16], strides = [1, 1]} : vector<1x64xf32> to vector<1x16xf32>
    %675 = arith.negf %674 : vector<1x16xf32>
    %676 = math.exp %675 : vector<1x16xf32>
    %cst_136 = arith.constant 1.000000e+00 : f32
    %677 = vector.broadcast %cst_136 : f32 to vector<1x16xf32>
    %678 = arith.addf %677, %676 : vector<1x16xf32>
    %679 = arith.divf %677, %678 : vector<1x16xf32>
    %680 = arith.mulf %671, %654 : vector<1x16xf32>
    %681 = arith.mulf %665, %673 : vector<1x16xf32>
    %682 = arith.addf %680, %681 : vector<1x16xf32>
    %683 = math.tanh %682 : vector<1x16xf32>
    %684 = arith.mulf %679, %683 : vector<1x16xf32>
    %685 = vector.extract_strided_slice %486 {offsets = [7, 0], sizes = [1, 64], strides = [1, 1]} : vector<8x64xf32> to vector<1x64xf32>
    %cst_137 = arith.constant dense<0.000000e+00> : vector<1x64xf32>
    %686 = tpu.matmul %684, %10, %cst_137 {dimension_numbers = #tpu.dot_dimension_numbers<[1], [0], [0], [1], [0, 0, 1, 1], [], []>} : vector<1x16xf32>, vector<16x64xf32>, vector<1x64xf32> -> vector<1x64xf32>
    %687 = arith.addf %685, %686 : vector<1x64xf32>
    %688 = vector.extract_strided_slice %687 {offsets = [0, 0], sizes = [1, 16], strides = [1, 1]} : vector<1x64xf32> to vector<1x16xf32>
    %689 = arith.negf %688 : vector<1x16xf32>
    %690 = math.exp %689 : vector<1x16xf32>
    %cst_138 = arith.constant 1.000000e+00 : f32
    %691 = vector.broadcast %cst_138 : f32 to vector<1x16xf32>
    %692 = arith.addf %691, %690 : vector<1x16xf32>
    %693 = arith.divf %691, %692 : vector<1x16xf32>
    %694 = vector.extract_strided_slice %687 {offsets = [0, 16], sizes = [1, 16], strides = [1, 1]} : vector<1x64xf32> to vector<1x16xf32>
    %695 = arith.negf %694 : vector<1x16xf32>
    %696 = math.exp %695 : vector<1x16xf32>
    %cst_139 = arith.constant 1.000000e+00 : f32
    %697 = vector.broadcast %cst_139 : f32 to vector<1x16xf32>
    %698 = arith.addf %697, %696 : vector<1x16xf32>
    %699 = arith.divf %697, %698 : vector<1x16xf32>
    %700 = vector.extract_strided_slice %687 {offsets = [0, 32], sizes = [1, 16], strides = [1, 1]} : vector<1x64xf32> to vector<1x16xf32>
    %701 = math.tanh %700 : vector<1x16xf32>
    %702 = vector.extract_strided_slice %687 {offsets = [0, 48], sizes = [1, 16], strides = [1, 1]} : vector<1x64xf32> to vector<1x16xf32>
    %703 = arith.negf %702 : vector<1x16xf32>
    %704 = math.exp %703 : vector<1x16xf32>
    %cst_140 = arith.constant 1.000000e+00 : f32
    %705 = vector.broadcast %cst_140 : f32 to vector<1x16xf32>
    %706 = arith.addf %705, %704 : vector<1x16xf32>
    %707 = arith.divf %705, %706 : vector<1x16xf32>
    %708 = arith.mulf %699, %682 : vector<1x16xf32>
    %709 = arith.mulf %693, %701 : vector<1x16xf32>
    %710 = arith.addf %708, %709 : vector<1x16xf32>
    %711 = math.tanh %710 : vector<1x16xf32>
    %712 = arith.mulf %707, %711 : vector<1x16xf32>
    %713 = tpu.concatenate %516, %544, %572, %600, %628, %656, %684, %712 in 0 : vector<1x16xf32>, vector<1x16xf32>, vector<1x16xf32>, vector<1x16xf32>, vector<1x16xf32>, vector<1x16xf32>, vector<1x16xf32>, vector<1x16xf32> -> vector<8x16xf32>
    %cst_141 = arith.constant dense<0.000000e+00> : vector<8x64xf32>
    %714 = tpu.matmul %483, %12, %cst_141 {dimension_numbers = #tpu.dot_dimension_numbers<[1], [0], [0], [1], [0, 0, 1, 1], [], []>} : vector<8x32xf32>, vector<32x64xf32>, vector<8x64xf32> -> vector<8x64xf32>
    %715 = vector.broadcast %14 : vector<1x64xf32> to vector<8x64xf32>
    %716 = arith.addf %714, %715 : vector<8x64xf32>
    %cst_142 = arith.constant 0.000000e+00 : f32
    %717 = vector.broadcast %cst_142 : f32 to vector<1x16xf32>
    %cst_143 = arith.constant 0.000000e+00 : f32
    %718 = vector.broadcast %cst_143 : f32 to vector<1x16xf32>
    %719 = vector.extract_strided_slice %716 {offsets = [7, 0], sizes = [1, 64], strides = [1, 1]} : vector<8x64xf32> to vector<1x64xf32>
    %cst_144 = arith.constant dense<0.000000e+00> : vector<1x64xf32>
    %720 = tpu.matmul %717, %13, %cst_144 {dimension_numbers = #tpu.dot_dimension_numbers<[1], [0], [0], [1], [0, 0, 1, 1], [], []>} : vector<1x16xf32>, vector<16x64xf32>, vector<1x64xf32> -> vector<1x64xf32>
    %721 = arith.addf %719, %720 : vector<1x64xf32>
    %722 = vector.extract_strided_slice %721 {offsets = [0, 0], sizes = [1, 16], strides = [1, 1]} : vector<1x64xf32> to vector<1x16xf32>
    %723 = arith.negf %722 : vector<1x16xf32>
    %724 = math.exp %723 : vector<1x16xf32>
    %cst_145 = arith.constant 1.000000e+00 : f32
    %725 = vector.broadcast %cst_145 : f32 to vector<1x16xf32>
    %726 = arith.addf %725, %724 : vector<1x16xf32>
    %727 = arith.divf %725, %726 : vector<1x16xf32>
    %728 = vector.extract_strided_slice %721 {offsets = [0, 16], sizes = [1, 16], strides = [1, 1]} : vector<1x64xf32> to vector<1x16xf32>
    %729 = arith.negf %728 : vector<1x16xf32>
    %730 = math.exp %729 : vector<1x16xf32>
    %cst_146 = arith.constant 1.000000e+00 : f32
    %731 = vector.broadcast %cst_146 : f32 to vector<1x16xf32>
    %732 = arith.addf %731, %730 : vector<1x16xf32>
    %733 = arith.divf %731, %732 : vector<1x16xf32>
    %734 = vector.extract_strided_slice %721 {offsets = [0, 32], sizes = [1, 16], strides = [1, 1]} : vector<1x64xf32> to vector<1x16xf32>
    %735 = math.tanh %734 : vector<1x16xf32>
    %736 = vector.extract_strided_slice %721 {offsets = [0, 48], sizes = [1, 16], strides = [1, 1]} : vector<1x64xf32> to vector<1x16xf32>
    %737 = arith.negf %736 : vector<1x16xf32>
    %738 = math.exp %737 : vector<1x16xf32>
    %cst_147 = arith.constant 1.000000e+00 : f32
    %739 = vector.broadcast %cst_147 : f32 to vector<1x16xf32>
    %740 = arith.addf %739, %738 : vector<1x16xf32>
    %741 = arith.divf %739, %740 : vector<1x16xf32>
    %742 = arith.mulf %733, %718 : vector<1x16xf32>
    %743 = arith.mulf %727, %735 : vector<1x16xf32>
    %744 = arith.addf %742, %743 : vector<1x16xf32>
    %745 = math.tanh %744 : vector<1x16xf32>
    %746 = arith.mulf %741, %745 : vector<1x16xf32>
    %747 = vector.extract_strided_slice %716 {offsets = [6, 0], sizes = [1, 64], strides = [1, 1]} : vector<8x64xf32> to vector<1x64xf32>
    %cst_148 = arith.constant dense<0.000000e+00> : vector<1x64xf32>
    %748 = tpu.matmul %746, %13, %cst_148 {dimension_numbers = #tpu.dot_dimension_numbers<[1], [0], [0], [1], [0, 0, 1, 1], [], []>} : vector<1x16xf32>, vector<16x64xf32>, vector<1x64xf32> -> vector<1x64xf32>
    %749 = arith.addf %747, %748 : vector<1x64xf32>
    %750 = vector.extract_strided_slice %749 {offsets = [0, 0], sizes = [1, 16], strides = [1, 1]} : vector<1x64xf32> to vector<1x16xf32>
    %751 = arith.negf %750 : vector<1x16xf32>
    %752 = math.exp %751 : vector<1x16xf32>
    %cst_149 = arith.constant 1.000000e+00 : f32
    %753 = vector.broadcast %cst_149 : f32 to vector<1x16xf32>
    %754 = arith.addf %753, %752 : vector<1x16xf32>
    %755 = arith.divf %753, %754 : vector<1x16xf32>
    %756 = vector.extract_strided_slice %749 {offsets = [0, 16], sizes = [1, 16], strides = [1, 1]} : vector<1x64xf32> to vector<1x16xf32>
    %757 = arith.negf %756 : vector<1x16xf32>
    %758 = math.exp %757 : vector<1x16xf32>
    %cst_150 = arith.constant 1.000000e+00 : f32
    %759 = vector.broadcast %cst_150 : f32 to vector<1x16xf32>
    %760 = arith.addf %759, %758 : vector<1x16xf32>
    %761 = arith.divf %759, %760 : vector<1x16xf32>
    %762 = vector.extract_strided_slice %749 {offsets = [0, 32], sizes = [1, 16], strides = [1, 1]} : vector<1x64xf32> to vector<1x16xf32>
    %763 = math.tanh %762 : vector<1x16xf32>
    %764 = vector.extract_strided_slice %749 {offsets = [0, 48], sizes = [1, 16], strides = [1, 1]} : vector<1x64xf32> to vector<1x16xf32>
    %765 = arith.negf %764 : vector<1x16xf32>
    %766 = math.exp %765 : vector<1x16xf32>
    %cst_151 = arith.constant 1.000000e+00 : f32
    %767 = vector.broadcast %cst_151 : f32 to vector<1x16xf32>
    %768 = arith.addf %767, %766 : vector<1x16xf32>
    %769 = arith.divf %767, %768 : vector<1x16xf32>
    %770 = arith.mulf %761, %744 : vector<1x16xf32>
    %771 = arith.mulf %755, %763 : vector<1x16xf32>
    %772 = arith.addf %770, %771 : vector<1x16xf32>
    %773 = math.tanh %772 : vector<1x16xf32>
    %774 = arith.mulf %769, %773 : vector<1x16xf32>
    %775 = vector.extract_strided_slice %716 {offsets = [5, 0], sizes = [1, 64], strides = [1, 1]} : vector<8x64xf32> to vector<1x64xf32>
    %cst_152 = arith.constant dense<0.000000e+00> : vector<1x64xf32>
    %776 = tpu.matmul %774, %13, %cst_152 {dimension_numbers = #tpu.dot_dimension_numbers<[1], [0], [0], [1], [0, 0, 1, 1], [], []>} : vector<1x16xf32>, vector<16x64xf32>, vector<1x64xf32> -> vector<1x64xf32>
    %777 = arith.addf %775, %776 : vector<1x64xf32>
    %778 = vector.extract_strided_slice %777 {offsets = [0, 0], sizes = [1, 16], strides = [1, 1]} : vector<1x64xf32> to vector<1x16xf32>
    %779 = arith.negf %778 : vector<1x16xf32>
    %780 = math.exp %779 : vector<1x16xf32>
    %cst_153 = arith.constant 1.000000e+00 : f32
    %781 = vector.broadcast %cst_153 : f32 to vector<1x16xf32>
    %782 = arith.addf %781, %780 : vector<1x16xf32>
    %783 = arith.divf %781, %782 : vector<1x16xf32>
    %784 = vector.extract_strided_slice %777 {offsets = [0, 16], sizes = [1, 16], strides = [1, 1]} : vector<1x64xf32> to vector<1x16xf32>
    %785 = arith.negf %784 : vector<1x16xf32>
    %786 = math.exp %785 : vector<1x16xf32>
    %cst_154 = arith.constant 1.000000e+00 : f32
    %787 = vector.broadcast %cst_154 : f32 to vector<1x16xf32>
    %788 = arith.addf %787, %786 : vector<1x16xf32>
    %789 = arith.divf %787, %788 : vector<1x16xf32>
    %790 = vector.extract_strided_slice %777 {offsets = [0, 32], sizes = [1, 16], strides = [1, 1]} : vector<1x64xf32> to vector<1x16xf32>
    %791 = math.tanh %790 : vector<1x16xf32>
    %792 = vector.extract_strided_slice %777 {offsets = [0, 48], sizes = [1, 16], strides = [1, 1]} : vector<1x64xf32> to vector<1x16xf32>
    %793 = arith.negf %792 : vector<1x16xf32>
    %794 = math.exp %793 : vector<1x16xf32>
    %cst_155 = arith.constant 1.000000e+00 : f32
    %795 = vector.broadcast %cst_155 : f32 to vector<1x16xf32>
    %796 = arith.addf %795, %794 : vector<1x16xf32>
    %797 = arith.divf %795, %796 : vector<1x16xf32>
    %798 = arith.mulf %789, %772 : vector<1x16xf32>
    %799 = arith.mulf %783, %791 : vector<1x16xf32>
    %800 = arith.addf %798, %799 : vector<1x16xf32>
    %801 = math.tanh %800 : vector<1x16xf32>
    %802 = arith.mulf %797, %801 : vector<1x16xf32>
    %803 = vector.extract_strided_slice %716 {offsets = [4, 0], sizes = [1, 64], strides = [1, 1]} : vector<8x64xf32> to vector<1x64xf32>
    %cst_156 = arith.constant dense<0.000000e+00> : vector<1x64xf32>
    %804 = tpu.matmul %802, %13, %cst_156 {dimension_numbers = #tpu.dot_dimension_numbers<[1], [0], [0], [1], [0, 0, 1, 1], [], []>} : vector<1x16xf32>, vector<16x64xf32>, vector<1x64xf32> -> vector<1x64xf32>
    %805 = arith.addf %803, %804 : vector<1x64xf32>
    %806 = vector.extract_strided_slice %805 {offsets = [0, 0], sizes = [1, 16], strides = [1, 1]} : vector<1x64xf32> to vector<1x16xf32>
    %807 = arith.negf %806 : vector<1x16xf32>
    %808 = math.exp %807 : vector<1x16xf32>
    %cst_157 = arith.constant 1.000000e+00 : f32
    %809 = vector.broadcast %cst_157 : f32 to vector<1x16xf32>
    %810 = arith.addf %809, %808 : vector<1x16xf32>
    %811 = arith.divf %809, %810 : vector<1x16xf32>
    %812 = vector.extract_strided_slice %805 {offsets = [0, 16], sizes = [1, 16], strides = [1, 1]} : vector<1x64xf32> to vector<1x16xf32>
    %813 = arith.negf %812 : vector<1x16xf32>
    %814 = math.exp %813 : vector<1x16xf32>
    %cst_158 = arith.constant 1.000000e+00 : f32
    %815 = vector.broadcast %cst_158 : f32 to vector<1x16xf32>
    %816 = arith.addf %815, %814 : vector<1x16xf32>
    %817 = arith.divf %815, %816 : vector<1x16xf32>
    %818 = vector.extract_strided_slice %805 {offsets = [0, 32], sizes = [1, 16], strides = [1, 1]} : vector<1x64xf32> to vector<1x16xf32>
    %819 = math.tanh %818 : vector<1x16xf32>
    %820 = vector.extract_strided_slice %805 {offsets = [0, 48], sizes = [1, 16], strides = [1, 1]} : vector<1x64xf32> to vector<1x16xf32>
    %821 = arith.negf %820 : vector<1x16xf32>
    %822 = math.exp %821 : vector<1x16xf32>
    %cst_159 = arith.constant 1.000000e+00 : f32
    %823 = vector.broadcast %cst_159 : f32 to vector<1x16xf32>
    %824 = arith.addf %823, %822 : vector<1x16xf32>
    %825 = arith.divf %823, %824 : vector<1x16xf32>
    %826 = arith.mulf %817, %800 : vector<1x16xf32>
    %827 = arith.mulf %811, %819 : vector<1x16xf32>
    %828 = arith.addf %826, %827 : vector<1x16xf32>
    %829 = math.tanh %828 : vector<1x16xf32>
    %830 = arith.mulf %825, %829 : vector<1x16xf32>
    %831 = vector.extract_strided_slice %716 {offsets = [3, 0], sizes = [1, 64], strides = [1, 1]} : vector<8x64xf32> to vector<1x64xf32>
    %cst_160 = arith.constant dense<0.000000e+00> : vector<1x64xf32>
    %832 = tpu.matmul %830, %13, %cst_160 {dimension_numbers = #tpu.dot_dimension_numbers<[1], [0], [0], [1], [0, 0, 1, 1], [], []>} : vector<1x16xf32>, vector<16x64xf32>, vector<1x64xf32> -> vector<1x64xf32>
    %833 = arith.addf %831, %832 : vector<1x64xf32>
    %834 = vector.extract_strided_slice %833 {offsets = [0, 0], sizes = [1, 16], strides = [1, 1]} : vector<1x64xf32> to vector<1x16xf32>
    %835 = arith.negf %834 : vector<1x16xf32>
    %836 = math.exp %835 : vector<1x16xf32>
    %cst_161 = arith.constant 1.000000e+00 : f32
    %837 = vector.broadcast %cst_161 : f32 to vector<1x16xf32>
    %838 = arith.addf %837, %836 : vector<1x16xf32>
    %839 = arith.divf %837, %838 : vector<1x16xf32>
    %840 = vector.extract_strided_slice %833 {offsets = [0, 16], sizes = [1, 16], strides = [1, 1]} : vector<1x64xf32> to vector<1x16xf32>
    %841 = arith.negf %840 : vector<1x16xf32>
    %842 = math.exp %841 : vector<1x16xf32>
    %cst_162 = arith.constant 1.000000e+00 : f32
    %843 = vector.broadcast %cst_162 : f32 to vector<1x16xf32>
    %844 = arith.addf %843, %842 : vector<1x16xf32>
    %845 = arith.divf %843, %844 : vector<1x16xf32>
    %846 = vector.extract_strided_slice %833 {offsets = [0, 32], sizes = [1, 16], strides = [1, 1]} : vector<1x64xf32> to vector<1x16xf32>
    %847 = math.tanh %846 : vector<1x16xf32>
    %848 = vector.extract_strided_slice %833 {offsets = [0, 48], sizes = [1, 16], strides = [1, 1]} : vector<1x64xf32> to vector<1x16xf32>
    %849 = arith.negf %848 : vector<1x16xf32>
    %850 = math.exp %849 : vector<1x16xf32>
    %cst_163 = arith.constant 1.000000e+00 : f32
    %851 = vector.broadcast %cst_163 : f32 to vector<1x16xf32>
    %852 = arith.addf %851, %850 : vector<1x16xf32>
    %853 = arith.divf %851, %852 : vector<1x16xf32>
    %854 = arith.mulf %845, %828 : vector<1x16xf32>
    %855 = arith.mulf %839, %847 : vector<1x16xf32>
    %856 = arith.addf %854, %855 : vector<1x16xf32>
    %857 = math.tanh %856 : vector<1x16xf32>
    %858 = arith.mulf %853, %857 : vector<1x16xf32>
    %859 = vector.extract_strided_slice %716 {offsets = [2, 0], sizes = [1, 64], strides = [1, 1]} : vector<8x64xf32> to vector<1x64xf32>
    %cst_164 = arith.constant dense<0.000000e+00> : vector<1x64xf32>
    %860 = tpu.matmul %858, %13, %cst_164 {dimension_numbers = #tpu.dot_dimension_numbers<[1], [0], [0], [1], [0, 0, 1, 1], [], []>} : vector<1x16xf32>, vector<16x64xf32>, vector<1x64xf32> -> vector<1x64xf32>
    %861 = arith.addf %859, %860 : vector<1x64xf32>
    %862 = vector.extract_strided_slice %861 {offsets = [0, 0], sizes = [1, 16], strides = [1, 1]} : vector<1x64xf32> to vector<1x16xf32>
    %863 = arith.negf %862 : vector<1x16xf32>
    %864 = math.exp %863 : vector<1x16xf32>
    %cst_165 = arith.constant 1.000000e+00 : f32
    %865 = vector.broadcast %cst_165 : f32 to vector<1x16xf32>
    %866 = arith.addf %865, %864 : vector<1x16xf32>
    %867 = arith.divf %865, %866 : vector<1x16xf32>
    %868 = vector.extract_strided_slice %861 {offsets = [0, 16], sizes = [1, 16], strides = [1, 1]} : vector<1x64xf32> to vector<1x16xf32>
    %869 = arith.negf %868 : vector<1x16xf32>
    %870 = math.exp %869 : vector<1x16xf32>
    %cst_166 = arith.constant 1.000000e+00 : f32
    %871 = vector.broadcast %cst_166 : f32 to vector<1x16xf32>
    %872 = arith.addf %871, %870 : vector<1x16xf32>
    %873 = arith.divf %871, %872 : vector<1x16xf32>
    %874 = vector.extract_strided_slice %861 {offsets = [0, 32], sizes = [1, 16], strides = [1, 1]} : vector<1x64xf32> to vector<1x16xf32>
    %875 = math.tanh %874 : vector<1x16xf32>
    %876 = vector.extract_strided_slice %861 {offsets = [0, 48], sizes = [1, 16], strides = [1, 1]} : vector<1x64xf32> to vector<1x16xf32>
    %877 = arith.negf %876 : vector<1x16xf32>
    %878 = math.exp %877 : vector<1x16xf32>
    %cst_167 = arith.constant 1.000000e+00 : f32
    %879 = vector.broadcast %cst_167 : f32 to vector<1x16xf32>
    %880 = arith.addf %879, %878 : vector<1x16xf32>
    %881 = arith.divf %879, %880 : vector<1x16xf32>
    %882 = arith.mulf %873, %856 : vector<1x16xf32>
    %883 = arith.mulf %867, %875 : vector<1x16xf32>
    %884 = arith.addf %882, %883 : vector<1x16xf32>
    %885 = math.tanh %884 : vector<1x16xf32>
    %886 = arith.mulf %881, %885 : vector<1x16xf32>
    %887 = vector.extract_strided_slice %716 {offsets = [1, 0], sizes = [1, 64], strides = [1, 1]} : vector<8x64xf32> to vector<1x64xf32>
    %cst_168 = arith.constant dense<0.000000e+00> : vector<1x64xf32>
    %888 = tpu.matmul %886, %13, %cst_168 {dimension_numbers = #tpu.dot_dimension_numbers<[1], [0], [0], [1], [0, 0, 1, 1], [], []>} : vector<1x16xf32>, vector<16x64xf32>, vector<1x64xf32> -> vector<1x64xf32>
    %889 = arith.addf %887, %888 : vector<1x64xf32>
    %890 = vector.extract_strided_slice %889 {offsets = [0, 0], sizes = [1, 16], strides = [1, 1]} : vector<1x64xf32> to vector<1x16xf32>
    %891 = arith.negf %890 : vector<1x16xf32>
    %892 = math.exp %891 : vector<1x16xf32>
    %cst_169 = arith.constant 1.000000e+00 : f32
    %893 = vector.broadcast %cst_169 : f32 to vector<1x16xf32>
    %894 = arith.addf %893, %892 : vector<1x16xf32>
    %895 = arith.divf %893, %894 : vector<1x16xf32>
    %896 = vector.extract_strided_slice %889 {offsets = [0, 16], sizes = [1, 16], strides = [1, 1]} : vector<1x64xf32> to vector<1x16xf32>
    %897 = arith.negf %896 : vector<1x16xf32>
    %898 = math.exp %897 : vector<1x16xf32>
    %cst_170 = arith.constant 1.000000e+00 : f32
    %899 = vector.broadcast %cst_170 : f32 to vector<1x16xf32>
    %900 = arith.addf %899, %898 : vector<1x16xf32>
    %901 = arith.divf %899, %900 : vector<1x16xf32>
    %902 = vector.extract_strided_slice %889 {offsets = [0, 32], sizes = [1, 16], strides = [1, 1]} : vector<1x64xf32> to vector<1x16xf32>
    %903 = math.tanh %902 : vector<1x16xf32>
    %904 = vector.extract_strided_slice %889 {offsets = [0, 48], sizes = [1, 16], strides = [1, 1]} : vector<1x64xf32> to vector<1x16xf32>
    %905 = arith.negf %904 : vector<1x16xf32>
    %906 = math.exp %905 : vector<1x16xf32>
    %cst_171 = arith.constant 1.000000e+00 : f32
    %907 = vector.broadcast %cst_171 : f32 to vector<1x16xf32>
    %908 = arith.addf %907, %906 : vector<1x16xf32>
    %909 = arith.divf %907, %908 : vector<1x16xf32>
    %910 = arith.mulf %901, %884 : vector<1x16xf32>
    %911 = arith.mulf %895, %903 : vector<1x16xf32>
    %912 = arith.addf %910, %911 : vector<1x16xf32>
    %913 = math.tanh %912 : vector<1x16xf32>
    %914 = arith.mulf %909, %913 : vector<1x16xf32>
    %915 = vector.extract_strided_slice %716 {offsets = [0, 0], sizes = [1, 64], strides = [1, 1]} : vector<8x64xf32> to vector<1x64xf32>
    %cst_172 = arith.constant dense<0.000000e+00> : vector<1x64xf32>
    %916 = tpu.matmul %914, %13, %cst_172 {dimension_numbers = #tpu.dot_dimension_numbers<[1], [0], [0], [1], [0, 0, 1, 1], [], []>} : vector<1x16xf32>, vector<16x64xf32>, vector<1x64xf32> -> vector<1x64xf32>
    %917 = arith.addf %915, %916 : vector<1x64xf32>
    %918 = vector.extract_strided_slice %917 {offsets = [0, 0], sizes = [1, 16], strides = [1, 1]} : vector<1x64xf32> to vector<1x16xf32>
    %919 = arith.negf %918 : vector<1x16xf32>
    %920 = math.exp %919 : vector<1x16xf32>
    %cst_173 = arith.constant 1.000000e+00 : f32
    %921 = vector.broadcast %cst_173 : f32 to vector<1x16xf32>
    %922 = arith.addf %921, %920 : vector<1x16xf32>
    %923 = arith.divf %921, %922 : vector<1x16xf32>
    %924 = vector.extract_strided_slice %917 {offsets = [0, 16], sizes = [1, 16], strides = [1, 1]} : vector<1x64xf32> to vector<1x16xf32>
    %925 = arith.negf %924 : vector<1x16xf32>
    %926 = math.exp %925 : vector<1x16xf32>
    %cst_174 = arith.constant 1.000000e+00 : f32
    %927 = vector.broadcast %cst_174 : f32 to vector<1x16xf32>
    %928 = arith.addf %927, %926 : vector<1x16xf32>
    %929 = arith.divf %927, %928 : vector<1x16xf32>
    %930 = vector.extract_strided_slice %917 {offsets = [0, 32], sizes = [1, 16], strides = [1, 1]} : vector<1x64xf32> to vector<1x16xf32>
    %931 = math.tanh %930 : vector<1x16xf32>
    %932 = vector.extract_strided_slice %917 {offsets = [0, 48], sizes = [1, 16], strides = [1, 1]} : vector<1x64xf32> to vector<1x16xf32>
    %933 = arith.negf %932 : vector<1x16xf32>
    %934 = math.exp %933 : vector<1x16xf32>
    %cst_175 = arith.constant 1.000000e+00 : f32
    %935 = vector.broadcast %cst_175 : f32 to vector<1x16xf32>
    %936 = arith.addf %935, %934 : vector<1x16xf32>
    %937 = arith.divf %935, %936 : vector<1x16xf32>
    %938 = arith.mulf %929, %912 : vector<1x16xf32>
    %939 = arith.mulf %923, %931 : vector<1x16xf32>
    %940 = arith.addf %938, %939 : vector<1x16xf32>
    %941 = math.tanh %940 : vector<1x16xf32>
    %942 = arith.mulf %937, %941 : vector<1x16xf32>
    %943 = tpu.concatenate %942, %914, %886, %858, %830, %802, %774, %746 in 0 : vector<1x16xf32>, vector<1x16xf32>, vector<1x16xf32>, vector<1x16xf32>, vector<1x16xf32>, vector<1x16xf32>, vector<1x16xf32>, vector<1x16xf32> -> vector<8x16xf32>
    %944 = tpu.concatenate %713, %943 in 1 : vector<8x16xf32>, vector<8x16xf32> -> vector<8x32xf32>
    %cst_176 = arith.constant 0.000000e+00 : f32
    %945 = vector.broadcast %cst_176 : f32 to vector<8x32xf32>
    %946 = arith.maximumf %944, %945 : vector<8x32xf32>
    %cst_177 = arith.constant dense<0xFF800000> : vector<32xf32>
    %947 = vector.multi_reduction <maximumf>, %946, %cst_177 [0] : vector<8x32xf32> to vector<32xf32>
    %948 = vector.shape_cast %947 : vector<32xf32> to vector<1x32xf32>
    %949 = vector.broadcast %948 : vector<1x32xf32> to vector<8x32xf32>
    %950 = arith.subf %946, %949 : vector<8x32xf32>
    %951 = math.exp %950 : vector<8x32xf32>
    %cst_178 = arith.constant dense<0.000000e+00> : vector<32xf32>
    %952 = vector.multi_reduction <add>, %951, %cst_178 [0] : vector<8x32xf32> to vector<32xf32>
    %953 = vector.shape_cast %952 : vector<32xf32> to vector<1x32xf32>
    %954 = vector.broadcast %953 : vector<1x32xf32> to vector<8x32xf32>
    %955 = arith.divf %951, %954 : vector<8x32xf32>
    %956 = arith.mulf %946, %955 : vector<8x32xf32>
    %957 = arith.addf %946, %956 : vector<8x32xf32>
    %cst_179 = arith.constant dense<0.000000e+00> : vector<8x32xf32>
    %958 = tpu.matmul %957, %1, %cst_179 {dimension_numbers = #tpu.dot_dimension_numbers<[1], [0], [0], [1], [0, 0, 1, 1], [], []>} : vector<8x32xf32>, vector<32x32xf32>, vector<8x32xf32> -> vector<8x32xf32>
    %cst_180 = arith.constant dense<0.000000e+00> : vector<8x32xf32>
    %959 = tpu.matmul %0, %958, %cst_180 {dimension_numbers = #tpu.dot_dimension_numbers<[1], [0], [0], [1], [0, 0, 1, 1], [], []>} : vector<8x8xf32>, vector<8x32xf32>, vector<8x32xf32> -> vector<8x32xf32>
    %960 = vector.broadcast %2 : vector<1x32xf32> to vector<8x32xf32>
    %961 = arith.addf %959, %960 : vector<8x32xf32>
    %cst_181 = arith.constant 0.000000e+00 : f32
    %962 = vector.broadcast %cst_181 : f32 to vector<8x32xf32>
    %963 = arith.maximumf %961, %962 : vector<8x32xf32>
    %964 = arith.addf %22, %963 : vector<8x32xf32>
    %cst_182 = arith.constant dense<0.000000e+00> : vector<8x64xf32>
    %965 = tpu.matmul %964, %3, %cst_182 {dimension_numbers = #tpu.dot_dimension_numbers<[1], [0], [0], [1], [0, 0, 1, 1], [], []>} : vector<8x32xf32>, vector<32x64xf32>, vector<8x64xf32> -> vector<8x64xf32>
    %966 = vector.broadcast %5 : vector<1x64xf32> to vector<8x64xf32>
    %967 = arith.addf %965, %966 : vector<8x64xf32>
    %cst_183 = arith.constant 0.000000e+00 : f32
    %968 = vector.broadcast %cst_183 : f32 to vector<1x16xf32>
    %cst_184 = arith.constant 0.000000e+00 : f32
    %969 = vector.broadcast %cst_184 : f32 to vector<1x16xf32>
    %970 = vector.extract_strided_slice %967 {offsets = [0, 0], sizes = [1, 64], strides = [1, 1]} : vector<8x64xf32> to vector<1x64xf32>
    %cst_185 = arith.constant dense<0.000000e+00> : vector<1x64xf32>
    %971 = tpu.matmul %968, %4, %cst_185 {dimension_numbers = #tpu.dot_dimension_numbers<[1], [0], [0], [1], [0, 0, 1, 1], [], []>} : vector<1x16xf32>, vector<16x64xf32>, vector<1x64xf32> -> vector<1x64xf32>
    %972 = arith.addf %970, %971 : vector<1x64xf32>
    %973 = vector.extract_strided_slice %972 {offsets = [0, 0], sizes = [1, 16], strides = [1, 1]} : vector<1x64xf32> to vector<1x16xf32>
    %974 = arith.negf %973 : vector<1x16xf32>
    %975 = math.exp %974 : vector<1x16xf32>
    %cst_186 = arith.constant 1.000000e+00 : f32
    %976 = vector.broadcast %cst_186 : f32 to vector<1x16xf32>
    %977 = arith.addf %976, %975 : vector<1x16xf32>
    %978 = arith.divf %976, %977 : vector<1x16xf32>
    %979 = vector.extract_strided_slice %972 {offsets = [0, 16], sizes = [1, 16], strides = [1, 1]} : vector<1x64xf32> to vector<1x16xf32>
    %980 = arith.negf %979 : vector<1x16xf32>
    %981 = math.exp %980 : vector<1x16xf32>
    %cst_187 = arith.constant 1.000000e+00 : f32
    %982 = vector.broadcast %cst_187 : f32 to vector<1x16xf32>
    %983 = arith.addf %982, %981 : vector<1x16xf32>
    %984 = arith.divf %982, %983 : vector<1x16xf32>
    %985 = vector.extract_strided_slice %972 {offsets = [0, 32], sizes = [1, 16], strides = [1, 1]} : vector<1x64xf32> to vector<1x16xf32>
    %986 = math.tanh %985 : vector<1x16xf32>
    %987 = vector.extract_strided_slice %972 {offsets = [0, 48], sizes = [1, 16], strides = [1, 1]} : vector<1x64xf32> to vector<1x16xf32>
    %988 = arith.negf %987 : vector<1x16xf32>
    %989 = math.exp %988 : vector<1x16xf32>
    %cst_188 = arith.constant 1.000000e+00 : f32
    %990 = vector.broadcast %cst_188 : f32 to vector<1x16xf32>
    %991 = arith.addf %990, %989 : vector<1x16xf32>
    %992 = arith.divf %990, %991 : vector<1x16xf32>
    %993 = arith.mulf %984, %969 : vector<1x16xf32>
    %994 = arith.mulf %978, %986 : vector<1x16xf32>
    %995 = arith.addf %993, %994 : vector<1x16xf32>
    %996 = math.tanh %995 : vector<1x16xf32>
    %997 = arith.mulf %992, %996 : vector<1x16xf32>
    %998 = vector.extract_strided_slice %967 {offsets = [1, 0], sizes = [1, 64], strides = [1, 1]} : vector<8x64xf32> to vector<1x64xf32>
    %cst_189 = arith.constant dense<0.000000e+00> : vector<1x64xf32>
    %999 = tpu.matmul %997, %4, %cst_189 {dimension_numbers = #tpu.dot_dimension_numbers<[1], [0], [0], [1], [0, 0, 1, 1], [], []>} : vector<1x16xf32>, vector<16x64xf32>, vector<1x64xf32> -> vector<1x64xf32>
    %1000 = arith.addf %998, %999 : vector<1x64xf32>
    %1001 = vector.extract_strided_slice %1000 {offsets = [0, 0], sizes = [1, 16], strides = [1, 1]} : vector<1x64xf32> to vector<1x16xf32>
    %1002 = arith.negf %1001 : vector<1x16xf32>
    %1003 = math.exp %1002 : vector<1x16xf32>
    %cst_190 = arith.constant 1.000000e+00 : f32
    %1004 = vector.broadcast %cst_190 : f32 to vector<1x16xf32>
    %1005 = arith.addf %1004, %1003 : vector<1x16xf32>
    %1006 = arith.divf %1004, %1005 : vector<1x16xf32>
    %1007 = vector.extract_strided_slice %1000 {offsets = [0, 16], sizes = [1, 16], strides = [1, 1]} : vector<1x64xf32> to vector<1x16xf32>
    %1008 = arith.negf %1007 : vector<1x16xf32>
    %1009 = math.exp %1008 : vector<1x16xf32>
    %cst_191 = arith.constant 1.000000e+00 : f32
    %1010 = vector.broadcast %cst_191 : f32 to vector<1x16xf32>
    %1011 = arith.addf %1010, %1009 : vector<1x16xf32>
    %1012 = arith.divf %1010, %1011 : vector<1x16xf32>
    %1013 = vector.extract_strided_slice %1000 {offsets = [0, 32], sizes = [1, 16], strides = [1, 1]} : vector<1x64xf32> to vector<1x16xf32>
    %1014 = math.tanh %1013 : vector<1x16xf32>
    %1015 = vector.extract_strided_slice %1000 {offsets = [0, 48], sizes = [1, 16], strides = [1, 1]} : vector<1x64xf32> to vector<1x16xf32>
    %1016 = arith.negf %1015 : vector<1x16xf32>
    %1017 = math.exp %1016 : vector<1x16xf32>
    %cst_192 = arith.constant 1.000000e+00 : f32
    %1018 = vector.broadcast %cst_192 : f32 to vector<1x16xf32>
    %1019 = arith.addf %1018, %1017 : vector<1x16xf32>
    %1020 = arith.divf %1018, %1019 : vector<1x16xf32>
    %1021 = arith.mulf %1012, %995 : vector<1x16xf32>
    %1022 = arith.mulf %1006, %1014 : vector<1x16xf32>
    %1023 = arith.addf %1021, %1022 : vector<1x16xf32>
    %1024 = math.tanh %1023 : vector<1x16xf32>
    %1025 = arith.mulf %1020, %1024 : vector<1x16xf32>
    %1026 = vector.extract_strided_slice %967 {offsets = [2, 0], sizes = [1, 64], strides = [1, 1]} : vector<8x64xf32> to vector<1x64xf32>
    %cst_193 = arith.constant dense<0.000000e+00> : vector<1x64xf32>
    %1027 = tpu.matmul %1025, %4, %cst_193 {dimension_numbers = #tpu.dot_dimension_numbers<[1], [0], [0], [1], [0, 0, 1, 1], [], []>} : vector<1x16xf32>, vector<16x64xf32>, vector<1x64xf32> -> vector<1x64xf32>
    %1028 = arith.addf %1026, %1027 : vector<1x64xf32>
    %1029 = vector.extract_strided_slice %1028 {offsets = [0, 0], sizes = [1, 16], strides = [1, 1]} : vector<1x64xf32> to vector<1x16xf32>
    %1030 = arith.negf %1029 : vector<1x16xf32>
    %1031 = math.exp %1030 : vector<1x16xf32>
    %cst_194 = arith.constant 1.000000e+00 : f32
    %1032 = vector.broadcast %cst_194 : f32 to vector<1x16xf32>
    %1033 = arith.addf %1032, %1031 : vector<1x16xf32>
    %1034 = arith.divf %1032, %1033 : vector<1x16xf32>
    %1035 = vector.extract_strided_slice %1028 {offsets = [0, 16], sizes = [1, 16], strides = [1, 1]} : vector<1x64xf32> to vector<1x16xf32>
    %1036 = arith.negf %1035 : vector<1x16xf32>
    %1037 = math.exp %1036 : vector<1x16xf32>
    %cst_195 = arith.constant 1.000000e+00 : f32
    %1038 = vector.broadcast %cst_195 : f32 to vector<1x16xf32>
    %1039 = arith.addf %1038, %1037 : vector<1x16xf32>
    %1040 = arith.divf %1038, %1039 : vector<1x16xf32>
    %1041 = vector.extract_strided_slice %1028 {offsets = [0, 32], sizes = [1, 16], strides = [1, 1]} : vector<1x64xf32> to vector<1x16xf32>
    %1042 = math.tanh %1041 : vector<1x16xf32>
    %1043 = vector.extract_strided_slice %1028 {offsets = [0, 48], sizes = [1, 16], strides = [1, 1]} : vector<1x64xf32> to vector<1x16xf32>
    %1044 = arith.negf %1043 : vector<1x16xf32>
    %1045 = math.exp %1044 : vector<1x16xf32>
    %cst_196 = arith.constant 1.000000e+00 : f32
    %1046 = vector.broadcast %cst_196 : f32 to vector<1x16xf32>
    %1047 = arith.addf %1046, %1045 : vector<1x16xf32>
    %1048 = arith.divf %1046, %1047 : vector<1x16xf32>
    %1049 = arith.mulf %1040, %1023 : vector<1x16xf32>
    %1050 = arith.mulf %1034, %1042 : vector<1x16xf32>
    %1051 = arith.addf %1049, %1050 : vector<1x16xf32>
    %1052 = math.tanh %1051 : vector<1x16xf32>
    %1053 = arith.mulf %1048, %1052 : vector<1x16xf32>
    %1054 = vector.extract_strided_slice %967 {offsets = [3, 0], sizes = [1, 64], strides = [1, 1]} : vector<8x64xf32> to vector<1x64xf32>
    %cst_197 = arith.constant dense<0.000000e+00> : vector<1x64xf32>
    %1055 = tpu.matmul %1053, %4, %cst_197 {dimension_numbers = #tpu.dot_dimension_numbers<[1], [0], [0], [1], [0, 0, 1, 1], [], []>} : vector<1x16xf32>, vector<16x64xf32>, vector<1x64xf32> -> vector<1x64xf32>
    %1056 = arith.addf %1054, %1055 : vector<1x64xf32>
    %1057 = vector.extract_strided_slice %1056 {offsets = [0, 0], sizes = [1, 16], strides = [1, 1]} : vector<1x64xf32> to vector<1x16xf32>
    %1058 = arith.negf %1057 : vector<1x16xf32>
    %1059 = math.exp %1058 : vector<1x16xf32>
    %cst_198 = arith.constant 1.000000e+00 : f32
    %1060 = vector.broadcast %cst_198 : f32 to vector<1x16xf32>
    %1061 = arith.addf %1060, %1059 : vector<1x16xf32>
    %1062 = arith.divf %1060, %1061 : vector<1x16xf32>
    %1063 = vector.extract_strided_slice %1056 {offsets = [0, 16], sizes = [1, 16], strides = [1, 1]} : vector<1x64xf32> to vector<1x16xf32>
    %1064 = arith.negf %1063 : vector<1x16xf32>
    %1065 = math.exp %1064 : vector<1x16xf32>
    %cst_199 = arith.constant 1.000000e+00 : f32
    %1066 = vector.broadcast %cst_199 : f32 to vector<1x16xf32>
    %1067 = arith.addf %1066, %1065 : vector<1x16xf32>
    %1068 = arith.divf %1066, %1067 : vector<1x16xf32>
    %1069 = vector.extract_strided_slice %1056 {offsets = [0, 32], sizes = [1, 16], strides = [1, 1]} : vector<1x64xf32> to vector<1x16xf32>
    %1070 = math.tanh %1069 : vector<1x16xf32>
    %1071 = vector.extract_strided_slice %1056 {offsets = [0, 48], sizes = [1, 16], strides = [1, 1]} : vector<1x64xf32> to vector<1x16xf32>
    %1072 = arith.negf %1071 : vector<1x16xf32>
    %1073 = math.exp %1072 : vector<1x16xf32>
    %cst_200 = arith.constant 1.000000e+00 : f32
    %1074 = vector.broadcast %cst_200 : f32 to vector<1x16xf32>
    %1075 = arith.addf %1074, %1073 : vector<1x16xf32>
    %1076 = arith.divf %1074, %1075 : vector<1x16xf32>
    %1077 = arith.mulf %1068, %1051 : vector<1x16xf32>
    %1078 = arith.mulf %1062, %1070 : vector<1x16xf32>
    %1079 = arith.addf %1077, %1078 : vector<1x16xf32>
    %1080 = math.tanh %1079 : vector<1x16xf32>
    %1081 = arith.mulf %1076, %1080 : vector<1x16xf32>
    %1082 = vector.extract_strided_slice %967 {offsets = [4, 0], sizes = [1, 64], strides = [1, 1]} : vector<8x64xf32> to vector<1x64xf32>
    %cst_201 = arith.constant dense<0.000000e+00> : vector<1x64xf32>
    %1083 = tpu.matmul %1081, %4, %cst_201 {dimension_numbers = #tpu.dot_dimension_numbers<[1], [0], [0], [1], [0, 0, 1, 1], [], []>} : vector<1x16xf32>, vector<16x64xf32>, vector<1x64xf32> -> vector<1x64xf32>
    %1084 = arith.addf %1082, %1083 : vector<1x64xf32>
    %1085 = vector.extract_strided_slice %1084 {offsets = [0, 0], sizes = [1, 16], strides = [1, 1]} : vector<1x64xf32> to vector<1x16xf32>
    %1086 = arith.negf %1085 : vector<1x16xf32>
    %1087 = math.exp %1086 : vector<1x16xf32>
    %cst_202 = arith.constant 1.000000e+00 : f32
    %1088 = vector.broadcast %cst_202 : f32 to vector<1x16xf32>
    %1089 = arith.addf %1088, %1087 : vector<1x16xf32>
    %1090 = arith.divf %1088, %1089 : vector<1x16xf32>
    %1091 = vector.extract_strided_slice %1084 {offsets = [0, 16], sizes = [1, 16], strides = [1, 1]} : vector<1x64xf32> to vector<1x16xf32>
    %1092 = arith.negf %1091 : vector<1x16xf32>
    %1093 = math.exp %1092 : vector<1x16xf32>
    %cst_203 = arith.constant 1.000000e+00 : f32
    %1094 = vector.broadcast %cst_203 : f32 to vector<1x16xf32>
    %1095 = arith.addf %1094, %1093 : vector<1x16xf32>
    %1096 = arith.divf %1094, %1095 : vector<1x16xf32>
    %1097 = vector.extract_strided_slice %1084 {offsets = [0, 32], sizes = [1, 16], strides = [1, 1]} : vector<1x64xf32> to vector<1x16xf32>
    %1098 = math.tanh %1097 : vector<1x16xf32>
    %1099 = vector.extract_strided_slice %1084 {offsets = [0, 48], sizes = [1, 16], strides = [1, 1]} : vector<1x64xf32> to vector<1x16xf32>
    %1100 = arith.negf %1099 : vector<1x16xf32>
    %1101 = math.exp %1100 : vector<1x16xf32>
    %cst_204 = arith.constant 1.000000e+00 : f32
    %1102 = vector.broadcast %cst_204 : f32 to vector<1x16xf32>
    %1103 = arith.addf %1102, %1101 : vector<1x16xf32>
    %1104 = arith.divf %1102, %1103 : vector<1x16xf32>
    %1105 = arith.mulf %1096, %1079 : vector<1x16xf32>
    %1106 = arith.mulf %1090, %1098 : vector<1x16xf32>
    %1107 = arith.addf %1105, %1106 : vector<1x16xf32>
    %1108 = math.tanh %1107 : vector<1x16xf32>
    %1109 = arith.mulf %1104, %1108 : vector<1x16xf32>
    %1110 = vector.extract_strided_slice %967 {offsets = [5, 0], sizes = [1, 64], strides = [1, 1]} : vector<8x64xf32> to vector<1x64xf32>
    %cst_205 = arith.constant dense<0.000000e+00> : vector<1x64xf32>
    %1111 = tpu.matmul %1109, %4, %cst_205 {dimension_numbers = #tpu.dot_dimension_numbers<[1], [0], [0], [1], [0, 0, 1, 1], [], []>} : vector<1x16xf32>, vector<16x64xf32>, vector<1x64xf32> -> vector<1x64xf32>
    %1112 = arith.addf %1110, %1111 : vector<1x64xf32>
    %1113 = vector.extract_strided_slice %1112 {offsets = [0, 0], sizes = [1, 16], strides = [1, 1]} : vector<1x64xf32> to vector<1x16xf32>
    %1114 = arith.negf %1113 : vector<1x16xf32>
    %1115 = math.exp %1114 : vector<1x16xf32>
    %cst_206 = arith.constant 1.000000e+00 : f32
    %1116 = vector.broadcast %cst_206 : f32 to vector<1x16xf32>
    %1117 = arith.addf %1116, %1115 : vector<1x16xf32>
    %1118 = arith.divf %1116, %1117 : vector<1x16xf32>
    %1119 = vector.extract_strided_slice %1112 {offsets = [0, 16], sizes = [1, 16], strides = [1, 1]} : vector<1x64xf32> to vector<1x16xf32>
    %1120 = arith.negf %1119 : vector<1x16xf32>
    %1121 = math.exp %1120 : vector<1x16xf32>
    %cst_207 = arith.constant 1.000000e+00 : f32
    %1122 = vector.broadcast %cst_207 : f32 to vector<1x16xf32>
    %1123 = arith.addf %1122, %1121 : vector<1x16xf32>
    %1124 = arith.divf %1122, %1123 : vector<1x16xf32>
    %1125 = vector.extract_strided_slice %1112 {offsets = [0, 32], sizes = [1, 16], strides = [1, 1]} : vector<1x64xf32> to vector<1x16xf32>
    %1126 = math.tanh %1125 : vector<1x16xf32>
    %1127 = vector.extract_strided_slice %1112 {offsets = [0, 48], sizes = [1, 16], strides = [1, 1]} : vector<1x64xf32> to vector<1x16xf32>
    %1128 = arith.negf %1127 : vector<1x16xf32>
    %1129 = math.exp %1128 : vector<1x16xf32>
    %cst_208 = arith.constant 1.000000e+00 : f32
    %1130 = vector.broadcast %cst_208 : f32 to vector<1x16xf32>
    %1131 = arith.addf %1130, %1129 : vector<1x16xf32>
    %1132 = arith.divf %1130, %1131 : vector<1x16xf32>
    %1133 = arith.mulf %1124, %1107 : vector<1x16xf32>
    %1134 = arith.mulf %1118, %1126 : vector<1x16xf32>
    %1135 = arith.addf %1133, %1134 : vector<1x16xf32>
    %1136 = math.tanh %1135 : vector<1x16xf32>
    %1137 = arith.mulf %1132, %1136 : vector<1x16xf32>
    %1138 = vector.extract_strided_slice %967 {offsets = [6, 0], sizes = [1, 64], strides = [1, 1]} : vector<8x64xf32> to vector<1x64xf32>
    %cst_209 = arith.constant dense<0.000000e+00> : vector<1x64xf32>
    %1139 = tpu.matmul %1137, %4, %cst_209 {dimension_numbers = #tpu.dot_dimension_numbers<[1], [0], [0], [1], [0, 0, 1, 1], [], []>} : vector<1x16xf32>, vector<16x64xf32>, vector<1x64xf32> -> vector<1x64xf32>
    %1140 = arith.addf %1138, %1139 : vector<1x64xf32>
    %1141 = vector.extract_strided_slice %1140 {offsets = [0, 0], sizes = [1, 16], strides = [1, 1]} : vector<1x64xf32> to vector<1x16xf32>
    %1142 = arith.negf %1141 : vector<1x16xf32>
    %1143 = math.exp %1142 : vector<1x16xf32>
    %cst_210 = arith.constant 1.000000e+00 : f32
    %1144 = vector.broadcast %cst_210 : f32 to vector<1x16xf32>
    %1145 = arith.addf %1144, %1143 : vector<1x16xf32>
    %1146 = arith.divf %1144, %1145 : vector<1x16xf32>
    %1147 = vector.extract_strided_slice %1140 {offsets = [0, 16], sizes = [1, 16], strides = [1, 1]} : vector<1x64xf32> to vector<1x16xf32>
    %1148 = arith.negf %1147 : vector<1x16xf32>
    %1149 = math.exp %1148 : vector<1x16xf32>
    %cst_211 = arith.constant 1.000000e+00 : f32
    %1150 = vector.broadcast %cst_211 : f32 to vector<1x16xf32>
    %1151 = arith.addf %1150, %1149 : vector<1x16xf32>
    %1152 = arith.divf %1150, %1151 : vector<1x16xf32>
    %1153 = vector.extract_strided_slice %1140 {offsets = [0, 32], sizes = [1, 16], strides = [1, 1]} : vector<1x64xf32> to vector<1x16xf32>
    %1154 = math.tanh %1153 : vector<1x16xf32>
    %1155 = vector.extract_strided_slice %1140 {offsets = [0, 48], sizes = [1, 16], strides = [1, 1]} : vector<1x64xf32> to vector<1x16xf32>
    %1156 = arith.negf %1155 : vector<1x16xf32>
    %1157 = math.exp %1156 : vector<1x16xf32>
    %cst_212 = arith.constant 1.000000e+00 : f32
    %1158 = vector.broadcast %cst_212 : f32 to vector<1x16xf32>
    %1159 = arith.addf %1158, %1157 : vector<1x16xf32>
    %1160 = arith.divf %1158, %1159 : vector<1x16xf32>
    %1161 = arith.mulf %1152, %1135 : vector<1x16xf32>
    %1162 = arith.mulf %1146, %1154 : vector<1x16xf32>
    %1163 = arith.addf %1161, %1162 : vector<1x16xf32>
    %1164 = math.tanh %1163 : vector<1x16xf32>
    %1165 = arith.mulf %1160, %1164 : vector<1x16xf32>
    %1166 = vector.extract_strided_slice %967 {offsets = [7, 0], sizes = [1, 64], strides = [1, 1]} : vector<8x64xf32> to vector<1x64xf32>
    %cst_213 = arith.constant dense<0.000000e+00> : vector<1x64xf32>
    %1167 = tpu.matmul %1165, %4, %cst_213 {dimension_numbers = #tpu.dot_dimension_numbers<[1], [0], [0], [1], [0, 0, 1, 1], [], []>} : vector<1x16xf32>, vector<16x64xf32>, vector<1x64xf32> -> vector<1x64xf32>
    %1168 = arith.addf %1166, %1167 : vector<1x64xf32>
    %1169 = vector.extract_strided_slice %1168 {offsets = [0, 0], sizes = [1, 16], strides = [1, 1]} : vector<1x64xf32> to vector<1x16xf32>
    %1170 = arith.negf %1169 : vector<1x16xf32>
    %1171 = math.exp %1170 : vector<1x16xf32>
    %cst_214 = arith.constant 1.000000e+00 : f32
    %1172 = vector.broadcast %cst_214 : f32 to vector<1x16xf32>
    %1173 = arith.addf %1172, %1171 : vector<1x16xf32>
    %1174 = arith.divf %1172, %1173 : vector<1x16xf32>
    %1175 = vector.extract_strided_slice %1168 {offsets = [0, 16], sizes = [1, 16], strides = [1, 1]} : vector<1x64xf32> to vector<1x16xf32>
    %1176 = arith.negf %1175 : vector<1x16xf32>
    %1177 = math.exp %1176 : vector<1x16xf32>
    %cst_215 = arith.constant 1.000000e+00 : f32
    %1178 = vector.broadcast %cst_215 : f32 to vector<1x16xf32>
    %1179 = arith.addf %1178, %1177 : vector<1x16xf32>
    %1180 = arith.divf %1178, %1179 : vector<1x16xf32>
    %1181 = vector.extract_strided_slice %1168 {offsets = [0, 32], sizes = [1, 16], strides = [1, 1]} : vector<1x64xf32> to vector<1x16xf32>
    %1182 = math.tanh %1181 : vector<1x16xf32>
    %1183 = vector.extract_strided_slice %1168 {offsets = [0, 48], sizes = [1, 16], strides = [1, 1]} : vector<1x64xf32> to vector<1x16xf32>
    %1184 = arith.negf %1183 : vector<1x16xf32>
    %1185 = math.exp %1184 : vector<1x16xf32>
    %cst_216 = arith.constant 1.000000e+00 : f32
    %1186 = vector.broadcast %cst_216 : f32 to vector<1x16xf32>
    %1187 = arith.addf %1186, %1185 : vector<1x16xf32>
    %1188 = arith.divf %1186, %1187 : vector<1x16xf32>
    %1189 = arith.mulf %1180, %1163 : vector<1x16xf32>
    %1190 = arith.mulf %1174, %1182 : vector<1x16xf32>
    %1191 = arith.addf %1189, %1190 : vector<1x16xf32>
    %1192 = math.tanh %1191 : vector<1x16xf32>
    %1193 = arith.mulf %1188, %1192 : vector<1x16xf32>
    %1194 = tpu.concatenate %997, %1025, %1053, %1081, %1109, %1137, %1165, %1193 in 0 : vector<1x16xf32>, vector<1x16xf32>, vector<1x16xf32>, vector<1x16xf32>, vector<1x16xf32>, vector<1x16xf32>, vector<1x16xf32>, vector<1x16xf32> -> vector<8x16xf32>
    %cst_217 = arith.constant dense<0.000000e+00> : vector<8x64xf32>
    %1195 = tpu.matmul %964, %6, %cst_217 {dimension_numbers = #tpu.dot_dimension_numbers<[1], [0], [0], [1], [0, 0, 1, 1], [], []>} : vector<8x32xf32>, vector<32x64xf32>, vector<8x64xf32> -> vector<8x64xf32>
    %1196 = vector.broadcast %8 : vector<1x64xf32> to vector<8x64xf32>
    %1197 = arith.addf %1195, %1196 : vector<8x64xf32>
    %cst_218 = arith.constant 0.000000e+00 : f32
    %1198 = vector.broadcast %cst_218 : f32 to vector<1x16xf32>
    %cst_219 = arith.constant 0.000000e+00 : f32
    %1199 = vector.broadcast %cst_219 : f32 to vector<1x16xf32>
    %1200 = vector.extract_strided_slice %1197 {offsets = [7, 0], sizes = [1, 64], strides = [1, 1]} : vector<8x64xf32> to vector<1x64xf32>
    %cst_220 = arith.constant dense<0.000000e+00> : vector<1x64xf32>
    %1201 = tpu.matmul %1198, %7, %cst_220 {dimension_numbers = #tpu.dot_dimension_numbers<[1], [0], [0], [1], [0, 0, 1, 1], [], []>} : vector<1x16xf32>, vector<16x64xf32>, vector<1x64xf32> -> vector<1x64xf32>
    %1202 = arith.addf %1200, %1201 : vector<1x64xf32>
    %1203 = vector.extract_strided_slice %1202 {offsets = [0, 0], sizes = [1, 16], strides = [1, 1]} : vector<1x64xf32> to vector<1x16xf32>
    %1204 = arith.negf %1203 : vector<1x16xf32>
    %1205 = math.exp %1204 : vector<1x16xf32>
    %cst_221 = arith.constant 1.000000e+00 : f32
    %1206 = vector.broadcast %cst_221 : f32 to vector<1x16xf32>
    %1207 = arith.addf %1206, %1205 : vector<1x16xf32>
    %1208 = arith.divf %1206, %1207 : vector<1x16xf32>
    %1209 = vector.extract_strided_slice %1202 {offsets = [0, 16], sizes = [1, 16], strides = [1, 1]} : vector<1x64xf32> to vector<1x16xf32>
    %1210 = arith.negf %1209 : vector<1x16xf32>
    %1211 = math.exp %1210 : vector<1x16xf32>
    %cst_222 = arith.constant 1.000000e+00 : f32
    %1212 = vector.broadcast %cst_222 : f32 to vector<1x16xf32>
    %1213 = arith.addf %1212, %1211 : vector<1x16xf32>
    %1214 = arith.divf %1212, %1213 : vector<1x16xf32>
    %1215 = vector.extract_strided_slice %1202 {offsets = [0, 32], sizes = [1, 16], strides = [1, 1]} : vector<1x64xf32> to vector<1x16xf32>
    %1216 = math.tanh %1215 : vector<1x16xf32>
    %1217 = vector.extract_strided_slice %1202 {offsets = [0, 48], sizes = [1, 16], strides = [1, 1]} : vector<1x64xf32> to vector<1x16xf32>
    %1218 = arith.negf %1217 : vector<1x16xf32>
    %1219 = math.exp %1218 : vector<1x16xf32>
    %cst_223 = arith.constant 1.000000e+00 : f32
    %1220 = vector.broadcast %cst_223 : f32 to vector<1x16xf32>
    %1221 = arith.addf %1220, %1219 : vector<1x16xf32>
    %1222 = arith.divf %1220, %1221 : vector<1x16xf32>
    %1223 = arith.mulf %1214, %1199 : vector<1x16xf32>
    %1224 = arith.mulf %1208, %1216 : vector<1x16xf32>
    %1225 = arith.addf %1223, %1224 : vector<1x16xf32>
    %1226 = math.tanh %1225 : vector<1x16xf32>
    %1227 = arith.mulf %1222, %1226 : vector<1x16xf32>
    %1228 = vector.extract_strided_slice %1197 {offsets = [6, 0], sizes = [1, 64], strides = [1, 1]} : vector<8x64xf32> to vector<1x64xf32>
    %cst_224 = arith.constant dense<0.000000e+00> : vector<1x64xf32>
    %1229 = tpu.matmul %1227, %7, %cst_224 {dimension_numbers = #tpu.dot_dimension_numbers<[1], [0], [0], [1], [0, 0, 1, 1], [], []>} : vector<1x16xf32>, vector<16x64xf32>, vector<1x64xf32> -> vector<1x64xf32>
    %1230 = arith.addf %1228, %1229 : vector<1x64xf32>
    %1231 = vector.extract_strided_slice %1230 {offsets = [0, 0], sizes = [1, 16], strides = [1, 1]} : vector<1x64xf32> to vector<1x16xf32>
    %1232 = arith.negf %1231 : vector<1x16xf32>
    %1233 = math.exp %1232 : vector<1x16xf32>
    %cst_225 = arith.constant 1.000000e+00 : f32
    %1234 = vector.broadcast %cst_225 : f32 to vector<1x16xf32>
    %1235 = arith.addf %1234, %1233 : vector<1x16xf32>
    %1236 = arith.divf %1234, %1235 : vector<1x16xf32>
    %1237 = vector.extract_strided_slice %1230 {offsets = [0, 16], sizes = [1, 16], strides = [1, 1]} : vector<1x64xf32> to vector<1x16xf32>
    %1238 = arith.negf %1237 : vector<1x16xf32>
    %1239 = math.exp %1238 : vector<1x16xf32>
    %cst_226 = arith.constant 1.000000e+00 : f32
    %1240 = vector.broadcast %cst_226 : f32 to vector<1x16xf32>
    %1241 = arith.addf %1240, %1239 : vector<1x16xf32>
    %1242 = arith.divf %1240, %1241 : vector<1x16xf32>
    %1243 = vector.extract_strided_slice %1230 {offsets = [0, 32], sizes = [1, 16], strides = [1, 1]} : vector<1x64xf32> to vector<1x16xf32>
    %1244 = math.tanh %1243 : vector<1x16xf32>
    %1245 = vector.extract_strided_slice %1230 {offsets = [0, 48], sizes = [1, 16], strides = [1, 1]} : vector<1x64xf32> to vector<1x16xf32>
    %1246 = arith.negf %1245 : vector<1x16xf32>
    %1247 = math.exp %1246 : vector<1x16xf32>
    %cst_227 = arith.constant 1.000000e+00 : f32
    %1248 = vector.broadcast %cst_227 : f32 to vector<1x16xf32>
    %1249 = arith.addf %1248, %1247 : vector<1x16xf32>
    %1250 = arith.divf %1248, %1249 : vector<1x16xf32>
    %1251 = arith.mulf %1242, %1225 : vector<1x16xf32>
    %1252 = arith.mulf %1236, %1244 : vector<1x16xf32>
    %1253 = arith.addf %1251, %1252 : vector<1x16xf32>
    %1254 = math.tanh %1253 : vector<1x16xf32>
    %1255 = arith.mulf %1250, %1254 : vector<1x16xf32>
    %1256 = vector.extract_strided_slice %1197 {offsets = [5, 0], sizes = [1, 64], strides = [1, 1]} : vector<8x64xf32> to vector<1x64xf32>
    %cst_228 = arith.constant dense<0.000000e+00> : vector<1x64xf32>
    %1257 = tpu.matmul %1255, %7, %cst_228 {dimension_numbers = #tpu.dot_dimension_numbers<[1], [0], [0], [1], [0, 0, 1, 1], [], []>} : vector<1x16xf32>, vector<16x64xf32>, vector<1x64xf32> -> vector<1x64xf32>
    %1258 = arith.addf %1256, %1257 : vector<1x64xf32>
    %1259 = vector.extract_strided_slice %1258 {offsets = [0, 0], sizes = [1, 16], strides = [1, 1]} : vector<1x64xf32> to vector<1x16xf32>
    %1260 = arith.negf %1259 : vector<1x16xf32>
    %1261 = math.exp %1260 : vector<1x16xf32>
    %cst_229 = arith.constant 1.000000e+00 : f32
    %1262 = vector.broadcast %cst_229 : f32 to vector<1x16xf32>
    %1263 = arith.addf %1262, %1261 : vector<1x16xf32>
    %1264 = arith.divf %1262, %1263 : vector<1x16xf32>
    %1265 = vector.extract_strided_slice %1258 {offsets = [0, 16], sizes = [1, 16], strides = [1, 1]} : vector<1x64xf32> to vector<1x16xf32>
    %1266 = arith.negf %1265 : vector<1x16xf32>
    %1267 = math.exp %1266 : vector<1x16xf32>
    %cst_230 = arith.constant 1.000000e+00 : f32
    %1268 = vector.broadcast %cst_230 : f32 to vector<1x16xf32>
    %1269 = arith.addf %1268, %1267 : vector<1x16xf32>
    %1270 = arith.divf %1268, %1269 : vector<1x16xf32>
    %1271 = vector.extract_strided_slice %1258 {offsets = [0, 32], sizes = [1, 16], strides = [1, 1]} : vector<1x64xf32> to vector<1x16xf32>
    %1272 = math.tanh %1271 : vector<1x16xf32>
    %1273 = vector.extract_strided_slice %1258 {offsets = [0, 48], sizes = [1, 16], strides = [1, 1]} : vector<1x64xf32> to vector<1x16xf32>
    %1274 = arith.negf %1273 : vector<1x16xf32>
    %1275 = math.exp %1274 : vector<1x16xf32>
    %cst_231 = arith.constant 1.000000e+00 : f32
    %1276 = vector.broadcast %cst_231 : f32 to vector<1x16xf32>
    %1277 = arith.addf %1276, %1275 : vector<1x16xf32>
    %1278 = arith.divf %1276, %1277 : vector<1x16xf32>
    %1279 = arith.mulf %1270, %1253 : vector<1x16xf32>
    %1280 = arith.mulf %1264, %1272 : vector<1x16xf32>
    %1281 = arith.addf %1279, %1280 : vector<1x16xf32>
    %1282 = math.tanh %1281 : vector<1x16xf32>
    %1283 = arith.mulf %1278, %1282 : vector<1x16xf32>
    %1284 = vector.extract_strided_slice %1197 {offsets = [4, 0], sizes = [1, 64], strides = [1, 1]} : vector<8x64xf32> to vector<1x64xf32>
    %cst_232 = arith.constant dense<0.000000e+00> : vector<1x64xf32>
    %1285 = tpu.matmul %1283, %7, %cst_232 {dimension_numbers = #tpu.dot_dimension_numbers<[1], [0], [0], [1], [0, 0, 1, 1], [], []>} : vector<1x16xf32>, vector<16x64xf32>, vector<1x64xf32> -> vector<1x64xf32>
    %1286 = arith.addf %1284, %1285 : vector<1x64xf32>
    %1287 = vector.extract_strided_slice %1286 {offsets = [0, 0], sizes = [1, 16], strides = [1, 1]} : vector<1x64xf32> to vector<1x16xf32>
    %1288 = arith.negf %1287 : vector<1x16xf32>
    %1289 = math.exp %1288 : vector<1x16xf32>
    %cst_233 = arith.constant 1.000000e+00 : f32
    %1290 = vector.broadcast %cst_233 : f32 to vector<1x16xf32>
    %1291 = arith.addf %1290, %1289 : vector<1x16xf32>
    %1292 = arith.divf %1290, %1291 : vector<1x16xf32>
    %1293 = vector.extract_strided_slice %1286 {offsets = [0, 16], sizes = [1, 16], strides = [1, 1]} : vector<1x64xf32> to vector<1x16xf32>
    %1294 = arith.negf %1293 : vector<1x16xf32>
    %1295 = math.exp %1294 : vector<1x16xf32>
    %cst_234 = arith.constant 1.000000e+00 : f32
    %1296 = vector.broadcast %cst_234 : f32 to vector<1x16xf32>
    %1297 = arith.addf %1296, %1295 : vector<1x16xf32>
    %1298 = arith.divf %1296, %1297 : vector<1x16xf32>
    %1299 = vector.extract_strided_slice %1286 {offsets = [0, 32], sizes = [1, 16], strides = [1, 1]} : vector<1x64xf32> to vector<1x16xf32>
    %1300 = math.tanh %1299 : vector<1x16xf32>
    %1301 = vector.extract_strided_slice %1286 {offsets = [0, 48], sizes = [1, 16], strides = [1, 1]} : vector<1x64xf32> to vector<1x16xf32>
    %1302 = arith.negf %1301 : vector<1x16xf32>
    %1303 = math.exp %1302 : vector<1x16xf32>
    %cst_235 = arith.constant 1.000000e+00 : f32
    %1304 = vector.broadcast %cst_235 : f32 to vector<1x16xf32>
    %1305 = arith.addf %1304, %1303 : vector<1x16xf32>
    %1306 = arith.divf %1304, %1305 : vector<1x16xf32>
    %1307 = arith.mulf %1298, %1281 : vector<1x16xf32>
    %1308 = arith.mulf %1292, %1300 : vector<1x16xf32>
    %1309 = arith.addf %1307, %1308 : vector<1x16xf32>
    %1310 = math.tanh %1309 : vector<1x16xf32>
    %1311 = arith.mulf %1306, %1310 : vector<1x16xf32>
    %1312 = vector.extract_strided_slice %1197 {offsets = [3, 0], sizes = [1, 64], strides = [1, 1]} : vector<8x64xf32> to vector<1x64xf32>
    %cst_236 = arith.constant dense<0.000000e+00> : vector<1x64xf32>
    %1313 = tpu.matmul %1311, %7, %cst_236 {dimension_numbers = #tpu.dot_dimension_numbers<[1], [0], [0], [1], [0, 0, 1, 1], [], []>} : vector<1x16xf32>, vector<16x64xf32>, vector<1x64xf32> -> vector<1x64xf32>
    %1314 = arith.addf %1312, %1313 : vector<1x64xf32>
    %1315 = vector.extract_strided_slice %1314 {offsets = [0, 0], sizes = [1, 16], strides = [1, 1]} : vector<1x64xf32> to vector<1x16xf32>
    %1316 = arith.negf %1315 : vector<1x16xf32>
    %1317 = math.exp %1316 : vector<1x16xf32>
    %cst_237 = arith.constant 1.000000e+00 : f32
    %1318 = vector.broadcast %cst_237 : f32 to vector<1x16xf32>
    %1319 = arith.addf %1318, %1317 : vector<1x16xf32>
    %1320 = arith.divf %1318, %1319 : vector<1x16xf32>
    %1321 = vector.extract_strided_slice %1314 {offsets = [0, 16], sizes = [1, 16], strides = [1, 1]} : vector<1x64xf32> to vector<1x16xf32>
    %1322 = arith.negf %1321 : vector<1x16xf32>
    %1323 = math.exp %1322 : vector<1x16xf32>
    %cst_238 = arith.constant 1.000000e+00 : f32
    %1324 = vector.broadcast %cst_238 : f32 to vector<1x16xf32>
    %1325 = arith.addf %1324, %1323 : vector<1x16xf32>
    %1326 = arith.divf %1324, %1325 : vector<1x16xf32>
    %1327 = vector.extract_strided_slice %1314 {offsets = [0, 32], sizes = [1, 16], strides = [1, 1]} : vector<1x64xf32> to vector<1x16xf32>
    %1328 = math.tanh %1327 : vector<1x16xf32>
    %1329 = vector.extract_strided_slice %1314 {offsets = [0, 48], sizes = [1, 16], strides = [1, 1]} : vector<1x64xf32> to vector<1x16xf32>
    %1330 = arith.negf %1329 : vector<1x16xf32>
    %1331 = math.exp %1330 : vector<1x16xf32>
    %cst_239 = arith.constant 1.000000e+00 : f32
    %1332 = vector.broadcast %cst_239 : f32 to vector<1x16xf32>
    %1333 = arith.addf %1332, %1331 : vector<1x16xf32>
    %1334 = arith.divf %1332, %1333 : vector<1x16xf32>
    %1335 = arith.mulf %1326, %1309 : vector<1x16xf32>
    %1336 = arith.mulf %1320, %1328 : vector<1x16xf32>
    %1337 = arith.addf %1335, %1336 : vector<1x16xf32>
    %1338 = math.tanh %1337 : vector<1x16xf32>
    %1339 = arith.mulf %1334, %1338 : vector<1x16xf32>
    %1340 = vector.extract_strided_slice %1197 {offsets = [2, 0], sizes = [1, 64], strides = [1, 1]} : vector<8x64xf32> to vector<1x64xf32>
    %cst_240 = arith.constant dense<0.000000e+00> : vector<1x64xf32>
    %1341 = tpu.matmul %1339, %7, %cst_240 {dimension_numbers = #tpu.dot_dimension_numbers<[1], [0], [0], [1], [0, 0, 1, 1], [], []>} : vector<1x16xf32>, vector<16x64xf32>, vector<1x64xf32> -> vector<1x64xf32>
    %1342 = arith.addf %1340, %1341 : vector<1x64xf32>
    %1343 = vector.extract_strided_slice %1342 {offsets = [0, 0], sizes = [1, 16], strides = [1, 1]} : vector<1x64xf32> to vector<1x16xf32>
    %1344 = arith.negf %1343 : vector<1x16xf32>
    %1345 = math.exp %1344 : vector<1x16xf32>
    %cst_241 = arith.constant 1.000000e+00 : f32
    %1346 = vector.broadcast %cst_241 : f32 to vector<1x16xf32>
    %1347 = arith.addf %1346, %1345 : vector<1x16xf32>
    %1348 = arith.divf %1346, %1347 : vector<1x16xf32>
    %1349 = vector.extract_strided_slice %1342 {offsets = [0, 16], sizes = [1, 16], strides = [1, 1]} : vector<1x64xf32> to vector<1x16xf32>
    %1350 = arith.negf %1349 : vector<1x16xf32>
    %1351 = math.exp %1350 : vector<1x16xf32>
    %cst_242 = arith.constant 1.000000e+00 : f32
    %1352 = vector.broadcast %cst_242 : f32 to vector<1x16xf32>
    %1353 = arith.addf %1352, %1351 : vector<1x16xf32>
    %1354 = arith.divf %1352, %1353 : vector<1x16xf32>
    %1355 = vector.extract_strided_slice %1342 {offsets = [0, 32], sizes = [1, 16], strides = [1, 1]} : vector<1x64xf32> to vector<1x16xf32>
    %1356 = math.tanh %1355 : vector<1x16xf32>
    %1357 = vector.extract_strided_slice %1342 {offsets = [0, 48], sizes = [1, 16], strides = [1, 1]} : vector<1x64xf32> to vector<1x16xf32>
    %1358 = arith.negf %1357 : vector<1x16xf32>
    %1359 = math.exp %1358 : vector<1x16xf32>
    %cst_243 = arith.constant 1.000000e+00 : f32
    %1360 = vector.broadcast %cst_243 : f32 to vector<1x16xf32>
    %1361 = arith.addf %1360, %1359 : vector<1x16xf32>
    %1362 = arith.divf %1360, %1361 : vector<1x16xf32>
    %1363 = arith.mulf %1354, %1337 : vector<1x16xf32>
    %1364 = arith.mulf %1348, %1356 : vector<1x16xf32>
    %1365 = arith.addf %1363, %1364 : vector<1x16xf32>
    %1366 = math.tanh %1365 : vector<1x16xf32>
    %1367 = arith.mulf %1362, %1366 : vector<1x16xf32>
    %1368 = vector.extract_strided_slice %1197 {offsets = [1, 0], sizes = [1, 64], strides = [1, 1]} : vector<8x64xf32> to vector<1x64xf32>
    %cst_244 = arith.constant dense<0.000000e+00> : vector<1x64xf32>
    %1369 = tpu.matmul %1367, %7, %cst_244 {dimension_numbers = #tpu.dot_dimension_numbers<[1], [0], [0], [1], [0, 0, 1, 1], [], []>} : vector<1x16xf32>, vector<16x64xf32>, vector<1x64xf32> -> vector<1x64xf32>
    %1370 = arith.addf %1368, %1369 : vector<1x64xf32>
    %1371 = vector.extract_strided_slice %1370 {offsets = [0, 0], sizes = [1, 16], strides = [1, 1]} : vector<1x64xf32> to vector<1x16xf32>
    %1372 = arith.negf %1371 : vector<1x16xf32>
    %1373 = math.exp %1372 : vector<1x16xf32>
    %cst_245 = arith.constant 1.000000e+00 : f32
    %1374 = vector.broadcast %cst_245 : f32 to vector<1x16xf32>
    %1375 = arith.addf %1374, %1373 : vector<1x16xf32>
    %1376 = arith.divf %1374, %1375 : vector<1x16xf32>
    %1377 = vector.extract_strided_slice %1370 {offsets = [0, 16], sizes = [1, 16], strides = [1, 1]} : vector<1x64xf32> to vector<1x16xf32>
    %1378 = arith.negf %1377 : vector<1x16xf32>
    %1379 = math.exp %1378 : vector<1x16xf32>
    %cst_246 = arith.constant 1.000000e+00 : f32
    %1380 = vector.broadcast %cst_246 : f32 to vector<1x16xf32>
    %1381 = arith.addf %1380, %1379 : vector<1x16xf32>
    %1382 = arith.divf %1380, %1381 : vector<1x16xf32>
    %1383 = vector.extract_strided_slice %1370 {offsets = [0, 32], sizes = [1, 16], strides = [1, 1]} : vector<1x64xf32> to vector<1x16xf32>
    %1384 = math.tanh %1383 : vector<1x16xf32>
    %1385 = vector.extract_strided_slice %1370 {offsets = [0, 48], sizes = [1, 16], strides = [1, 1]} : vector<1x64xf32> to vector<1x16xf32>
    %1386 = arith.negf %1385 : vector<1x16xf32>
    %1387 = math.exp %1386 : vector<1x16xf32>
    %cst_247 = arith.constant 1.000000e+00 : f32
    %1388 = vector.broadcast %cst_247 : f32 to vector<1x16xf32>
    %1389 = arith.addf %1388, %1387 : vector<1x16xf32>
    %1390 = arith.divf %1388, %1389 : vector<1x16xf32>
    %1391 = arith.mulf %1382, %1365 : vector<1x16xf32>
    %1392 = arith.mulf %1376, %1384 : vector<1x16xf32>
    %1393 = arith.addf %1391, %1392 : vector<1x16xf32>
    %1394 = math.tanh %1393 : vector<1x16xf32>
    %1395 = arith.mulf %1390, %1394 : vector<1x16xf32>
    %1396 = vector.extract_strided_slice %1197 {offsets = [0, 0], sizes = [1, 64], strides = [1, 1]} : vector<8x64xf32> to vector<1x64xf32>
    %cst_248 = arith.constant dense<0.000000e+00> : vector<1x64xf32>
    %1397 = tpu.matmul %1395, %7, %cst_248 {dimension_numbers = #tpu.dot_dimension_numbers<[1], [0], [0], [1], [0, 0, 1, 1], [], []>} : vector<1x16xf32>, vector<16x64xf32>, vector<1x64xf32> -> vector<1x64xf32>
    %1398 = arith.addf %1396, %1397 : vector<1x64xf32>
    %1399 = vector.extract_strided_slice %1398 {offsets = [0, 0], sizes = [1, 16], strides = [1, 1]} : vector<1x64xf32> to vector<1x16xf32>
    %1400 = arith.negf %1399 : vector<1x16xf32>
    %1401 = math.exp %1400 : vector<1x16xf32>
    %cst_249 = arith.constant 1.000000e+00 : f32
    %1402 = vector.broadcast %cst_249 : f32 to vector<1x16xf32>
    %1403 = arith.addf %1402, %1401 : vector<1x16xf32>
    %1404 = arith.divf %1402, %1403 : vector<1x16xf32>
    %1405 = vector.extract_strided_slice %1398 {offsets = [0, 16], sizes = [1, 16], strides = [1, 1]} : vector<1x64xf32> to vector<1x16xf32>
    %1406 = arith.negf %1405 : vector<1x16xf32>
    %1407 = math.exp %1406 : vector<1x16xf32>
    %cst_250 = arith.constant 1.000000e+00 : f32
    %1408 = vector.broadcast %cst_250 : f32 to vector<1x16xf32>
    %1409 = arith.addf %1408, %1407 : vector<1x16xf32>
    %1410 = arith.divf %1408, %1409 : vector<1x16xf32>
    %1411 = vector.extract_strided_slice %1398 {offsets = [0, 32], sizes = [1, 16], strides = [1, 1]} : vector<1x64xf32> to vector<1x16xf32>
    %1412 = math.tanh %1411 : vector<1x16xf32>
    %1413 = vector.extract_strided_slice %1398 {offsets = [0, 48], sizes = [1, 16], strides = [1, 1]} : vector<1x64xf32> to vector<1x16xf32>
    %1414 = arith.negf %1413 : vector<1x16xf32>
    %1415 = math.exp %1414 : vector<1x16xf32>
    %cst_251 = arith.constant 1.000000e+00 : f32
    %1416 = vector.broadcast %cst_251 : f32 to vector<1x16xf32>
    %1417 = arith.addf %1416, %1415 : vector<1x16xf32>
    %1418 = arith.divf %1416, %1417 : vector<1x16xf32>
    %1419 = arith.mulf %1410, %1393 : vector<1x16xf32>
    %1420 = arith.mulf %1404, %1412 : vector<1x16xf32>
    %1421 = arith.addf %1419, %1420 : vector<1x16xf32>
    %1422 = math.tanh %1421 : vector<1x16xf32>
    %1423 = arith.mulf %1418, %1422 : vector<1x16xf32>
    %1424 = tpu.concatenate %1423, %1395, %1367, %1339, %1311, %1283, %1255, %1227 in 0 : vector<1x16xf32>, vector<1x16xf32>, vector<1x16xf32>, vector<1x16xf32>, vector<1x16xf32>, vector<1x16xf32>, vector<1x16xf32>, vector<1x16xf32> -> vector<8x16xf32>
    %1425 = tpu.concatenate %1194, %1424 in 1 : vector<8x16xf32>, vector<8x16xf32> -> vector<8x32xf32>
    %cst_252 = arith.constant dense<0.000000e+00> : vector<8x64xf32>
    %1426 = tpu.matmul %1425, %9, %cst_252 {dimension_numbers = #tpu.dot_dimension_numbers<[1], [0], [0], [1], [0, 0, 1, 1], [], []>} : vector<8x32xf32>, vector<32x64xf32>, vector<8x64xf32> -> vector<8x64xf32>
    %1427 = vector.broadcast %11 : vector<1x64xf32> to vector<8x64xf32>
    %1428 = arith.addf %1426, %1427 : vector<8x64xf32>
    %cst_253 = arith.constant 0.000000e+00 : f32
    %1429 = vector.broadcast %cst_253 : f32 to vector<1x16xf32>
    %cst_254 = arith.constant 0.000000e+00 : f32
    %1430 = vector.broadcast %cst_254 : f32 to vector<1x16xf32>
    %1431 = vector.extract_strided_slice %1428 {offsets = [0, 0], sizes = [1, 64], strides = [1, 1]} : vector<8x64xf32> to vector<1x64xf32>
    %cst_255 = arith.constant dense<0.000000e+00> : vector<1x64xf32>
    %1432 = tpu.matmul %1429, %10, %cst_255 {dimension_numbers = #tpu.dot_dimension_numbers<[1], [0], [0], [1], [0, 0, 1, 1], [], []>} : vector<1x16xf32>, vector<16x64xf32>, vector<1x64xf32> -> vector<1x64xf32>
    %1433 = arith.addf %1431, %1432 : vector<1x64xf32>
    %1434 = vector.extract_strided_slice %1433 {offsets = [0, 0], sizes = [1, 16], strides = [1, 1]} : vector<1x64xf32> to vector<1x16xf32>
    %1435 = arith.negf %1434 : vector<1x16xf32>
    %1436 = math.exp %1435 : vector<1x16xf32>
    %cst_256 = arith.constant 1.000000e+00 : f32
    %1437 = vector.broadcast %cst_256 : f32 to vector<1x16xf32>
    %1438 = arith.addf %1437, %1436 : vector<1x16xf32>
    %1439 = arith.divf %1437, %1438 : vector<1x16xf32>
    %1440 = vector.extract_strided_slice %1433 {offsets = [0, 16], sizes = [1, 16], strides = [1, 1]} : vector<1x64xf32> to vector<1x16xf32>
    %1441 = arith.negf %1440 : vector<1x16xf32>
    %1442 = math.exp %1441 : vector<1x16xf32>
    %cst_257 = arith.constant 1.000000e+00 : f32
    %1443 = vector.broadcast %cst_257 : f32 to vector<1x16xf32>
    %1444 = arith.addf %1443, %1442 : vector<1x16xf32>
    %1445 = arith.divf %1443, %1444 : vector<1x16xf32>
    %1446 = vector.extract_strided_slice %1433 {offsets = [0, 32], sizes = [1, 16], strides = [1, 1]} : vector<1x64xf32> to vector<1x16xf32>
    %1447 = math.tanh %1446 : vector<1x16xf32>
    %1448 = vector.extract_strided_slice %1433 {offsets = [0, 48], sizes = [1, 16], strides = [1, 1]} : vector<1x64xf32> to vector<1x16xf32>
    %1449 = arith.negf %1448 : vector<1x16xf32>
    %1450 = math.exp %1449 : vector<1x16xf32>
    %cst_258 = arith.constant 1.000000e+00 : f32
    %1451 = vector.broadcast %cst_258 : f32 to vector<1x16xf32>
    %1452 = arith.addf %1451, %1450 : vector<1x16xf32>
    %1453 = arith.divf %1451, %1452 : vector<1x16xf32>
    %1454 = arith.mulf %1445, %1430 : vector<1x16xf32>
    %1455 = arith.mulf %1439, %1447 : vector<1x16xf32>
    %1456 = arith.addf %1454, %1455 : vector<1x16xf32>
    %1457 = math.tanh %1456 : vector<1x16xf32>
    %1458 = arith.mulf %1453, %1457 : vector<1x16xf32>
    %1459 = vector.extract_strided_slice %1428 {offsets = [1, 0], sizes = [1, 64], strides = [1, 1]} : vector<8x64xf32> to vector<1x64xf32>
    %cst_259 = arith.constant dense<0.000000e+00> : vector<1x64xf32>
    %1460 = tpu.matmul %1458, %10, %cst_259 {dimension_numbers = #tpu.dot_dimension_numbers<[1], [0], [0], [1], [0, 0, 1, 1], [], []>} : vector<1x16xf32>, vector<16x64xf32>, vector<1x64xf32> -> vector<1x64xf32>
    %1461 = arith.addf %1459, %1460 : vector<1x64xf32>
    %1462 = vector.extract_strided_slice %1461 {offsets = [0, 0], sizes = [1, 16], strides = [1, 1]} : vector<1x64xf32> to vector<1x16xf32>
    %1463 = arith.negf %1462 : vector<1x16xf32>
    %1464 = math.exp %1463 : vector<1x16xf32>
    %cst_260 = arith.constant 1.000000e+00 : f32
    %1465 = vector.broadcast %cst_260 : f32 to vector<1x16xf32>
    %1466 = arith.addf %1465, %1464 : vector<1x16xf32>
    %1467 = arith.divf %1465, %1466 : vector<1x16xf32>
    %1468 = vector.extract_strided_slice %1461 {offsets = [0, 16], sizes = [1, 16], strides = [1, 1]} : vector<1x64xf32> to vector<1x16xf32>
    %1469 = arith.negf %1468 : vector<1x16xf32>
    %1470 = math.exp %1469 : vector<1x16xf32>
    %cst_261 = arith.constant 1.000000e+00 : f32
    %1471 = vector.broadcast %cst_261 : f32 to vector<1x16xf32>
    %1472 = arith.addf %1471, %1470 : vector<1x16xf32>
    %1473 = arith.divf %1471, %1472 : vector<1x16xf32>
    %1474 = vector.extract_strided_slice %1461 {offsets = [0, 32], sizes = [1, 16], strides = [1, 1]} : vector<1x64xf32> to vector<1x16xf32>
    %1475 = math.tanh %1474 : vector<1x16xf32>
    %1476 = vector.extract_strided_slice %1461 {offsets = [0, 48], sizes = [1, 16], strides = [1, 1]} : vector<1x64xf32> to vector<1x16xf32>
    %1477 = arith.negf %1476 : vector<1x16xf32>
    %1478 = math.exp %1477 : vector<1x16xf32>
    %cst_262 = arith.constant 1.000000e+00 : f32
    %1479 = vector.broadcast %cst_262 : f32 to vector<1x16xf32>
    %1480 = arith.addf %1479, %1478 : vector<1x16xf32>
    %1481 = arith.divf %1479, %1480 : vector<1x16xf32>
    %1482 = arith.mulf %1473, %1456 : vector<1x16xf32>
    %1483 = arith.mulf %1467, %1475 : vector<1x16xf32>
    %1484 = arith.addf %1482, %1483 : vector<1x16xf32>
    %1485 = math.tanh %1484 : vector<1x16xf32>
    %1486 = arith.mulf %1481, %1485 : vector<1x16xf32>
    %1487 = vector.extract_strided_slice %1428 {offsets = [2, 0], sizes = [1, 64], strides = [1, 1]} : vector<8x64xf32> to vector<1x64xf32>
    %cst_263 = arith.constant dense<0.000000e+00> : vector<1x64xf32>
    %1488 = tpu.matmul %1486, %10, %cst_263 {dimension_numbers = #tpu.dot_dimension_numbers<[1], [0], [0], [1], [0, 0, 1, 1], [], []>} : vector<1x16xf32>, vector<16x64xf32>, vector<1x64xf32> -> vector<1x64xf32>
    %1489 = arith.addf %1487, %1488 : vector<1x64xf32>
    %1490 = vector.extract_strided_slice %1489 {offsets = [0, 0], sizes = [1, 16], strides = [1, 1]} : vector<1x64xf32> to vector<1x16xf32>
    %1491 = arith.negf %1490 : vector<1x16xf32>
    %1492 = math.exp %1491 : vector<1x16xf32>
    %cst_264 = arith.constant 1.000000e+00 : f32
    %1493 = vector.broadcast %cst_264 : f32 to vector<1x16xf32>
    %1494 = arith.addf %1493, %1492 : vector<1x16xf32>
    %1495 = arith.divf %1493, %1494 : vector<1x16xf32>
    %1496 = vector.extract_strided_slice %1489 {offsets = [0, 16], sizes = [1, 16], strides = [1, 1]} : vector<1x64xf32> to vector<1x16xf32>
    %1497 = arith.negf %1496 : vector<1x16xf32>
    %1498 = math.exp %1497 : vector<1x16xf32>
    %cst_265 = arith.constant 1.000000e+00 : f32
    %1499 = vector.broadcast %cst_265 : f32 to vector<1x16xf32>
    %1500 = arith.addf %1499, %1498 : vector<1x16xf32>
    %1501 = arith.divf %1499, %1500 : vector<1x16xf32>
    %1502 = vector.extract_strided_slice %1489 {offsets = [0, 32], sizes = [1, 16], strides = [1, 1]} : vector<1x64xf32> to vector<1x16xf32>
    %1503 = math.tanh %1502 : vector<1x16xf32>
    %1504 = vector.extract_strided_slice %1489 {offsets = [0, 48], sizes = [1, 16], strides = [1, 1]} : vector<1x64xf32> to vector<1x16xf32>
    %1505 = arith.negf %1504 : vector<1x16xf32>
    %1506 = math.exp %1505 : vector<1x16xf32>
    %cst_266 = arith.constant 1.000000e+00 : f32
    %1507 = vector.broadcast %cst_266 : f32 to vector<1x16xf32>
    %1508 = arith.addf %1507, %1506 : vector<1x16xf32>
    %1509 = arith.divf %1507, %1508 : vector<1x16xf32>
    %1510 = arith.mulf %1501, %1484 : vector<1x16xf32>
    %1511 = arith.mulf %1495, %1503 : vector<1x16xf32>
    %1512 = arith.addf %1510, %1511 : vector<1x16xf32>
    %1513 = math.tanh %1512 : vector<1x16xf32>
    %1514 = arith.mulf %1509, %1513 : vector<1x16xf32>
    %1515 = vector.extract_strided_slice %1428 {offsets = [3, 0], sizes = [1, 64], strides = [1, 1]} : vector<8x64xf32> to vector<1x64xf32>
    %cst_267 = arith.constant dense<0.000000e+00> : vector<1x64xf32>
    %1516 = tpu.matmul %1514, %10, %cst_267 {dimension_numbers = #tpu.dot_dimension_numbers<[1], [0], [0], [1], [0, 0, 1, 1], [], []>} : vector<1x16xf32>, vector<16x64xf32>, vector<1x64xf32> -> vector<1x64xf32>
    %1517 = arith.addf %1515, %1516 : vector<1x64xf32>
    %1518 = vector.extract_strided_slice %1517 {offsets = [0, 0], sizes = [1, 16], strides = [1, 1]} : vector<1x64xf32> to vector<1x16xf32>
    %1519 = arith.negf %1518 : vector<1x16xf32>
    %1520 = math.exp %1519 : vector<1x16xf32>
    %cst_268 = arith.constant 1.000000e+00 : f32
    %1521 = vector.broadcast %cst_268 : f32 to vector<1x16xf32>
    %1522 = arith.addf %1521, %1520 : vector<1x16xf32>
    %1523 = arith.divf %1521, %1522 : vector<1x16xf32>
    %1524 = vector.extract_strided_slice %1517 {offsets = [0, 16], sizes = [1, 16], strides = [1, 1]} : vector<1x64xf32> to vector<1x16xf32>
    %1525 = arith.negf %1524 : vector<1x16xf32>
    %1526 = math.exp %1525 : vector<1x16xf32>
    %cst_269 = arith.constant 1.000000e+00 : f32
    %1527 = vector.broadcast %cst_269 : f32 to vector<1x16xf32>
    %1528 = arith.addf %1527, %1526 : vector<1x16xf32>
    %1529 = arith.divf %1527, %1528 : vector<1x16xf32>
    %1530 = vector.extract_strided_slice %1517 {offsets = [0, 32], sizes = [1, 16], strides = [1, 1]} : vector<1x64xf32> to vector<1x16xf32>
    %1531 = math.tanh %1530 : vector<1x16xf32>
    %1532 = vector.extract_strided_slice %1517 {offsets = [0, 48], sizes = [1, 16], strides = [1, 1]} : vector<1x64xf32> to vector<1x16xf32>
    %1533 = arith.negf %1532 : vector<1x16xf32>
    %1534 = math.exp %1533 : vector<1x16xf32>
    %cst_270 = arith.constant 1.000000e+00 : f32
    %1535 = vector.broadcast %cst_270 : f32 to vector<1x16xf32>
    %1536 = arith.addf %1535, %1534 : vector<1x16xf32>
    %1537 = arith.divf %1535, %1536 : vector<1x16xf32>
    %1538 = arith.mulf %1529, %1512 : vector<1x16xf32>
    %1539 = arith.mulf %1523, %1531 : vector<1x16xf32>
    %1540 = arith.addf %1538, %1539 : vector<1x16xf32>
    %1541 = math.tanh %1540 : vector<1x16xf32>
    %1542 = arith.mulf %1537, %1541 : vector<1x16xf32>
    %1543 = vector.extract_strided_slice %1428 {offsets = [4, 0], sizes = [1, 64], strides = [1, 1]} : vector<8x64xf32> to vector<1x64xf32>
    %cst_271 = arith.constant dense<0.000000e+00> : vector<1x64xf32>
    %1544 = tpu.matmul %1542, %10, %cst_271 {dimension_numbers = #tpu.dot_dimension_numbers<[1], [0], [0], [1], [0, 0, 1, 1], [], []>} : vector<1x16xf32>, vector<16x64xf32>, vector<1x64xf32> -> vector<1x64xf32>
    %1545 = arith.addf %1543, %1544 : vector<1x64xf32>
    %1546 = vector.extract_strided_slice %1545 {offsets = [0, 0], sizes = [1, 16], strides = [1, 1]} : vector<1x64xf32> to vector<1x16xf32>
    %1547 = arith.negf %1546 : vector<1x16xf32>
    %1548 = math.exp %1547 : vector<1x16xf32>
    %cst_272 = arith.constant 1.000000e+00 : f32
    %1549 = vector.broadcast %cst_272 : f32 to vector<1x16xf32>
    %1550 = arith.addf %1549, %1548 : vector<1x16xf32>
    %1551 = arith.divf %1549, %1550 : vector<1x16xf32>
    %1552 = vector.extract_strided_slice %1545 {offsets = [0, 16], sizes = [1, 16], strides = [1, 1]} : vector<1x64xf32> to vector<1x16xf32>
    %1553 = arith.negf %1552 : vector<1x16xf32>
    %1554 = math.exp %1553 : vector<1x16xf32>
    %cst_273 = arith.constant 1.000000e+00 : f32
    %1555 = vector.broadcast %cst_273 : f32 to vector<1x16xf32>
    %1556 = arith.addf %1555, %1554 : vector<1x16xf32>
    %1557 = arith.divf %1555, %1556 : vector<1x16xf32>
    %1558 = vector.extract_strided_slice %1545 {offsets = [0, 32], sizes = [1, 16], strides = [1, 1]} : vector<1x64xf32> to vector<1x16xf32>
    %1559 = math.tanh %1558 : vector<1x16xf32>
    %1560 = vector.extract_strided_slice %1545 {offsets = [0, 48], sizes = [1, 16], strides = [1, 1]} : vector<1x64xf32> to vector<1x16xf32>
    %1561 = arith.negf %1560 : vector<1x16xf32>
    %1562 = math.exp %1561 : vector<1x16xf32>
    %cst_274 = arith.constant 1.000000e+00 : f32
    %1563 = vector.broadcast %cst_274 : f32 to vector<1x16xf32>
    %1564 = arith.addf %1563, %1562 : vector<1x16xf32>
    %1565 = arith.divf %1563, %1564 : vector<1x16xf32>
    %1566 = arith.mulf %1557, %1540 : vector<1x16xf32>
    %1567 = arith.mulf %1551, %1559 : vector<1x16xf32>
    %1568 = arith.addf %1566, %1567 : vector<1x16xf32>
    %1569 = math.tanh %1568 : vector<1x16xf32>
    %1570 = arith.mulf %1565, %1569 : vector<1x16xf32>
    %1571 = vector.extract_strided_slice %1428 {offsets = [5, 0], sizes = [1, 64], strides = [1, 1]} : vector<8x64xf32> to vector<1x64xf32>
    %cst_275 = arith.constant dense<0.000000e+00> : vector<1x64xf32>
    %1572 = tpu.matmul %1570, %10, %cst_275 {dimension_numbers = #tpu.dot_dimension_numbers<[1], [0], [0], [1], [0, 0, 1, 1], [], []>} : vector<1x16xf32>, vector<16x64xf32>, vector<1x64xf32> -> vector<1x64xf32>
    %1573 = arith.addf %1571, %1572 : vector<1x64xf32>
    %1574 = vector.extract_strided_slice %1573 {offsets = [0, 0], sizes = [1, 16], strides = [1, 1]} : vector<1x64xf32> to vector<1x16xf32>
    %1575 = arith.negf %1574 : vector<1x16xf32>
    %1576 = math.exp %1575 : vector<1x16xf32>
    %cst_276 = arith.constant 1.000000e+00 : f32
    %1577 = vector.broadcast %cst_276 : f32 to vector<1x16xf32>
    %1578 = arith.addf %1577, %1576 : vector<1x16xf32>
    %1579 = arith.divf %1577, %1578 : vector<1x16xf32>
    %1580 = vector.extract_strided_slice %1573 {offsets = [0, 16], sizes = [1, 16], strides = [1, 1]} : vector<1x64xf32> to vector<1x16xf32>
    %1581 = arith.negf %1580 : vector<1x16xf32>
    %1582 = math.exp %1581 : vector<1x16xf32>
    %cst_277 = arith.constant 1.000000e+00 : f32
    %1583 = vector.broadcast %cst_277 : f32 to vector<1x16xf32>
    %1584 = arith.addf %1583, %1582 : vector<1x16xf32>
    %1585 = arith.divf %1583, %1584 : vector<1x16xf32>
    %1586 = vector.extract_strided_slice %1573 {offsets = [0, 32], sizes = [1, 16], strides = [1, 1]} : vector<1x64xf32> to vector<1x16xf32>
    %1587 = math.tanh %1586 : vector<1x16xf32>
    %1588 = vector.extract_strided_slice %1573 {offsets = [0, 48], sizes = [1, 16], strides = [1, 1]} : vector<1x64xf32> to vector<1x16xf32>
    %1589 = arith.negf %1588 : vector<1x16xf32>
    %1590 = math.exp %1589 : vector<1x16xf32>
    %cst_278 = arith.constant 1.000000e+00 : f32
    %1591 = vector.broadcast %cst_278 : f32 to vector<1x16xf32>
    %1592 = arith.addf %1591, %1590 : vector<1x16xf32>
    %1593 = arith.divf %1591, %1592 : vector<1x16xf32>
    %1594 = arith.mulf %1585, %1568 : vector<1x16xf32>
    %1595 = arith.mulf %1579, %1587 : vector<1x16xf32>
    %1596 = arith.addf %1594, %1595 : vector<1x16xf32>
    %1597 = math.tanh %1596 : vector<1x16xf32>
    %1598 = arith.mulf %1593, %1597 : vector<1x16xf32>
    %1599 = vector.extract_strided_slice %1428 {offsets = [6, 0], sizes = [1, 64], strides = [1, 1]} : vector<8x64xf32> to vector<1x64xf32>
    %cst_279 = arith.constant dense<0.000000e+00> : vector<1x64xf32>
    %1600 = tpu.matmul %1598, %10, %cst_279 {dimension_numbers = #tpu.dot_dimension_numbers<[1], [0], [0], [1], [0, 0, 1, 1], [], []>} : vector<1x16xf32>, vector<16x64xf32>, vector<1x64xf32> -> vector<1x64xf32>
    %1601 = arith.addf %1599, %1600 : vector<1x64xf32>
    %1602 = vector.extract_strided_slice %1601 {offsets = [0, 0], sizes = [1, 16], strides = [1, 1]} : vector<1x64xf32> to vector<1x16xf32>
    %1603 = arith.negf %1602 : vector<1x16xf32>
    %1604 = math.exp %1603 : vector<1x16xf32>
    %cst_280 = arith.constant 1.000000e+00 : f32
    %1605 = vector.broadcast %cst_280 : f32 to vector<1x16xf32>
    %1606 = arith.addf %1605, %1604 : vector<1x16xf32>
    %1607 = arith.divf %1605, %1606 : vector<1x16xf32>
    %1608 = vector.extract_strided_slice %1601 {offsets = [0, 16], sizes = [1, 16], strides = [1, 1]} : vector<1x64xf32> to vector<1x16xf32>
    %1609 = arith.negf %1608 : vector<1x16xf32>
    %1610 = math.exp %1609 : vector<1x16xf32>
    %cst_281 = arith.constant 1.000000e+00 : f32
    %1611 = vector.broadcast %cst_281 : f32 to vector<1x16xf32>
    %1612 = arith.addf %1611, %1610 : vector<1x16xf32>
    %1613 = arith.divf %1611, %1612 : vector<1x16xf32>
    %1614 = vector.extract_strided_slice %1601 {offsets = [0, 32], sizes = [1, 16], strides = [1, 1]} : vector<1x64xf32> to vector<1x16xf32>
    %1615 = math.tanh %1614 : vector<1x16xf32>
    %1616 = vector.extract_strided_slice %1601 {offsets = [0, 48], sizes = [1, 16], strides = [1, 1]} : vector<1x64xf32> to vector<1x16xf32>
    %1617 = arith.negf %1616 : vector<1x16xf32>
    %1618 = math.exp %1617 : vector<1x16xf32>
    %cst_282 = arith.constant 1.000000e+00 : f32
    %1619 = vector.broadcast %cst_282 : f32 to vector<1x16xf32>
    %1620 = arith.addf %1619, %1618 : vector<1x16xf32>
    %1621 = arith.divf %1619, %1620 : vector<1x16xf32>
    %1622 = arith.mulf %1613, %1596 : vector<1x16xf32>
    %1623 = arith.mulf %1607, %1615 : vector<1x16xf32>
    %1624 = arith.addf %1622, %1623 : vector<1x16xf32>
    %1625 = math.tanh %1624 : vector<1x16xf32>
    %1626 = arith.mulf %1621, %1625 : vector<1x16xf32>
    %1627 = vector.extract_strided_slice %1428 {offsets = [7, 0], sizes = [1, 64], strides = [1, 1]} : vector<8x64xf32> to vector<1x64xf32>
    %cst_283 = arith.constant dense<0.000000e+00> : vector<1x64xf32>
    %1628 = tpu.matmul %1626, %10, %cst_283 {dimension_numbers = #tpu.dot_dimension_numbers<[1], [0], [0], [1], [0, 0, 1, 1], [], []>} : vector<1x16xf32>, vector<16x64xf32>, vector<1x64xf32> -> vector<1x64xf32>
    %1629 = arith.addf %1627, %1628 : vector<1x64xf32>
    %1630 = vector.extract_strided_slice %1629 {offsets = [0, 0], sizes = [1, 16], strides = [1, 1]} : vector<1x64xf32> to vector<1x16xf32>
    %1631 = arith.negf %1630 : vector<1x16xf32>
    %1632 = math.exp %1631 : vector<1x16xf32>
    %cst_284 = arith.constant 1.000000e+00 : f32
    %1633 = vector.broadcast %cst_284 : f32 to vector<1x16xf32>
    %1634 = arith.addf %1633, %1632 : vector<1x16xf32>
    %1635 = arith.divf %1633, %1634 : vector<1x16xf32>
    %1636 = vector.extract_strided_slice %1629 {offsets = [0, 16], sizes = [1, 16], strides = [1, 1]} : vector<1x64xf32> to vector<1x16xf32>
    %1637 = arith.negf %1636 : vector<1x16xf32>
    %1638 = math.exp %1637 : vector<1x16xf32>
    %cst_285 = arith.constant 1.000000e+00 : f32
    %1639 = vector.broadcast %cst_285 : f32 to vector<1x16xf32>
    %1640 = arith.addf %1639, %1638 : vector<1x16xf32>
    %1641 = arith.divf %1639, %1640 : vector<1x16xf32>
    %1642 = vector.extract_strided_slice %1629 {offsets = [0, 32], sizes = [1, 16], strides = [1, 1]} : vector<1x64xf32> to vector<1x16xf32>
    %1643 = math.tanh %1642 : vector<1x16xf32>
    %1644 = vector.extract_strided_slice %1629 {offsets = [0, 48], sizes = [1, 16], strides = [1, 1]} : vector<1x64xf32> to vector<1x16xf32>
    %1645 = arith.negf %1644 : vector<1x16xf32>
    %1646 = math.exp %1645 : vector<1x16xf32>
    %cst_286 = arith.constant 1.000000e+00 : f32
    %1647 = vector.broadcast %cst_286 : f32 to vector<1x16xf32>
    %1648 = arith.addf %1647, %1646 : vector<1x16xf32>
    %1649 = arith.divf %1647, %1648 : vector<1x16xf32>
    %1650 = arith.mulf %1641, %1624 : vector<1x16xf32>
    %1651 = arith.mulf %1635, %1643 : vector<1x16xf32>
    %1652 = arith.addf %1650, %1651 : vector<1x16xf32>
    %1653 = math.tanh %1652 : vector<1x16xf32>
    %1654 = arith.mulf %1649, %1653 : vector<1x16xf32>
    %1655 = tpu.concatenate %1458, %1486, %1514, %1542, %1570, %1598, %1626, %1654 in 0 : vector<1x16xf32>, vector<1x16xf32>, vector<1x16xf32>, vector<1x16xf32>, vector<1x16xf32>, vector<1x16xf32>, vector<1x16xf32>, vector<1x16xf32> -> vector<8x16xf32>
    %cst_287 = arith.constant dense<0.000000e+00> : vector<8x64xf32>
    %1656 = tpu.matmul %1425, %12, %cst_287 {dimension_numbers = #tpu.dot_dimension_numbers<[1], [0], [0], [1], [0, 0, 1, 1], [], []>} : vector<8x32xf32>, vector<32x64xf32>, vector<8x64xf32> -> vector<8x64xf32>
    %1657 = vector.broadcast %14 : vector<1x64xf32> to vector<8x64xf32>
    %1658 = arith.addf %1656, %1657 : vector<8x64xf32>
    %cst_288 = arith.constant 0.000000e+00 : f32
    %1659 = vector.broadcast %cst_288 : f32 to vector<1x16xf32>
    %cst_289 = arith.constant 0.000000e+00 : f32
    %1660 = vector.broadcast %cst_289 : f32 to vector<1x16xf32>
    %1661 = vector.extract_strided_slice %1658 {offsets = [7, 0], sizes = [1, 64], strides = [1, 1]} : vector<8x64xf32> to vector<1x64xf32>
    %cst_290 = arith.constant dense<0.000000e+00> : vector<1x64xf32>
    %1662 = tpu.matmul %1659, %13, %cst_290 {dimension_numbers = #tpu.dot_dimension_numbers<[1], [0], [0], [1], [0, 0, 1, 1], [], []>} : vector<1x16xf32>, vector<16x64xf32>, vector<1x64xf32> -> vector<1x64xf32>
    %1663 = arith.addf %1661, %1662 : vector<1x64xf32>
    %1664 = vector.extract_strided_slice %1663 {offsets = [0, 0], sizes = [1, 16], strides = [1, 1]} : vector<1x64xf32> to vector<1x16xf32>
    %1665 = arith.negf %1664 : vector<1x16xf32>
    %1666 = math.exp %1665 : vector<1x16xf32>
    %cst_291 = arith.constant 1.000000e+00 : f32
    %1667 = vector.broadcast %cst_291 : f32 to vector<1x16xf32>
    %1668 = arith.addf %1667, %1666 : vector<1x16xf32>
    %1669 = arith.divf %1667, %1668 : vector<1x16xf32>
    %1670 = vector.extract_strided_slice %1663 {offsets = [0, 16], sizes = [1, 16], strides = [1, 1]} : vector<1x64xf32> to vector<1x16xf32>
    %1671 = arith.negf %1670 : vector<1x16xf32>
    %1672 = math.exp %1671 : vector<1x16xf32>
    %cst_292 = arith.constant 1.000000e+00 : f32
    %1673 = vector.broadcast %cst_292 : f32 to vector<1x16xf32>
    %1674 = arith.addf %1673, %1672 : vector<1x16xf32>
    %1675 = arith.divf %1673, %1674 : vector<1x16xf32>
    %1676 = vector.extract_strided_slice %1663 {offsets = [0, 32], sizes = [1, 16], strides = [1, 1]} : vector<1x64xf32> to vector<1x16xf32>
    %1677 = math.tanh %1676 : vector<1x16xf32>
    %1678 = vector.extract_strided_slice %1663 {offsets = [0, 48], sizes = [1, 16], strides = [1, 1]} : vector<1x64xf32> to vector<1x16xf32>
    %1679 = arith.negf %1678 : vector<1x16xf32>
    %1680 = math.exp %1679 : vector<1x16xf32>
    %cst_293 = arith.constant 1.000000e+00 : f32
    %1681 = vector.broadcast %cst_293 : f32 to vector<1x16xf32>
    %1682 = arith.addf %1681, %1680 : vector<1x16xf32>
    %1683 = arith.divf %1681, %1682 : vector<1x16xf32>
    %1684 = arith.mulf %1675, %1660 : vector<1x16xf32>
    %1685 = arith.mulf %1669, %1677 : vector<1x16xf32>
    %1686 = arith.addf %1684, %1685 : vector<1x16xf32>
    %1687 = math.tanh %1686 : vector<1x16xf32>
    %1688 = arith.mulf %1683, %1687 : vector<1x16xf32>
    %1689 = vector.extract_strided_slice %1658 {offsets = [6, 0], sizes = [1, 64], strides = [1, 1]} : vector<8x64xf32> to vector<1x64xf32>
    %cst_294 = arith.constant dense<0.000000e+00> : vector<1x64xf32>
    %1690 = tpu.matmul %1688, %13, %cst_294 {dimension_numbers = #tpu.dot_dimension_numbers<[1], [0], [0], [1], [0, 0, 1, 1], [], []>} : vector<1x16xf32>, vector<16x64xf32>, vector<1x64xf32> -> vector<1x64xf32>
    %1691 = arith.addf %1689, %1690 : vector<1x64xf32>
    %1692 = vector.extract_strided_slice %1691 {offsets = [0, 0], sizes = [1, 16], strides = [1, 1]} : vector<1x64xf32> to vector<1x16xf32>
    %1693 = arith.negf %1692 : vector<1x16xf32>
    %1694 = math.exp %1693 : vector<1x16xf32>
    %cst_295 = arith.constant 1.000000e+00 : f32
    %1695 = vector.broadcast %cst_295 : f32 to vector<1x16xf32>
    %1696 = arith.addf %1695, %1694 : vector<1x16xf32>
    %1697 = arith.divf %1695, %1696 : vector<1x16xf32>
    %1698 = vector.extract_strided_slice %1691 {offsets = [0, 16], sizes = [1, 16], strides = [1, 1]} : vector<1x64xf32> to vector<1x16xf32>
    %1699 = arith.negf %1698 : vector<1x16xf32>
    %1700 = math.exp %1699 : vector<1x16xf32>
    %cst_296 = arith.constant 1.000000e+00 : f32
    %1701 = vector.broadcast %cst_296 : f32 to vector<1x16xf32>
    %1702 = arith.addf %1701, %1700 : vector<1x16xf32>
    %1703 = arith.divf %1701, %1702 : vector<1x16xf32>
    %1704 = vector.extract_strided_slice %1691 {offsets = [0, 32], sizes = [1, 16], strides = [1, 1]} : vector<1x64xf32> to vector<1x16xf32>
    %1705 = math.tanh %1704 : vector<1x16xf32>
    %1706 = vector.extract_strided_slice %1691 {offsets = [0, 48], sizes = [1, 16], strides = [1, 1]} : vector<1x64xf32> to vector<1x16xf32>
    %1707 = arith.negf %1706 : vector<1x16xf32>
    %1708 = math.exp %1707 : vector<1x16xf32>
    %cst_297 = arith.constant 1.000000e+00 : f32
    %1709 = vector.broadcast %cst_297 : f32 to vector<1x16xf32>
    %1710 = arith.addf %1709, %1708 : vector<1x16xf32>
    %1711 = arith.divf %1709, %1710 : vector<1x16xf32>
    %1712 = arith.mulf %1703, %1686 : vector<1x16xf32>
    %1713 = arith.mulf %1697, %1705 : vector<1x16xf32>
    %1714 = arith.addf %1712, %1713 : vector<1x16xf32>
    %1715 = math.tanh %1714 : vector<1x16xf32>
    %1716 = arith.mulf %1711, %1715 : vector<1x16xf32>
    %1717 = vector.extract_strided_slice %1658 {offsets = [5, 0], sizes = [1, 64], strides = [1, 1]} : vector<8x64xf32> to vector<1x64xf32>
    %cst_298 = arith.constant dense<0.000000e+00> : vector<1x64xf32>
    %1718 = tpu.matmul %1716, %13, %cst_298 {dimension_numbers = #tpu.dot_dimension_numbers<[1], [0], [0], [1], [0, 0, 1, 1], [], []>} : vector<1x16xf32>, vector<16x64xf32>, vector<1x64xf32> -> vector<1x64xf32>
    %1719 = arith.addf %1717, %1718 : vector<1x64xf32>
    %1720 = vector.extract_strided_slice %1719 {offsets = [0, 0], sizes = [1, 16], strides = [1, 1]} : vector<1x64xf32> to vector<1x16xf32>
    %1721 = arith.negf %1720 : vector<1x16xf32>
    %1722 = math.exp %1721 : vector<1x16xf32>
    %cst_299 = arith.constant 1.000000e+00 : f32
    %1723 = vector.broadcast %cst_299 : f32 to vector<1x16xf32>
    %1724 = arith.addf %1723, %1722 : vector<1x16xf32>
    %1725 = arith.divf %1723, %1724 : vector<1x16xf32>
    %1726 = vector.extract_strided_slice %1719 {offsets = [0, 16], sizes = [1, 16], strides = [1, 1]} : vector<1x64xf32> to vector<1x16xf32>
    %1727 = arith.negf %1726 : vector<1x16xf32>
    %1728 = math.exp %1727 : vector<1x16xf32>
    %cst_300 = arith.constant 1.000000e+00 : f32
    %1729 = vector.broadcast %cst_300 : f32 to vector<1x16xf32>
    %1730 = arith.addf %1729, %1728 : vector<1x16xf32>
    %1731 = arith.divf %1729, %1730 : vector<1x16xf32>
    %1732 = vector.extract_strided_slice %1719 {offsets = [0, 32], sizes = [1, 16], strides = [1, 1]} : vector<1x64xf32> to vector<1x16xf32>
    %1733 = math.tanh %1732 : vector<1x16xf32>
    %1734 = vector.extract_strided_slice %1719 {offsets = [0, 48], sizes = [1, 16], strides = [1, 1]} : vector<1x64xf32> to vector<1x16xf32>
    %1735 = arith.negf %1734 : vector<1x16xf32>
    %1736 = math.exp %1735 : vector<1x16xf32>
    %cst_301 = arith.constant 1.000000e+00 : f32
    %1737 = vector.broadcast %cst_301 : f32 to vector<1x16xf32>
    %1738 = arith.addf %1737, %1736 : vector<1x16xf32>
    %1739 = arith.divf %1737, %1738 : vector<1x16xf32>
    %1740 = arith.mulf %1731, %1714 : vector<1x16xf32>
    %1741 = arith.mulf %1725, %1733 : vector<1x16xf32>
    %1742 = arith.addf %1740, %1741 : vector<1x16xf32>
    %1743 = math.tanh %1742 : vector<1x16xf32>
    %1744 = arith.mulf %1739, %1743 : vector<1x16xf32>
    %1745 = vector.extract_strided_slice %1658 {offsets = [4, 0], sizes = [1, 64], strides = [1, 1]} : vector<8x64xf32> to vector<1x64xf32>
    %cst_302 = arith.constant dense<0.000000e+00> : vector<1x64xf32>
    %1746 = tpu.matmul %1744, %13, %cst_302 {dimension_numbers = #tpu.dot_dimension_numbers<[1], [0], [0], [1], [0, 0, 1, 1], [], []>} : vector<1x16xf32>, vector<16x64xf32>, vector<1x64xf32> -> vector<1x64xf32>
    %1747 = arith.addf %1745, %1746 : vector<1x64xf32>
    %1748 = vector.extract_strided_slice %1747 {offsets = [0, 0], sizes = [1, 16], strides = [1, 1]} : vector<1x64xf32> to vector<1x16xf32>
    %1749 = arith.negf %1748 : vector<1x16xf32>
    %1750 = math.exp %1749 : vector<1x16xf32>
    %cst_303 = arith.constant 1.000000e+00 : f32
    %1751 = vector.broadcast %cst_303 : f32 to vector<1x16xf32>
    %1752 = arith.addf %1751, %1750 : vector<1x16xf32>
    %1753 = arith.divf %1751, %1752 : vector<1x16xf32>
    %1754 = vector.extract_strided_slice %1747 {offsets = [0, 16], sizes = [1, 16], strides = [1, 1]} : vector<1x64xf32> to vector<1x16xf32>
    %1755 = arith.negf %1754 : vector<1x16xf32>
    %1756 = math.exp %1755 : vector<1x16xf32>
    %cst_304 = arith.constant 1.000000e+00 : f32
    %1757 = vector.broadcast %cst_304 : f32 to vector<1x16xf32>
    %1758 = arith.addf %1757, %1756 : vector<1x16xf32>
    %1759 = arith.divf %1757, %1758 : vector<1x16xf32>
    %1760 = vector.extract_strided_slice %1747 {offsets = [0, 32], sizes = [1, 16], strides = [1, 1]} : vector<1x64xf32> to vector<1x16xf32>
    %1761 = math.tanh %1760 : vector<1x16xf32>
    %1762 = vector.extract_strided_slice %1747 {offsets = [0, 48], sizes = [1, 16], strides = [1, 1]} : vector<1x64xf32> to vector<1x16xf32>
    %1763 = arith.negf %1762 : vector<1x16xf32>
    %1764 = math.exp %1763 : vector<1x16xf32>
    %cst_305 = arith.constant 1.000000e+00 : f32
    %1765 = vector.broadcast %cst_305 : f32 to vector<1x16xf32>
    %1766 = arith.addf %1765, %1764 : vector<1x16xf32>
    %1767 = arith.divf %1765, %1766 : vector<1x16xf32>
    %1768 = arith.mulf %1759, %1742 : vector<1x16xf32>
    %1769 = arith.mulf %1753, %1761 : vector<1x16xf32>
    %1770 = arith.addf %1768, %1769 : vector<1x16xf32>
    %1771 = math.tanh %1770 : vector<1x16xf32>
    %1772 = arith.mulf %1767, %1771 : vector<1x16xf32>
    %1773 = vector.extract_strided_slice %1658 {offsets = [3, 0], sizes = [1, 64], strides = [1, 1]} : vector<8x64xf32> to vector<1x64xf32>
    %cst_306 = arith.constant dense<0.000000e+00> : vector<1x64xf32>
    %1774 = tpu.matmul %1772, %13, %cst_306 {dimension_numbers = #tpu.dot_dimension_numbers<[1], [0], [0], [1], [0, 0, 1, 1], [], []>} : vector<1x16xf32>, vector<16x64xf32>, vector<1x64xf32> -> vector<1x64xf32>
    %1775 = arith.addf %1773, %1774 : vector<1x64xf32>
    %1776 = vector.extract_strided_slice %1775 {offsets = [0, 0], sizes = [1, 16], strides = [1, 1]} : vector<1x64xf32> to vector<1x16xf32>
    %1777 = arith.negf %1776 : vector<1x16xf32>
    %1778 = math.exp %1777 : vector<1x16xf32>
    %cst_307 = arith.constant 1.000000e+00 : f32
    %1779 = vector.broadcast %cst_307 : f32 to vector<1x16xf32>
    %1780 = arith.addf %1779, %1778 : vector<1x16xf32>
    %1781 = arith.divf %1779, %1780 : vector<1x16xf32>
    %1782 = vector.extract_strided_slice %1775 {offsets = [0, 16], sizes = [1, 16], strides = [1, 1]} : vector<1x64xf32> to vector<1x16xf32>
    %1783 = arith.negf %1782 : vector<1x16xf32>
    %1784 = math.exp %1783 : vector<1x16xf32>
    %cst_308 = arith.constant 1.000000e+00 : f32
    %1785 = vector.broadcast %cst_308 : f32 to vector<1x16xf32>
    %1786 = arith.addf %1785, %1784 : vector<1x16xf32>
    %1787 = arith.divf %1785, %1786 : vector<1x16xf32>
    %1788 = vector.extract_strided_slice %1775 {offsets = [0, 32], sizes = [1, 16], strides = [1, 1]} : vector<1x64xf32> to vector<1x16xf32>
    %1789 = math.tanh %1788 : vector<1x16xf32>
    %1790 = vector.extract_strided_slice %1775 {offsets = [0, 48], sizes = [1, 16], strides = [1, 1]} : vector<1x64xf32> to vector<1x16xf32>
    %1791 = arith.negf %1790 : vector<1x16xf32>
    %1792 = math.exp %1791 : vector<1x16xf32>
    %cst_309 = arith.constant 1.000000e+00 : f32
    %1793 = vector.broadcast %cst_309 : f32 to vector<1x16xf32>
    %1794 = arith.addf %1793, %1792 : vector<1x16xf32>
    %1795 = arith.divf %1793, %1794 : vector<1x16xf32>
    %1796 = arith.mulf %1787, %1770 : vector<1x16xf32>
    %1797 = arith.mulf %1781, %1789 : vector<1x16xf32>
    %1798 = arith.addf %1796, %1797 : vector<1x16xf32>
    %1799 = math.tanh %1798 : vector<1x16xf32>
    %1800 = arith.mulf %1795, %1799 : vector<1x16xf32>
    %1801 = vector.extract_strided_slice %1658 {offsets = [2, 0], sizes = [1, 64], strides = [1, 1]} : vector<8x64xf32> to vector<1x64xf32>
    %cst_310 = arith.constant dense<0.000000e+00> : vector<1x64xf32>
    %1802 = tpu.matmul %1800, %13, %cst_310 {dimension_numbers = #tpu.dot_dimension_numbers<[1], [0], [0], [1], [0, 0, 1, 1], [], []>} : vector<1x16xf32>, vector<16x64xf32>, vector<1x64xf32> -> vector<1x64xf32>
    %1803 = arith.addf %1801, %1802 : vector<1x64xf32>
    %1804 = vector.extract_strided_slice %1803 {offsets = [0, 0], sizes = [1, 16], strides = [1, 1]} : vector<1x64xf32> to vector<1x16xf32>
    %1805 = arith.negf %1804 : vector<1x16xf32>
    %1806 = math.exp %1805 : vector<1x16xf32>
    %cst_311 = arith.constant 1.000000e+00 : f32
    %1807 = vector.broadcast %cst_311 : f32 to vector<1x16xf32>
    %1808 = arith.addf %1807, %1806 : vector<1x16xf32>
    %1809 = arith.divf %1807, %1808 : vector<1x16xf32>
    %1810 = vector.extract_strided_slice %1803 {offsets = [0, 16], sizes = [1, 16], strides = [1, 1]} : vector<1x64xf32> to vector<1x16xf32>
    %1811 = arith.negf %1810 : vector<1x16xf32>
    %1812 = math.exp %1811 : vector<1x16xf32>
    %cst_312 = arith.constant 1.000000e+00 : f32
    %1813 = vector.broadcast %cst_312 : f32 to vector<1x16xf32>
    %1814 = arith.addf %1813, %1812 : vector<1x16xf32>
    %1815 = arith.divf %1813, %1814 : vector<1x16xf32>
    %1816 = vector.extract_strided_slice %1803 {offsets = [0, 32], sizes = [1, 16], strides = [1, 1]} : vector<1x64xf32> to vector<1x16xf32>
    %1817 = math.tanh %1816 : vector<1x16xf32>
    %1818 = vector.extract_strided_slice %1803 {offsets = [0, 48], sizes = [1, 16], strides = [1, 1]} : vector<1x64xf32> to vector<1x16xf32>
    %1819 = arith.negf %1818 : vector<1x16xf32>
    %1820 = math.exp %1819 : vector<1x16xf32>
    %cst_313 = arith.constant 1.000000e+00 : f32
    %1821 = vector.broadcast %cst_313 : f32 to vector<1x16xf32>
    %1822 = arith.addf %1821, %1820 : vector<1x16xf32>
    %1823 = arith.divf %1821, %1822 : vector<1x16xf32>
    %1824 = arith.mulf %1815, %1798 : vector<1x16xf32>
    %1825 = arith.mulf %1809, %1817 : vector<1x16xf32>
    %1826 = arith.addf %1824, %1825 : vector<1x16xf32>
    %1827 = math.tanh %1826 : vector<1x16xf32>
    %1828 = arith.mulf %1823, %1827 : vector<1x16xf32>
    %1829 = vector.extract_strided_slice %1658 {offsets = [1, 0], sizes = [1, 64], strides = [1, 1]} : vector<8x64xf32> to vector<1x64xf32>
    %cst_314 = arith.constant dense<0.000000e+00> : vector<1x64xf32>
    %1830 = tpu.matmul %1828, %13, %cst_314 {dimension_numbers = #tpu.dot_dimension_numbers<[1], [0], [0], [1], [0, 0, 1, 1], [], []>} : vector<1x16xf32>, vector<16x64xf32>, vector<1x64xf32> -> vector<1x64xf32>
    %1831 = arith.addf %1829, %1830 : vector<1x64xf32>
    %1832 = vector.extract_strided_slice %1831 {offsets = [0, 0], sizes = [1, 16], strides = [1, 1]} : vector<1x64xf32> to vector<1x16xf32>
    %1833 = arith.negf %1832 : vector<1x16xf32>
    %1834 = math.exp %1833 : vector<1x16xf32>
    %cst_315 = arith.constant 1.000000e+00 : f32
    %1835 = vector.broadcast %cst_315 : f32 to vector<1x16xf32>
    %1836 = arith.addf %1835, %1834 : vector<1x16xf32>
    %1837 = arith.divf %1835, %1836 : vector<1x16xf32>
    %1838 = vector.extract_strided_slice %1831 {offsets = [0, 16], sizes = [1, 16], strides = [1, 1]} : vector<1x64xf32> to vector<1x16xf32>
    %1839 = arith.negf %1838 : vector<1x16xf32>
    %1840 = math.exp %1839 : vector<1x16xf32>
    %cst_316 = arith.constant 1.000000e+00 : f32
    %1841 = vector.broadcast %cst_316 : f32 to vector<1x16xf32>
    %1842 = arith.addf %1841, %1840 : vector<1x16xf32>
    %1843 = arith.divf %1841, %1842 : vector<1x16xf32>
    %1844 = vector.extract_strided_slice %1831 {offsets = [0, 32], sizes = [1, 16], strides = [1, 1]} : vector<1x64xf32> to vector<1x16xf32>
    %1845 = math.tanh %1844 : vector<1x16xf32>
    %1846 = vector.extract_strided_slice %1831 {offsets = [0, 48], sizes = [1, 16], strides = [1, 1]} : vector<1x64xf32> to vector<1x16xf32>
    %1847 = arith.negf %1846 : vector<1x16xf32>
    %1848 = math.exp %1847 : vector<1x16xf32>
    %cst_317 = arith.constant 1.000000e+00 : f32
    %1849 = vector.broadcast %cst_317 : f32 to vector<1x16xf32>
    %1850 = arith.addf %1849, %1848 : vector<1x16xf32>
    %1851 = arith.divf %1849, %1850 : vector<1x16xf32>
    %1852 = arith.mulf %1843, %1826 : vector<1x16xf32>
    %1853 = arith.mulf %1837, %1845 : vector<1x16xf32>
    %1854 = arith.addf %1852, %1853 : vector<1x16xf32>
    %1855 = math.tanh %1854 : vector<1x16xf32>
    %1856 = arith.mulf %1851, %1855 : vector<1x16xf32>
    %1857 = vector.extract_strided_slice %1658 {offsets = [0, 0], sizes = [1, 64], strides = [1, 1]} : vector<8x64xf32> to vector<1x64xf32>
    %cst_318 = arith.constant dense<0.000000e+00> : vector<1x64xf32>
    %1858 = tpu.matmul %1856, %13, %cst_318 {dimension_numbers = #tpu.dot_dimension_numbers<[1], [0], [0], [1], [0, 0, 1, 1], [], []>} : vector<1x16xf32>, vector<16x64xf32>, vector<1x64xf32> -> vector<1x64xf32>
    %1859 = arith.addf %1857, %1858 : vector<1x64xf32>
    %1860 = vector.extract_strided_slice %1859 {offsets = [0, 0], sizes = [1, 16], strides = [1, 1]} : vector<1x64xf32> to vector<1x16xf32>
    %1861 = arith.negf %1860 : vector<1x16xf32>
    %1862 = math.exp %1861 : vector<1x16xf32>
    %cst_319 = arith.constant 1.000000e+00 : f32
    %1863 = vector.broadcast %cst_319 : f32 to vector<1x16xf32>
    %1864 = arith.addf %1863, %1862 : vector<1x16xf32>
    %1865 = arith.divf %1863, %1864 : vector<1x16xf32>
    %1866 = vector.extract_strided_slice %1859 {offsets = [0, 16], sizes = [1, 16], strides = [1, 1]} : vector<1x64xf32> to vector<1x16xf32>
    %1867 = arith.negf %1866 : vector<1x16xf32>
    %1868 = math.exp %1867 : vector<1x16xf32>
    %cst_320 = arith.constant 1.000000e+00 : f32
    %1869 = vector.broadcast %cst_320 : f32 to vector<1x16xf32>
    %1870 = arith.addf %1869, %1868 : vector<1x16xf32>
    %1871 = arith.divf %1869, %1870 : vector<1x16xf32>
    %1872 = vector.extract_strided_slice %1859 {offsets = [0, 32], sizes = [1, 16], strides = [1, 1]} : vector<1x64xf32> to vector<1x16xf32>
    %1873 = math.tanh %1872 : vector<1x16xf32>
    %1874 = vector.extract_strided_slice %1859 {offsets = [0, 48], sizes = [1, 16], strides = [1, 1]} : vector<1x64xf32> to vector<1x16xf32>
    %1875 = arith.negf %1874 : vector<1x16xf32>
    %1876 = math.exp %1875 : vector<1x16xf32>
    %cst_321 = arith.constant 1.000000e+00 : f32
    %1877 = vector.broadcast %cst_321 : f32 to vector<1x16xf32>
    %1878 = arith.addf %1877, %1876 : vector<1x16xf32>
    %1879 = arith.divf %1877, %1878 : vector<1x16xf32>
    %1880 = arith.mulf %1871, %1854 : vector<1x16xf32>
    %1881 = arith.mulf %1865, %1873 : vector<1x16xf32>
    %1882 = arith.addf %1880, %1881 : vector<1x16xf32>
    %1883 = math.tanh %1882 : vector<1x16xf32>
    %1884 = arith.mulf %1879, %1883 : vector<1x16xf32>
    %1885 = tpu.concatenate %1884, %1856, %1828, %1800, %1772, %1744, %1716, %1688 in 0 : vector<1x16xf32>, vector<1x16xf32>, vector<1x16xf32>, vector<1x16xf32>, vector<1x16xf32>, vector<1x16xf32>, vector<1x16xf32>, vector<1x16xf32> -> vector<8x16xf32>
    %1886 = tpu.concatenate %1655, %1885 in 1 : vector<8x16xf32>, vector<8x16xf32> -> vector<8x32xf32>
    %cst_322 = arith.constant 0.000000e+00 : f32
    %1887 = vector.broadcast %cst_322 : f32 to vector<8x32xf32>
    %1888 = arith.maximumf %1886, %1887 : vector<8x32xf32>
    %cst_323 = arith.constant dense<0xFF800000> : vector<32xf32>
    %1889 = vector.multi_reduction <maximumf>, %1888, %cst_323 [0] : vector<8x32xf32> to vector<32xf32>
    %1890 = vector.shape_cast %1889 : vector<32xf32> to vector<1x32xf32>
    %1891 = vector.broadcast %1890 : vector<1x32xf32> to vector<8x32xf32>
    %1892 = arith.subf %1888, %1891 : vector<8x32xf32>
    %1893 = math.exp %1892 : vector<8x32xf32>
    %cst_324 = arith.constant dense<0.000000e+00> : vector<32xf32>
    %1894 = vector.multi_reduction <add>, %1893, %cst_324 [0] : vector<8x32xf32> to vector<32xf32>
    %1895 = vector.shape_cast %1894 : vector<32xf32> to vector<1x32xf32>
    %1896 = vector.broadcast %1895 : vector<1x32xf32> to vector<8x32xf32>
    %1897 = arith.divf %1893, %1896 : vector<8x32xf32>
    %1898 = arith.mulf %1888, %1897 : vector<8x32xf32>
    %1899 = arith.addf %1888, %1898 : vector<8x32xf32>
    %cst_325 = arith.constant dense<0.000000e+00> : vector<8x32xf32>
    %1900 = tpu.matmul %1899, %1, %cst_325 {dimension_numbers = #tpu.dot_dimension_numbers<[1], [0], [0], [1], [0, 0, 1, 1], [], []>} : vector<8x32xf32>, vector<32x32xf32>, vector<8x32xf32> -> vector<8x32xf32>
    %cst_326 = arith.constant dense<0.000000e+00> : vector<8x32xf32>
    %1901 = tpu.matmul %0, %1900, %cst_326 {dimension_numbers = #tpu.dot_dimension_numbers<[1], [0], [0], [1], [0, 0, 1, 1], [], []>} : vector<8x8xf32>, vector<8x32xf32>, vector<8x32xf32> -> vector<8x32xf32>
    %1902 = vector.broadcast %2 : vector<1x32xf32> to vector<8x32xf32>
    %1903 = arith.addf %1901, %1902 : vector<8x32xf32>
    %c0_327 = arith.constant 0 : index
    %c0_328 = arith.constant 0 : index
    %1904 = vector.load %arg18[%c0_327, %c0_328] : memref<8x32xf32, #tpu.memory_space<vmem>>, vector<8x32xf32>
    tpu.vector_store %arg18[%c0_327, %c0_328], %1903 {strides = array<i32>} : memref<8x32xf32, #tpu.memory_space<vmem>>, vector<8x32xf32>,
    return
  }
}

</mosaic_0001>

<bundles_post_ra>
// kernel: tpu_custom_call.1
= control target key start
LH: loop header
LB: loop body
LE: loop exit
PB: predicated region body
PF: predicated region fallthrough
CT: control target
= control target key end

     0   :  { %s11264_s0 = inlined_call_operand.hbm [shape: f32[8,16], index: 0, kind: input, shape index: {}]   ;;  %s11265_s1 = inlined_call_operand.hbm [shape: f32[8,8], index: 1, kind: input, shape index: {}]   ;;  %s11266_s2 = inlined_call_operand.hbm [shape: f32[16,32], index: 2, kind: input, shape index: {}]   ;;  %s11267_s3 = inlined_call_operand.vmem [shape: f32[1,32], index: 3, kind: input, shape index: {}]   ;;  %s11268_s4 = inlined_call_operand.hbm [shape: f32[32,64], index: 4, kind: input, shape index: {}]   ;;  %s11269_s5 = inlined_call_operand.hbm [shape: f32[16,64], index: 5, kind: input, shape index: {}]   ;;  %s11270_s6 = inlined_call_operand.hbm [shape: f32[1,64], index: 6, kind: input, shape index: {}]   ;;  %s11271_s7 = inlined_call_operand.hbm [shape: f32[32,64], index: 7, kind: input, shape index: {}]   ;;  %s11272_s8 = inlined_call_operand.hbm [shape: f32[16,64], index: 8, kind: input, shape index: {}]   ;;  %s11273_s9 = inlined_call_operand.hbm [shape: f32[1,64], index: 9, kind: input, shape index: {}]   ;;  %s11274_s10 = inlined_call_operand.vmem [shape: f32[32,64], index: 10, kind: input, shape index: {}]   ;;  %s11275_s11 = inlined_call_operand.hbm [shape: f32[16,64], index: 11, kind: input, shape index: {}]   ;;  %s11276_s12 = inlined_call_operand.hbm [shape: f32[1,64], index: 12, kind: input, shape index: {}]   ;;  %s11277_s13 = inlined_call_operand.hbm [shape: f32[32,64], index: 13, kind: input, shape index: {}]   ;;  %s11278_s14 = inlined_call_operand.vmem [shape: f32[16,64], index: 14, kind: input, shape index: {}]   ;;  %s11279_s15 = inlined_call_operand.vmem [shape: f32[1,64], index: 15, kind: input, shape index: {}]   ;;  %s11280_s16 = inlined_call_operand.hbm [shape: f32[32,32], index: 16, kind: input, shape index: {}]   ;;  %s11281_s17 = inlined_call_operand.vmem [shape: f32[1,32], index: 17, kind: input, shape index: {}]   ;;  %s11282_s18 = inlined_call_operand.hbm [shape: f32[8,32], index: 18, kind: output, shape index: {}]  }
   0x1   :  { %11286 = sst [smem:[#allocation32_spill]] %s11264_s0 }
   0x2   :  { %11287 = sst [smem:[#allocation33_spill]] %s11265_s1 }
   0x3   :  { %11288 = sst [smem:[#allocation34_spill]] %s11266_s2 }
   0x4   :  { %23 = vsyncpa [#allocation3], 0 }
   0x5   :  { %24 = vsyncpa [#allocation6], 0 }
   0x6   :  { %25 = vsyncpa [#allocation9], 0 }
   0x7   :  { %26 = vsyncpa [#allocation12], 0 }
   0x8   :  { %27 = vsyncpa [#allocation15], 0 }
   0x9   :  { %28 = vsyncpa [#allocation18], 0 }
   0xa   :  { %29 = vsyncpa [#allocation21], 0 }
   0xb   :  { %30 = vsyncpa [#allocation4], 0  ;;  %s9909_s27 = smov [#allocation5]   ;;  %s11289_s0 = sld [smem:[#allocation33_spill]] }
   0xc   :  { %s47_s28 = sshll.u32 %s9909_s27, 4  ;;  %s48_s28 = int_to_ptr.vmem [resolvable:$true] %s47_s28 }
  0x11   :  { %s9585_s19 = scalar_lea.hbm %s11289_s0, 128 }
  0x12   :  { %p9586_p0 = scmp.ne.s32.totalorder %s11289_s0, %s9585_s19  ;;  %p9589_p1 = scmp.lt.u32.totalorder %s9585_s19, %s11289_s0 }
  0x14   :  { %p9591_p2 = pnand %p9589_p1, %p9586_p0 }
  0x16   :  { %9594 = shalt.err (!%p9591_p2)
}
  0x17   :  { %s9595_s2 = scalar_lea.vmem %s48_s28, 128  ;;  %p9600_p4 = scmp.lt.s32.totalorder %s48_s28, %s48_s28 }
  0x18   :  { %p9596_p3 = scmp.ne.s32.totalorder %s48_s28, %s9595_s2  ;;  %p9601_p5 = scmp.lt.s32.totalorder %s9595_s2, %s9595_s2 }
  0x1a   :  { %p9602_p6 = por %p9601_p5, %p9600_p4 }
  0x1c   :  { %p9603_p7 = pnand %p9602_p6, %p9596_p3 }
  0x1e   :  { %9606 = shalt.err (!%p9603_p7)
}
  0x1f   :  { %50 = dma.hbm_to_vmem [thread:$0]  %s11289_s0, 128, %s48_s28, [#allocation6]  }
  0x20   :  { %s9910_s25 = smov [#allocation8]   ;;  %s9911_s27 = smov [#allocation11]  }
  0x21   :  { %s70_s26 = sshll.u32 %s9910_s25, 4  ;;  %s95_s29 = sshll.u32 %s9911_s27, 4  ;;  %s71_s26 = int_to_ptr.vmem [resolvable:$true] %s70_s26  ;;  %s96_s29 = int_to_ptr.vmem [resolvable:$true] %s95_s29 }
  0x22   :  { %s9607_s1 = scalar_lea.hbm %s11268_s4, 512 }
  0x23   :  { %p9608_p8 = scmp.ne.s32.totalorder %s11268_s4, %s9607_s1  ;;  %p9611_p9 = scmp.lt.u32.totalorder %s9607_s1, %s11268_s4 }
  0x25   :  { %p9613_p10 = pnand %p9611_p9, %p9608_p8 }
  0x27   :  { %9616 = shalt.err (!%p9613_p10)
}
  0x28   :  { %s9617_s28 = scalar_lea.vmem %s71_s26, 512  ;;  %p9622_p12 = scmp.lt.s32.totalorder %s71_s26, %s71_s26 }
  0x29   :  { %p9618_p11 = scmp.ne.s32.totalorder %s71_s26, %s9617_s28  ;;  %p9623_p13 = scmp.lt.s32.totalorder %s9617_s28, %s9617_s28 }
  0x2b   :  { %p9624_p0 = por %p9623_p13, %p9622_p12 }
  0x2d   :  { %p9625_p1 = pnand %p9624_p0, %p9618_p11 }
  0x2f   :  { %9628 = shalt.err (!%p9625_p1)
}
  0x30   :  { %s9912_s0 = smov 128   ;;  %s9913_s23 = smov 8  }
  0x31   :  { %76 = dma.hbm_to_vmem [thread:$0]  %s11268_s4, 512, %s71_s26, [#allocation9], %s9912_s0, %s9912_s0, %s9913_s23  }
  0x32   :  { %s9629_s19 = scalar_lea.hbm %s11270_s6, 16 }
  0x33   :  { %p9630_p2 = scmp.ne.s32.totalorder %s11270_s6, %s9629_s19  ;;  %p9633_p3 = scmp.lt.u32.totalorder %s9629_s19, %s11270_s6 }
  0x35   :  { %p9635_p4 = pnand %p9633_p3, %p9630_p2 }
  0x37   :  { %9638 = shalt.err (!%p9635_p4)
}
  0x38   :  { %s9639_s2 = scalar_lea.vmem %s96_s29, 16  ;;  %s9643_s28 = scalar_lea.vmem %s96_s29, 32 }
  0x39   :  { %p9640_p5 = scmp.ne.s32.totalorder %s96_s29, %s9639_s2  ;;  %p9644_p6 = scmp.lt.s32.totalorder %s96_s29, %s96_s29 }
  0x3a   :  { %p9645_p7 = scmp.lt.s32.totalorder %s9643_s28, %s9639_s2 }
  0x3c   :  { %p9646_p8 = por %p9645_p7, %p9644_p6 }
  0x3e   :  { %p9647_p9 = pnand %p9646_p8, %p9640_p5 }
  0x40   :  { %9650 = shalt.err (!%p9647_p9)
}
  0x41   :  { %98 = dma.hbm_to_vmem [thread:$0]  %s11270_s6, 16, %s96_s29, [#allocation12]  }
  0x42   :  { %s9914_s24 = smov [#allocation14]   ;;  %s9915_s27 = smov [#allocation17]  }
  0x43   :  { %s116_s25 = sshll.u32 %s9914_s24, 4  ;;  %s140_s30 = sshll.u32 %s9915_s27, 4  ;;  %s117_s25 = int_to_ptr.vmem [resolvable:$true] %s116_s25  ;;  %s141_s30 = int_to_ptr.vmem [resolvable:$true] %s140_s30 }
  0x44   :  { %s9651_s20 = scalar_lea.hbm %s11272_s8, 256 }
  0x45   :  { %p9652_p10 = scmp.ne.s32.totalorder %s11272_s8, %s9651_s20  ;;  %p9655_p11 = scmp.lt.u32.totalorder %s9651_s20, %s11272_s8 }
  0x47   :  { %p9657_p12 = pnand %p9655_p11, %p9652_p10 }
  0x49   :  { %9660 = shalt.err (!%p9657_p12)
}
  0x4a   :  { %s9661_s6 = scalar_lea.vmem %s117_s25, 256  ;;  %p9666_p0 = scmp.lt.s32.totalorder %s117_s25, %s117_s25 }
  0x4b   :  { %p9662_p13 = scmp.ne.s32.totalorder %s117_s25, %s9661_s6  ;;  %p9667_p1 = scmp.lt.s32.totalorder %s9661_s6, %s9661_s6 }
  0x4d   :  { %p9668_p2 = por %p9667_p1, %p9666_p0 }
  0x4f   :  { %p9669_p3 = pnand %p9668_p2, %p9662_p13 }
  0x51   :  { %9672 = shalt.err (!%p9669_p3)
}
  0x52   :  { %122 = dma.hbm_to_vmem [thread:$0]  %s11272_s8, 256, %s117_s25, [#allocation15], %s9912_s0, %s9912_s0, %s9913_s23  }
  0x53   :  { %s9673_s27 = scalar_lea.hbm %s11275_s11, 256 }
  0x54   :  { %p9674_p4 = scmp.ne.s32.totalorder %s11275_s11, %s9673_s27  ;;  %p9677_p5 = scmp.lt.u32.totalorder %s9673_s27, %s11275_s11 }
  0x56   :  { %p9679_p6 = pnand %p9677_p5, %p9674_p4 }
  0x58   :  { %9682 = shalt.err (!%p9679_p6)
}
  0x59   :  { %s9683_s22 = scalar_lea.vmem %s141_s30, 256  ;;  %p9688_p8 = scmp.lt.s32.totalorder %s141_s30, %s141_s30 }
  0x5a   :  { %p9684_p7 = scmp.ne.s32.totalorder %s141_s30, %s9683_s22  ;;  %p9689_p9 = scmp.lt.s32.totalorder %s9683_s22, %s9683_s22 }
  0x5c   :  { %p9690_p10 = por %p9689_p9, %p9688_p8 }
  0x5e   :  { %p9691_p11 = pnand %p9690_p10, %p9684_p7 }
  0x60   :  { %9694 = shalt.err (!%p9691_p11)
}
  0x61   :  { %146 = dma.hbm_to_vmem [thread:$0]  %s11275_s11, 256, %s141_s30, [#allocation18], %s9912_s0, %s9912_s0, %s9913_s23  }
  0x62   :  { %s9916_s2 = smov [#allocation20]   ;;  %s9917_s6 = smov [#allocation2]  }
  0x63   :  { %s162_s28 = sshll.u32 %s9916_s2, 4  ;;  %s37_s29 = sshll.u32 %s9917_s6, 4  ;;  %s163_s28 = int_to_ptr.vmem [resolvable:$true] %s162_s28  ;;  %s38_s29 = int_to_ptr.vmem [resolvable:$true] %s37_s29 }
  0x64   :  { %s9695_s24 = scalar_lea.hbm %s11277_s13, 512 }
  0x65   :  { %p9696_p12 = scmp.ne.s32.totalorder %s11277_s13, %s9695_s24  ;;  %p9699_p13 = scmp.lt.u32.totalorder %s9695_s24, %s11277_s13 }
  0x67   :  { %p9701_p0 = pnand %p9699_p13, %p9696_p12 }
  0x69   :  { %9704 = shalt.err (!%p9701_p0)
}
  0x6a   :  { %s9705_s11 = scalar_lea.vmem %s163_s28, 512  ;;  %p9710_p2 = scmp.lt.s32.totalorder %s163_s28, %s163_s28 }
  0x6b   :  { %p9706_p1 = scmp.ne.s32.totalorder %s163_s28, %s9705_s11  ;;  %p9711_p3 = scmp.lt.s32.totalorder %s9705_s11, %s9705_s11 }
  0x6d   :  { %p9712_p4 = por %p9711_p3, %p9710_p2 }
  0x6f   :  { %p9713_p5 = pnand %p9712_p4, %p9706_p1 }
  0x71   :  { %9716 = shalt.err (!%p9713_p5)
}
  0x72   :  { %168 = dma.hbm_to_vmem [thread:$0]  %s11277_s13, 512, %s163_s28, [#allocation21], %s9912_s0, %s9912_s0, %s9913_s23  }
  0x73   :  { %s11290_s25 = sld [smem:[#allocation32_spill]] }
  0x79   :  { %s9717_s2 = scalar_lea.hbm %s11290_s25, 128 }
  0x7a   :  { %p9718_p6 = scmp.ne.s32.totalorder %s11290_s25, %s9717_s2  ;;  %p9721_p7 = scmp.lt.u32.totalorder %s9717_s2, %s11290_s25 }
  0x7c   :  { %p9723_p8 = pnand %p9721_p7, %p9718_p6 }
  0x7e   :  { %9726 = shalt.err (!%p9723_p8)
}
  0x7f   :  { %s9727_s27 = scalar_lea.vmem %s38_s29, 128  ;;  %p9732_p10 = scmp.lt.s32.totalorder %s38_s29, %s38_s29 }
  0x80   :  { %p9728_p9 = scmp.ne.s32.totalorder %s38_s29, %s9727_s27  ;;  %p9733_p11 = scmp.lt.s32.totalorder %s9727_s27, %s9727_s27 }
  0x82   :  { %p9734_p12 = por %p9733_p11, %p9732_p10 }
  0x84   :  { %p9735_p13 = pnand %p9734_p12, %p9728_p9 }
  0x86   :  { %9738 = shalt.err (!%p9735_p13)
}
  0x87   :  { %40 = dma.hbm_to_vmem [thread:$0]  %s11290_s25, 128, %s38_s29, [#allocation3]  }
  0x88   :  { %s9918_s19 = smov [#allocation7]   ;;  %s9919_s20 = smov [#allocation10]  }
  0x89   :  { %s56_s1 = sshll.u32 %s9918_s19, 4  ;;  %s82_s11 = sshll.u32 %s9919_s20, 4  ;;  %s57_s1 = int_to_ptr.vmem [resolvable:$true] %s56_s1  ;;  %s83_s11 = int_to_ptr.vmem [resolvable:$true] %s82_s11 }
  0x8a   :  { %s11291_s22 = sld [smem:[#allocation34_spill]] }
  0x90   :  { %s9739_s8 = scalar_lea.hbm %s11291_s22, 256 }
  0x91   :  { %p9740_p0 = scmp.ne.s32.totalorder %s11291_s22, %s9739_s8  ;;  %p9743_p1 = scmp.lt.u32.totalorder %s9739_s8, %s11291_s22 }
  0x93   :  { %p9745_p2 = pnand %p9743_p1, %p9740_p0 }
  0x95   :  { %9748 = shalt.err (!%p9745_p2)
}
  0x96   :  { %s9749_s29 = scalar_lea.vmem %s57_s1, 256  ;;  %p9754_p4 = scmp.lt.s32.totalorder %s57_s1, %s57_s1 }
  0x97   :  { %p9750_p3 = scmp.ne.s32.totalorder %s57_s1, %s9749_s29  ;;  %p9755_p5 = scmp.lt.s32.totalorder %s9749_s29, %s9749_s29 }
  0x99   :  { %p9756_p6 = por %p9755_p5, %p9754_p4 }
  0x9b   :  { %p9757_p7 = pnand %p9756_p6, %p9750_p3 }
  0x9d   :  { %9760 = shalt.err (!%p9757_p7)
}
  0x9e   :  { %62 = dma.hbm_to_vmem [thread:$0]  %s11291_s22, 256, %s57_s1, [#allocation6], %s9912_s0, %s9912_s0, %s9913_s23  }
  0x9f   :  { %s9761_s28 = scalar_lea.hbm %s11269_s5, 256 }
  0xa0   :  { %p9762_p8 = scmp.ne.s32.totalorder %s11269_s5, %s9761_s28  ;;  %p9765_p9 = scmp.lt.u32.totalorder %s9761_s28, %s11269_s5 }
  0xa2   :  { %p9767_p10 = pnand %p9765_p9, %p9762_p8 }
  0xa4   :  { %9770 = shalt.err (!%p9767_p10)
}
  0xa5   :  { %s9771_s8 = scalar_lea.vmem %s83_s11, 256  ;;  %p9776_p12 = scmp.lt.s32.totalorder %s83_s11, %s83_s11 }
  0xa6   :  { %p9772_p11 = scmp.ne.s32.totalorder %s83_s11, %s9771_s8  ;;  %p9777_p13 = scmp.lt.s32.totalorder %s9771_s8, %s9771_s8 }
  0xa8   :  { %p9778_p0 = por %p9777_p13, %p9776_p12 }
  0xaa   :  { %p9779_p1 = pnand %p9778_p0, %p9772_p11 }
  0xac   :  { %9782 = shalt.err (!%p9779_p1)
}
  0xad   :  { %88 = dma.hbm_to_vmem [thread:$0]  %s11269_s5, 256, %s83_s11, [#allocation9], %s9912_s0, %s9912_s0, %s9913_s23  }
  0xae   :  { %s9920_s2 = smov [#allocation13]   ;;  %s9921_s4 = smov [#allocation16]  }
  0xaf   :  { %s104_s6 = sshll.u32 %s9920_s2, 4  ;;  %s129_s26 = sshll.u32 %s9921_s4, 4  ;;  %s105_s6 = int_to_ptr.vmem [resolvable:$true] %s104_s6  ;;  %s130_s26 = int_to_ptr.vmem [resolvable:$true] %s129_s26 }
  0xb0   :  { %s9783_s24 = scalar_lea.hbm %s11271_s7, 512 }
  0xb1   :  { %p9784_p2 = scmp.ne.s32.totalorder %s11271_s7, %s9783_s24  ;;  %p9787_p3 = scmp.lt.u32.totalorder %s9783_s24, %s11271_s7 }
  0xb3   :  { %p9789_p4 = pnand %p9787_p3, %p9784_p2 }
  0xb5   :  { %9792 = shalt.err (!%p9789_p4)
}
  0xb6   :  { %s9793_s5 = scalar_lea.vmem %s105_s6, 512  ;;  %p9798_p6 = scmp.lt.s32.totalorder %s105_s6, %s105_s6 }
  0xb7   :  { %p9794_p5 = scmp.ne.s32.totalorder %s105_s6, %s9793_s5  ;;  %p9799_p7 = scmp.lt.s32.totalorder %s9793_s5, %s9793_s5 }
  0xb9   :  { %p9800_p8 = por %p9799_p7, %p9798_p6 }
  0xbb   :  { %p9801_p9 = pnand %p9800_p8, %p9794_p5 }
  0xbd   :  { %9804 = shalt.err (!%p9801_p9)
}
  0xbe   :  { %110 = dma.hbm_to_vmem [thread:$0]  %s11271_s7, 512, %s105_s6, [#allocation12], %s9912_s0, %s9912_s0, %s9913_s23  }
  0xbf   :  { %s9805_s8 = scalar_lea.hbm %s11273_s9, 16 }
  0xc0   :  { %p9806_p10 = scmp.ne.s32.totalorder %s11273_s9, %s9805_s8  ;;  %p9809_p11 = scmp.lt.u32.totalorder %s9805_s8, %s11273_s9 }
  0xc2   :  { %p9811_p12 = pnand %p9809_p11, %p9806_p10 }
  0xc4   :  { %9814 = shalt.err (!%p9811_p12)
}
  0xc5   :  { %s9815_s29 = scalar_lea.vmem %s130_s26, 16  ;;  %s9819_s25 = scalar_lea.vmem %s130_s26, 32 }
  0xc6   :  { %p9816_p13 = scmp.ne.s32.totalorder %s130_s26, %s9815_s29  ;;  %p9820_p0 = scmp.lt.s32.totalorder %s130_s26, %s130_s26 }
  0xc7   :  { %p9821_p1 = scmp.lt.s32.totalorder %s9819_s25, %s9815_s29 }
  0xc9   :  { %p9822_p2 = por %p9821_p1, %p9820_p0 }
  0xcb   :  { %p9823_p3 = pnand %p9822_p2, %p9816_p13 }
  0xcd   :  { %9826 = shalt.err (!%p9823_p3)
}
  0xce   :  { %132 = dma.hbm_to_vmem [thread:$0]  %s11273_s9, 16, %s130_s26, [#allocation15]  }
  0xcf   :  { %s9922_s24 = smov [#allocation19]   ;;  %s9923_s13 = smov [#allocation22]  }
  0xd0   :  { %s153_s27 = sshll.u32 %s9922_s24, 4  ;;  %s178_s28 = sshll.u32 %s9923_s13, 4  ;;  %s154_s27 = int_to_ptr.vmem [resolvable:$true] %s153_s27  ;;  %s179_s28 = int_to_ptr.vmem [resolvable:$true] %s178_s28 }
  0xd1   :  { %s9827_s11 = scalar_lea.hbm %s11276_s12, 16 }
  0xd2   :  { %p9828_p4 = scmp.ne.s32.totalorder %s11276_s12, %s9827_s11  ;;  %p9831_p5 = scmp.lt.u32.totalorder %s9827_s11, %s11276_s12 }
  0xd4   :  { %p9833_p6 = pnand %p9831_p5, %p9828_p4 }
  0xd6   :  { %9836 = shalt.err (!%p9833_p6)
}
  0xd7   :  { %s9837_s9 = scalar_lea.vmem %s154_s27, 16  ;;  %s9841_s26 = scalar_lea.vmem %s154_s27, 32 }
  0xd8   :  { %p9838_p7 = scmp.ne.s32.totalorder %s154_s27, %s9837_s9  ;;  %p9842_p8 = scmp.lt.s32.totalorder %s154_s27, %s154_s27 }
  0xd9   :  { %p9843_p9 = scmp.lt.s32.totalorder %s9841_s26, %s9837_s9 }
  0xdb   :  { %p9844_p10 = por %p9843_p9, %p9842_p8 }
  0xdd   :  { %p9845_p11 = pnand %p9844_p10, %p9838_p7 }
  0xdf   :  { %9848 = shalt.err (!%p9845_p11)
}
  0xe0   :  { %156 = dma.hbm_to_vmem [thread:$0]  %s11276_s12, 16, %s154_s27, [#allocation18]  }
  0xe1   :  { %s9849_s29 = scalar_lea.hbm %s11280_s16, 512 }
  0xe2   :  { %p9850_p12 = scmp.ne.s32.totalorder %s11280_s16, %s9849_s29  ;;  %p9853_p13 = scmp.lt.u32.totalorder %s9849_s29, %s11280_s16 }
  0xe4   :  { %p9855_p0 = pnand %p9853_p13, %p9850_p12 }
  0xe6   :  { %9858 = shalt.err (!%p9855_p0)
}
  0xe7   :  { %s9859_s13 = scalar_lea.vmem %s179_s28, 512  ;;  %p9864_p2 = scmp.lt.s32.totalorder %s179_s28, %s179_s28 }
  0xe8   :  { %p9860_p1 = scmp.ne.s32.totalorder %s179_s28, %s9859_s13  ;;  %p9865_p3 = scmp.lt.s32.totalorder %s9859_s13, %s9859_s13 }
  0xea   :  { %p9866_p4 = por %p9865_p3, %p9864_p2 }
  0xec   :  { %p9867_p5 = pnand %p9866_p4, %p9860_p1 }
  0xee   :  { %9870 = shalt.err (!%p9867_p5)
}
  0xef   :  { %184 = dma.hbm_to_vmem [thread:$0]  %s11280_s16, 512, %s179_s28, [#allocation21], %s9912_s0, %s9912_s0, %s9913_s23  }
  0xf0   :  { %9893 = dma.done.wait [#allocation3], 128  }
  0xf1   :  { %9894 = vsyncadd [#allocation3], 4294967168 }
  0xf2   :  { %9895 = dma.done.wait [#allocation6], 384  }
  0xf3   :  { %9896 = vsyncadd [#allocation6], 4294966912 }
  0xf4   :  { %9897 = dma.done.wait [#allocation9], 768  }
  0xf5   :  { %9898 = vsyncadd [#allocation9], 4294966528 }
  0xf6   :  { %9899 = dma.done.wait [#allocation12], 528  }
  0xf7   :  { %9900 = vsyncadd [#allocation12], 4294966768 }
  0xf8   :  { %9901 = dma.done.wait [#allocation15], 272  }
  0xf9   :  { %9902 = vsyncadd [#allocation15], 4294967024 }
  0xfa   :  { %9903 = dma.done.wait [#allocation18], 272  }
  0xfb   :  { %9904 = vsyncadd [#allocation18], 4294967024 }
  0xfc   :  { %9905 = dma.done.wait [#allocation21], 1024  }
  0xfd   :  { %9906 = vsyncadd [#allocation21], 4294966272  ;;  %v9924_v0 = vmov 0.0|0.0   ;;  %vm9925_vm0 = vmmov 0   ;;  %v9926_v1 = vmov 0.0   ;;  %v261_v2 = vld [vmem:[#allocation7] sm:$0xff] }
  0xfe   :  { %8793 = vmatprep.subr.bf16.mxu0 %v9924_v0  ;;  %8250 = vmatprep.mubr.msk.f32.mxu0 %vm9925_vm0, %v9926_v1  ;;  %v262_v3 = vld [vmem:[#allocation7 + $0x8] sm:$0xff]  ;;  %v232_v5 = vld [vmem:[#allocation8] sm:$0xff]  ;;  %v233_v6 = vld [vmem:[#allocation8 + $0x8] sm:$0xff]  ;;  %vm270_vm1 = vcmask 130048   ;;  %vm351_vm2 = vcmask 261120   ;;  %s9928_s23 = smov 16  }
  0xff   :  { %8796 = vmatprep.subr.bf16.mxu1 %v9924_v0  ;;  %8261 = vmatprep.mubr.msk.f32.mxu1 %vm9925_vm0, %v9926_v1  ;;  %v8794_v4 = vpack.c.bf16 %v262_v3, %v261_v2  ;;  %v10213_v7 = vpack.c.bf16 %v233_v6, %v232_v5  ;;  %v260_v8 = vld [vmem:[#allocation2] sm:$0xff]  ;;  %v234_v9 = vld [vmem:[#allocation8 + $0x10] sm:$0xff]  ;;  %v235_v10 = vld [vmem:[#allocation8 + $0x18] sm:$0xff]  ;;  %s9929_s28 = smov 32   ;;  %s9930_s19 = smov 80   ;;  %vm1271_vm3 = vcmask 1040384  }
 0x100   :  { %v10221_v11 = vpack.c.bf16 %v235_v10, %v234_v9  ;;  %v236_v12 = vld [vmem:[#allocation10] sm:$0xff]  ;;  %v237_v13 = vld [vmem:[#allocation10 + $0x8] sm:$0xff]  ;;  %v7870_v15 = vld [vmem:[%s11267_s3] ss:$0 sm:$0xff]  ;;  %s9927_s3 = smov 96   ;;  %vm1273_vm4 = vcmask 1041408  }
 0x101   :  { %8795 = vmatpush3.bf16.msra.mxu0 %v8794_v4  ;;  %8798 = vmatpush3.bf16.msra.mxu1 %v10213_v7  ;;  %v10223_v14 = vpack.c.bf16 %v237_v13, %v236_v12  ;;  %v7872_v22 = vld [vmem:[#allocation11] ss:$0 sm:$0xff]  ;;  %vm1275_vm5 = vcmask 1042432   ;;  %vm1277_vm6 = vcmask 1043456   ;;  %vm1279_vm7 = vcmask 1044480  }
 0x102   :  { %8802 = vmatprep.subr.bf16.mxu0 %v9924_v0  ;;  %8799 = vmatprep.subr.bf16.mxu1 %v9924_v0  ;;  %vm1281_vm8 = vcmask 1045504   ;;  %vm1283_vm9 = vcmask 1046528   ;;  %vm4187_vm10 = vcmask 64512  }
 0x104   :  { %8251 = vmatmul.mubr.msk.f32.vlgmr.msra.gmra.mrb[0].mxu0 %vm270_vm1, %v260_v8 }
 0x105   :  { %8268 = vmatprep.mubr.msk.f32.mxu0 %vm9925_vm0, %v9926_v1  ;;  %8801 = vmatpush3.bf16.msra.mxu1 %v10221_v11 }
 0x106   :  { %8804 = vmatpush3.bf16.msra.mxu0 %v10223_v14  ;;  %8808 = vmatprep.subr.bf16.mxu1 %v9924_v0 }
 0x107   :  { %8805 = vmatprep.subr.bf16.mxu0 %v9924_v0 }
 0x109   :  { %8269 = vmatmul.mubr.f32.vlgmr.msra.gmra.mrb[2].mxu0 %v9926_v1 }
 0x10a   :  { %8807 = vmatpush3.bf16.msra.mxu0 %v10223_v14  ;;  %8275 = vmatprep.mubr.msk.f32.mxu0 %vm9925_vm0, %v9926_v1 }
 0x10b   :  { %8811 = vmatprep.subr.bf16.mxu0 %v9924_v0 }
 0x1d7   :  { %v340_v16 = vpop.f32.mrb[0].mxu0 }
 0x1d8   :  { %v341_v17 = vadd.f32 %v7870_v15, %v340_v16  ;;  %v8252_v18 = vpop.f32.mrb[1].mxu0 }
 0x1da   :  { %v10237_v19 = vmax.f32 %v341_v17, 0.0 }
 0x1dc   :  { %8262 = vmatmul.mubr.msk.f32.vlgmr.msra.gmra.mrb[0].mxu1 %vm351_vm2, %v10237_v19  ;;  %v10245_v20 = vpop.f32.mrb[2].mxu0 }
 0x1dd   :  { %8810 = vmatpush3.bf16.msra.mxu1 %v10223_v14  ;;  %8282 = vmatprep.mubr.msk.f32.mxu1 %vm9925_vm0, %v9926_v1  ;;  %v8270_v21 = vpop.f32.mrb[3].mxu0 }
 0x1de   :  { %8814 = vmatprep.subr.bf16.mxu1 %v9924_v0 }
 0x2af   :  { %v421_v23 = vpop.f32.mrb[0].mxu1 }
 0x2b0   :  { %v10247_v24 = vadd.f32 %v7872_v22, %v421_v23  ;;  %v8263_v25 = vpop.f32.mrb[1].mxu1 }
 0x2b2   :  { %v498_v26 = vadd.f32 %v10245_v20, %v10247_v24 }
 0x2b4   :  { %9059 = vtanh.f32 %v498_v26  ;;  %v7874_v28 = vmul.f32 -1.442695, %v498_v26 }
 0x2b6   :  { %9061 = vpow2.f32 %v7874_v28 }
 0x2be   :  { %v9060_v27 = vpop.eup %9059 }
 0x2bf   :  { %508 = vrot.lane.b32.xlu0 %v9060_v27, %s9927_s3 }
 0x2c0   :  { %v9062_v29 = vpop.eup %9061 }
 0x2c1   :  { %v502_v30 = vadd.f32 1.0, %v9062_v29 }
 0x2c3   :  { %9063 = vrcp.f32 %v502_v30 }
 0x2cd   :  { %v9064_v31 = vpop.eup %9063 }
 0x2ce   :  { %v506_v34 = vmul.f32 0.0, %v9064_v31 }
 0x331   :  { %v509_v32 = vpop.permute.xlu0 %508 }
 0x332   :  { %v511_v33 = vmul.f32 %v9064_v31, %v509_v32 }
 0x334   :  { %513 = vrot.lane.b32.xlu0 %v511_v33, %s9928_s23 }
 0x3a6   :  { %v514_v35 = vpop.permute.xlu0 %513 }
 0x3a7   :  { %v516_v36 = vadd.f32 %v514_v35, %v506_v34 }
 0x3a9   :  { %9065 = vtanh.f32 %v516_v36  ;;  %v610_v52 = vrot.slane %v516_v36, 7 }
 0x3b3   :  { %v9066_v37 = vpop.eup %9065 }
 0x3b4   :  { %519 = vrot.lane.b32.xlu1 %v9066_v37, %s9929_s28 }
 0x426   :  { %v520_v38 = vpop.permute.xlu1 %519 }
 0x427   :  { %v10254_v39 = vmul.f32 %v9064_v31, %v520_v38 }
 0x429   :  { %524 = vrot.lane.b32.xlu1 %v10254_v39, %s9930_s19 }
 0x49b   :  { %v525_v40 = vpop.permute.xlu1 %524 }
 0x49c   :  { %8276 = vmatmul.mubr.msk.f32.vlgmr.msra.gmra.mrb[4].mxu0 %vm270_vm1, %v525_v40 }
 0x49d   :  { %8813 = vmatpush3.bf16.msra.mxu0 %v10223_v14  ;;  %8289 = vmatprep.mubr.msk.f32.mxu0 %vm9925_vm0, %v9926_v1 }
 0x49e   :  { %8817 = vmatprep.subr.bf16.mxu0 %v9924_v0 }
 0x56f   :  { %v594_v41 = vpop.f32.mrb[4].mxu0 }
 0x570   :  { %v599_v42 = vrot.slane %v594_v41, 7  ;;  %v8277_v43 = vpop.f32.mrb[5].mxu0 }
 0x572   :  { %v601_v44 = vadd.f32 %v599_v42, %v10247_v24 }
 0x574   :  { %9067 = vtanh.f32 %v601_v44  ;;  %v7876_v46 = vmul.f32 -1.442695, %v601_v44 }
 0x576   :  { %9069 = vpow2.f32 %v7876_v46 }
 0x57e   :  { %v9068_v45 = vpop.eup %9067 }
 0x57f   :  { %614 = vrot.lane.b32.xlu0 %v9068_v45, %s9927_s3 }
 0x580   :  { %v9070_v47 = vpop.eup %9069 }
 0x581   :  { %v605_v48 = vadd.f32 1.0, %v9070_v47 }
 0x583   :  { %9071 = vrcp.f32 %v605_v48 }
 0x58d   :  { %v9072_v49 = vpop.eup %9071 }
 0x58e   :  { %v612_v53 = vmul.f32 %v9072_v49, %v610_v52 }
 0x5f1   :  { %v615_v50 = vpop.permute.xlu0 %614 }
 0x5f2   :  { %v617_v51 = vmul.f32 %v9072_v49, %v615_v50 }
 0x5f4   :  { %619 = vrot.lane.b32.xlu1 %v617_v51, %s9928_s23 }
 0x666   :  { %v620_v54 = vpop.permute.xlu1 %619 }
 0x667   :  { %v622_v55 = vadd.f32 %v620_v54, %v612_v53 }
 0x669   :  { %9073 = vtanh.f32 %v622_v55  ;;  %v717_v12 = vrot.slane %v622_v55, 7 }
 0x673   :  { %v9074_v56 = vpop.eup %9073 }
 0x674   :  { %625 = vrot.lane.b32.xlu0 %v9074_v56, %s9929_s28 }
 0x6e6   :  { %v626_v57 = vpop.permute.xlu0 %625 }
 0x6e7   :  { %v628_v58 = vmul.f32 %v9072_v49, %v626_v57 }
 0x6e9   :  { %v630_v59 = vrot.slane %v628_v58, 1  ;;  %v1272_v22 = vsel %vm1271_vm3, %v10254_v39, %v628_v58 }
 0x6eb   :  { %631 = vrot.lane.b32.xlu1 %v630_v59, %s9930_s19 }
 0x75d   :  { %v632_v60 = vpop.permute.xlu1 %631 }
 0x75e   :  { %8283 = vmatmul.mubr.msk.f32.vlgmr.msra.gmra.mrb[2].mxu1 %vm270_vm1, %v632_v60 }
 0x75f   :  { %8816 = vmatpush3.bf16.msra.mxu1 %v10223_v14  ;;  %8296 = vmatprep.mubr.msk.f32.mxu1 %vm9925_vm0, %v9926_v1 }
 0x760   :  { %8820 = vmatprep.subr.bf16.mxu1 %v9924_v0 }
 0x831   :  { %v701_v61 = vpop.f32.mrb[2].mxu1 }
 0x832   :  { %v706_v62 = vrot.slane %v701_v61, 6  ;;  %v8284_v63 = vpop.f32.mrb[3].mxu1 }
 0x834   :  { %v708_v2 = vadd.f32 %v706_v62, %v10247_v24 }
 0x836   :  { %9075 = vtanh.f32 %v708_v2  ;;  %v7878_v4 = vmul.f32 -1.442695, %v708_v2 }
 0x838   :  { %9077 = vpow2.f32 %v7878_v4 }
 0x840   :  { %v9076_v3 = vpop.eup %9075 }
 0x841   :  { %721 = vrot.lane.b32.xlu0 %v9076_v3, %s9927_s3 }
 0x842   :  { %v9078_v5 = vpop.eup %9077 }
 0x843   :  { %v712_v6 = vadd.f32 1.0, %v9078_v5 }
 0x845   :  { %9079 = vrcp.f32 %v712_v6 }
 0x84f   :  { %v9080_v8 = vpop.eup %9079 }
 0x850   :  { %v719_v13 = vmul.f32 %v9080_v8, %v717_v12 }
 0x8b3   :  { %v722_v9 = vpop.permute.xlu0 %721 }
 0x8b4   :  { %v724_v10 = vmul.f32 %v9080_v8, %v722_v9 }
 0x8b6   :  { %726 = vrot.lane.b32.xlu1 %v724_v10, %s9928_s23 }
 0x928   :  { %v727_v15 = vpop.permute.xlu1 %726 }
 0x929   :  { %v729_v16 = vadd.f32 %v727_v15, %v719_v13 }
 0x92b   :  { %9081 = vtanh.f32 %v729_v16  ;;  %v824_v38 = vrot.slane %v729_v16, 7 }
 0x935   :  { %v9082_v17 = vpop.eup %9081 }
 0x936   :  { %732 = vrot.lane.b32.xlu0 %v9082_v17, %s9929_s28 }
 0x9a8   :  { %v733_v18 = vpop.permute.xlu0 %732 }
 0x9a9   :  { %v735_v21 = vmul.f32 %v9080_v8, %v733_v18 }
 0x9ab   :  { %v737_v23 = vrot.slane %v735_v21, 2  ;;  %v1274_v25 = vsel %vm1273_vm4, %v1272_v22, %v735_v21 }
 0x9ad   :  { %738 = vrot.lane.b32.xlu1 %v737_v23, %s9930_s19 }
 0xa1f   :  { %v739_v26 = vpop.permute.xlu1 %738 }
 0xa20   :  { %8290 = vmatmul.mubr.msk.f32.vlgmr.msra.gmra.mrb[6].mxu0 %vm270_vm1, %v739_v26 }
 0xa21   :  { %8819 = vmatpush3.bf16.msra.mxu0 %v10223_v14  ;;  %8303 = vmatprep.mubr.msk.f32.mxu0 %vm9925_vm0, %v9926_v1 }
 0xa22   :  { %8823 = vmatprep.subr.bf16.mxu0 %v9924_v0 }
 0xaf3   :  { %v808_v27 = vpop.f32.mrb[6].mxu0 }
 0xaf4   :  { %v813_v28 = vrot.slane %v808_v27, 5  ;;  %v8291_v29 = vpop.f32.mrb[7].mxu0 }
 0xaf6   :  { %v815_v30 = vadd.f32 %v813_v28, %v10247_v24 }
 0xaf8   :  { %9083 = vtanh.f32 %v815_v30  ;;  %v7880_v32 = vmul.f32 -1.442695, %v815_v30 }
 0xafa   :  { %9085 = vpow2.f32 %v7880_v32 }
 0xb02   :  { %v9084_v31 = vpop.eup %9083 }
 0xb03   :  { %828 = vrot.lane.b32.xlu0 %v9084_v31, %s9927_s3 }
 0xb04   :  { %v9086_v33 = vpop.eup %9085 }
 0xb05   :  { %v819_v34 = vadd.f32 1.0, %v9086_v33  ;;  %v239_v33 = vld [vmem:[#allocation13] sm:$0xff] }
 0xb07   :  { %9087 = vrcp.f32 %v819_v34  ;;  %v240_v34 = vld [vmem:[#allocation13 + $0x8] sm:$0xff] }
 0xb11   :  { %v9088_v35 = vpop.eup %9087 }
 0xb12   :  { %v826_v39 = vmul.f32 %v9088_v35, %v824_v38 }
 0xb75   :  { %v829_v36 = vpop.permute.xlu0 %828 }
 0xb76   :  { %v831_v37 = vmul.f32 %v9088_v35, %v829_v36  ;;  %v241_v36 = vld [vmem:[#allocation13 + $0x10] sm:$0xff] }
 0xb78   :  { %833 = vrot.lane.b32.xlu1 %v831_v37, %s9928_s23  ;;  %v242_v37 = vld [vmem:[#allocation13 + $0x18] sm:$0xff] }
 0xbea   :  { %v834_v40 = vpop.permute.xlu1 %833 }
 0xbeb   :  { %v836_v41 = vadd.f32 %v834_v40, %v826_v39  ;;  %v10318_v39 = vpack.c.bf16 %v242_v37, %v241_v36 }
 0xbed   :  { %9089 = vtanh.f32 %v836_v41  ;;  %v931_v59 = vrot.slane %v836_v41, 7 }
 0xbf7   :  { %v9090_v42 = vpop.eup %9089 }
 0xbf8   :  { %839 = vrot.lane.b32.xlu0 %v9090_v42, %s9929_s28 }
 0xc6a   :  { %v840_v43 = vpop.permute.xlu0 %839 }
 0xc6b   :  { %v842_v44 = vmul.f32 %v9088_v35, %v840_v43  ;;  %v10314_v35 = vpack.c.bf16 %v240_v34, %v239_v33 }
 0xc6d   :  { %v844_v45 = vrot.slane %v842_v44, 3  ;;  %v1276_v46 = vsel %vm1275_vm5, %v1274_v25, %v842_v44 }
 0xc6f   :  { %845 = vrot.lane.b32.xlu1 %v844_v45, %s9930_s19 }
 0xce1   :  { %v846_v47 = vpop.permute.xlu1 %845 }
 0xce2   :  { %8297 = vmatmul.mubr.msk.f32.vlgmr.msra.gmra.mrb[4].mxu1 %vm270_vm1, %v846_v47 }
 0xce3   :  { %8822 = vmatpush3.bf16.msra.mxu1 %v10223_v14  ;;  %8310 = vmatprep.mubr.msk.f32.mxu1 %vm9925_vm0, %v9926_v1 }
 0xce4   :  { %8826 = vmatprep.subr.bf16.mxu1 %v9924_v0 }
 0xdb5   :  { %v915_v48 = vpop.f32.mrb[4].mxu1 }
 0xdb6   :  { %v920_v49 = vrot.slane %v915_v48, 4  ;;  %v8298_v50 = vpop.f32.mrb[5].mxu1 }
 0xdb8   :  { %v922_v51 = vadd.f32 %v920_v49, %v10247_v24 }
 0xdba   :  { %9091 = vtanh.f32 %v922_v51  ;;  %v7882_v53 = vmul.f32 -1.442695, %v922_v51 }
 0xdbc   :  { %9093 = vpow2.f32 %v7882_v53 }
 0xdc4   :  { %v9092_v52 = vpop.eup %9091 }
 0xdc5   :  { %935 = vrot.lane.b32.xlu0 %v9092_v52, %s9927_s3 }
 0xdc6   :  { %v9094_v54 = vpop.eup %9093 }
 0xdc7   :  { %v926_v55 = vadd.f32 1.0, %v9094_v54 }
 0xdc9   :  { %9095 = vrcp.f32 %v926_v55 }
 0xdd3   :  { %v9096_v56 = vpop.eup %9095 }
 0xdd4   :  { %v933_v60 = vmul.f32 %v9096_v56, %v931_v59  ;;  %v244_v59 = vld [vmem:[#allocation14 + $0x8] sm:$0xff] }
 0xe37   :  { %v936_v57 = vpop.permute.xlu0 %935 }
 0xe38   :  { %v938_v58 = vmul.f32 %v9096_v56, %v936_v57 }
 0xe3a   :  { %940 = vrot.lane.b32.xlu1 %v938_v58, %s9928_s23  ;;  %v243_v58 = vld [vmem:[#allocation14] sm:$0xff] }
 0xeac   :  { %v941_v61 = vpop.permute.xlu1 %940 }
 0xead   :  { %v943_v62 = vadd.f32 %v941_v61, %v933_v60  ;;  %v10336_v60 = vpack.c.bf16 %v244_v59, %v243_v58 }
 0xeaf   :  { %9097 = vtanh.f32 %v943_v62  ;;  %v1038_v23 = vrot.slane %v943_v62, 7 }
 0xeb9   :  { %v9098_v63 = vpop.eup %9097 }
 0xeba   :  { %946 = vrot.lane.b32.xlu0 %v9098_v63, %s9929_s28 }
 0xf2c   :  { %v947_v2 = vpop.permute.xlu0 %946 }
 0xf2d   :  { %v949_v3 = vmul.f32 %v9096_v56, %v947_v2 }
 0xf2f   :  { %v951_v4 = vrot.slane %v949_v3, 4  ;;  %v1278_v5 = vsel %vm1277_vm6, %v1276_v46, %v949_v3 }
 0xf31   :  { %952 = vrot.lane.b32.xlu1 %v951_v4, %s9930_s19 }
 0xfa3   :  { %v953_v6 = vpop.permute.xlu1 %952 }
 0xfa4   :  { %8304 = vmatmul.mubr.msk.f32.vlgmr.msra.gmra.mrb[8].mxu0 %vm270_vm1, %v953_v6  ;;  %v7889_v6 = vld [vmem:[#allocation16] ss:$0 sm:$0xff] }
 0xfa5   :  { %8825 = vmatpush3.bf16.msra.mxu0 %v10223_v14  ;;  %8317 = vmatprep.mubr.msk.f32.mxu0 %vm9925_vm0, %v9926_v1 }
 0xfa6   :  { %8832 = vmatprep.subr.bf16.mxu0 %v9924_v0 }
0x1077   :  { %v1022_v8 = vpop.f32.mrb[8].mxu0 }
0x1078   :  { %v1027_v9 = vrot.slane %v1022_v8, 3  ;;  %v8305_v10 = vpop.f32.mrb[9].mxu0 }
0x107a   :  { %v1029_v12 = vadd.f32 %v1027_v9, %v10247_v24 }
0x107c   :  { %9099 = vtanh.f32 %v1029_v12  ;;  %v7884_v15 = vmul.f32 -1.442695, %v1029_v12 }
0x107e   :  { %9101 = vpow2.f32 %v7884_v15 }
0x1086   :  { %v9100_v13 = vpop.eup %9099 }
0x1087   :  { %1042 = vrot.lane.b32.xlu0 %v9100_v13, %s9927_s3 }
0x1088   :  { %v9102_v16 = vpop.eup %9101 }
0x1089   :  { %v1033_v17 = vadd.f32 1.0, %v9102_v16 }
0x108b   :  { %9103 = vrcp.f32 %v1033_v17 }
0x1095   :  { %v9104_v18 = vpop.eup %9103 }
0x1096   :  { %v1040_v25 = vmul.f32 %v9104_v18, %v1038_v23 }
0x10f9   :  { %v1043_v21 = vpop.permute.xlu0 %1042 }
0x10fa   :  { %v1045_v22 = vmul.f32 %v9104_v18, %v1043_v21 }
0x10fc   :  { %1047 = vrot.lane.b32.xlu1 %v1045_v22, %s9928_s23 }
0x116e   :  { %v1048_v26 = vpop.permute.xlu1 %1047 }
0x116f   :  { %v1050_v27 = vadd.f32 %v1048_v26, %v1040_v25 }
0x1171   :  { %9105 = vtanh.f32 %v1050_v27  ;;  %v1145_v53 = vrot.slane %v1050_v27, 7 }
0x117b   :  { %v9106_v28 = vpop.eup %9105 }
0x117c   :  { %1053 = vrot.lane.b32.xlu0 %v9106_v28, %s9929_s28 }
0x11ee   :  { %v1054_v29 = vpop.permute.xlu0 %1053 }
0x11ef   :  { %v1056_v30 = vmul.f32 %v9104_v18, %v1054_v29 }
0x11f1   :  { %v1058_v31 = vrot.slane %v1056_v30, 5  ;;  %v1280_v32 = vsel %vm1279_vm7, %v1278_v5, %v1056_v30 }
0x11f3   :  { %1059 = vrot.lane.b32.xlu1 %v1058_v31, %s9930_s19 }
0x1265   :  { %v1060_v38 = vpop.permute.xlu1 %1059 }
0x1266   :  { %8311 = vmatmul.mubr.msk.f32.vlgmr.msra.gmra.mrb[6].mxu1 %vm270_vm1, %v1060_v38 }
0x1267   :  { %8828 = vmatpush3.bf16.msra.mxu1 %v10314_v35  ;;  %8328 = vmatprep.mubr.msk.f32.mxu1 %vm9925_vm0, %v9926_v1 }
0x1268   :  { %8829 = vmatprep.subr.bf16.mxu1 %v9924_v0 }
0x126b   :  { %8831 = vmatpush3.bf16.msra.mxu1 %v10318_v39 }
0x126c   :  { %8838 = vmatprep.subr.bf16.mxu1 %v9924_v0 }
0x126e   :  { %8329 = vmatmul.mubr.msk.f32.vlgmr.msra.gmra.mrb[8].mxu1 %vm351_vm2, %v10237_v19 }
0x126f   :  { %8349 = vmatprep.mubr.msk.f32.mxu1 %vm9925_vm0, %v9926_v1  ;;  %8840 = vmatpush3.bf16.msra.mxu1 %v10336_v60 }
0x1270   :  { %8844 = vmatprep.subr.bf16.mxu1 %v9924_v0 }
0x1339   :  { %v1129_v40 = vpop.f32.mrb[6].mxu1 }
0x133a   :  { %v1134_v41 = vrot.slane %v1129_v40, 2  ;;  %v8312_v42 = vpop.f32.mrb[7].mxu1 }
0x133c   :  { %v1136_v43 = vadd.f32 %v1134_v41, %v10247_v24 }
0x133e   :  { %9107 = vtanh.f32 %v1136_v43  ;;  %v7886_v47 = vmul.f32 -1.442695, %v1136_v43 }
0x1340   :  { %9109 = vpow2.f32 %v7886_v47 }
0x1341   :  { %v1357_v44 = vpop.f32.mrb[8].mxu1 }
0x1342   :  { %v8330_v45 = vpop.f32.mrb[9].mxu1  ;;  %v10358_v9 = vadd.f32 %v7889_v6, %v1357_v44 }
0x1348   :  { %v9108_v46 = vpop.eup %9107 }
0x1349   :  { %1149 = vrot.lane.b32.xlu0 %v9108_v46, %s9927_s3 }
0x134a   :  { %v9110_v48 = vpop.eup %9109 }
0x134b   :  { %v1140_v49 = vadd.f32 1.0, %v9110_v48 }
0x134d   :  { %9111 = vrcp.f32 %v1140_v49 }
0x1357   :  { %v9112_v50 = vpop.eup %9111 }
0x1358   :  { %v1147_v54 = vmul.f32 %v9112_v50, %v1145_v53 }
0x13bb   :  { %v1150_v51 = vpop.permute.xlu0 %1149 }
0x13bc   :  { %v1152_v52 = vmul.f32 %v9112_v50, %v1150_v51 }
0x13be   :  { %1154 = vrot.lane.b32.xlu1 %v1152_v52, %s9928_s23 }
0x1430   :  { %v1155_v55 = vpop.permute.xlu1 %1154 }
0x1431   :  { %v10332_v56 = vadd.f32 %v1155_v55, %v1147_v54 }
0x1433   :  { %9113 = vtanh.f32 %v10332_v56 }
0x143d   :  { %v9114_v57 = vpop.eup %9113 }
0x143e   :  { %1160 = vrot.lane.b32.xlu0 %v9114_v57, %s9929_s28 }
0x14b0   :  { %v1161_v61 = vpop.permute.xlu0 %1160 }
0x14b1   :  { %v1163_v62 = vmul.f32 %v9112_v50, %v1161_v61 }
0x14b3   :  { %v1165_v63 = vrot.slane %v1163_v62, 6  ;;  %v10341_v2 = vsel %vm1281_vm8, %v1280_v32, %v1163_v62 }
0x14b5   :  { %1166 = vrot.lane.b32.xlu1 %v1165_v63, %s9930_s19 }
0x1527   :  { %v1167_v3 = vpop.permute.xlu1 %1166 }
0x1528   :  { %8318 = vmatmul.mubr.msk.f32.vlgmr.msra.gmra.mrb[10].mxu0 %vm270_vm1, %v1167_v3 }
0x1529   :  { %8834 = vmatpush3.bf16.msra.mxu0 %v10336_v60  ;;  %8335 = vmatprep.mubr.msk.f32.mxu0 %vm9925_vm0, %v9926_v1 }
0x152a   :  { %8835 = vmatprep.subr.bf16.mxu0 %v9924_v0 }
0x152c   :  { %8336 = vmatmul.mubr.f32.vlgmr.msra.gmra.mrb[12].mxu0 %v9926_v1 }
0x152d   :  { %8837 = vmatpush3.bf16.msra.mxu0 %v10336_v60  ;;  %8342 = vmatprep.mubr.msk.f32.mxu0 %vm9925_vm0, %v9926_v1 }
0x152e   :  { %8841 = vmatprep.subr.bf16.mxu0 %v9924_v0 }
0x15fb   :  { %v10354_v4 = vpop.f32.mrb[10].mxu0 }
0x15fc   :  { %v8319_v5 = vpop.f32.mrb[11].mxu0 }
0x15ff   :  { %v10356_v8 = vpop.f32.mrb[12].mxu0 }
0x1600   :  { %v1432_v10 = vrot.slane %v10356_v8, 1  ;;  %v8337_v12 = vpop.f32.mrb[13].mxu0 }
0x1602   :  { %v1434_v13 = vadd.f32 %v1432_v10, %v10358_v9 }
0x1604   :  { %9115 = vtanh.f32 %v1434_v13  ;;  %v7891_v16 = vmul.f32 -1.442695, %v1434_v13 }
0x1606   :  { %9117 = vpow2.f32 %v7891_v16 }
0x160e   :  { %v9116_v15 = vpop.eup %9115 }
0x160f   :  { %1444 = vrot.lane.b32.xlu0 %v9116_v15, %s9927_s3 }
0x1610   :  { %v9118_v17 = vpop.eup %9117 }
0x1611   :  { %v1438_v18 = vadd.f32 1.0, %v9118_v17 }
0x1613   :  { %9119 = vrcp.f32 %v1438_v18 }
0x161d   :  { %v9120_v21 = vpop.eup %9119 }
0x161e   :  { %v1442_v25 = vmul.f32 0.0, %v9120_v21 }
0x1681   :  { %v1445_v22 = vpop.permute.xlu0 %1444 }
0x1682   :  { %v1447_v23 = vmul.f32 %v9120_v21, %v1445_v22 }
0x1684   :  { %1449 = vrot.lane.b32.xlu1 %v1447_v23, %s9928_s23 }
0x16f6   :  { %v1450_v26 = vpop.permute.xlu1 %1449 }
0x16f7   :  { %v1452_v27 = vadd.f32 %v1450_v26, %v1442_v25 }
0x16f9   :  { %9121 = vtanh.f32 %v1452_v27  ;;  %v1547_v46 = vrot.slane %v1452_v27, 1 }
0x1703   :  { %v9122_v28 = vpop.eup %9121 }
0x1704   :  { %1455 = vrot.lane.b32.xlu0 %v9122_v28, %s9929_s28 }
0x1776   :  { %v1456_v29 = vpop.permute.xlu0 %1455 }
0x1777   :  { %v10367_v30 = vmul.f32 %v9120_v21, %v1456_v29 }
0x1779   :  { %v1460_v31 = vrot.slane %v10367_v30, 7 }
0x177b   :  { %1461 = vrot.lane.b32.xlu1 %v1460_v31, %s9930_s19 }
0x17ed   :  { %v1462_v32 = vpop.permute.xlu1 %1461 }
0x17ee   :  { %8343 = vmatmul.mubr.msk.f32.vlgmr.msra.gmra.mrb[14].mxu0 %vm270_vm1, %v1462_v32 }
0x17ef   :  { %8843 = vmatpush3.bf16.msra.mxu0 %v10336_v60  ;;  %8356 = vmatprep.mubr.msk.f32.mxu0 %vm9925_vm0, %v9926_v1 }
0x17f0   :  { %8847 = vmatprep.subr.bf16.mxu0 %v9924_v0 }
0x18c1   :  { %v1531_v33 = vpop.f32.mrb[14].mxu0 }
0x18c2   :  { %v1536_v34 = vrot.slane %v1531_v33, 2  ;;  %v8344_v36 = vpop.f32.mrb[15].mxu0 }
0x18c4   :  { %v1538_v37 = vadd.f32 %v1536_v34, %v10358_v9 }
0x18c6   :  { %9123 = vtanh.f32 %v1538_v37  ;;  %v7893_v40 = vmul.f32 -1.442695, %v1538_v37 }
0x18c8   :  { %9125 = vpow2.f32 %v7893_v40 }
0x18d0   :  { %v9124_v38 = vpop.eup %9123 }
0x18d1   :  { %1551 = vrot.lane.b32.xlu0 %v9124_v38, %s9927_s3 }
0x18d2   :  { %v9126_v41 = vpop.eup %9125 }
0x18d3   :  { %v1542_v42 = vadd.f32 1.0, %v9126_v41 }
0x18d5   :  { %9127 = vrcp.f32 %v1542_v42 }
0x18df   :  { %v9128_v43 = vpop.eup %9127 }
0x18e0   :  { %v1549_v47 = vmul.f32 %v9128_v43, %v1547_v46 }
0x1943   :  { %v1552_v44 = vpop.permute.xlu0 %1551 }
0x1944   :  { %v1554_v45 = vmul.f32 %v9128_v43, %v1552_v44 }
0x1946   :  { %1556 = vrot.lane.b32.xlu1 %v1554_v45, %s9928_s23 }
0x19b8   :  { %v1557_v48 = vpop.permute.xlu1 %1556 }
0x19b9   :  { %v1559_v49 = vadd.f32 %v1557_v48, %v1549_v47 }
0x19bb   :  { %9129 = vtanh.f32 %v1559_v49  ;;  %v1654_v13 = vrot.slane %v1559_v49, 1 }
0x19c5   :  { %v9130_v50 = vpop.eup %9129 }
0x19c6   :  { %1562 = vrot.lane.b32.xlu0 %v9130_v50, %s9929_s28 }
0x1a38   :  { %v1563_v51 = vpop.permute.xlu0 %1562 }
0x1a39   :  { %v10380_v52 = vmul.f32 %v9128_v43, %v1563_v51 }
0x1a3b   :  { %v1567_v53 = vrot.slane %v10380_v52, 6 }
0x1a3d   :  { %1568 = vrot.lane.b32.xlu1 %v1567_v53, %s9930_s19 }
0x1aaf   :  { %v1569_v54 = vpop.permute.xlu1 %1568 }
0x1ab0   :  { %8350 = vmatmul.mubr.msk.f32.vlgmr.msra.gmra.mrb[10].mxu1 %vm270_vm1, %v1569_v54 }
0x1ab1   :  { %8846 = vmatpush3.bf16.msra.mxu1 %v10336_v60  ;;  %8363 = vmatprep.mubr.msk.f32.mxu1 %vm9925_vm0, %v9926_v1 }
0x1ab2   :  { %8850 = vmatprep.subr.bf16.mxu1 %v9924_v0 }
0x1b83   :  { %v1638_v55 = vpop.f32.mrb[10].mxu1 }
0x1b84   :  { %v1643_v57 = vrot.slane %v1638_v55, 3  ;;  %v8351_v58 = vpop.f32.mrb[11].mxu1 }
0x1b86   :  { %v1645_v59 = vadd.f32 %v1643_v57, %v10358_v9 }
0x1b88   :  { %9131 = vtanh.f32 %v1645_v59  ;;  %v7895_v62 = vmul.f32 -1.442695, %v1645_v59 }
0x1b8a   :  { %9133 = vpow2.f32 %v7895_v62 }
0x1b92   :  { %v9132_v61 = vpop.eup %9131 }
0x1b93   :  { %1658 = vrot.lane.b32.xlu0 %v9132_v61, %s9927_s3 }
0x1b94   :  { %v9134_v63 = vpop.eup %9133 }
0x1b95   :  { %v1649_v3 = vadd.f32 1.0, %v9134_v63 }
0x1b97   :  { %9135 = vrcp.f32 %v1649_v3 }
0x1ba1   :  { %v9136_v5 = vpop.eup %9135 }
0x1ba2   :  { %v1656_v15 = vmul.f32 %v9136_v5, %v1654_v13 }
0x1c05   :  { %v1659_v6 = vpop.permute.xlu0 %1658 }
0x1c06   :  { %v1661_v12 = vmul.f32 %v9136_v5, %v1659_v6 }
0x1c08   :  { %1663 = vrot.lane.b32.xlu1 %v1661_v12, %s9928_s23 }
0x1c7a   :  { %v1664_v16 = vpop.permute.xlu1 %1663 }
0x1c7b   :  { %v1666_v17 = vadd.f32 %v1664_v16, %v1656_v15 }
0x1c7d   :  { %9137 = vtanh.f32 %v1666_v17  ;;  %v1761_v40 = vrot.slane %v1666_v17, 1 }
0x1c87   :  { %v9138_v18 = vpop.eup %9137 }
0x1c88   :  { %1669 = vrot.lane.b32.xlu0 %v9138_v18, %s9929_s28 }
0x1cfa   :  { %v1670_v21 = vpop.permute.xlu0 %1669 }
0x1cfb   :  { %v10393_v22 = vmul.f32 %v9136_v5, %v1670_v21 }
0x1cfd   :  { %v1674_v23 = vrot.slane %v10393_v22, 5 }
0x1cff   :  { %1675 = vrot.lane.b32.xlu1 %v1674_v23, %s9930_s19 }
0x1d71   :  { %v1676_v25 = vpop.permute.xlu1 %1675 }
0x1d72   :  { %8357 = vmatmul.mubr.msk.f32.vlgmr.msra.gmra.mrb[16].mxu0 %vm270_vm1, %v1676_v25 }
0x1d73   :  { %8849 = vmatpush3.bf16.msra.mxu0 %v10336_v60  ;;  %8370 = vmatprep.mubr.msk.f32.mxu0 %vm9925_vm0, %v9926_v1 }
0x1d74   :  { %8853 = vmatprep.subr.bf16.mxu0 %v9924_v0 }
0x1e45   :  { %v1745_v26 = vpop.f32.mrb[16].mxu0 }
0x1e46   :  { %v1750_v27 = vrot.slane %v1745_v26, 4  ;;  %v8358_v28 = vpop.f32.mrb[17].mxu0 }
0x1e48   :  { %v1752_v29 = vadd.f32 %v1750_v27, %v10358_v9 }
0x1e4a   :  { %9139 = vtanh.f32 %v1752_v29  ;;  %v7897_v32 = vmul.f32 -1.442695, %v1752_v29 }
0x1e4c   :  { %9141 = vpow2.f32 %v7897_v32 }
0x1e54   :  { %v9140_v31 = vpop.eup %9139 }
0x1e55   :  { %1765 = vrot.lane.b32.xlu0 %v9140_v31, %s9927_s3 }
0x1e56   :  { %v9142_v33 = vpop.eup %9141 }
0x1e57   :  { %v1756_v34 = vadd.f32 1.0, %v9142_v33 }
0x1e59   :  { %9143 = vrcp.f32 %v1756_v34 }
0x1e63   :  { %v9144_v36 = vpop.eup %9143 }
0x1e64   :  { %v1763_v41 = vmul.f32 %v9144_v36, %v1761_v40 }
0x1ec7   :  { %v1766_v37 = vpop.permute.xlu0 %1765 }
0x1ec8   :  { %v1768_v38 = vmul.f32 %v9144_v36, %v1766_v37 }
0x1eca   :  { %1770 = vrot.lane.b32.xlu1 %v1768_v38, %s9928_s23 }
0x1f3c   :  { %v1771_v42 = vpop.permute.xlu1 %1770 }
0x1f3d   :  { %v1773_v43 = vadd.f32 %v1771_v42, %v1763_v41 }
0x1f3f   :  { %9145 = vtanh.f32 %v1773_v43  ;;  %v1868_v63 = vrot.slane %v1773_v43, 1 }
0x1f49   :  { %v9146_v44 = vpop.eup %9145 }
0x1f4a   :  { %1776 = vrot.lane.b32.xlu0 %v9146_v44, %s9929_s28 }
0x1fbc   :  { %v1777_v45 = vpop.permute.xlu0 %1776 }
0x1fbd   :  { %v10406_v46 = vmul.f32 %v9144_v36, %v1777_v45 }
0x1fbf   :  { %v1781_v47 = vrot.slane %v10406_v46, 4 }
0x1fc1   :  { %1782 = vrot.lane.b32.xlu1 %v1781_v47, %s9930_s19 }
0x2033   :  { %v1783_v48 = vpop.permute.xlu1 %1782 }
0x2034   :  { %8364 = vmatmul.mubr.msk.f32.vlgmr.msra.gmra.mrb[12].mxu1 %vm270_vm1, %v1783_v48 }
0x2035   :  { %8852 = vmatpush3.bf16.msra.mxu1 %v10336_v60  ;;  %8377 = vmatprep.mubr.msk.f32.mxu1 %vm9925_vm0, %v9926_v1 }
0x2036   :  { %8856 = vmatprep.subr.bf16.mxu1 %v9924_v0 }
0x2107   :  { %v1852_v49 = vpop.f32.mrb[12].mxu1 }
0x2108   :  { %v1857_v50 = vrot.slane %v1852_v49, 5  ;;  %v8365_v51 = vpop.f32.mrb[13].mxu1 }
0x210a   :  { %v1859_v53 = vadd.f32 %v1857_v50, %v10358_v9 }
0x210c   :  { %9147 = vtanh.f32 %v1859_v53  ;;  %v7899_v55 = vmul.f32 -1.442695, %v1859_v53 }
0x210e   :  { %9149 = vpow2.f32 %v7899_v55 }
0x2116   :  { %v9148_v54 = vpop.eup %9147 }
0x2117   :  { %1872 = vrot.lane.b32.xlu0 %v9148_v54, %s9927_s3 }
0x2118   :  { %v9150_v57 = vpop.eup %9149 }
0x2119   :  { %v1863_v58 = vadd.f32 1.0, %v9150_v57 }
0x211b   :  { %9151 = vrcp.f32 %v1863_v58 }
0x2125   :  { %v9152_v59 = vpop.eup %9151 }
0x2126   :  { %v1870_v3 = vmul.f32 %v9152_v59, %v1868_v63 }
0x2189   :  { %v1873_v61 = vpop.permute.xlu0 %1872 }
0x218a   :  { %v1875_v62 = vmul.f32 %v9152_v59, %v1873_v61 }
0x218c   :  { %1877 = vrot.lane.b32.xlu1 %v1875_v62, %s9928_s23 }
0x21fe   :  { %v1878_v5 = vpop.permute.xlu1 %1877 }
0x21ff   :  { %v1880_v6 = vadd.f32 %v1878_v5, %v1870_v3  ;;  %v1241_v5 = vrot.slane %v10354_v4, 1 }
0x2201   :  { %9153 = vtanh.f32 %v1880_v6  ;;  %v1975_v34 = vrot.slane %v1880_v6, 1  ;;  %v1243_v6 = vadd.f32 %v1241_v5, %v10247_v24 }
0x220b   :  { %v9154_v12 = vpop.eup %9153 }
0x220c   :  { %1883 = vrot.lane.b32.xlu0 %v9154_v12, %s9929_s28 }
0x227e   :  { %v1884_v13 = vpop.permute.xlu0 %1883 }
0x227f   :  { %v10419_v15 = vmul.f32 %v9152_v59, %v1884_v13 }
0x2281   :  { %v1888_v16 = vrot.slane %v10419_v15, 3 }
0x2283   :  { %1889 = vrot.lane.b32.xlu1 %v1888_v16, %s9930_s19 }
0x22f5   :  { %v1890_v17 = vpop.permute.xlu1 %1889 }
0x22f6   :  { %8371 = vmatmul.mubr.msk.f32.vlgmr.msra.gmra.mrb[18].mxu0 %vm270_vm1, %v1890_v17 }
0x22f7   :  { %8855 = vmatpush3.bf16.msra.mxu0 %v10336_v60  ;;  %8384 = vmatprep.mubr.msk.f32.mxu0 %vm9925_vm0, %v9926_v1 }
0x22f8   :  { %8862 = vmatprep.subr.bf16.mxu0 %v9924_v0 }
0x23c9   :  { %v1959_v18 = vpop.f32.mrb[18].mxu0 }
0x23ca   :  { %v1964_v21 = vrot.slane %v1959_v18, 6  ;;  %v8372_v23 = vpop.f32.mrb[19].mxu0  ;;  %v7888_v18 = vmul.f32 -1.442695, %v1243_v6 }
0x23cc   :  { %v1966_v25 = vadd.f32 %v1964_v21, %v10358_v9 }
0x23ce   :  { %9155 = vtanh.f32 %v1966_v25  ;;  %v7901_v27 = vmul.f32 -1.442695, %v1966_v25 }
0x23d0   :  { %9157 = vpow2.f32 %v7901_v27  ;;  %v1252_v27 = vrot.slane %v10332_v56, 7 }
0x23d8   :  { %v9156_v26 = vpop.eup %9155 }
0x23d9   :  { %1979 = vrot.lane.b32.xlu0 %v9156_v26, %s9927_s3 }
0x23da   :  { %v9158_v28 = vpop.eup %9157 }
0x23db   :  { %v1970_v29 = vadd.f32 1.0, %v9158_v28 }
0x23dd   :  { %9159 = vrcp.f32 %v1970_v29 }
0x23e7   :  { %v9160_v31 = vpop.eup %9159 }
0x23e8   :  { %v1977_v36 = vmul.f32 %v9160_v31, %v1975_v34 }
0x244b   :  { %v1980_v32 = vpop.permute.xlu0 %1979 }
0x244c   :  { %v1982_v33 = vmul.f32 %v9160_v31, %v1980_v32 }
0x244e   :  { %1984 = vrot.lane.b32.xlu1 %v1982_v33, %s9928_s23 }
0x24c0   :  { %v1985_v37 = vpop.permute.xlu1 %1984 }
0x24c1   :  { %v1987_v38 = vadd.f32 %v1985_v37, %v1977_v36 }
0x24c3   :  { %9161 = vtanh.f32 %v1987_v38  ;;  %v2082_v59 = vrot.slane %v1987_v38, 1 }
0x24cd   :  { %v9162_v40 = vpop.eup %9161 }
0x24ce   :  { %1990 = vrot.lane.b32.xlu0 %v9162_v40, %s9929_s28 }
0x2540   :  { %v1991_v41 = vpop.permute.xlu0 %1990 }
0x2541   :  { %v10432_v42 = vmul.f32 %v9160_v31, %v1991_v41 }
0x2543   :  { %v1995_v43 = vrot.slane %v10432_v42, 2 }
0x2545   :  { %1996 = vrot.lane.b32.xlu1 %v1995_v43, %s9930_s19 }
0x25b7   :  { %v1997_v44 = vpop.permute.xlu1 %1996 }
0x25b8   :  { %8378 = vmatmul.mubr.msk.f32.vlgmr.msra.gmra.mrb[14].mxu1 %vm270_vm1, %v1997_v44 }
0x25b9   :  { %8395 = vmatprep.mubr.msk.f32.mxu1 %vm9925_vm0, %v9926_v1 }
0x268b   :  { %v2066_v45 = vpop.f32.mrb[14].mxu1 }
0x268c   :  { %v2071_v47 = vrot.slane %v2066_v45, 7  ;;  %v8379_v48 = vpop.f32.mrb[15].mxu1 }
0x268e   :  { %v2073_v49 = vadd.f32 %v2071_v47, %v10358_v9 }
0x2690   :  { %9163 = vtanh.f32 %v2073_v49  ;;  %v7903_v51 = vmul.f32 -1.442695, %v2073_v49 }
0x2692   :  { %9165 = vpow2.f32 %v7903_v51  ;;  %v247_v51 = vld [vmem:[%s11274_s10 + $0x8] sm:$0xff] }
0x269a   :  { %v9164_v50 = vpop.eup %9163 }
0x269b   :  { %2086 = vrot.lane.b32.xlu0 %v9164_v50, %s9927_s3  ;;  %v246_v50 = vld [vmem:[%s11274_s10] sm:$0xff] }
0x269c   :  { %v9166_v53 = vpop.eup %9165 }
0x269d   :  { %v2077_v54 = vadd.f32 1.0, %v9166_v53  ;;  %v248_v53 = vld [vmem:[%s11274_s10 + $0x10] sm:$0xff] }
0x269f   :  { %9167 = vrcp.f32 %v2077_v54  ;;  %v10468_v54 = vpack.c.bf16 %v247_v51, %v246_v50 }
0x26a1   :  { %8858 = vmatpush3.bf16.msra.mxu1 %v10468_v54 }
0x26a2   :  { %8859 = vmatprep.subr.bf16.mxu1 %v9924_v0 }
0x26a9   :  { %v9168_v55 = vpop.eup %9167 }
0x26aa   :  { %v2084_v61 = vmul.f32 %v9168_v55, %v2082_v59 }
0x270d   :  { %v2087_v57 = vpop.permute.xlu0 %2086 }
0x270e   :  { %v2089_v58 = vmul.f32 %v9168_v55, %v2087_v57  ;;  %v250_v57 = vld [vmem:[#allocation17] sm:$0xff] }
0x2710   :  { %2091 = vrot.lane.b32.xlu1 %v2089_v58, %s9928_s23  ;;  %v251_v58 = vld [vmem:[#allocation17 + $0x8] sm:$0xff] }
0x2711   :  { %v10473_v59 = vpack.c.bf16 %v251_v58, %v250_v57 }
0x2782   :  { %v2092_v62 = vpop.permute.xlu1 %2091 }
0x2783   :  { %v2094_v63 = vadd.f32 %v2092_v62, %v2084_v61 }
0x2785   :  { %9169 = vtanh.f32 %v2094_v63  ;;  %v2186_v45 = vrot.slane %v2094_v63, 1 }
0x2786   :  { %9171 = vtanh.f32 %v1243_v6 }
0x2787   :  { %9173 = vpow2.f32 %v7888_v18 }
0x278f   :  { %v9170_v3 = vpop.eup %9169 }
0x2790   :  { %2097 = vrot.lane.b32.xlu0 %v9170_v3, %s9929_s28  ;;  %v9172_v17 = vpop.eup %9171 }
0x2791   :  { %v9174_v21 = vpop.eup %9173 }
0x2792   :  { %v1247_v23 = vadd.f32 1.0, %v9174_v21 }
0x2794   :  { %9175 = vrcp.f32 %v1247_v23 }
0x279e   :  { %v9176_v24 = vpop.eup %9175 }
0x279f   :  { %v1254_v28 = vmul.f32 %v9176_v24, %v1252_v27 }
0x2802   :  { %v2098_v12 = vpop.permute.xlu0 %2097 }
0x2803   :  { %v10445_v13 = vmul.f32 %v9168_v55, %v2098_v12  ;;  %v249_v55 = vld [vmem:[%s11274_s10 + $0x18] sm:$0xff] }
0x2804   :  { %v10476_v63 = vpack.c.bf16 %v249_v55, %v248_v53 }
0x2805   :  { %v2102_v16 = vrot.slane %v10445_v13, 1 }
0x2806   :  { %8861 = vmatpush3.bf16.msra.mxu1 %v10476_v63 }
0x2807   :  { %2103 = vrot.lane.b32.xlu1 %v2102_v16, %s9930_s19  ;;  %8868 = vmatprep.subr.bf16.mxu1 %v9924_v0 }
0x280b   :  { %1256 = vrot.lane.b32.xlu1 %v9172_v17, %s9927_s3 }
0x2879   :  { %v2104_v25 = vpop.permute.xlu1 %2103 }
0x287a   :  { %8385 = vmatmul.mubr.msk.f32.vlgmr.msra.gmra.mrb[20].mxu0 %vm270_vm1, %v2104_v25 }
0x287b   :  { %8402 = vmatprep.mubr.msk.f32.mxu0 %vm9925_vm0, %v9926_v1  ;;  %8864 = vmatpush3.bf16.msra.mxu0 %v10473_v59 }
0x287c   :  { %8865 = vmatprep.subr.bf16.mxu0 %v9924_v0 }
0x287d   :  { %v1257_v4 = vpop.permute.xlu1 %1256 }
0x287e   :  { %v1259_v26 = vmul.f32 %v9176_v24, %v1257_v4  ;;  %8403 = vmatmul.mubr.f32.vlgmr.msra.gmra.mrb[22].mxu0 %v9926_v1 }
0x287f   :  { %8867 = vmatpush3.bf16.msra.mxu0 %v10473_v59  ;;  %8409 = vmatprep.mubr.msk.f32.mxu0 %vm9925_vm0, %v9926_v1 }
0x2880   :  { %1261 = vrot.lane.b32.xlu1 %v1259_v26, %s9928_s23  ;;  %8871 = vmatprep.subr.bf16.mxu0 %v9924_v0 }
0x28f2   :  { %v1262_v29 = vpop.permute.xlu1 %1261 }
0x28f3   :  { %v1264_v31 = vadd.f32 %v1262_v29, %v1254_v28 }
0x28f5   :  { %9177 = vtanh.f32 %v1264_v31 }
0x28ff   :  { %v9178_v32 = vpop.eup %9177 }
0x2900   :  { %1267 = vrot.lane.b32.xlu1 %v9178_v32, %s9929_s28 }
0x294d   :  { %v2173_v33 = vpop.f32.mrb[20].mxu0 }
0x294e   :  { %v2177_v34 = vadd.f32 %v2173_v33, %v10358_v9  ;;  %v8386_v36 = vpop.f32.mrb[21].mxu0 }
0x2950   :  { %9179 = vtanh.f32 %v2177_v34  ;;  %v7905_v38 = vmul.f32 -1.442695, %v2177_v34 }
0x2952   :  { %9181 = vpow2.f32 %v7905_v38 }
0x295a   :  { %v9180_v37 = vpop.eup %9179 }
0x295b   :  { %2190 = vrot.lane.b32.xlu0 %v9180_v37, %s9927_s3 }
0x295c   :  { %v9182_v40 = vpop.eup %9181 }
0x295d   :  { %v2181_v41 = vadd.f32 1.0, %v9182_v40 }
0x295f   :  { %9183 = vrcp.f32 %v2181_v41 }
0x2969   :  { %v9184_v56 = vpop.eup %9183 }
0x296a   :  { %v2188_v47 = vmul.f32 %v9184_v56, %v2186_v45 }
0x2972   :  { %v1268_v9 = vpop.permute.xlu1 %1267 }
0x2973   :  { %v1270_v62 = vmul.f32 %v9176_v24, %v1268_v9 }
0x2975   :  { %v1284_v3 = vsel %vm1283_vm9, %v10341_v2, %v1270_v62 }
0x29cd   :  { %v2191_v43 = vpop.permute.xlu0 %2190 }
0x29ce   :  { %v2193_v44 = vmul.f32 %v9184_v56, %v2191_v43 }
0x29d0   :  { %2195 = vrot.lane.b32.xlu0 %v2193_v44, %s9928_s23 }
0x2a42   :  { %v2196_v48 = vpop.permute.xlu0 %2195 }
0x2a43   :  { %v2198_v49 = vadd.f32 %v2196_v48, %v2188_v47 }
0x2a45   :  { %9185 = vtanh.f32 %v2198_v49 }
0x2a4f   :  { %v9186_v61 = vpop.eup %9185 }
0x2a50   :  { %2201 = vrot.lane.b32.xlu0 %v9186_v61, %s9929_s28 }
0x2a54   :  { %2213 = vrot.lane.b32.xlu0 %v1284_v3, %s9930_s19 }
0x2ac2   :  { %v2202_v5 = vpop.permute.xlu0 %2201 }
0x2ac3   :  { %v2204_v6 = vmul.f32 %v9184_v56, %v2202_v5 }
0x2ac5   :  { %v2205_v2 = vsel %vm1271_vm3, %v2204_v6, %v10445_v13 }
0x2ac6   :  { %v2206_v12 = vsel %vm1273_vm4, %v2205_v2, %v10432_v42  ;;  %v2214_v13 = vpop.permute.xlu0 %2213 }
0x2ac7   :  { %v2207_v16 = vsel %vm1275_vm5, %v2206_v12, %v10419_v15 }
0x2ac8   :  { %v2208_v17 = vsel %vm1277_vm6, %v2207_v16, %v10406_v46 }
0x2ac9   :  { %v2209_v18 = vsel %vm1279_vm7, %v2208_v17, %v10393_v22  ;;  %v7906_v22 = vld [vmem:[#allocation19] ss:$0 sm:$0xff] }
0x2aca   :  { %v2210_v21 = vsel %vm1281_vm8, %v2209_v18, %v10380_v52  ;;  %v10516_v52 = vpop.f32.mrb[22].mxu0 }
0x2acb   :  { %v2211_v23 = vsel %vm1283_vm9, %v2210_v21, %v10367_v30  ;;  %v8404_v30 = vpop.f32.mrb[23].mxu0 }
0x2acc   :  { %2217 = vrot.lane.b32.xlu1 %v2211_v23, %s9927_s3 }
0x2b3e   :  { %v2218_v25 = vpop.permute.xlu1 %2217 }
0x2b3f   :  { %v10508_v42 = vsel %vm270_vm1, %v2214_v13, %v2218_v25 }
0x2b40   :  { %8396 = vmatmul.mubr.msk.f32.vlgmr.msra.gmra.mrb[16].mxu1 %vm351_vm2, %v10508_v42 }
0x2b41   :  { %8870 = vmatpush3.bf16.msra.mxu1 %v10473_v59  ;;  %8416 = vmatprep.mubr.msk.f32.mxu1 %vm9925_vm0, %v9926_v1 }
0x2b42   :  { %8874 = vmatprep.subr.bf16.mxu1 %v9924_v0 }
0x2c13   :  { %v2296_v46 = vpop.f32.mrb[16].mxu1 }
0x2c14   :  { %v10518_v15 = vadd.f32 %v7906_v22, %v2296_v46  ;;  %v8397_v24 = vpop.f32.mrb[17].mxu1 }
0x2c16   :  { %v2370_v4 = vadd.f32 %v10516_v52, %v10518_v15 }
0x2c18   :  { %9187 = vtanh.f32 %v2370_v4  ;;  %v7908_v27 = vmul.f32 -1.442695, %v2370_v4 }
0x2c1a   :  { %9189 = vpow2.f32 %v7908_v27 }
0x2c22   :  { %v9188_v26 = vpop.eup %9187 }
0x2c23   :  { %2380 = vrot.lane.b32.xlu0 %v9188_v26, %s9927_s3 }
0x2c24   :  { %v9190_v28 = vpop.eup %9189 }
0x2c25   :  { %v2374_v29 = vadd.f32 1.0, %v9190_v28 }
0x2c27   :  { %9191 = vrcp.f32 %v2374_v29 }
0x2c31   :  { %v9192_v31 = vpop.eup %9191 }
0x2c32   :  { %v2378_v34 = vmul.f32 0.0, %v9192_v31 }
0x2c95   :  { %v2381_v32 = vpop.permute.xlu0 %2380 }
0x2c96   :  { %v2383_v33 = vmul.f32 %v9192_v31, %v2381_v32 }
0x2c98   :  { %2385 = vrot.lane.b32.xlu1 %v2383_v33, %s9928_s23 }
0x2d0a   :  { %v2386_v36 = vpop.permute.xlu1 %2385 }
0x2d0b   :  { %v2388_v37 = vadd.f32 %v2386_v36, %v2378_v34 }
0x2d0d   :  { %9193 = vtanh.f32 %v2388_v37  ;;  %v2482_v57 = vrot.slane %v2388_v37, 7 }
0x2d17   :  { %v9194_v38 = vpop.eup %9193 }
0x2d18   :  { %2391 = vrot.lane.b32.xlu0 %v9194_v38, %s9929_s28 }
0x2d8a   :  { %v2392_v40 = vpop.permute.xlu0 %2391 }
0x2d8b   :  { %v10525_v41 = vmul.f32 %v9192_v31, %v2392_v40 }
0x2d8d   :  { %2396 = vrot.lane.b32.xlu1 %v10525_v41, %s9930_s19 }
0x2dff   :  { %v2397_v56 = vpop.permute.xlu1 %2396 }
0x2e00   :  { %8410 = vmatmul.mubr.msk.f32.vlgmr.msra.gmra.mrb[24].mxu0 %vm270_vm1, %v2397_v56 }
0x2e01   :  { %8873 = vmatpush3.bf16.msra.mxu0 %v10473_v59  ;;  %8423 = vmatprep.mubr.msk.f32.mxu0 %vm9925_vm0, %v9926_v1 }
0x2e02   :  { %8877 = vmatprep.subr.bf16.mxu0 %v9924_v0 }
0x2ed3   :  { %v2466_v43 = vpop.f32.mrb[24].mxu0 }
0x2ed4   :  { %v2471_v44 = vrot.slane %v2466_v43, 7  ;;  %v8411_v45 = vpop.f32.mrb[25].mxu0 }
0x2ed6   :  { %v2473_v47 = vadd.f32 %v2471_v44, %v10518_v15 }
0x2ed8   :  { %9195 = vtanh.f32 %v2473_v47  ;;  %v7910_v49 = vmul.f32 -1.442695, %v2473_v47 }
0x2eda   :  { %9197 = vpow2.f32 %v7910_v49 }
0x2ee2   :  { %v9196_v48 = vpop.eup %9195 }
0x2ee3   :  { %2486 = vrot.lane.b32.xlu0 %v9196_v48, %s9927_s3 }
0x2ee4   :  { %v9198_v9 = vpop.eup %9197 }
0x2ee5   :  { %v2477_v50 = vadd.f32 1.0, %v9198_v9 }
0x2ee7   :  { %9199 = vrcp.f32 %v2477_v50 }
0x2ef1   :  { %v9200_v51 = vpop.eup %9199 }
0x2ef2   :  { %v2484_v58 = vmul.f32 %v9200_v51, %v2482_v57 }
0x2f55   :  { %v2487_v53 = vpop.permute.xlu0 %2486 }
0x2f56   :  { %v2489_v55 = vmul.f32 %v9200_v51, %v2487_v53 }
0x2f58   :  { %2491 = vrot.lane.b32.xlu1 %v2489_v55, %s9928_s23 }
0x2fca   :  { %v2492_v61 = vpop.permute.xlu1 %2491 }
0x2fcb   :  { %v2494_v62 = vadd.f32 %v2492_v61, %v2484_v58 }
0x2fcd   :  { %9201 = vtanh.f32 %v2494_v62  ;;  %v2589_v4 = vrot.slane %v2494_v62, 7 }
0x2fd7   :  { %v9202_v3 = vpop.eup %9201 }
0x2fd8   :  { %2497 = vrot.lane.b32.xlu0 %v9202_v3, %s9929_s28 }
0x304a   :  { %v2498_v5 = vpop.permute.xlu0 %2497 }
0x304b   :  { %v2500_v6 = vmul.f32 %v9200_v51, %v2498_v5 }
0x304d   :  { %v2502_v2 = vrot.slane %v2500_v6, 1  ;;  %v3143_v33 = vsel %vm1271_vm3, %v10525_v41, %v2500_v6 }
0x304f   :  { %2503 = vrot.lane.b32.xlu1 %v2502_v2, %s9930_s19 }
0x30c1   :  { %v2504_v12 = vpop.permute.xlu1 %2503 }
0x30c2   :  { %8417 = vmatmul.mubr.msk.f32.vlgmr.msra.gmra.mrb[18].mxu1 %vm270_vm1, %v2504_v12 }
0x30c3   :  { %8876 = vmatpush3.bf16.msra.mxu1 %v10473_v59  ;;  %8430 = vmatprep.mubr.msk.f32.mxu1 %vm9925_vm0, %v9926_v1 }
0x30c4   :  { %8880 = vmatprep.subr.bf16.mxu1 %v9924_v0 }
0x3195   :  { %v2573_v16 = vpop.f32.mrb[18].mxu1 }
0x3196   :  { %v2578_v17 = vrot.slane %v2573_v16, 6  ;;  %v8418_v18 = vpop.f32.mrb[19].mxu1 }
0x3198   :  { %v2580_v21 = vadd.f32 %v2578_v17, %v10518_v15 }
0x319a   :  { %9203 = vtanh.f32 %v2580_v21  ;;  %v7912_v13 = vmul.f32 -1.442695, %v2580_v21 }
0x319c   :  { %9205 = vpow2.f32 %v7912_v13 }
0x31a4   :  { %v9204_v23 = vpop.eup %9203 }
0x31a5   :  { %2593 = vrot.lane.b32.xlu0 %v9204_v23, %s9927_s3 }
0x31a6   :  { %v9206_v25 = vpop.eup %9205 }
0x31a7   :  { %v2584_v30 = vadd.f32 1.0, %v9206_v25 }
0x31a9   :  { %9207 = vrcp.f32 %v2584_v30 }
0x31b3   :  { %v9208_v22 = vpop.eup %9207 }
0x31b4   :  { %v2591_v26 = vmul.f32 %v9208_v22, %v2589_v4 }
0x3217   :  { %v2594_v46 = vpop.permute.xlu0 %2593 }
0x3218   :  { %v2596_v24 = vmul.f32 %v9208_v22, %v2594_v46 }
0x321a   :  { %2598 = vrot.lane.b32.xlu1 %v2596_v24, %s9928_s23 }
0x328c   :  { %v2599_v27 = vpop.permute.xlu1 %2598 }
0x328d   :  { %v2601_v28 = vadd.f32 %v2599_v27, %v2591_v26 }
0x328f   :  { %9209 = vtanh.f32 %v2601_v28  ;;  %v2696_v50 = vrot.slane %v2601_v28, 7 }
0x3299   :  { %v9210_v29 = vpop.eup %9209 }
0x329a   :  { %2604 = vrot.lane.b32.xlu0 %v9210_v29, %s9929_s28 }
0x330c   :  { %v2605_v31 = vpop.permute.xlu0 %2604 }
0x330d   :  { %v2607_v32 = vmul.f32 %v9208_v22, %v2605_v31 }
0x330f   :  { %v2609_v34 = vrot.slane %v2607_v32, 2  ;;  %v3144_v36 = vsel %vm1273_vm4, %v3143_v33, %v2607_v32 }
0x3311   :  { %2610 = vrot.lane.b32.xlu1 %v2609_v34, %s9930_s19 }
0x3383   :  { %v2611_v37 = vpop.permute.xlu1 %2610 }
0x3384   :  { %8424 = vmatmul.mubr.msk.f32.vlgmr.msra.gmra.mrb[26].mxu0 %vm270_vm1, %v2611_v37 }
0x3385   :  { %8879 = vmatpush3.bf16.msra.mxu0 %v10473_v59  ;;  %8437 = vmatprep.mubr.msk.f32.mxu0 %vm9925_vm0, %v9926_v1 }
0x3386   :  { %8883 = vmatprep.subr.bf16.mxu0 %v9924_v0 }
0x3457   :  { %v2680_v38 = vpop.f32.mrb[26].mxu0 }
0x3458   :  { %v2685_v40 = vrot.slane %v2680_v38, 5  ;;  %v8425_v56 = vpop.f32.mrb[27].mxu0 }
0x345a   :  { %v2687_v41 = vadd.f32 %v2685_v40, %v10518_v15 }
0x345c   :  { %9211 = vtanh.f32 %v2687_v41  ;;  %v7914_v44 = vmul.f32 -1.442695, %v2687_v41 }
0x345e   :  { %9213 = vpow2.f32 %v7914_v44 }
0x3466   :  { %v9212_v43 = vpop.eup %9211 }
0x3467   :  { %2700 = vrot.lane.b32.xlu0 %v9212_v43, %s9927_s3 }
0x3468   :  { %v9214_v45 = vpop.eup %9213 }
0x3469   :  { %v2691_v47 = vadd.f32 1.0, %v9214_v45 }
0x346b   :  { %9215 = vrcp.f32 %v2691_v47 }
0x3475   :  { %v9216_v48 = vpop.eup %9215 }
0x3476   :  { %v2698_v51 = vmul.f32 %v9216_v48, %v2696_v50 }
0x34d9   :  { %v2701_v49 = vpop.permute.xlu0 %2700 }
0x34da   :  { %v2703_v9 = vmul.f32 %v9216_v48, %v2701_v49 }
0x34dc   :  { %2705 = vrot.lane.b32.xlu1 %v2703_v9, %s9928_s23 }
0x354e   :  { %v2706_v53 = vpop.permute.xlu1 %2705 }
0x354f   :  { %v2708_v55 = vadd.f32 %v2706_v53, %v2698_v51 }
0x3551   :  { %9217 = vtanh.f32 %v2708_v55  ;;  %v2803_v22 = vrot.slane %v2708_v55, 7 }
0x355b   :  { %v9218_v57 = vpop.eup %9217 }
0x355c   :  { %2711 = vrot.lane.b32.xlu0 %v9218_v57, %s9929_s28 }
0x35ce   :  { %v2712_v58 = vpop.permute.xlu0 %2711 }
0x35cf   :  { %v2714_v61 = vmul.f32 %v9216_v48, %v2712_v58  ;;  %v253_v58 = vld [vmem:[#allocation20] sm:$0xff] }
0x35d1   :  { %v2716_v62 = vrot.slane %v2714_v61, 3  ;;  %v3145_v3 = vsel %vm1275_vm5, %v3144_v36, %v2714_v61  ;;  %v254_v61 = vld [vmem:[#allocation20 + $0x8] sm:$0xff] }
0x35d3   :  { %2717 = vrot.lane.b32.xlu1 %v2716_v62, %s9930_s19  ;;  %v10585_v62 = vpack.c.bf16 %v254_v61, %v253_v58 }
0x3645   :  { %v2718_v5 = vpop.permute.xlu1 %2717 }
0x3646   :  { %8431 = vmatmul.mubr.msk.f32.vlgmr.msra.gmra.mrb[20].mxu1 %vm270_vm1, %v2718_v5  ;;  %v256_v5 = vld [vmem:[#allocation20 + $0x18] sm:$0xff] }
0x3647   :  { %8882 = vmatpush3.bf16.msra.mxu1 %v10473_v59  ;;  %8444 = vmatprep.mubr.msk.f32.mxu1 %vm9925_vm0, %v9926_v1 }
0x3648   :  { %8886 = vmatprep.subr.bf16.mxu1 %v9924_v0 }
0x3719   :  { %v2787_v6 = vpop.f32.mrb[20].mxu1 }
0x371a   :  { %v2792_v2 = vrot.slane %v2787_v6, 4  ;;  %v8432_v12 = vpop.f32.mrb[21].mxu1 }
0x371c   :  { %v2794_v16 = vadd.f32 %v2792_v2, %v10518_v15 }
0x371e   :  { %9219 = vtanh.f32 %v2794_v16  ;;  %v7916_v18 = vmul.f32 -1.442695, %v2794_v16 }
0x3720   :  { %9221 = vpow2.f32 %v7916_v18 }
0x3728   :  { %v9220_v17 = vpop.eup %9219 }
0x3729   :  { %2807 = vrot.lane.b32.xlu0 %v9220_v17, %s9927_s3 }
0x372a   :  { %v9222_v21 = vpop.eup %9221 }
0x372b   :  { %v2798_v23 = vadd.f32 1.0, %v9222_v21 }
0x372d   :  { %9223 = vrcp.f32 %v2798_v23 }
0x3737   :  { %v9224_v13 = vpop.eup %9223 }
0x3738   :  { %v2805_v46 = vmul.f32 %v9224_v13, %v2803_v22 }
0x379b   :  { %v2808_v25 = vpop.permute.xlu0 %2807 }
0x379c   :  { %v2810_v30 = vmul.f32 %v9224_v13, %v2808_v25 }
0x379e   :  { %2812 = vrot.lane.b32.xlu1 %v2810_v30, %s9928_s23 }
0x3810   :  { %v2813_v24 = vpop.permute.xlu1 %2812 }
0x3811   :  { %v2815_v4 = vadd.f32 %v2813_v24, %v2805_v46 }
0x3813   :  { %9225 = vtanh.f32 %v2815_v4  ;;  %v2910_v47 = vrot.slane %v2815_v4, 7 }
0x381d   :  { %v9226_v26 = vpop.eup %9225 }
0x381e   :  { %2818 = vrot.lane.b32.xlu0 %v9226_v26, %s9929_s28 }
0x3890   :  { %v2819_v27 = vpop.permute.xlu0 %2818 }
0x3891   :  { %v2821_v28 = vmul.f32 %v9224_v13, %v2819_v27 }
0x3893   :  { %v2823_v29 = vrot.slane %v2821_v28, 4  ;;  %v3146_v31 = vsel %vm1277_vm6, %v3145_v3, %v2821_v28  ;;  %v255_v3 = vld [vmem:[#allocation20 + $0x10] sm:$0xff] }
0x3894   :  { %v10589_v2 = vpack.c.bf16 %v256_v5, %v255_v3 }
0x3895   :  { %2824 = vrot.lane.b32.xlu1 %v2823_v29, %s9930_s19 }
0x3907   :  { %v2825_v32 = vpop.permute.xlu1 %2824 }
0x3908   :  { %8438 = vmatmul.mubr.msk.f32.vlgmr.msra.gmra.mrb[28].mxu0 %vm270_vm1, %v2825_v32  ;;  %v258_v32 = vld [vmem:[%s11278_s14 + $0x8] sm:$0xff] }
0x3909   :  { %8885 = vmatpush3.bf16.msra.mxu0 %v10473_v59  ;;  %8451 = vmatprep.mubr.msk.f32.mxu0 %vm9925_vm0, %v9926_v1 }
0x390a   :  { %8892 = vmatprep.subr.bf16.mxu0 %v9924_v0 }
0x39db   :  { %v2894_v33 = vpop.f32.mrb[28].mxu0 }
0x39dc   :  { %v2899_v34 = vrot.slane %v2894_v33, 3  ;;  %v8439_v36 = vpop.f32.mrb[29].mxu0 }
0x39de   :  { %v2901_v37 = vadd.f32 %v2899_v34, %v10518_v15 }
0x39e0   :  { %9227 = vtanh.f32 %v2901_v37  ;;  %v7918_v40 = vmul.f32 -1.442695, %v2901_v37 }
0x39e2   :  { %9229 = vpow2.f32 %v7918_v40 }
0x39ea   :  { %v9228_v38 = vpop.eup %9227 }
0x39eb   :  { %2914 = vrot.lane.b32.xlu0 %v9228_v38, %s9927_s3 }
0x39ec   :  { %v9230_v56 = vpop.eup %9229 }
0x39ed   :  { %v2905_v41 = vadd.f32 1.0, %v9230_v56 }
0x39ef   :  { %9231 = vrcp.f32 %v2905_v41 }
0x39f9   :  { %v9232_v43 = vpop.eup %9231 }
0x39fa   :  { %v2912_v48 = vmul.f32 %v9232_v43, %v2910_v47 }
0x3a5d   :  { %v2915_v44 = vpop.permute.xlu0 %2914 }
0x3a5e   :  { %v2917_v45 = vmul.f32 %v9232_v43, %v2915_v44 }
0x3a60   :  { %2919 = vrot.lane.b32.xlu1 %v2917_v45, %s9928_s23 }
0x3ad2   :  { %v2920_v49 = vpop.permute.xlu1 %2919 }
0x3ad3   :  { %v2922_v9 = vadd.f32 %v2920_v49, %v2912_v48 }
0x3ad5   :  { %9233 = vtanh.f32 %v2922_v9  ;;  %v3017_v4 = vrot.slane %v2922_v9, 7 }
0x3adf   :  { %v9234_v50 = vpop.eup %9233 }
0x3ae0   :  { %2925 = vrot.lane.b32.xlu0 %v9234_v50, %s9929_s28 }
0x3b52   :  { %v2926_v51 = vpop.permute.xlu0 %2925 }
0x3b53   :  { %v2928_v53 = vmul.f32 %v9232_v43, %v2926_v51  ;;  %v7923_v43 = vld [vmem:[%s11279_s15] ss:$0 sm:$0xff] }
0x3b55   :  { %v2930_v55 = vrot.slane %v2928_v53, 5  ;;  %v3147_v57 = vsel %vm1279_vm7, %v3146_v31, %v2928_v53  ;;  %v257_v31 = vld [vmem:[%s11278_s14] sm:$0xff] }
0x3b56   :  { %v10613_v33 = vpack.c.bf16 %v258_v32, %v257_v31 }
0x3b57   :  { %2931 = vrot.lane.b32.xlu1 %v2930_v55, %s9930_s19 }
0x3bc9   :  { %v2932_v6 = vpop.permute.xlu1 %2931 }
0x3bca   :  { %8445 = vmatmul.mubr.msk.f32.vlgmr.msra.gmra.mrb[22].mxu1 %vm270_vm1, %v2932_v6 }
0x3bcb   :  { %8888 = vmatpush3.bf16.msra.mxu1 %v10585_v62  ;;  %8462 = vmatprep.mubr.msk.f32.mxu1 %vm9925_vm0, %v9926_v1 }
0x3bcc   :  { %8889 = vmatprep.subr.bf16.mxu1 %v9924_v0 }
0x3bcf   :  { %8891 = vmatpush3.bf16.msra.mxu1 %v10589_v2 }
0x3bd0   :  { %8898 = vmatprep.subr.bf16.mxu1 %v9924_v0 }
0x3bd2   :  { %8463 = vmatmul.mubr.msk.f32.vlgmr.msra.gmra.mrb[24].mxu1 %vm351_vm2, %v10508_v42 }
0x3bd3   :  { %8483 = vmatprep.mubr.msk.f32.mxu1 %vm9925_vm0, %v9926_v1  ;;  %8900 = vmatpush3.bf16.msra.mxu1 %v10613_v33 }
0x3bd4   :  { %8904 = vmatprep.subr.bf16.mxu1 %v9924_v0 }
0x3c9d   :  { %v3001_v12 = vpop.f32.mrb[22].mxu1 }
0x3c9e   :  { %v3006_v16 = vrot.slane %v3001_v12, 2  ;;  %v8446_v17 = vpop.f32.mrb[23].mxu1 }
0x3ca0   :  { %v3008_v18 = vadd.f32 %v3006_v16, %v10518_v15 }
0x3ca2   :  { %9235 = vtanh.f32 %v3008_v18  ;;  %v7920_v25 = vmul.f32 -1.442695, %v3008_v18 }
0x3ca4   :  { %9237 = vpow2.f32 %v7920_v25 }
0x3ca5   :  { %v3222_v21 = vpop.f32.mrb[24].mxu1 }
0x3ca6   :  { %v8464_v23 = vpop.f32.mrb[25].mxu1  ;;  %v10638_v45 = vadd.f32 %v7923_v43, %v3222_v21 }
0x3cac   :  { %v9236_v13 = vpop.eup %9235 }
0x3cad   :  { %3021 = vrot.lane.b32.xlu0 %v9236_v13, %s9927_s3 }
0x3cae   :  { %v9238_v30 = vpop.eup %9237 }
0x3caf   :  { %v3012_v22 = vadd.f32 1.0, %v9238_v30 }
0x3cb1   :  { %9239 = vrcp.f32 %v3012_v22 }
0x3cbb   :  { %v9240_v42 = vpop.eup %9239 }
0x3cbc   :  { %v3019_v26 = vmul.f32 %v9240_v42, %v3017_v4 }
0x3d1f   :  { %v3022_v46 = vpop.permute.xlu0 %3021 }
0x3d20   :  { %v3024_v24 = vmul.f32 %v9240_v42, %v3022_v46 }
0x3d22   :  { %3026 = vrot.lane.b32.xlu1 %v3024_v24, %s9928_s23 }
0x3d94   :  { %v3027_v27 = vpop.permute.xlu1 %3026 }
0x3d95   :  { %v10603_v28 = vadd.f32 %v3027_v27, %v3019_v26 }
0x3d97   :  { %9241 = vtanh.f32 %v10603_v28 }
0x3da1   :  { %v9242_v29 = vpop.eup %9241 }
0x3da2   :  { %3032 = vrot.lane.b32.xlu0 %v9242_v29, %s9929_s28 }
0x3e14   :  { %v3033_v34 = vpop.permute.xlu0 %3032 }
0x3e15   :  { %v3035_v36 = vmul.f32 %v9240_v42, %v3033_v34 }
0x3e17   :  { %v3037_v37 = vrot.slane %v3035_v36, 6  ;;  %v10618_v38 = vsel %vm1281_vm8, %v3147_v57, %v3035_v36 }
0x3e19   :  { %3038 = vrot.lane.b32.xlu1 %v3037_v37, %s9930_s19 }
0x3e8b   :  { %v3039_v40 = vpop.permute.xlu1 %3038 }
0x3e8c   :  { %8452 = vmatmul.mubr.msk.f32.vlgmr.msra.gmra.mrb[30].mxu0 %vm270_vm1, %v3039_v40 }
0x3e8d   :  { %8894 = vmatpush3.bf16.msra.mxu0 %v10613_v33  ;;  %8469 = vmatprep.mubr.msk.f32.mxu0 %vm9925_vm0, %v9926_v1 }
0x3e8e   :  { %8895 = vmatprep.subr.bf16.mxu0 %v9924_v0 }
0x3e90   :  { %8470 = vmatmul.mubr.f32.vlgmr.msra.gmra.mrb[32].mxu0 %v9926_v1 }
0x3e91   :  { %8897 = vmatpush3.bf16.msra.mxu0 %v10613_v33  ;;  %8476 = vmatprep.mubr.msk.f32.mxu0 %vm9925_vm0, %v9926_v1 }
0x3e92   :  { %8901 = vmatprep.subr.bf16.mxu0 %v9924_v0 }
0x3f5f   :  { %v10631_v56 = vpop.f32.mrb[30].mxu0 }
0x3f60   :  { %v8453_v41 = vpop.f32.mrb[31].mxu0 }
0x3f63   :  { %v10636_v44 = vpop.f32.mrb[32].mxu0 }
0x3f64   :  { %v3297_v47 = vrot.slane %v10636_v44, 1  ;;  %v8471_v48 = vpop.f32.mrb[33].mxu0 }
0x3f66   :  { %v3299_v49 = vadd.f32 %v3297_v47, %v10638_v45 }
0x3f68   :  { %9243 = vtanh.f32 %v3299_v49  ;;  %v7925_v50 = vmul.f32 -1.442695, %v3299_v49 }
0x3f6a   :  { %9245 = vpow2.f32 %v7925_v50 }
0x3f72   :  { %v9244_v9 = vpop.eup %9243 }
0x3f73   :  { %3309 = vrot.lane.b32.xlu0 %v9244_v9, %s9927_s3 }
0x3f74   :  { %v9246_v51 = vpop.eup %9245 }
0x3f75   :  { %v3303_v53 = vadd.f32 1.0, %v9246_v51 }
0x3f77   :  { %9247 = vrcp.f32 %v3303_v53 }
0x3f81   :  { %v9248_v55 = vpop.eup %9247 }
0x3f82   :  { %v3307_v61 = vmul.f32 0.0, %v9248_v55 }
0x3fe5   :  { %v3310_v57 = vpop.permute.xlu0 %3309 }
0x3fe6   :  { %v3312_v58 = vmul.f32 %v9248_v55, %v3310_v57 }
0x3fe8   :  { %3314 = vrot.lane.b32.xlu1 %v3312_v58, %s9928_s23 }
0x405a   :  { %v3315_v3 = vpop.permute.xlu1 %3314 }
0x405b   :  { %v3317_v5 = vadd.f32 %v3315_v3, %v3307_v61 }
0x405d   :  { %9249 = vtanh.f32 %v3317_v5  ;;  %v3412_v27 = vrot.slane %v3317_v5, 1 }
0x4067   :  { %v9250_v6 = vpop.eup %9249 }
0x4068   :  { %3320 = vrot.lane.b32.xlu0 %v9250_v6, %s9929_s28 }
0x40da   :  { %v3321_v12 = vpop.permute.xlu0 %3320 }
0x40db   :  { %v10647_v16 = vmul.f32 %v9248_v55, %v3321_v12 }
0x40dd   :  { %v3325_v17 = vrot.slane %v10647_v16, 7 }
0x40df   :  { %3326 = vrot.lane.b32.xlu1 %v3325_v17, %s9930_s19 }
0x4151   :  { %v3327_v18 = vpop.permute.xlu1 %3326 }
0x4152   :  { %8477 = vmatmul.mubr.msk.f32.vlgmr.msra.gmra.mrb[34].mxu0 %vm270_vm1, %v3327_v18 }
0x4153   :  { %8903 = vmatpush3.bf16.msra.mxu0 %v10613_v33  ;;  %8490 = vmatprep.mubr.msk.f32.mxu0 %vm9925_vm0, %v9926_v1 }
0x4154   :  { %8907 = vmatprep.subr.bf16.mxu0 %v9924_v0 }
0x4225   :  { %v3396_v21 = vpop.f32.mrb[34].mxu0 }
0x4226   :  { %v3401_v23 = vrot.slane %v3396_v21, 2  ;;  %v8478_v13 = vpop.f32.mrb[35].mxu0 }
0x4228   :  { %v3403_v25 = vadd.f32 %v3401_v23, %v10638_v45 }
0x422a   :  { %9251 = vtanh.f32 %v3403_v25  ;;  %v7927_v22 = vmul.f32 -1.442695, %v3403_v25 }
0x422c   :  { %9253 = vpow2.f32 %v7927_v22 }
0x4234   :  { %v9252_v30 = vpop.eup %9251 }
0x4235   :  { %3416 = vrot.lane.b32.xlu0 %v9252_v30, %s9927_s3 }
0x4236   :  { %v9254_v42 = vpop.eup %9253 }
0x4237   :  { %v3407_v46 = vadd.f32 1.0, %v9254_v42 }
0x4239   :  { %9255 = vrcp.f32 %v3407_v46 }
0x4243   :  { %v9256_v24 = vpop.eup %9255 }
0x4244   :  { %v3414_v29 = vmul.f32 %v9256_v24, %v3412_v27 }
0x42a7   :  { %v3417_v4 = vpop.permute.xlu0 %3416 }
0x42a8   :  { %v3419_v26 = vmul.f32 %v9256_v24, %v3417_v4 }
0x42aa   :  { %3421 = vrot.lane.b32.xlu1 %v3419_v26, %s9928_s23 }
0x431c   :  { %v3422_v31 = vpop.permute.xlu1 %3421 }
0x431d   :  { %v3424_v32 = vadd.f32 %v3422_v31, %v3414_v29 }
0x431f   :  { %9257 = vtanh.f32 %v3424_v32  ;;  %v3519_v3 = vrot.slane %v3424_v32, 1 }
0x4329   :  { %v9258_v34 = vpop.eup %9257 }
0x432a   :  { %3427 = vrot.lane.b32.xlu0 %v9258_v34, %s9929_s28 }
0x439c   :  { %v3428_v36 = vpop.permute.xlu0 %3427 }
0x439d   :  { %v10660_v37 = vmul.f32 %v9256_v24, %v3428_v36 }
0x439f   :  { %v3432_v40 = vrot.slane %v10660_v37, 6 }
0x43a1   :  { %3433 = vrot.lane.b32.xlu1 %v3432_v40, %s9930_s19 }
0x4413   :  { %v3434_v41 = vpop.permute.xlu1 %3433 }
0x4414   :  { %8484 = vmatmul.mubr.msk.f32.vlgmr.msra.gmra.mrb[26].mxu1 %vm270_vm1, %v3434_v41 }
0x4415   :  { %8906 = vmatpush3.bf16.msra.mxu1 %v10613_v33  ;;  %8497 = vmatprep.mubr.msk.f32.mxu1 %vm9925_vm0, %v9926_v1 }
0x4416   :  { %8910 = vmatprep.subr.bf16.mxu1 %v9924_v0 }
0x44e7   :  { %v3503_v43 = vpop.f32.mrb[26].mxu1 }
0x44e8   :  { %v3508_v48 = vrot.slane %v3503_v43, 3  ;;  %v8485_v49 = vpop.f32.mrb[27].mxu1 }
0x44ea   :  { %v3510_v9 = vadd.f32 %v3508_v48, %v10638_v45 }
0x44ec   :  { %9259 = vtanh.f32 %v3510_v9  ;;  %v7929_v51 = vmul.f32 -1.442695, %v3510_v9 }
0x44ee   :  { %9261 = vpow2.f32 %v7929_v51 }
0x44f6   :  { %v9260_v50 = vpop.eup %9259 }
0x44f7   :  { %3523 = vrot.lane.b32.xlu0 %v9260_v50, %s9927_s3 }
0x44f8   :  { %v9262_v53 = vpop.eup %9261 }
0x44f9   :  { %v3514_v55 = vadd.f32 1.0, %v9262_v53 }
0x44fb   :  { %9263 = vrcp.f32 %v3514_v55 }
0x4505   :  { %v9264_v57 = vpop.eup %9263 }
0x4506   :  { %v3521_v5 = vmul.f32 %v9264_v57, %v3519_v3 }
0x4569   :  { %v3524_v58 = vpop.permute.xlu0 %3523 }
0x456a   :  { %v3526_v61 = vmul.f32 %v9264_v57, %v3524_v58 }
0x456c   :  { %3528 = vrot.lane.b32.xlu1 %v3526_v61, %s9928_s23 }
0x45de   :  { %v3529_v6 = vpop.permute.xlu1 %3528 }
0x45df   :  { %v3531_v12 = vadd.f32 %v3529_v6, %v3521_v5 }
0x45e1   :  { %9265 = vtanh.f32 %v3531_v12  ;;  %v3626_v32 = vrot.slane %v3531_v12, 1 }
0x45eb   :  { %v9266_v17 = vpop.eup %9265 }
0x45ec   :  { %3534 = vrot.lane.b32.xlu0 %v9266_v17, %s9929_s28 }
0x465e   :  { %v3535_v18 = vpop.permute.xlu0 %3534 }
0x465f   :  { %v10673_v21 = vmul.f32 %v9264_v57, %v3535_v18 }
0x4661   :  { %v3539_v23 = vrot.slane %v10673_v21, 5 }
0x4663   :  { %3540 = vrot.lane.b32.xlu1 %v3539_v23, %s9930_s19 }
0x46d5   :  { %v3541_v13 = vpop.permute.xlu1 %3540 }
0x46d6   :  { %8491 = vmatmul.mubr.msk.f32.vlgmr.msra.gmra.mrb[36].mxu0 %vm270_vm1, %v3541_v13 }
0x46d7   :  { %8909 = vmatpush3.bf16.msra.mxu0 %v10613_v33  ;;  %8504 = vmatprep.mubr.msk.f32.mxu0 %vm9925_vm0, %v9926_v1 }
0x46d8   :  { %8913 = vmatprep.subr.bf16.mxu0 %v9924_v0 }
0x47a9   :  { %v3610_v25 = vpop.f32.mrb[36].mxu0 }
0x47aa   :  { %v3615_v30 = vrot.slane %v3610_v25, 4  ;;  %v8492_v22 = vpop.f32.mrb[37].mxu0 }
0x47ac   :  { %v3617_v42 = vadd.f32 %v3615_v30, %v10638_v45 }
0x47ae   :  { %9267 = vtanh.f32 %v3617_v42  ;;  %v7931_v24 = vmul.f32 -1.442695, %v3617_v42 }
0x47b0   :  { %9269 = vpow2.f32 %v7931_v24 }
0x47b8   :  { %v9268_v46 = vpop.eup %9267 }
0x47b9   :  { %3630 = vrot.lane.b32.xlu0 %v9268_v46, %s9927_s3 }
0x47ba   :  { %v9270_v4 = vpop.eup %9269 }
0x47bb   :  { %v3621_v26 = vadd.f32 1.0, %v9270_v4 }
0x47bd   :  { %9271 = vrcp.f32 %v3621_v26 }
0x47c7   :  { %v9272_v27 = vpop.eup %9271 }
0x47c8   :  { %v3628_v34 = vmul.f32 %v9272_v27, %v3626_v32 }
0x482b   :  { %v3631_v29 = vpop.permute.xlu0 %3630 }
0x482c   :  { %v3633_v31 = vmul.f32 %v9272_v27, %v3631_v29 }
0x482e   :  { %3635 = vrot.lane.b32.xlu1 %v3633_v31, %s9928_s23 }
0x48a0   :  { %v3636_v36 = vpop.permute.xlu1 %3635 }
0x48a1   :  { %v3638_v40 = vadd.f32 %v3636_v36, %v3628_v34 }
0x48a3   :  { %9273 = vtanh.f32 %v3638_v40  ;;  %v3733_v17 = vrot.slane %v3638_v40, 1 }
0x48ad   :  { %v9274_v41 = vpop.eup %9273 }
0x48ae   :  { %3641 = vrot.lane.b32.xlu0 %v9274_v41, %s9929_s28 }
0x4920   :  { %v3642_v43 = vpop.permute.xlu0 %3641 }
0x4921   :  { %v10686_v48 = vmul.f32 %v9272_v27, %v3642_v43 }
0x4923   :  { %v3646_v49 = vrot.slane %v10686_v48, 4 }
0x4925   :  { %3647 = vrot.lane.b32.xlu1 %v3646_v49, %s9930_s19 }
0x4997   :  { %v3648_v9 = vpop.permute.xlu1 %3647 }
0x4998   :  { %8498 = vmatmul.mubr.msk.f32.vlgmr.msra.gmra.mrb[28].mxu1 %vm270_vm1, %v3648_v9 }
0x4999   :  { %8912 = vmatpush3.bf16.msra.mxu1 %v10613_v33  ;;  %8511 = vmatprep.mubr.msk.f32.mxu1 %vm9925_vm0, %v9926_v1 }
0x499a   :  { %8916 = vmatprep.subr.bf16.mxu1 %v9924_v0 }
0x4a6b   :  { %v3717_v50 = vpop.f32.mrb[28].mxu1 }
0x4a6c   :  { %v3722_v51 = vrot.slane %v3717_v50, 5  ;;  %v8499_v53 = vpop.f32.mrb[29].mxu1 }
0x4a6e   :  { %v3724_v55 = vadd.f32 %v3722_v51, %v10638_v45 }
0x4a70   :  { %9275 = vtanh.f32 %v3724_v55  ;;  %v7933_v58 = vmul.f32 -1.442695, %v3724_v55 }
0x4a72   :  { %9277 = vpow2.f32 %v7933_v58 }
0x4a7a   :  { %v9276_v57 = vpop.eup %9275 }
0x4a7b   :  { %3737 = vrot.lane.b32.xlu0 %v9276_v57, %s9927_s3 }
0x4a7c   :  { %v9278_v61 = vpop.eup %9277 }
0x4a7d   :  { %v3728_v3 = vadd.f32 1.0, %v9278_v61 }
0x4a7f   :  { %9279 = vrcp.f32 %v3728_v3 }
0x4a89   :  { %v9280_v5 = vpop.eup %9279 }
0x4a8a   :  { %v3735_v18 = vmul.f32 %v9280_v5, %v3733_v17 }
0x4aed   :  { %v3738_v6 = vpop.permute.xlu0 %3737 }
0x4aee   :  { %v3740_v12 = vmul.f32 %v9280_v5, %v3738_v6 }
0x4af0   :  { %3742 = vrot.lane.b32.xlu1 %v3740_v12, %s9928_s23 }
0x4b62   :  { %v3743_v23 = vpop.permute.xlu1 %3742 }
0x4b63   :  { %v3745_v13 = vadd.f32 %v3743_v23, %v3735_v18 }
0x4b65   :  { %9281 = vtanh.f32 %v3745_v13  ;;  %v3840_v43 = vrot.slane %v3745_v13, 1 }
0x4b6f   :  { %v9282_v25 = vpop.eup %9281 }
0x4b70   :  { %3748 = vrot.lane.b32.xlu0 %v9282_v25, %s9929_s28 }
0x4be2   :  { %v3749_v30 = vpop.permute.xlu0 %3748 }
0x4be3   :  { %v10699_v22 = vmul.f32 %v9280_v5, %v3749_v30 }
0x4be5   :  { %v3753_v42 = vrot.slane %v10699_v22, 3 }
0x4be7   :  { %3754 = vrot.lane.b32.xlu1 %v3753_v42, %s9930_s19 }
0x4c59   :  { %v3755_v46 = vpop.permute.xlu1 %3754 }
0x4c5a   :  { %8505 = vmatmul.mubr.msk.f32.vlgmr.msra.gmra.mrb[38].mxu0 %vm270_vm1, %v3755_v46 }
0x4c5b   :  { %8915 = vmatpush3.bf16.msra.mxu0 %v10613_v33  ;;  %8518 = vmatprep.mubr.msk.f32.mxu0 %vm9925_vm0, %v9926_v1 }
0x4c5c   :  { %8532 = vmatprep.subr.mxu0 %v9926_v1 }
0x4d2d   :  { %v3824_v24 = vpop.f32.mrb[38].mxu0 }
0x4d2e   :  { %v3829_v4 = vrot.slane %v3824_v24, 6  ;;  %v8506_v26 = vpop.f32.mrb[39].mxu0 }
0x4d30   :  { %v3831_v27 = vadd.f32 %v3829_v4, %v10638_v45 }
0x4d32   :  { %9283 = vtanh.f32 %v3831_v27  ;;  %v7935_v31 = vmul.f32 -1.442695, %v3831_v27  ;;  %v3113_v27 = vrot.slane %v10631_v56, 1 }
0x4d34   :  { %9285 = vpow2.f32 %v7935_v31 }
0x4d3c   :  { %v9284_v29 = vpop.eup %9283 }
0x4d3d   :  { %3844 = vrot.lane.b32.xlu0 %v9284_v29, %s9927_s3  ;;  %v3115_v29 = vadd.f32 %v3113_v27, %v10518_v15 }
0x4d3e   :  { %v9286_v32 = vpop.eup %9285 }
0x4d3f   :  { %v3835_v34 = vadd.f32 1.0, %v9286_v32 }
0x4d41   :  { %9287 = vrcp.f32 %v3835_v34 }
0x4d4b   :  { %v9288_v36 = vpop.eup %9287 }
0x4d4c   :  { %v3842_v49 = vmul.f32 %v9288_v36, %v3840_v43 }
0x4daf   :  { %v3845_v40 = vpop.permute.xlu0 %3844 }
0x4db0   :  { %v3847_v41 = vmul.f32 %v9288_v36, %v3845_v40  ;;  %v7922_v40 = vmul.f32 -1.442695, %v3115_v29 }
0x4db2   :  { %3849 = vrot.lane.b32.xlu1 %v3847_v41, %s9928_s23 }
0x4e24   :  { %v3850_v9 = vpop.permute.xlu1 %3849 }
0x4e25   :  { %v3852_v50 = vadd.f32 %v3850_v9, %v3842_v49 }
0x4e27   :  { %9289 = vtanh.f32 %v3852_v50  ;;  %v3947_v42 = vrot.slane %v3852_v50, 1  ;;  %v3124_v50 = vrot.slane %v10603_v28, 7 }
0x4e31   :  { %v9290_v51 = vpop.eup %9289 }
0x4e32   :  { %3855 = vrot.lane.b32.xlu0 %v9290_v51, %s9929_s28 }
0x4ea4   :  { %v3856_v53 = vpop.permute.xlu0 %3855 }
0x4ea5   :  { %v10712_v55 = vmul.f32 %v9288_v36, %v3856_v53 }
0x4ea7   :  { %v3860_v57 = vrot.slane %v10712_v55, 2 }
0x4ea9   :  { %3861 = vrot.lane.b32.xlu1 %v3860_v57, %s9930_s19 }
0x4f1b   :  { %v3862_v58 = vpop.permute.xlu1 %3861 }
0x4f1c   :  { %8512 = vmatmul.mubr.msk.f32.vlgmr.msra.gmra.mrb[30].mxu1 %vm270_vm1, %v3862_v58 }
0x4f1d   :  { %8529 = vmatprep.mubr.msk.f32.mxu1 %vm9925_vm0, %v9926_v1 }
0x4fef   :  { %v3931_v61 = vpop.f32.mrb[30].mxu1 }
0x4ff0   :  { %v3936_v3 = vrot.slane %v3931_v61, 7  ;;  %v8513_v5 = vpop.f32.mrb[31].mxu1 }
0x4ff2   :  { %v3938_v6 = vadd.f32 %v3936_v3, %v10638_v45 }
0x4ff4   :  { %9291 = vtanh.f32 %v3938_v6  ;;  %v7937_v17 = vmul.f32 -1.442695, %v3938_v6 }
0x4ff6   :  { %9293 = vpow2.f32 %v7937_v17 }
0x4ffe   :  { %v9292_v12 = vpop.eup %9291 }
0x4fff   :  { %3951 = vrot.lane.b32.xlu0 %v9292_v12, %s9927_s3 }
0x5000   :  { %v9294_v18 = vpop.eup %9293 }
0x5001   :  { %v3942_v23 = vadd.f32 1.0, %v9294_v18 }
0x5003   :  { %9295 = vrcp.f32 %v3942_v23 }
0x500d   :  { %v9296_v13 = vpop.eup %9295 }
0x500e   :  { %v3949_v46 = vmul.f32 %v9296_v13, %v3947_v42 }
0x5071   :  { %v3952_v25 = vpop.permute.xlu0 %3951 }
0x5072   :  { %v3954_v30 = vmul.f32 %v9296_v13, %v3952_v25 }
0x5074   :  { %3956 = vrot.lane.b32.xlu1 %v3954_v30, %s9928_s23 }
0x50e6   :  { %v3957_v24 = vpop.permute.xlu1 %3956 }
0x50e7   :  { %v3959_v4 = vadd.f32 %v3957_v24, %v3949_v46 }
0x50e9   :  { %9297 = vtanh.f32 %v3959_v4  ;;  %v4051_v25 = vrot.slane %v3959_v4, 1 }
0x50ea   :  { %9299 = vtanh.f32 %v3115_v29 }
0x50eb   :  { %9301 = vpow2.f32 %v7922_v40 }
0x50f3   :  { %v9298_v26 = vpop.eup %9297 }
0x50f4   :  { %3962 = vrot.lane.b32.xlu0 %v9298_v26, %s9929_s28  ;;  %v9300_v36 = vpop.eup %9299 }
0x50f5   :  { %v9302_v41 = vpop.eup %9301 }
0x50f6   :  { %v3119_v43 = vadd.f32 1.0, %v9302_v41 }
0x50f8   :  { %9303 = vrcp.f32 %v3119_v43 }
0x5102   :  { %v9304_v15 = vpop.eup %9303 }
0x5103   :  { %v3126_v51 = vmul.f32 %v9304_v15, %v3124_v50 }
0x5166   :  { %v3963_v31 = vpop.permute.xlu0 %3962 }
0x5167   :  { %v3965_v32 = vmul.f32 %v9296_v13, %v3963_v31 }
0x5169   :  { %v3967_v34 = vrot.slane %v3965_v32, 1 }
0x516b   :  { %3968 = vrot.lane.b32.xlu1 %v3967_v34, %s9930_s19 }
0x516f   :  { %3128 = vrot.lane.b32.xlu1 %v9300_v36, %s9927_s3 }
0x51dd   :  { %v3969_v49 = vpop.permute.xlu1 %3968 }
0x51de   :  { %8519 = vmatmul.mubr.msk.f32.vlgmr.msra.gmra.mrb[40].mxu0 %vm270_vm1, %v3969_v49  ;;  %v228_v49 = vld [vmem:[#allocation22 + $0x8] sm:$0xff] }
0x51df   :  { %8534 = vmatprep.mubr.msk.f32.mxu0 %vm9925_vm0, %v9926_v1 }
0x51e1   :  { %v3129_v56 = vpop.permute.xlu1 %3128 }
0x51e2   :  { %v3131_v9 = vmul.f32 %v9304_v15, %v3129_v56 }
0x51e4   :  { %3133 = vrot.lane.b32.xlu1 %v3131_v9, %s9928_s23 }
0x5256   :  { %v3134_v53 = vpop.permute.xlu1 %3133 }
0x5257   :  { %v3136_v57 = vadd.f32 %v3134_v53, %v3126_v51 }
0x5259   :  { %9305 = vtanh.f32 %v3136_v57 }
0x5263   :  { %v9306_v58 = vpop.eup %9305 }
0x5264   :  { %3139 = vrot.lane.b32.xlu1 %v9306_v58, %s9929_s28 }
0x52b1   :  { %v4038_v61 = vpop.f32.mrb[40].mxu0 }
0x52b2   :  { %v4042_v3 = vadd.f32 %v4038_v61, %v10638_v45  ;;  %v8520_v5 = vpop.f32.mrb[41].mxu0 }
0x52b4   :  { %9307 = vtanh.f32 %v4042_v3  ;;  %v7939_v12 = vmul.f32 -1.442695, %v4042_v3 }
0x52b6   :  { %9309 = vpow2.f32 %v7939_v12 }
0x52be   :  { %v9308_v6 = vpop.eup %9307 }
0x52bf   :  { %4055 = vrot.lane.b32.xlu0 %v9308_v6, %s9927_s3 }
0x52c0   :  { %v9310_v17 = vpop.eup %9309 }
0x52c1   :  { %v4046_v18 = vadd.f32 1.0, %v9310_v17 }
0x52c3   :  { %9311 = vrcp.f32 %v4046_v18 }
0x52cd   :  { %v9312_v28 = vpop.eup %9311 }
0x52ce   :  { %v4053_v30 = vmul.f32 %v9312_v28, %v4051_v25 }
0x52d6   :  { %v3140_v45 = vpop.permute.xlu1 %3139 }
0x52d7   :  { %v3142_v26 = vmul.f32 %v9304_v15, %v3140_v45 }
0x52d9   :  { %v3149_v27 = vsel %vm1283_vm9, %v10618_v38, %v3142_v26 }
0x5331   :  { %v4056_v23 = vpop.permute.xlu0 %4055 }
0x5332   :  { %v4058_v13 = vmul.f32 %v9312_v28, %v4056_v23 }
0x5334   :  { %4060 = vrot.lane.b32.xlu0 %v4058_v13, %s9928_s23 }
0x53a6   :  { %v4061_v42 = vpop.permute.xlu0 %4060 }
0x53a7   :  { %v4063_v46 = vadd.f32 %v4061_v42, %v4053_v30 }
0x53a9   :  { %9313 = vtanh.f32 %v4063_v46 }
0x53b3   :  { %v9314_v24 = vpop.eup %9313 }
0x53b4   :  { %4066 = vrot.lane.b32.xlu0 %v9314_v24, %s9929_s28  ;;  %v226_v24 = vld [vmem:[#allocation5] sm:$0xff] }
0x53b8   :  { %4078 = vrot.lane.b32.xlu0 %v3149_v27, %s9930_s19 }
0x5426   :  { %v4067_v29 = vpop.permute.xlu0 %4066 }
0x5427   :  { %v4069_v31 = vmul.f32 %v9312_v28, %v4067_v29  ;;  %v7941_v29 = vld [vmem:[%s11281_s17] ss:$0 sm:$0xff] }
0x5429   :  { %v4070_v34 = vsel %vm1271_vm3, %v4069_v31, %v3965_v32  ;;  %v227_v32 = vld [vmem:[#allocation22] sm:$0xff] }
0x542a   :  { %v4071_v4 = vsel %vm1273_vm4, %v4070_v34, %v10712_v55  ;;  %v10754_v55 = vpack.c.bf16 %v228_v49, %v227_v32 }
0x542b   :  { %v4072_v36 = vsel %vm1275_vm5, %v4071_v4, %v10699_v22  ;;  %v230_v22 = vld [vmem:[#allocation22 + $0x18] sm:$0xff] }
0x542c   :  { %v4073_v40 = vsel %vm1277_vm6, %v4072_v36, %v10686_v48  ;;  %8918 = vmatpush3.bf16.msra.mxu1 %v10754_v55  ;;  %v229_v48 = vld [vmem:[#allocation22 + $0x10] sm:$0xff] }
0x542d   :  { %v4074_v41 = vsel %vm1279_vm7, %v4073_v40, %v10673_v21  ;;  %8919 = vmatprep.subr.bf16.mxu1 %v9924_v0  ;;  %v10758_v15 = vpack.c.bf16 %v230_v22, %v229_v48 }
0x542e   :  { %v4075_v38 = vsel %vm1281_vm8, %v4074_v41, %v10660_v37  ;;  %v4079_v37 = vpop.permute.xlu0 %4078 }
0x542f   :  { %v4076_v43 = vsel %vm1283_vm9, %v4075_v38, %v10647_v16 }
0x5430   :  { %4082 = vrot.lane.b32.xlu1 %v4076_v43, %s9927_s3  ;;  %8921 = vmatpush3.bf16.msra.mxu1 %v10758_v15 }
0x5431   :  { %8928 = vmatprep.subr.bf16.mxu1 %v9924_v0 }
0x54a2   :  { %v4083_v16 = vpop.permute.xlu1 %4082 }
0x54a3   :  { %v4085_v21 = vsel %vm270_vm1, %v4079_v37, %v4083_v16 }
0x54a4   :  { %v4086_v56 = vmax.f32 %v4085_v21, 0.0 }
0x54a6   :  { %v4087_v9 = vsel %vm351_vm2, %v4086_v56, -inf }
0x54a7   :  { %v4088_v50 = vrot.slane %v4087_v9, 4 }
0x54a9   :  { %v4089_v51 = vmax.f32 %v4087_v9, %v4088_v50 }
0x54ab   :  { %v4090_v53 = vrot.slane %v4089_v51, 2 }
0x54ad   :  { %v4091_v57 = vmax.f32 %v4089_v51, %v4090_v53 }
0x54af   :  { %v4092_v58 = vrot.slane %v4091_v57, 1 }
0x54b1   :  { %v4093_v61 = vmax.f32 %v4091_v57, %v4092_v58 }
0x54b3   :  { %v4094_v3 = vsub.f32 %v4086_v56, %v4093_v61 }
0x54b5   :  { %v4095_v5 = vmul.f32 1.442695, %v4094_v3 }
0x54b7   :  { %9315 = vpow2.f32 %v4095_v5 }
0x54c1   :  { %v9316_v6 = vpop.eup %9315 }
0x54c2   :  { %v4097_v12 = vsel %vm351_vm2, %v9316_v6, 0.0 }
0x54c3   :  { %v4098_v17 = vrot.slane %v4097_v12, 4 }
0x54c5   :  { %v4099_v18 = vadd.f32 %v4098_v17, %v4097_v12 }
0x54c7   :  { %v4100_v28 = vrot.slane %v4099_v18, 2 }
0x54c9   :  { %v4101_v23 = vadd.f32 %v4100_v28, %v4099_v18 }
0x54cb   :  { %v4102_v13 = vrot.slane %v4101_v23, 1 }
0x54cd   :  { %v4103_v25 = vadd.f32 %v4102_v13, %v4101_v23 }
0x54cf   :  { %9317 = vrcp.f32 %v4103_v25 }
0x54d9   :  { %v9318_v30 = vpop.eup %9317 }
0x54da   :  { %v4105_v42 = vmul.f32 %v9318_v30, %v9316_v6 }
0x54dc   :  { %v4106_v46 = vmul.f32 %v4105_v42, %v4086_v56 }
0x54de   :  { %v4107_v45 = vadd.f32 %v4106_v46, %v4086_v56 }
0x54e0   :  { %8530 = vmatmul.mubr.msk.f32.vlgmr.msra.gmra.mrb[32].mxu1 %vm351_vm2, %v4107_v45 }
0x54e1   :  { %8930 = vmatpush3.bf16.msra.mxu1 %v10223_v14  ;;  %8552 = vmatprep.mubr.msk.f32.mxu1 %vm9925_vm0, %v9926_v1 }
0x54e2   :  { %8931 = vmatprep.subr.bf16.mxu1 %v9924_v0 }
0x55b3   :  { %v4177_v26 = vpop.f32.mrb[32].mxu1 }
0x55b4   :  { %v8531_v27 = vpop.f32.mrb[33].mxu1  ;;  %8533 = vmatpush3.msra.mxu0 %v4177_v26 }
0x55b5   :  { %8535 = vmatmul.mubr.msk.f32.vlgmr.msra.gmra.mrb[42].mxu0 %vm4187_vm10, %v226_v24  ;;  %8922 = vmatprep.subr.bf16.mxu0 %v9924_v0 }
0x55b6   :  { %8924 = vmatpush3.bf16.msra.mxu0 %v10213_v7  ;;  %8545 = vmatprep.mubr.msk.f32.mxu0 %vm9925_vm0, %v9926_v1 }
0x55b7   :  { %8925 = vmatprep.subr.bf16.mxu0 %v9924_v0 }
0x55ba   :  { %8927 = vmatpush3.bf16.msra.mxu0 %v10221_v11  ;;  %v9579_v11 = vld [vmem:[#allocation11] ss:$0 sm:$0xff] }
0x55bb   :  { %8934 = vmatprep.subr.bf16.mxu0 %v9924_v0 }
0x5688   :  { %v4257_v31 = vpop.f32.mrb[42].mxu0 }
0x5689   :  { %v4258_v34 = vadd.f32 %v7941_v29, %v4257_v31  ;;  %v8536_v4 = vpop.f32.mrb[43].mxu0 }
0x568b   :  { %v4261_v36 = vmax.f32 %v4258_v34, 0.0 }
0x568d   :  { %v10782_v40 = vadd.f32 %v4261_v36, %v10237_v19 }
0x568f   :  { %8546 = vmatmul.mubr.msk.f32.vlgmr.msra.gmra.mrb[44].mxu0 %vm351_vm2, %v10782_v40 }
0x5690   :  { %8936 = vmatpush3.bf16.msra.mxu0 %v10223_v14  ;;  %8566 = vmatprep.mubr.msk.f32.mxu0 %vm9925_vm0, %v9926_v1 }
0x5691   :  { %8940 = vmatprep.subr.bf16.mxu0 %v9924_v0 }
0x5762   :  { %v4332_v7 = vpop.f32.mrb[44].mxu0 }
0x5763   :  { %v10790_v41 = vadd.f32 %v9579_v11, %v4332_v7  ;;  %v8547_v38 = vpop.f32.mrb[45].mxu0 }
0x5765   :  { %v4336_v43 = vadd.f32 %v10790_v41, %v10245_v20 }
0x5767   :  { %9319 = vtanh.f32 %v4336_v43  ;;  %v7944_v32 = vmul.f32 -1.442695, %v4336_v43 }
0x5769   :  { %9321 = vpow2.f32 %v7944_v32 }
0x5771   :  { %v9320_v19 = vpop.eup %9319 }
0x5772   :  { %4346 = vrot.lane.b32.xlu0 %v9320_v19, %s9927_s3 }
0x5773   :  { %v9322_v49 = vpop.eup %9321 }
0x5774   :  { %v4340_v48 = vadd.f32 1.0, %v9322_v49 }
0x5776   :  { %9323 = vrcp.f32 %v4340_v48 }
0x5780   :  { %v9324_v22 = vpop.eup %9323 }
0x5781   :  { %v4344_v21 = vmul.f32 0.0, %v9324_v22 }
0x57e4   :  { %v4347_v37 = vpop.permute.xlu0 %4346 }
0x57e5   :  { %v4349_v16 = vmul.f32 %v9324_v22, %v4347_v37 }
0x57e7   :  { %4351 = vrot.lane.b32.xlu1 %v4349_v16, %s9928_s23 }
0x5859   :  { %v4352_v56 = vpop.permute.xlu1 %4351 }
0x585a   :  { %v4354_v9 = vadd.f32 %v4352_v56, %v4344_v21 }
0x585c   :  { %9325 = vtanh.f32 %v4354_v9  ;;  %v4448_v13 = vrot.slane %v4354_v9, 7 }
0x5866   :  { %v9326_v50 = vpop.eup %9325 }
0x5867   :  { %4357 = vrot.lane.b32.xlu0 %v9326_v50, %s9929_s28 }
0x58d9   :  { %v4358_v20 = vpop.permute.xlu0 %4357 }
0x58da   :  { %v10797_v51 = vmul.f32 %v9324_v22, %v4358_v20 }
0x58dc   :  { %4362 = vrot.lane.b32.xlu1 %v10797_v51, %s9930_s19 }
0x594e   :  { %v4363_v53 = vpop.permute.xlu1 %4362 }
0x594f   :  { %8553 = vmatmul.mubr.msk.f32.vlgmr.msra.gmra.mrb[34].mxu1 %vm270_vm1, %v4363_v53 }
0x5950   :  { %8933 = vmatpush3.bf16.msra.mxu1 %v10223_v14  ;;  %8559 = vmatprep.mubr.msk.f32.mxu1 %vm9925_vm0, %v9926_v1 }
0x5951   :  { %8937 = vmatprep.subr.bf16.mxu1 %v9924_v0 }
0x5a22   :  { %v4432_v57 = vpop.f32.mrb[34].mxu1 }
0x5a23   :  { %v4437_v58 = vrot.slane %v4432_v57, 7  ;;  %v8554_v61 = vpop.f32.mrb[35].mxu1 }
0x5a25   :  { %v4439_v3 = vadd.f32 %v4437_v58, %v10790_v41 }
0x5a27   :  { %9327 = vtanh.f32 %v4439_v3  ;;  %v7946_v6 = vmul.f32 -1.442695, %v4439_v3 }
0x5a29   :  { %9329 = vpow2.f32 %v7946_v6 }
0x5a31   :  { %v9328_v5 = vpop.eup %9327 }
0x5a32   :  { %4452 = vrot.lane.b32.xlu0 %v9328_v5, %s9927_s3 }
0x5a33   :  { %v9330_v12 = vpop.eup %9329 }
0x5a34   :  { %v4443_v17 = vadd.f32 1.0, %v9330_v12 }
0x5a36   :  { %9331 = vrcp.f32 %v4443_v17 }
0x5a40   :  { %v9332_v18 = vpop.eup %9331 }
0x5a41   :  { %v4450_v25 = vmul.f32 %v9332_v18, %v4448_v13 }
0x5aa4   :  { %v4453_v28 = vpop.permute.xlu0 %4452 }
0x5aa5   :  { %v4455_v23 = vmul.f32 %v9332_v18, %v4453_v28 }
0x5aa7   :  { %4457 = vrot.lane.b32.xlu1 %v4455_v23, %s9928_s23 }
0x5b19   :  { %v4458_v30 = vpop.permute.xlu1 %4457 }
0x5b1a   :  { %v4460_v42 = vadd.f32 %v4458_v30, %v4450_v25 }
0x5b1c   :  { %9333 = vtanh.f32 %v4460_v42  ;;  %v4555_v49 = vrot.slane %v4460_v42, 7 }
0x5b26   :  { %v9334_v46 = vpop.eup %9333 }
0x5b27   :  { %4463 = vrot.lane.b32.xlu0 %v9334_v46, %s9929_s28 }
0x5b99   :  { %v4464_v45 = vpop.permute.xlu0 %4463 }
0x5b9a   :  { %v4466_v24 = vmul.f32 %v9332_v18, %v4464_v45 }
0x5b9c   :  { %v4468_v26 = vrot.slane %v4466_v24, 1  ;;  %v5109_v9 = vsel %vm1271_vm3, %v10797_v51, %v4466_v24 }
0x5b9e   :  { %4469 = vrot.lane.b32.xlu1 %v4468_v26, %s9930_s19 }
0x5c10   :  { %v4470_v27 = vpop.permute.xlu1 %4469 }
0x5c11   :  { %8560 = vmatmul.mubr.msk.f32.vlgmr.msra.gmra.mrb[36].mxu1 %vm270_vm1, %v4470_v27 }
0x5c12   :  { %8939 = vmatpush3.bf16.msra.mxu1 %v10223_v14  ;;  %8573 = vmatprep.mubr.msk.f32.mxu1 %vm9925_vm0, %v9926_v1 }
0x5c13   :  { %8943 = vmatprep.subr.bf16.mxu1 %v9924_v0 }
0x5ce4   :  { %v4539_v29 = vpop.f32.mrb[36].mxu1 }
0x5ce5   :  { %v4544_v31 = vrot.slane %v4539_v29, 6  ;;  %v8561_v34 = vpop.f32.mrb[37].mxu1 }
0x5ce7   :  { %v4546_v4 = vadd.f32 %v4544_v31, %v10790_v41 }
0x5ce9   :  { %9335 = vtanh.f32 %v4546_v4  ;;  %v7948_v7 = vmul.f32 -1.442695, %v4546_v4 }
0x5ceb   :  { %9337 = vpow2.f32 %v7948_v7 }
0x5cf3   :  { %v9336_v36 = vpop.eup %9335 }
0x5cf4   :  { %4559 = vrot.lane.b32.xlu0 %v9336_v36, %s9927_s3 }
0x5cf5   :  { %v9338_v11 = vpop.eup %9337 }
0x5cf6   :  { %v4550_v38 = vadd.f32 1.0, %v9338_v11 }
0x5cf8   :  { %9339 = vrcp.f32 %v4550_v38 }
0x5d02   :  { %v9340_v43 = vpop.eup %9339 }
0x5d03   :  { %v4557_v48 = vmul.f32 %v9340_v43, %v4555_v49 }
0x5d66   :  { %v4560_v19 = vpop.permute.xlu0 %4559 }
0x5d67   :  { %v4562_v32 = vmul.f32 %v9340_v43, %v4560_v19 }
0x5d69   :  { %4564 = vrot.lane.b32.xlu1 %v4562_v32, %s9928_s23 }
0x5ddb   :  { %v4565_v22 = vpop.permute.xlu1 %4564 }
0x5ddc   :  { %v4567_v37 = vadd.f32 %v4565_v22, %v4557_v48 }
0x5dde   :  { %9341 = vtanh.f32 %v4567_v37  ;;  %v4662_v23 = vrot.slane %v4567_v37, 7 }
0x5de8   :  { %v9342_v16 = vpop.eup %9341 }
0x5de9   :  { %4570 = vrot.lane.b32.xlu0 %v9342_v16, %s9929_s28 }
0x5e5b   :  { %v4571_v21 = vpop.permute.xlu0 %4570 }
0x5e5c   :  { %v4573_v56 = vmul.f32 %v9340_v43, %v4571_v21 }
0x5e5e   :  { %v4575_v50 = vrot.slane %v4573_v56, 2  ;;  %v5110_v20 = vsel %vm1273_vm4, %v5109_v9, %v4573_v56 }
0x5e60   :  { %4576 = vrot.lane.b32.xlu1 %v4575_v50, %s9930_s19 }
0x5ed2   :  { %v4577_v53 = vpop.permute.xlu1 %4576 }
0x5ed3   :  { %8567 = vmatmul.mubr.msk.f32.vlgmr.msra.gmra.mrb[46].mxu0 %vm270_vm1, %v4577_v53 }
0x5ed4   :  { %8942 = vmatpush3.bf16.msra.mxu0 %v10223_v14  ;;  %8580 = vmatprep.mubr.msk.f32.mxu0 %vm9925_vm0, %v9926_v1 }
0x5ed5   :  { %8946 = vmatprep.subr.bf16.mxu0 %v9924_v0 }
0x5fa6   :  { %v4646_v57 = vpop.f32.mrb[46].mxu0 }
0x5fa7   :  { %v4651_v58 = vrot.slane %v4646_v57, 5  ;;  %v8568_v61 = vpop.f32.mrb[47].mxu0 }
0x5fa9   :  { %v4653_v51 = vadd.f32 %v4651_v58, %v10790_v41 }
0x5fab   :  { %9343 = vtanh.f32 %v4653_v51  ;;  %v7950_v5 = vmul.f32 -1.442695, %v4653_v51 }
0x5fad   :  { %9345 = vpow2.f32 %v7950_v5 }
0x5fb5   :  { %v9344_v3 = vpop.eup %9343 }
0x5fb6   :  { %4666 = vrot.lane.b32.xlu0 %v9344_v3, %s9927_s3 }
0x5fb7   :  { %v9346_v6 = vpop.eup %9345 }
0x5fb8   :  { %v4657_v12 = vadd.f32 1.0, %v9346_v6 }
0x5fba   :  { %9347 = vrcp.f32 %v4657_v12 }
0x5fc4   :  { %v9348_v17 = vpop.eup %9347 }
0x5fc5   :  { %v4664_v13 = vmul.f32 %v9348_v17, %v4662_v23 }
0x6028   :  { %v4667_v18 = vpop.permute.xlu0 %4666 }
0x6029   :  { %v4669_v28 = vmul.f32 %v9348_v17, %v4667_v18 }
0x602b   :  { %4671 = vrot.lane.b32.xlu1 %v4669_v28, %s9928_s23 }
0x609d   :  { %v4672_v25 = vpop.permute.xlu1 %4671 }
0x609e   :  { %v4674_v30 = vadd.f32 %v4672_v25, %v4664_v13 }
0x60a0   :  { %9349 = vtanh.f32 %v4674_v30  ;;  %v4769_v49 = vrot.slane %v4674_v30, 7 }
0x60aa   :  { %v9350_v42 = vpop.eup %9349 }
0x60ab   :  { %4677 = vrot.lane.b32.xlu0 %v9350_v42, %s9929_s28 }
0x611d   :  { %v4678_v46 = vpop.permute.xlu0 %4677 }
0x611e   :  { %v4680_v45 = vmul.f32 %v9348_v17, %v4678_v46 }
0x6120   :  { %v4682_v24 = vrot.slane %v4680_v45, 3  ;;  %v5111_v26 = vsel %vm1275_vm5, %v5110_v20, %v4680_v45 }
0x6122   :  { %4683 = vrot.lane.b32.xlu1 %v4682_v24, %s9930_s19 }
0x6194   :  { %v4684_v27 = vpop.permute.xlu1 %4683 }
0x6195   :  { %8574 = vmatmul.mubr.msk.f32.vlgmr.msra.gmra.mrb[38].mxu1 %vm270_vm1, %v4684_v27 }
0x6196   :  { %8945 = vmatpush3.bf16.msra.mxu1 %v10223_v14  ;;  %8587 = vmatprep.mubr.msk.f32.mxu1 %vm9925_vm0, %v9926_v1 }
0x6197   :  { %8949 = vmatprep.subr.bf16.mxu1 %v9924_v0 }
0x6268   :  { %v4753_v29 = vpop.f32.mrb[38].mxu1 }
0x6269   :  { %v4758_v31 = vrot.slane %v4753_v29, 4  ;;  %v8575_v34 = vpop.f32.mrb[39].mxu1 }
0x626b   :  { %v4760_v4 = vadd.f32 %v4758_v31, %v10790_v41 }
0x626d   :  { %9351 = vtanh.f32 %v4760_v4  ;;  %v7952_v7 = vmul.f32 -1.442695, %v4760_v4 }
0x626f   :  { %9353 = vpow2.f32 %v7952_v7 }
0x6277   :  { %v9352_v36 = vpop.eup %9351 }
0x6278   :  { %4773 = vrot.lane.b32.xlu0 %v9352_v36, %s9927_s3 }
0x6279   :  { %v9354_v11 = vpop.eup %9353 }
0x627a   :  { %v4764_v38 = vadd.f32 1.0, %v9354_v11 }
0x627c   :  { %9355 = vrcp.f32 %v4764_v38 }
0x6286   :  { %v9356_v43 = vpop.eup %9355 }
0x6287   :  { %v4771_v48 = vmul.f32 %v9356_v43, %v4769_v49 }
0x62ea   :  { %v4774_v19 = vpop.permute.xlu0 %4773 }
0x62eb   :  { %v4776_v32 = vmul.f32 %v9356_v43, %v4774_v19 }
0x62ed   :  { %4778 = vrot.lane.b32.xlu1 %v4776_v32, %s9928_s23 }
0x635f   :  { %v4779_v22 = vpop.permute.xlu1 %4778 }
0x6360   :  { %v4781_v37 = vadd.f32 %v4779_v22, %v4771_v48 }
0x6362   :  { %9357 = vtanh.f32 %v4781_v37  ;;  %v4876_v18 = vrot.slane %v4781_v37, 7 }
0x636c   :  { %v9358_v16 = vpop.eup %9357 }
0x636d   :  { %4784 = vrot.lane.b32.xlu0 %v9358_v16, %s9929_s28 }
0x63df   :  { %v4785_v21 = vpop.permute.xlu0 %4784 }
0x63e0   :  { %v4787_v56 = vmul.f32 %v9356_v43, %v4785_v21 }
0x63e2   :  { %v4789_v9 = vrot.slane %v4787_v56, 4  ;;  %v5112_v50 = vsel %vm1277_vm6, %v5111_v26, %v4787_v56 }
0x63e4   :  { %4790 = vrot.lane.b32.xlu1 %v4789_v9, %s9930_s19 }
0x6456   :  { %v4791_v20 = vpop.permute.xlu1 %4790 }
0x6457   :  { %8581 = vmatmul.mubr.msk.f32.vlgmr.msra.gmra.mrb[48].mxu0 %vm270_vm1, %v4791_v20 }
0x6458   :  { %8948 = vmatpush3.bf16.msra.mxu0 %v10223_v14  ;;  %8594 = vmatprep.mubr.msk.f32.mxu0 %vm9925_vm0, %v9926_v1 }
0x6459   :  { %8955 = vmatprep.subr.bf16.mxu0 %v9924_v0 }
0x652a   :  { %v4860_v53 = vpop.f32.mrb[48].mxu0 }
0x652b   :  { %v4865_v57 = vrot.slane %v4860_v53, 3  ;;  %v8582_v58 = vpop.f32.mrb[49].mxu0 }
0x652d   :  { %v4867_v61 = vadd.f32 %v4865_v57, %v10790_v41 }
0x652f   :  { %9359 = vtanh.f32 %v4867_v61  ;;  %v7954_v3 = vmul.f32 -1.442695, %v4867_v61 }
0x6531   :  { %9361 = vpow2.f32 %v7954_v3 }
0x6539   :  { %v9360_v51 = vpop.eup %9359 }
0x653a   :  { %4880 = vrot.lane.b32.xlu0 %v9360_v51, %s9927_s3 }
0x653b   :  { %v9362_v5 = vpop.eup %9361 }
0x653c   :  { %v4871_v6 = vadd.f32 1.0, %v9362_v5 }
0x653e   :  { %9363 = vrcp.f32 %v4871_v6 }
0x6548   :  { %v9364_v14 = vpop.eup %9363 }
0x6549   :  { %v4878_v28 = vmul.f32 %v9364_v14, %v4876_v18 }
0x65ac   :  { %v4881_v12 = vpop.permute.xlu0 %4880 }
0x65ad   :  { %v4883_v17 = vmul.f32 %v9364_v14, %v4881_v12 }
0x65af   :  { %4885 = vrot.lane.b32.xlu1 %v4883_v17, %s9928_s23 }
0x6621   :  { %v4886_v23 = vpop.permute.xlu1 %4885 }
0x6622   :  { %v4888_v13 = vadd.f32 %v4886_v23, %v4878_v28 }
0x6624   :  { %9365 = vtanh.f32 %v4888_v13  ;;  %v4983_v21 = vrot.slane %v4888_v13, 7 }
0x662e   :  { %v9366_v25 = vpop.eup %9365 }
0x662f   :  { %4891 = vrot.lane.b32.xlu0 %v9366_v25, %s9929_s28 }
0x66a1   :  { %v4892_v30 = vpop.permute.xlu0 %4891 }
0x66a2   :  { %v4894_v42 = vmul.f32 %v9364_v14, %v4892_v30 }
0x66a4   :  { %v4896_v46 = vrot.slane %v4894_v42, 5  ;;  %v10856_v45 = vsel %vm1279_vm7, %v5112_v50, %v4894_v42 }
0x66a6   :  { %4897 = vrot.lane.b32.xlu1 %v4896_v46, %s9930_s19 }
0x6718   :  { %v4898_v24 = vpop.permute.xlu1 %4897 }
0x6719   :  { %8588 = vmatmul.mubr.msk.f32.vlgmr.msra.gmra.mrb[40].mxu1 %vm270_vm1, %v4898_v24 }
0x671a   :  { %8951 = vmatpush3.bf16.msra.mxu1 %v10314_v35  ;;  %8605 = vmatprep.mubr.msk.f32.mxu1 %vm9925_vm0, %v9926_v1 }
0x671b   :  { %8952 = vmatprep.subr.bf16.mxu1 %v9924_v0 }
0x671e   :  { %8954 = vmatpush3.bf16.msra.mxu1 %v10318_v39  ;;  %v9580_v39 = vld [vmem:[#allocation16] ss:$0 sm:$0xff] }
0x671f   :  { %8961 = vmatprep.subr.bf16.mxu1 %v9924_v0 }
0x6721   :  { %8606 = vmatmul.mubr.msk.f32.vlgmr.msra.gmra.mrb[42].mxu1 %vm351_vm2, %v10782_v40 }
0x6722   :  { %8963 = vmatpush3.bf16.msra.mxu1 %v10336_v60  ;;  %8626 = vmatprep.mubr.msk.f32.mxu1 %vm9925_vm0, %v9926_v1 }
0x6723   :  { %8967 = vmatprep.subr.bf16.mxu1 %v9924_v0 }
0x67ec   :  { %v4967_v35 = vpop.f32.mrb[40].mxu1 }
0x67ed   :  { %v4972_v26 = vrot.slane %v4967_v35, 2  ;;  %v8589_v27 = vpop.f32.mrb[41].mxu1 }
0x67ef   :  { %v4974_v29 = vadd.f32 %v4972_v26, %v10790_v41 }
0x67f1   :  { %9367 = vtanh.f32 %v4974_v29  ;;  %v7956_v11 = vmul.f32 -1.442695, %v4974_v29 }
0x67f4   :  { %v5182_v31 = vpop.f32.mrb[42].mxu1 }
0x67f5   :  { %v10873_v34 = vadd.f32 %v9580_v39, %v5182_v31  ;;  %v8607_v4 = vpop.f32.mrb[43].mxu1 }
0x67f7   :  { %v5186_v40 = vadd.f32 %v10873_v34, %v1432_v10 }
0x67f9   :  { %9369 = vtanh.f32 %v5186_v40  ;;  %v7960_v38 = vmul.f32 -1.442695, %v5186_v40 }
0x67fa   :  { %9371 = vpow2.f32 %v7956_v11 }
0x67fb   :  { %v9368_v36 = vpop.eup %9367  ;;  %9373 = vpow2.f32 %v7960_v38 }
0x67fc   :  { %4987 = vrot.lane.b32.xlu0 %v9368_v36, %s9927_s3 }
0x6803   :  { %v9370_v7 = vpop.eup %9369 }
0x6804   :  { %5196 = vrot.lane.b32.xlu1 %v9370_v7, %s9927_s3  ;;  %v9372_v43 = vpop.eup %9371 }
0x6805   :  { %v4978_v19 = vadd.f32 1.0, %v9372_v43  ;;  %v9374_v32 = vpop.eup %9373 }
0x6806   :  { %v5190_v49 = vadd.f32 1.0, %v9374_v32 }
0x6807   :  { %9375 = vrcp.f32 %v4978_v19 }
0x6808   :  { %9377 = vrcp.f32 %v5190_v49 }
0x6811   :  { %v9376_v8 = vpop.eup %9375 }
0x6812   :  { %v9378_v22 = vpop.eup %9377  ;;  %v4985_v56 = vmul.f32 %v9376_v8, %v4983_v21 }
0x6813   :  { %v5194_v20 = vmul.f32 0.0, %v9378_v22 }
0x686e   :  { %v4988_v48 = vpop.permute.xlu0 %4987 }
0x686f   :  { %v4990_v10 = vmul.f32 %v9376_v8, %v4988_v48 }
0x6871   :  { %4992 = vrot.lane.b32.xlu0 %v4990_v10, %s9928_s23 }
0x6876   :  { %v5197_v37 = vpop.permute.xlu1 %5196 }
0x6877   :  { %v5199_v16 = vmul.f32 %v9378_v22, %v5197_v37 }
0x6879   :  { %5201 = vrot.lane.b32.xlu1 %v5199_v16, %s9928_s23 }
0x68e3   :  { %v4993_v9 = vpop.permute.xlu0 %4992 }
0x68e4   :  { %v10882_v50 = vadd.f32 %v4993_v9, %v4985_v56 }
0x68e6   :  { %9379 = vtanh.f32 %v10882_v50 }
0x68eb   :  { %v5202_v53 = vpop.permute.xlu1 %5201 }
0x68ec   :  { %v5204_v57 = vadd.f32 %v5202_v53, %v5194_v20 }
0x68ee   :  { %9381 = vtanh.f32 %v5204_v57  ;;  %v5299_v39 = vrot.slane %v5204_v57, 1 }
0x68f0   :  { %v9380_v58 = vpop.eup %9379 }
0x68f1   :  { %4998 = vrot.lane.b32.xlu0 %v9380_v58, %s9929_s28 }
0x68f8   :  { %v9382_v61 = vpop.eup %9381 }
0x68f9   :  { %5207 = vrot.lane.b32.xlu1 %v9382_v61, %s9929_s28 }
0x6963   :  { %v4999_v51 = vpop.permute.xlu0 %4998 }
0x6964   :  { %v5001_v3 = vmul.f32 %v9376_v8, %v4999_v51 }
0x6966   :  { %v5003_v5 = vrot.slane %v5001_v3, 6  ;;  %v10889_v6 = vsel %vm1281_vm8, %v10856_v45, %v5001_v3 }
0x6968   :  { %5004 = vrot.lane.b32.xlu0 %v5003_v5, %s9930_s19 }
0x696b   :  { %v5208_v14 = vpop.permute.xlu1 %5207 }
0x696c   :  { %v10892_v12 = vmul.f32 %v9378_v22, %v5208_v14 }
0x696e   :  { %v5212_v17 = vrot.slane %v10892_v12, 7 }
0x6970   :  { %5213 = vrot.lane.b32.xlu1 %v5212_v17, %s9930_s19 }
0x69da   :  { %v5005_v18 = vpop.permute.xlu0 %5004 }
0x69db   :  { %8595 = vmatmul.mubr.msk.f32.vlgmr.msra.gmra.mrb[50].mxu0 %vm270_vm1, %v5005_v18 }
0x69dc   :  { %8957 = vmatpush3.bf16.msra.mxu0 %v10336_v60  ;;  %8612 = vmatprep.mubr.msk.f32.mxu0 %vm9925_vm0, %v9926_v1 }
0x69dd   :  { %8958 = vmatprep.subr.bf16.mxu0 %v9924_v0 }
0x69e2   :  { %v5214_v28 = vpop.permute.xlu1 %5213 }
0x69e3   :  { %8613 = vmatmul.mubr.msk.f32.vlgmr.msra.gmra.mrb[52].mxu0 %vm270_vm1, %v5214_v28 }
0x69e4   :  { %8960 = vmatpush3.bf16.msra.mxu0 %v10336_v60  ;;  %8619 = vmatprep.mubr.msk.f32.mxu0 %vm9925_vm0, %v9926_v1 }
0x69e5   :  { %8964 = vmatprep.subr.bf16.mxu0 %v9924_v0 }
0x6aae   :  { %v10906_v23 = vpop.f32.mrb[50].mxu0 }
0x6aaf   :  { %v8596_v13 = vpop.f32.mrb[51].mxu0 }
0x6ab6   :  { %v5283_v25 = vpop.f32.mrb[52].mxu0 }
0x6ab7   :  { %v5288_v30 = vrot.slane %v5283_v25, 2  ;;  %v8614_v42 = vpop.f32.mrb[53].mxu0 }
0x6ab9   :  { %v5290_v46 = vadd.f32 %v5288_v30, %v10873_v34 }
0x6abb   :  { %9383 = vtanh.f32 %v5290_v46  ;;  %v7962_v24 = vmul.f32 -1.442695, %v5290_v46 }
0x6abd   :  { %9385 = vpow2.f32 %v7962_v24 }
0x6ac5   :  { %v9384_v45 = vpop.eup %9383 }
0x6ac6   :  { %5303 = vrot.lane.b32.xlu0 %v9384_v45, %s9927_s3 }
0x6ac7   :  { %v9386_v35 = vpop.eup %9385 }
0x6ac8   :  { %v5294_v26 = vadd.f32 1.0, %v9386_v35 }
0x6aca   :  { %9387 = vrcp.f32 %v5294_v26 }
0x6ad4   :  { %v9388_v27 = vpop.eup %9387 }
0x6ad5   :  { %v5301_v4 = vmul.f32 %v9388_v27, %v5299_v39 }
0x6b38   :  { %v5304_v29 = vpop.permute.xlu0 %5303 }
0x6b39   :  { %v5306_v31 = vmul.f32 %v9388_v27, %v5304_v29 }
0x6b3b   :  { %5308 = vrot.lane.b32.xlu1 %v5306_v31, %s9928_s23 }
0x6bad   :  { %v5309_v40 = vpop.permute.xlu1 %5308 }
0x6bae   :  { %v5311_v36 = vadd.f32 %v5309_v40, %v5301_v4 }
0x6bb0   :  { %9389 = vtanh.f32 %v5311_v36  ;;  %v5406_v20 = vrot.slane %v5311_v36, 1 }
0x6bba   :  { %v9390_v7 = vpop.eup %9389 }
0x6bbb   :  { %5314 = vrot.lane.b32.xlu0 %v9390_v7, %s9929_s28 }
0x6c2d   :  { %v5315_v11 = vpop.permute.xlu0 %5314 }
0x6c2e   :  { %v10912_v38 = vmul.f32 %v9388_v27, %v5315_v11 }
0x6c30   :  { %v5319_v43 = vrot.slane %v10912_v38, 6 }
0x6c32   :  { %5320 = vrot.lane.b32.xlu1 %v5319_v43, %s9930_s19 }
0x6ca4   :  { %v5321_v19 = vpop.permute.xlu1 %5320 }
0x6ca5   :  { %8620 = vmatmul.mubr.msk.f32.vlgmr.msra.gmra.mrb[54].mxu0 %vm270_vm1, %v5321_v19 }
0x6ca6   :  { %8966 = vmatpush3.bf16.msra.mxu0 %v10336_v60  ;;  %8633 = vmatprep.mubr.msk.f32.mxu0 %vm9925_vm0, %v9926_v1 }
0x6ca7   :  { %8970 = vmatprep.subr.bf16.mxu0 %v9924_v0 }
0x6d78   :  { %v5390_v32 = vpop.f32.mrb[54].mxu0 }
0x6d79   :  { %v5395_v49 = vrot.slane %v5390_v32, 3  ;;  %v8621_v8 = vpop.f32.mrb[55].mxu0 }
0x6d7b   :  { %v5397_v48 = vadd.f32 %v5395_v49, %v10873_v34 }
0x6d7d   :  { %9391 = vtanh.f32 %v5397_v48  ;;  %v7964_v22 = vmul.f32 -1.442695, %v5397_v48 }
0x6d7f   :  { %9393 = vpow2.f32 %v7964_v22 }
0x6d87   :  { %v9392_v10 = vpop.eup %9391 }
0x6d88   :  { %5410 = vrot.lane.b32.xlu0 %v9392_v10, %s9927_s3 }
0x6d89   :  { %v9394_v37 = vpop.eup %9393 }
0x6d8a   :  { %v5401_v16 = vadd.f32 1.0, %v9394_v37 }
0x6d8c   :  { %9395 = vrcp.f32 %v5401_v16 }
0x6d96   :  { %v9396_v21 = vpop.eup %9395 }
0x6d97   :  { %v5408_v53 = vmul.f32 %v9396_v21, %v5406_v20 }
0x6dfa   :  { %v5411_v56 = vpop.permute.xlu0 %5410 }
0x6dfb   :  { %v5413_v9 = vmul.f32 %v9396_v21, %v5411_v56 }
0x6dfd   :  { %5415 = vrot.lane.b32.xlu1 %v5413_v9, %s9928_s23 }
0x6e6f   :  { %v5416_v57 = vpop.permute.xlu1 %5415 }
0x6e70   :  { %v5418_v58 = vadd.f32 %v5416_v57, %v5408_v53 }
0x6e72   :  { %9397 = vtanh.f32 %v5418_v58  ;;  %v5513_v26 = vrot.slane %v5418_v58, 1 }
0x6e7c   :  { %v9398_v61 = vpop.eup %9397 }
0x6e7d   :  { %5421 = vrot.lane.b32.xlu0 %v9398_v61, %s9929_s28 }
0x6eef   :  { %v5422_v51 = vpop.permute.xlu0 %5421 }
0x6ef0   :  { %v10925_v3 = vmul.f32 %v9396_v21, %v5422_v51 }
0x6ef2   :  { %v5426_v5 = vrot.slane %v10925_v3, 5 }
0x6ef4   :  { %5427 = vrot.lane.b32.xlu1 %v5426_v5, %s9930_s19 }
0x6f66   :  { %v5428_v14 = vpop.permute.xlu1 %5427 }
0x6f67   :  { %8627 = vmatmul.mubr.msk.f32.vlgmr.msra.gmra.mrb[44].mxu1 %vm270_vm1, %v5428_v14 }
0x6f68   :  { %8969 = vmatpush3.bf16.msra.mxu1 %v10336_v60  ;;  %8640 = vmatprep.mubr.msk.f32.mxu1 %vm9925_vm0, %v9926_v1 }
0x6f69   :  { %8973 = vmatprep.subr.bf16.mxu1 %v9924_v0 }
0x703a   :  { %v5497_v17 = vpop.f32.mrb[44].mxu1 }
0x703b   :  { %v5502_v18 = vrot.slane %v5497_v17, 4  ;;  %v8628_v28 = vpop.f32.mrb[45].mxu1 }
0x703d   :  { %v5504_v13 = vadd.f32 %v5502_v18, %v10873_v34 }
0x703f   :  { %9399 = vtanh.f32 %v5504_v13  ;;  %v7966_v30 = vmul.f32 -1.442695, %v5504_v13 }
0x7041   :  { %9401 = vpow2.f32 %v7966_v30 }
0x7049   :  { %v9400_v25 = vpop.eup %9399 }
0x704a   :  { %5517 = vrot.lane.b32.xlu0 %v9400_v25, %s9927_s3 }
0x704b   :  { %v9402_v42 = vpop.eup %9401 }
0x704c   :  { %v5508_v46 = vadd.f32 1.0, %v9402_v42 }
0x704e   :  { %9403 = vrcp.f32 %v5508_v46 }
0x7058   :  { %v9404_v45 = vpop.eup %9403 }
0x7059   :  { %v5515_v27 = vmul.f32 %v9404_v45, %v5513_v26 }
0x70bc   :  { %v5518_v24 = vpop.permute.xlu0 %5517 }
0x70bd   :  { %v5520_v35 = vmul.f32 %v9404_v45, %v5518_v24 }
0x70bf   :  { %5522 = vrot.lane.b32.xlu1 %v5520_v35, %s9928_s23 }
0x7131   :  { %v5523_v29 = vpop.permute.xlu1 %5522 }
0x7132   :  { %v5525_v31 = vadd.f32 %v5523_v29, %v5515_v27 }
0x7134   :  { %9405 = vtanh.f32 %v5525_v31  ;;  %v5620_v21 = vrot.slane %v5525_v31, 1 }
0x713e   :  { %v9406_v39 = vpop.eup %9405 }
0x713f   :  { %5528 = vrot.lane.b32.xlu0 %v9406_v39, %s9929_s28 }
0x71b1   :  { %v5529_v4 = vpop.permute.xlu0 %5528 }
0x71b2   :  { %v10938_v40 = vmul.f32 %v9404_v45, %v5529_v4 }
0x71b4   :  { %v5533_v36 = vrot.slane %v10938_v40, 4 }
0x71b6   :  { %5534 = vrot.lane.b32.xlu1 %v5533_v36, %s9930_s19 }
0x7228   :  { %v5535_v7 = vpop.permute.xlu1 %5534 }
0x7229   :  { %8634 = vmatmul.mubr.msk.f32.vlgmr.msra.gmra.mrb[56].mxu0 %vm270_vm1, %v5535_v7 }
0x722a   :  { %8972 = vmatpush3.bf16.msra.mxu0 %v10336_v60  ;;  %8647 = vmatprep.mubr.msk.f32.mxu0 %vm9925_vm0, %v9926_v1 }
0x722b   :  { %8976 = vmatprep.subr.bf16.mxu0 %v9924_v0 }
0x72fc   :  { %v5604_v11 = vpop.f32.mrb[56].mxu0 }
0x72fd   :  { %v5609_v43 = vrot.slane %v5604_v11, 5  ;;  %v8635_v19 = vpop.f32.mrb[57].mxu0 }
0x72ff   :  { %v5611_v32 = vadd.f32 %v5609_v43, %v10873_v34 }
0x7301   :  { %9407 = vtanh.f32 %v5611_v32  ;;  %v7968_v8 = vmul.f32 -1.442695, %v5611_v32 }
0x7303   :  { %9409 = vpow2.f32 %v7968_v8 }
0x730b   :  { %v9408_v49 = vpop.eup %9407 }
0x730c   :  { %5624 = vrot.lane.b32.xlu0 %v9408_v49, %s9927_s3 }
0x730d   :  { %v9410_v48 = vpop.eup %9409 }
0x730e   :  { %v5615_v10 = vadd.f32 1.0, %v9410_v48 }
0x7310   :  { %9411 = vrcp.f32 %v5615_v10 }
0x731a   :  { %v9412_v22 = vpop.eup %9411 }
0x731b   :  { %v5622_v56 = vmul.f32 %v9412_v22, %v5620_v21 }
0x737e   :  { %v5625_v37 = vpop.permute.xlu0 %5624 }
0x737f   :  { %v5627_v16 = vmul.f32 %v9412_v22, %v5625_v37 }
0x7381   :  { %5629 = vrot.lane.b32.xlu1 %v5627_v16, %s9928_s23 }
0x73f3   :  { %v5630_v9 = vpop.permute.xlu1 %5629 }
0x73f4   :  { %v5632_v20 = vadd.f32 %v5630_v9, %v5622_v56  ;;  %v5079_v56 = vrot.slane %v10906_v23, 1 }
0x73f6   :  { %9413 = vtanh.f32 %v5632_v20  ;;  %v5727_v45 = vrot.slane %v5632_v20, 1  ;;  %v5081_v9 = vadd.f32 %v5079_v56, %v10790_v41 }
0x7400   :  { %v9414_v53 = vpop.eup %9413 }
0x7401   :  { %5635 = vrot.lane.b32.xlu0 %v9414_v53, %s9929_s28 }
0x7473   :  { %v5636_v57 = vpop.permute.xlu0 %5635 }
0x7474   :  { %v10951_v58 = vmul.f32 %v9412_v22, %v5636_v57 }
0x7476   :  { %v5640_v61 = vrot.slane %v10951_v58, 3 }
0x7478   :  { %5641 = vrot.lane.b32.xlu1 %v5640_v61, %s9930_s19 }
0x74ea   :  { %v5642_v51 = vpop.permute.xlu1 %5641 }
0x74eb   :  { %8641 = vmatmul.mubr.msk.f32.vlgmr.msra.gmra.mrb[46].mxu1 %vm270_vm1, %v5642_v51  ;;  %v7958_v51 = vmul.f32 -1.442695, %v5081_v9 }
0x74ec   :  { %8975 = vmatpush3.bf16.msra.mxu1 %v10336_v60  ;;  %8654 = vmatprep.mubr.msk.f32.mxu1 %vm9925_vm0, %v9926_v1 }
0x74ed   :  { %8982 = vmatprep.subr.bf16.mxu1 %v9924_v0 }
0x75be   :  { %v5711_v5 = vpop.f32.mrb[46].mxu1 }
0x75bf   :  { %v5716_v14 = vrot.slane %v5711_v5, 6  ;;  %v8642_v17 = vpop.f32.mrb[47].mxu1 }
0x75c1   :  { %v5718_v18 = vadd.f32 %v5716_v14, %v10873_v34 }
0x75c3   :  { %9415 = vtanh.f32 %v5718_v18  ;;  %v7970_v13 = vmul.f32 -1.442695, %v5718_v18 }
0x75c5   :  { %9417 = vpow2.f32 %v7970_v13 }
0x75cd   :  { %v9416_v28 = vpop.eup %9415 }
0x75ce   :  { %5731 = vrot.lane.b32.xlu0 %v9416_v28, %s9927_s3  ;;  %v5090_v28 = vrot.slane %v10882_v50, 7 }
0x75cf   :  { %v9418_v25 = vpop.eup %9417 }
0x75d0   :  { %v5722_v30 = vadd.f32 1.0, %v9418_v25 }
0x75d2   :  { %9419 = vrcp.f32 %v5722_v30 }
0x75dc   :  { %v9420_v60 = vpop.eup %9419 }
0x75dd   :  { %v5729_v24 = vmul.f32 %v9420_v60, %v5727_v45 }
0x7640   :  { %v5732_v42 = vpop.permute.xlu0 %5731 }
0x7641   :  { %v5734_v46 = vmul.f32 %v9420_v60, %v5732_v42 }
0x7643   :  { %5736 = vrot.lane.b32.xlu1 %v5734_v46, %s9928_s23 }
0x76b5   :  { %v5737_v35 = vpop.permute.xlu1 %5736 }
0x76b6   :  { %v5739_v26 = vadd.f32 %v5737_v35, %v5729_v24 }
0x76b8   :  { %9421 = vtanh.f32 %v5739_v26 }
0x76c2   :  { %v9422_v27 = vpop.eup %9421 }
0x76c3   :  { %5742 = vrot.lane.b32.xlu0 %v9422_v27, %s9929_s28 }
0x7735   :  { %v5743_v29 = vpop.permute.xlu0 %5742 }
0x7736   :  { %v10964_v31 = vmul.f32 %v9420_v60, %v5743_v29 }
0x7738   :  { %v5747_v39 = vrot.slane %v10964_v31, 2 }
0x773a   :  { %5748 = vrot.lane.b32.xlu1 %v5747_v39, %s9930_s19 }
0x77ac   :  { %v5749_v4 = vpop.permute.xlu1 %5748 }
0x77ad   :  { %8648 = vmatmul.mubr.msk.f32.vlgmr.msra.gmra.mrb[58].mxu0 %vm270_vm1, %v5749_v4 }
0x77ae   :  { %8978 = vmatpush3.bf16.msra.mxu0 %v10468_v54  ;;  %8665 = vmatprep.mubr.msk.f32.mxu0 %vm9925_vm0, %v9926_v1 }
0x77af   :  { %8979 = vmatprep.subr.bf16.mxu0 %v9924_v0 }
0x77b2   :  { %8981 = vmatpush3.bf16.msra.mxu0 %v10476_v63  ;;  %v5834_v63 = vrot.slane %v5739_v26, 1 }
0x77b3   :  { %8988 = vmatprep.subr.bf16.mxu0 %v9924_v0 }
0x7880   :  { %v5818_v36 = vpop.f32.mrb[58].mxu0 }
0x7881   :  { %v5823_v7 = vrot.slane %v5818_v36, 7  ;;  %v8649_v11 = vpop.f32.mrb[59].mxu0 }
0x7883   :  { %v5825_v43 = vadd.f32 %v5823_v7, %v10873_v34 }
0x7885   :  { %9423 = vtanh.f32 %v5825_v43  ;;  %v7972_v32 = vmul.f32 -1.442695, %v5825_v43 }
0x7887   :  { %9425 = vpow2.f32 %v7972_v32 }
0x788f   :  { %v9424_v19 = vpop.eup %9423 }
0x7890   :  { %5838 = vrot.lane.b32.xlu0 %v9424_v19, %s9927_s3 }
0x7891   :  { %v9426_v54 = vpop.eup %9425 }
0x7892   :  { %v5829_v49 = vadd.f32 1.0, %v9426_v54 }
0x7894   :  { %9427 = vrcp.f32 %v5829_v49 }
0x789e   :  { %v9428_v8 = vpop.eup %9427 }
0x789f   :  { %v5836_v22 = vmul.f32 %v9428_v8, %v5834_v63 }
0x7902   :  { %v5839_v48 = vpop.permute.xlu0 %5838 }
0x7903   :  { %v5841_v10 = vmul.f32 %v9428_v8, %v5839_v48 }
0x7905   :  { %5843 = vrot.lane.b32.xlu1 %v5841_v10, %s9928_s23 }
0x7977   :  { %v5844_v37 = vpop.permute.xlu1 %5843 }
0x7978   :  { %v5846_v16 = vadd.f32 %v5844_v37, %v5836_v22 }
0x797a   :  { %9429 = vtanh.f32 %v5846_v16  ;;  %v5938_v4 = vrot.slane %v5846_v16, 1 }
0x797b   :  { %9431 = vtanh.f32 %v5081_v9 }
0x797c   :  { %9433 = vpow2.f32 %v7958_v51 }
0x7984   :  { %v9430_v21 = vpop.eup %9429 }
0x7985   :  { %5849 = vrot.lane.b32.xlu0 %v9430_v21, %s9929_s28  ;;  %v9432_v61 = vpop.eup %9431 }
0x7986   :  { %v9434_v5 = vpop.eup %9433 }
0x7987   :  { %v5085_v14 = vadd.f32 1.0, %v9434_v5 }
0x7989   :  { %9435 = vrcp.f32 %v5085_v14 }
0x7993   :  { %v9436_v41 = vpop.eup %9435 }
0x7994   :  { %v5092_v13 = vmul.f32 %v9436_v41, %v5090_v28 }
0x79f7   :  { %v5850_v20 = vpop.permute.xlu0 %5849 }
0x79f8   :  { %v5852_v53 = vmul.f32 %v9428_v8, %v5850_v20 }
0x79fa   :  { %v5854_v57 = vrot.slane %v5852_v53, 1 }
0x79fc   :  { %5855 = vrot.lane.b32.xlu1 %v5854_v57, %s9930_s19 }
0x7a00   :  { %5094 = vrot.lane.b32.xlu1 %v9432_v61, %s9927_s3 }
0x7a6e   :  { %v5856_v17 = vpop.permute.xlu1 %5855 }
0x7a6f   :  { %8655 = vmatmul.mubr.msk.f32.vlgmr.msra.gmra.mrb[48].mxu1 %vm270_vm1, %v5856_v17 }
0x7a70   :  { %8984 = vmatpush3.bf16.msra.mxu1 %v10473_v59  ;;  %8672 = vmatprep.mubr.msk.f32.mxu1 %vm9925_vm0, %v9926_v1 }
0x7a71   :  { %8985 = vmatprep.subr.bf16.mxu1 %v9924_v0 }
0x7a72   :  { %v5095_v23 = vpop.permute.xlu1 %5094 }
0x7a73   :  { %v5097_v18 = vmul.f32 %v9436_v41, %v5095_v23 }
0x7a75   :  { %5099 = vrot.lane.b32.xlu1 %v5097_v18, %s9928_s23 }
0x7ae7   :  { %v5100_v25 = vpop.permute.xlu1 %5099 }
0x7ae8   :  { %v5102_v30 = vadd.f32 %v5100_v25, %v5092_v13 }
0x7aea   :  { %9437 = vtanh.f32 %v5102_v30 }
0x7af4   :  { %v9438_v60 = vpop.eup %9437 }
0x7af5   :  { %5105 = vrot.lane.b32.xlu1 %v9438_v60, %s9929_s28 }
0x7b42   :  { %v5925_v42 = vpop.f32.mrb[48].mxu1 }
0x7b43   :  { %v5929_v46 = vadd.f32 %v5925_v42, %v10873_v34  ;;  %v8656_v45 = vpop.f32.mrb[49].mxu1 }
0x7b45   :  { %9439 = vtanh.f32 %v5929_v46  ;;  %v7974_v35 = vmul.f32 -1.442695, %v5929_v46 }
0x7b47   :  { %9441 = vpow2.f32 %v7974_v35 }
0x7b4f   :  { %v9440_v24 = vpop.eup %9439 }
0x7b50   :  { %5942 = vrot.lane.b32.xlu0 %v9440_v24, %s9927_s3 }
0x7b51   :  { %v9442_v26 = vpop.eup %9441 }
0x7b52   :  { %v5933_v27 = vadd.f32 1.0, %v9442_v26 }
0x7b54   :  { %9443 = vrcp.f32 %v5933_v27 }
0x7b5e   :  { %v9444_v50 = vpop.eup %9443 }
0x7b5f   :  { %v5940_v36 = vmul.f32 %v9444_v50, %v5938_v4 }
0x7b67   :  { %v5106_v34 = vpop.permute.xlu1 %5105 }
0x7b68   :  { %v5108_v19 = vmul.f32 %v9436_v41, %v5106_v34 }
0x7b6a   :  { %v5115_v32 = vsel %vm1283_vm9, %v10889_v6, %v5108_v19 }
0x7bc2   :  { %v5943_v29 = vpop.permute.xlu0 %5942 }
0x7bc3   :  { %v5945_v39 = vmul.f32 %v9444_v50, %v5943_v29 }
0x7bc5   :  { %5947 = vrot.lane.b32.xlu0 %v5945_v39, %s9928_s23 }
0x7c37   :  { %v5948_v7 = vpop.permute.xlu0 %5947 }
0x7c38   :  { %v5950_v11 = vadd.f32 %v5948_v7, %v5940_v36 }
0x7c3a   :  { %9445 = vtanh.f32 %v5950_v11 }
0x7c44   :  { %v9446_v43 = vpop.eup %9445 }
0x7c45   :  { %5953 = vrot.lane.b32.xlu0 %v9446_v43, %s9929_s28 }
0x7c49   :  { %5965 = vrot.lane.b32.xlu0 %v5115_v32, %s9930_s19 }
0x7cb7   :  { %v5954_v54 = vpop.permute.xlu0 %5953 }
0x7cb8   :  { %v5956_v49 = vmul.f32 %v9444_v50, %v5954_v54 }
0x7cba   :  { %v5957_v8 = vsel %vm1271_vm3, %v5956_v49, %v5852_v53 }
0x7cbb   :  { %v5958_v48 = vsel %vm1273_vm4, %v5957_v8, %v10964_v31  ;;  %v5966_v16 = vpop.permute.xlu0 %5965 }
0x7cbc   :  { %v5959_v10 = vsel %vm1275_vm5, %v5958_v48, %v10951_v58 }
0x7cbd   :  { %v5960_v63 = vsel %vm1277_vm6, %v5959_v10, %v10938_v40 }
0x7cbe   :  { %v5961_v22 = vsel %vm1279_vm7, %v5960_v63, %v10925_v3  ;;  %v9581_v3 = vld [vmem:[#allocation19] ss:$0 sm:$0xff] }
0x7cbf   :  { %v5962_v6 = vsel %vm1281_vm8, %v5961_v22, %v10912_v38 }
0x7cc0   :  { %v5963_v37 = vsel %vm1283_vm9, %v5962_v6, %v10892_v12 }
0x7cc1   :  { %5969 = vrot.lane.b32.xlu1 %v5963_v37, %s9927_s3 }
0x7d33   :  { %v5970_v21 = vpop.permute.xlu1 %5969 }
0x7d34   :  { %v11013_v31 = vsel %vm270_vm1, %v5966_v16, %v5970_v21 }
0x7d35   :  { %8666 = vmatmul.mubr.msk.f32.vlgmr.msra.gmra.mrb[60].mxu0 %vm351_vm2, %v11013_v31 }
0x7d36   :  { %8990 = vmatpush3.bf16.msra.mxu0 %v10473_v59  ;;  %8686 = vmatprep.mubr.msk.f32.mxu0 %vm9925_vm0, %v9926_v1 }
0x7d37   :  { %8994 = vmatprep.subr.bf16.mxu0 %v9924_v0 }
0x7e08   :  { %v6042_v38 = vpop.f32.mrb[60].mxu0 }
0x7e09   :  { %v11021_v12 = vadd.f32 %v9581_v3, %v6042_v38  ;;  %v8667_v40 = vpop.f32.mrb[61].mxu0 }
0x7e0b   :  { %v6046_v58 = vadd.f32 %v11021_v12, %v10516_v52 }
0x7e0d   :  { %9447 = vtanh.f32 %v6046_v58  ;;  %v7976_v9 = vmul.f32 -1.442695, %v6046_v58 }
0x7e0f   :  { %9449 = vpow2.f32 %v7976_v9 }
0x7e17   :  { %v9448_v56 = vpop.eup %9447 }
0x7e18   :  { %6056 = vrot.lane.b32.xlu0 %v9448_v56, %s9927_s3 }
0x7e19   :  { %v9450_v20 = vpop.eup %9449 }
0x7e1a   :  { %v6050_v53 = vadd.f32 1.0, %v9450_v20 }
0x7e1c   :  { %9451 = vrcp.f32 %v6050_v53 }
0x7e26   :  { %v9452_v57 = vpop.eup %9451 }
0x7e27   :  { %v6054_v5 = vmul.f32 0.0, %v9452_v57 }
0x7e8a   :  { %v6057_v61 = vpop.permute.xlu0 %6056 }
0x7e8b   :  { %v6059_v51 = vmul.f32 %v9452_v57, %v6057_v61 }
0x7e8d   :  { %6061 = vrot.lane.b32.xlu1 %v6059_v51, %s9928_s23 }
0x7eff   :  { %v6062_v14 = vpop.permute.xlu1 %6061 }
0x7f00   :  { %v6064_v17 = vadd.f32 %v6062_v14, %v6054_v5 }
0x7f02   :  { %9453 = vtanh.f32 %v6064_v17  ;;  %v6158_v27 = vrot.slane %v6064_v17, 7 }
0x7f0c   :  { %v9454_v41 = vpop.eup %9453 }
0x7f0d   :  { %6067 = vrot.lane.b32.xlu0 %v9454_v41, %s9929_s28 }
0x7f7f   :  { %v6068_v52 = vpop.permute.xlu0 %6067 }
0x7f80   :  { %v11028_v23 = vmul.f32 %v9452_v57, %v6068_v52 }
0x7f82   :  { %6072 = vrot.lane.b32.xlu1 %v11028_v23, %s9930_s19 }
0x7ff4   :  { %v6073_v18 = vpop.permute.xlu1 %6072 }
0x7ff5   :  { %8673 = vmatmul.mubr.msk.f32.vlgmr.msra.gmra.mrb[50].mxu1 %vm270_vm1, %v6073_v18 }
0x7ff6   :  { %8987 = vmatpush3.bf16.msra.mxu1 %v10473_v59  ;;  %8679 = vmatprep.mubr.msk.f32.mxu1 %vm9925_vm0, %v9926_v1 }
0x7ff7   :  { %8991 = vmatprep.subr.bf16.mxu1 %v9924_v0 }
0x80c8   :  { %v6142_v28 = vpop.f32.mrb[50].mxu1 }
0x80c9   :  { %v6147_v13 = vrot.slane %v6142_v28, 7  ;;  %v8674_v25 = vpop.f32.mrb[51].mxu1 }
0x80cb   :  { %v6149_v30 = vadd.f32 %v6147_v13, %v11021_v12 }
0x80cd   :  { %9455 = vtanh.f32 %v6149_v30  ;;  %v7978_v42 = vmul.f32 -1.442695, %v6149_v30 }
0x80cf   :  { %9457 = vpow2.f32 %v7978_v42 }
0x80d7   :  { %v9456_v60 = vpop.eup %9455 }
0x80d8   :  { %6162 = vrot.lane.b32.xlu0 %v9456_v60, %s9927_s3 }
0x80d9   :  { %v9458_v46 = vpop.eup %9457 }
0x80da   :  { %v6153_v45 = vadd.f32 1.0, %v9458_v46 }
0x80dc   :  { %9459 = vrcp.f32 %v6153_v45 }
0x80e6   :  { %v9460_v24 = vpop.eup %9459 }
0x80e7   :  { %v6160_v50 = vmul.f32 %v9460_v24, %v6158_v27 }
0x814a   :  { %v6163_v35 = vpop.permute.xlu0 %6162 }
0x814b   :  { %v6165_v26 = vmul.f32 %v9460_v24, %v6163_v35 }
0x814d   :  { %6167 = vrot.lane.b32.xlu1 %v6165_v26, %s9928_s23 }
0x81bf   :  { %v6168_v29 = vpop.permute.xlu1 %6167 }
0x81c0   :  { %v6170_v39 = vadd.f32 %v6168_v29, %v6160_v50 }
0x81c2   :  { %9461 = vtanh.f32 %v6170_v39  ;;  %v6265_v37 = vrot.slane %v6170_v39, 7 }
0x81cc   :  { %v9462_v4 = vpop.eup %9461 }
0x81cd   :  { %6173 = vrot.lane.b32.xlu0 %v9462_v4, %s9929_s28 }
0x823f   :  { %v6174_v36 = vpop.permute.xlu0 %6173 }
0x8240   :  { %v6176_v7 = vmul.f32 %v9460_v24, %v6174_v36 }
0x8242   :  { %v6178_v11 = vrot.slane %v6176_v7, 1  ;;  %v6819_v56 = vsel %vm1271_vm3, %v11028_v23, %v6176_v7 }
0x8244   :  { %6179 = vrot.lane.b32.xlu1 %v6178_v11, %s9930_s19 }
0x82b6   :  { %v6180_v34 = vpop.permute.xlu1 %6179 }
0x82b7   :  { %8680 = vmatmul.mubr.msk.f32.vlgmr.msra.gmra.mrb[52].mxu1 %vm270_vm1, %v6180_v34 }
0x82b8   :  { %8993 = vmatpush3.bf16.msra.mxu1 %v10473_v59  ;;  %8693 = vmatprep.mubr.msk.f32.mxu1 %vm9925_vm0, %v9926_v1 }
0x82b9   :  { %8997 = vmatprep.subr.bf16.mxu1 %v9924_v0 }
0x838a   :  { %v6249_v43 = vpop.f32.mrb[52].mxu1 }
0x838b   :  { %v6254_v19 = vrot.slane %v6249_v43, 6  ;;  %v8681_v32 = vpop.f32.mrb[53].mxu1 }
0x838d   :  { %v6256_v54 = vadd.f32 %v6254_v19, %v11021_v12 }
0x838f   :  { %9463 = vtanh.f32 %v6256_v54  ;;  %v7980_v8 = vmul.f32 -1.442695, %v6256_v54 }
0x8391   :  { %9465 = vpow2.f32 %v7980_v8 }
0x8399   :  { %v9464_v49 = vpop.eup %9463 }
0x839a   :  { %6269 = vrot.lane.b32.xlu0 %v9464_v49, %s9927_s3 }
0x839b   :  { %v9466_v48 = vpop.eup %9465 }
0x839c   :  { %v6260_v10 = vadd.f32 1.0, %v9466_v48 }
0x839e   :  { %9467 = vrcp.f32 %v6260_v10 }
0x83a8   :  { %v9468_v63 = vpop.eup %9467 }
0x83a9   :  { %v6267_v16 = vmul.f32 %v9468_v63, %v6265_v37 }
0x840c   :  { %v6270_v22 = vpop.permute.xlu0 %6269 }
0x840d   :  { %v6272_v6 = vmul.f32 %v9468_v63, %v6270_v22 }
0x840f   :  { %6274 = vrot.lane.b32.xlu1 %v6272_v6, %s9928_s23 }
0x8481   :  { %v6275_v21 = vpop.permute.xlu1 %6274 }
0x8482   :  { %v6277_v38 = vadd.f32 %v6275_v21, %v6267_v16 }
0x8484   :  { %9469 = vtanh.f32 %v6277_v38  ;;  %v6372_v13 = vrot.slane %v6277_v38, 7 }
0x848e   :  { %v9470_v3 = vpop.eup %9469 }
0x848f   :  { %6280 = vrot.lane.b32.xlu0 %v9470_v3, %s9929_s28 }
0x8501   :  { %v6281_v40 = vpop.permute.xlu0 %6280 }
0x8502   :  { %v6283_v58 = vmul.f32 %v9468_v63, %v6281_v40 }
0x8504   :  { %v6285_v9 = vrot.slane %v6283_v58, 2  ;;  %v6820_v20 = vsel %vm1273_vm4, %v6819_v56, %v6283_v58 }
0x8506   :  { %6286 = vrot.lane.b32.xlu1 %v6285_v9, %s9930_s19 }
0x8578   :  { %v6287_v53 = vpop.permute.xlu1 %6286 }
0x8579   :  { %8687 = vmatmul.mubr.msk.f32.vlgmr.msra.gmra.mrb[62].mxu0 %vm270_vm1, %v6287_v53 }
0x857a   :  { %8996 = vmatpush3.bf16.msra.mxu0 %v10473_v59  ;;  %8700 = vmatprep.mubr.msk.f32.mxu0 %vm9925_vm0, %v9926_v1 }
0x857b   :  { %9000 = vmatprep.subr.bf16.mxu0 %v9924_v0 }
0x864c   :  { %v6356_v57 = vpop.f32.mrb[62].mxu0 }
0x864d   :  { %v6361_v61 = vrot.slane %v6356_v57, 5  ;;  %v8688_v51 = vpop.f32.mrb[63].mxu0 }
0x864f   :  { %v6363_v5 = vadd.f32 %v6361_v61, %v11021_v12 }
0x8651   :  { %9471 = vtanh.f32 %v6363_v5  ;;  %v7982_v17 = vmul.f32 -1.442695, %v6363_v5 }
0x8653   :  { %9473 = vpow2.f32 %v7982_v17 }
0x865b   :  { %v9472_v14 = vpop.eup %9471 }
0x865c   :  { %6376 = vrot.lane.b32.xlu0 %v9472_v14, %s9927_s3 }
0x865d   :  { %v9474_v41 = vpop.eup %9473 }
0x865e   :  { %v6367_v52 = vadd.f32 1.0, %v9474_v41 }
0x8660   :  { %9475 = vrcp.f32 %v6367_v52 }
0x866a   :  { %v9476_v23 = vpop.eup %9475 }
0x866b   :  { %v6374_v25 = vmul.f32 %v9476_v23, %v6372_v13 }
0x86ce   :  { %v6377_v18 = vpop.permute.xlu0 %6376 }
0x86cf   :  { %v6379_v28 = vmul.f32 %v9476_v23, %v6377_v18 }
0x86d1   :  { %6381 = vrot.lane.b32.xlu1 %v6379_v28, %s9928_s23 }
0x8743   :  { %v6382_v30 = vpop.permute.xlu1 %6381 }
0x8744   :  { %v6384_v60 = vadd.f32 %v6382_v30, %v6374_v25 }
0x8746   :  { %9477 = vtanh.f32 %v6384_v60  ;;  %v6479_v32 = vrot.slane %v6384_v60, 7 }
0x8750   :  { %v9478_v42 = vpop.eup %9477 }
0x8751   :  { %6387 = vrot.lane.b32.xlu0 %v9478_v42, %s9929_s28 }
0x87c3   :  { %v6388_v46 = vpop.permute.xlu0 %6387 }
0x87c4   :  { %v6390_v45 = vmul.f32 %v9476_v23, %v6388_v46 }
0x87c6   :  { %v6392_v24 = vrot.slane %v6390_v45, 3  ;;  %v6821_v35 = vsel %vm1275_vm5, %v6820_v20, %v6390_v45 }
0x87c8   :  { %6393 = vrot.lane.b32.xlu1 %v6392_v24, %s9930_s19 }
0x883a   :  { %v6394_v26 = vpop.permute.xlu1 %6393 }
0x883b   :  { %8694 = vmatmul.mubr.msk.f32.vlgmr.msra.gmra.mrb[54].mxu1 %vm270_vm1, %v6394_v26 }
0x883c   :  { %8999 = vmatpush3.bf16.msra.mxu1 %v10473_v59  ;;  %8707 = vmatprep.mubr.msk.f32.mxu1 %vm9925_vm0, %v9926_v1 }
0x883d   :  { %9003 = vmatprep.subr.bf16.mxu1 %v9924_v0 }
0x890e   :  { %v6463_v27 = vpop.f32.mrb[54].mxu1 }
0x890f   :  { %v6468_v50 = vrot.slane %v6463_v27, 4  ;;  %v8695_v29 = vpop.f32.mrb[55].mxu1 }
0x8911   :  { %v6470_v39 = vadd.f32 %v6468_v50, %v11021_v12 }
0x8913   :  { %9479 = vtanh.f32 %v6470_v39  ;;  %v7984_v36 = vmul.f32 -1.442695, %v6470_v39 }
0x8915   :  { %9481 = vpow2.f32 %v7984_v36 }
0x891d   :  { %v9480_v4 = vpop.eup %9479 }
0x891e   :  { %6483 = vrot.lane.b32.xlu0 %v9480_v4, %s9927_s3 }
0x891f   :  { %v9482_v7 = vpop.eup %9481 }
0x8920   :  { %v6474_v11 = vadd.f32 1.0, %v9482_v7 }
0x8922   :  { %9483 = vrcp.f32 %v6474_v11 }
0x892c   :  { %v9484_v34 = vpop.eup %9483 }
0x892d   :  { %v6481_v54 = vmul.f32 %v9484_v34, %v6479_v32 }
0x8990   :  { %v6484_v43 = vpop.permute.xlu0 %6483 }
0x8991   :  { %v6486_v19 = vmul.f32 %v9484_v34, %v6484_v43 }
0x8993   :  { %6488 = vrot.lane.b32.xlu1 %v6486_v19, %s9928_s23 }
0x8a05   :  { %v6489_v49 = vpop.permute.xlu1 %6488 }
0x8a06   :  { %v6491_v8 = vadd.f32 %v6489_v49, %v6481_v54 }
0x8a08   :  { %9485 = vtanh.f32 %v6491_v8  ;;  %v6586_v57 = vrot.slane %v6491_v8, 7 }
0x8a12   :  { %v9486_v48 = vpop.eup %9485 }
0x8a13   :  { %6494 = vrot.lane.b32.xlu0 %v9486_v48, %s9929_s28 }
0x8a85   :  { %v6495_v10 = vpop.permute.xlu0 %6494 }
0x8a86   :  { %v6497_v63 = vmul.f32 %v9484_v34, %v6495_v10 }
0x8a88   :  { %v6499_v22 = vrot.slane %v6497_v63, 4  ;;  %v6822_v6 = vsel %vm1277_vm6, %v6821_v35, %v6497_v63 }
0x8a8a   :  { %6500 = vrot.lane.b32.xlu1 %v6499_v22, %s9930_s19 }
0x8afc   :  { %v6501_v37 = vpop.permute.xlu1 %6500 }
0x8afd   :  { %8701 = vmatmul.mubr.msk.f32.vlgmr.msra.gmra.mrb[64].mxu0 %vm270_vm1, %v6501_v37 }
0x8afe   :  { %9002 = vmatpush3.bf16.msra.mxu0 %v10473_v59  ;;  %8714 = vmatprep.mubr.msk.f32.mxu0 %vm9925_vm0, %v9926_v1 }
0x8aff   :  { %9009 = vmatprep.subr.bf16.mxu0 %v9924_v0 }
0x8bd0   :  { %v6570_v16 = vpop.f32.mrb[64].mxu0 }
0x8bd1   :  { %v6575_v21 = vrot.slane %v6570_v16, 3  ;;  %v8702_v38 = vpop.f32.mrb[65].mxu0 }
0x8bd3   :  { %v6577_v3 = vadd.f32 %v6575_v21, %v11021_v12 }
0x8bd5   :  { %9487 = vtanh.f32 %v6577_v3  ;;  %v7986_v58 = vmul.f32 -1.442695, %v6577_v3 }
0x8bd7   :  { %9489 = vpow2.f32 %v7986_v58 }
0x8bdf   :  { %v9488_v40 = vpop.eup %9487 }
0x8be0   :  { %6590 = vrot.lane.b32.xlu0 %v9488_v40, %s9927_s3 }
0x8be1   :  { %v9490_v56 = vpop.eup %9489 }
0x8be2   :  { %v6581_v9 = vadd.f32 1.0, %v9490_v56 }
0x8be4   :  { %9491 = vrcp.f32 %v6581_v9 }
0x8bee   :  { %v9492_v59 = vpop.eup %9491 }
0x8bef   :  { %v6588_v61 = vmul.f32 %v9492_v59, %v6586_v57 }
0x8c52   :  { %v6591_v20 = vpop.permute.xlu0 %6590 }
0x8c53   :  { %v6593_v53 = vmul.f32 %v9492_v59, %v6591_v20 }
0x8c55   :  { %6595 = vrot.lane.b32.xlu1 %v6593_v53, %s9928_s23 }
0x8cc7   :  { %v6596_v51 = vpop.permute.xlu1 %6595 }
0x8cc8   :  { %v6598_v5 = vadd.f32 %v6596_v51, %v6588_v61 }
0x8cca   :  { %9493 = vtanh.f32 %v6598_v5  ;;  %v6693_v11 = vrot.slane %v6598_v5, 7 }
0x8cd4   :  { %v9494_v14 = vpop.eup %9493 }
0x8cd5   :  { %6601 = vrot.lane.b32.xlu0 %v9494_v14, %s9929_s28 }
0x8d47   :  { %v6602_v17 = vpop.permute.xlu0 %6601 }
0x8d48   :  { %v6604_v41 = vmul.f32 %v9492_v59, %v6602_v17 }
0x8d4a   :  { %v6606_v52 = vrot.slane %v6604_v41, 5  ;;  %v11087_v23 = vsel %vm1279_vm7, %v6822_v6, %v6604_v41 }
0x8d4c   :  { %6607 = vrot.lane.b32.xlu1 %v6606_v52, %s9930_s19 }
0x8dbe   :  { %v6608_v18 = vpop.permute.xlu1 %6607 }
0x8dbf   :  { %8708 = vmatmul.mubr.msk.f32.vlgmr.msra.gmra.mrb[56].mxu1 %vm270_vm1, %v6608_v18 }
0x8dc0   :  { %9005 = vmatpush3.bf16.msra.mxu1 %v10585_v62  ;;  %8725 = vmatprep.mubr.msk.f32.mxu1 %vm9925_vm0, %v9926_v1 }
0x8dc1   :  { %9006 = vmatprep.subr.bf16.mxu1 %v9924_v0 }
0x8dc4   :  { %9008 = vmatpush3.bf16.msra.mxu1 %v10589_v2  ;;  %v9582_v2 = vld [vmem:[%s11279_s15] ss:$0 sm:$0xff]  ;;  %s9931_s15 = smov [#allocation23]  }
0x8dc5   :  { %9015 = vmatprep.subr.bf16.mxu1 %v9924_v0  ;;  %s7855_s24 = sshll.u32 %s9931_s15, 4  ;;  %s7856_s24 = int_to_ptr.vmem [resolvable:$true] %s7855_s24 }
0x8dc6   :  { %s9871_s27 = scalar_lea.vmem %s7856_s24, 128  ;;  %p9876_p7 = scmp.lt.s32.totalorder %s7856_s24, %s7856_s24 }
0x8dc7   :  { %8726 = vmatmul.mubr.msk.f32.vlgmr.msra.gmra.mrb[58].mxu1 %vm351_vm2, %v11013_v31  ;;  %p9872_p6 = scmp.ne.s32.totalorder %s7856_s24, %s9871_s27  ;;  %p9877_p8 = scmp.lt.s32.totalorder %s9871_s27, %s9871_s27 }
0x8dc8   :  { %9017 = vmatpush3.bf16.msra.mxu1 %v10613_v33  ;;  %8746 = vmatprep.mubr.msk.f32.mxu1 %vm9925_vm0, %v9926_v1 }
0x8dc9   :  { %9021 = vmatprep.subr.bf16.mxu1 %v9924_v0  ;;  %p9878_p9 = por %p9877_p8, %p9876_p7 }
0x8dcb   :  { %p9879_p10 = pnand %p9878_p9, %p9872_p6 }
0x8e92   :  { %v6677_v62 = vpop.f32.mrb[56].mxu1 }
0x8e93   :  { %v6682_v28 = vrot.slane %v6677_v62, 2  ;;  %v8709_v13 = vpop.f32.mrb[57].mxu1 }
0x8e95   :  { %v6684_v25 = vadd.f32 %v6682_v28, %v11021_v12 }
0x8e97   :  { %9495 = vtanh.f32 %v6684_v25  ;;  %v7988_v24 = vmul.f32 -1.442695, %v6684_v25 }
0x8e9a   :  { %v6892_v30 = vpop.f32.mrb[58].mxu1 }
0x8e9b   :  { %v11107_v60 = vadd.f32 %v9582_v2, %v6892_v30  ;;  %v8727_v31 = vpop.f32.mrb[59].mxu1 }
0x8e9d   :  { %v6896_v42 = vadd.f32 %v11107_v60, %v3297_v47 }
0x8e9f   :  { %9497 = vtanh.f32 %v6896_v42  ;;  %v7992_v35 = vmul.f32 -1.442695, %v6896_v42 }
0x8ea0   :  { %9499 = vpow2.f32 %v7988_v24 }
0x8ea1   :  { %v9496_v46 = vpop.eup %9495  ;;  %9501 = vpow2.f32 %v7992_v35 }
0x8ea2   :  { %6697 = vrot.lane.b32.xlu0 %v9496_v46, %s9927_s3 }
0x8ea9   :  { %v9498_v45 = vpop.eup %9497 }
0x8eaa   :  { %6906 = vrot.lane.b32.xlu1 %v9498_v45, %s9927_s3  ;;  %v9500_v26 = vpop.eup %9499 }
0x8eab   :  { %v6688_v27 = vadd.f32 1.0, %v9500_v26  ;;  %v9502_v50 = vpop.eup %9501 }
0x8eac   :  { %v6900_v29 = vadd.f32 1.0, %v9502_v50 }
0x8ead   :  { %9503 = vrcp.f32 %v6688_v27 }
0x8eae   :  { %9505 = vrcp.f32 %v6900_v29 }
0x8eb7   :  { %v9504_v44 = vpop.eup %9503 }
0x8eb8   :  { %v9506_v4 = vpop.eup %9505  ;;  %v6695_v34 = vmul.f32 %v9504_v44, %v6693_v11 }
0x8eb9   :  { %v6904_v32 = vmul.f32 0.0, %v9506_v4 }
0x8f14   :  { %v6698_v39 = vpop.permute.xlu0 %6697 }
0x8f15   :  { %v6700_v47 = vmul.f32 %v9504_v44, %v6698_v39 }
0x8f17   :  { %6702 = vrot.lane.b32.xlu0 %v6700_v47, %s9928_s23 }
0x8f1c   :  { %v6907_v36 = vpop.permute.xlu1 %6906 }
0x8f1d   :  { %v6909_v7 = vmul.f32 %v9506_v4, %v6907_v36 }
0x8f1f   :  { %6911 = vrot.lane.b32.xlu1 %v6909_v7, %s9928_s23 }
0x8f89   :  { %v6703_v43 = vpop.permute.xlu0 %6702 }
0x8f8a   :  { %v11116_v19 = vadd.f32 %v6703_v43, %v6695_v34 }
0x8f8c   :  { %9507 = vtanh.f32 %v11116_v19 }
0x8f91   :  { %v6912_v54 = vpop.permute.xlu1 %6911 }
0x8f92   :  { %v6914_v49 = vadd.f32 %v6912_v54, %v6904_v32 }
0x8f94   :  { %9509 = vtanh.f32 %v6914_v49  ;;  %v7009_v41 = vrot.slane %v6914_v49, 1 }
0x8f96   :  { %v9508_v8 = vpop.eup %9507 }
0x8f97   :  { %6708 = vrot.lane.b32.xlu0 %v9508_v8, %s9929_s28 }
0x8f9e   :  { %v9510_v48 = vpop.eup %9509 }
0x8f9f   :  { %6917 = vrot.lane.b32.xlu1 %v9510_v48, %s9929_s28 }
0x9009   :  { %v6709_v10 = vpop.permute.xlu0 %6708 }
0x900a   :  { %v6711_v63 = vmul.f32 %v9504_v44, %v6709_v10 }
0x900c   :  { %v6713_v22 = vrot.slane %v6711_v63, 6  ;;  %v11123_v6 = vsel %vm1281_vm8, %v11087_v23, %v6711_v63 }
0x900e   :  { %6714 = vrot.lane.b32.xlu0 %v6713_v22, %s9930_s19 }
0x9011   :  { %v6918_v37 = vpop.permute.xlu1 %6917 }
0x9012   :  { %v11126_v16 = vmul.f32 %v9506_v4, %v6918_v37 }
0x9014   :  { %v6922_v21 = vrot.slane %v11126_v16, 7 }
0x9016   :  { %6923 = vrot.lane.b32.xlu1 %v6922_v21, %s9930_s19 }
0x9080   :  { %v6715_v38 = vpop.permute.xlu0 %6714 }
0x9081   :  { %8715 = vmatmul.mubr.msk.f32.vlgmr.msra.gmra.mrb[66].mxu0 %vm270_vm1, %v6715_v38 }
0x9082   :  { %9011 = vmatpush3.bf16.msra.mxu0 %v10613_v33  ;;  %8732 = vmatprep.mubr.msk.f32.mxu0 %vm9925_vm0, %v9926_v1 }
0x9083   :  { %9012 = vmatprep.subr.bf16.mxu0 %v9924_v0 }
0x9088   :  { %v6924_v3 = vpop.permute.xlu1 %6923 }
0x9089   :  { %8733 = vmatmul.mubr.msk.f32.vlgmr.msra.gmra.mrb[68].mxu0 %vm270_vm1, %v6924_v3 }
0x908a   :  { %9014 = vmatpush3.bf16.msra.mxu0 %v10613_v33  ;;  %8739 = vmatprep.mubr.msk.f32.mxu0 %vm9925_vm0, %v9926_v1 }
0x908b   :  { %9018 = vmatprep.subr.bf16.mxu0 %v9924_v0 }
0x9154   :  { %v11140_v40 = vpop.f32.mrb[66].mxu0 }
0x9155   :  { %v8716_v58 = vpop.f32.mrb[67].mxu0 }
0x915c   :  { %v6993_v56 = vpop.f32.mrb[68].mxu0 }
0x915d   :  { %v6998_v9 = vrot.slane %v6993_v56, 2  ;;  %v8734_v59 = vpop.f32.mrb[69].mxu0 }
0x915f   :  { %v7000_v20 = vadd.f32 %v6998_v9, %v11107_v60 }
0x9161   :  { %9511 = vtanh.f32 %v7000_v20  ;;  %v7994_v57 = vmul.f32 -1.442695, %v7000_v20 }
0x9163   :  { %9513 = vpow2.f32 %v7994_v57 }
0x916b   :  { %v9512_v53 = vpop.eup %9511 }
0x916c   :  { %7013 = vrot.lane.b32.xlu0 %v9512_v53, %s9927_s3 }
0x916d   :  { %v9514_v61 = vpop.eup %9513 }
0x916e   :  { %v7004_v51 = vadd.f32 1.0, %v9514_v61 }
0x9170   :  { %9515 = vrcp.f32 %v7004_v51 }
0x917a   :  { %v9516_v5 = vpop.eup %9515 }
0x917b   :  { %v7011_v52 = vmul.f32 %v9516_v5, %v7009_v41 }
0x91de   :  { %v7014_v14 = vpop.permute.xlu0 %7013 }
0x91df   :  { %v7016_v17 = vmul.f32 %v9516_v5, %v7014_v14 }
0x91e1   :  { %7018 = vrot.lane.b32.xlu1 %v7016_v17, %s9928_s23 }
0x9253   :  { %v7019_v23 = vpop.permute.xlu1 %7018 }
0x9254   :  { %v7021_v18 = vadd.f32 %v7019_v23, %v7011_v52 }
0x9256   :  { %9517 = vtanh.f32 %v7021_v18  ;;  %v7116_v44 = vrot.slane %v7021_v18, 1 }
0x9260   :  { %v9518_v62 = vpop.eup %9517 }
0x9261   :  { %7024 = vrot.lane.b32.xlu0 %v9518_v62, %s9929_s28 }
0x92d3   :  { %v7025_v28 = vpop.permute.xlu0 %7024 }
0x92d4   :  { %v11146_v13 = vmul.f32 %v9516_v5, %v7025_v28 }
0x92d6   :  { %v7029_v25 = vrot.slane %v11146_v13, 6 }
0x92d8   :  { %7030 = vrot.lane.b32.xlu1 %v7029_v25, %s9930_s19 }
0x934a   :  { %v7031_v30 = vpop.permute.xlu1 %7030 }
0x934b   :  { %8740 = vmatmul.mubr.msk.f32.vlgmr.msra.gmra.mrb[70].mxu0 %vm270_vm1, %v7031_v30 }
0x934c   :  { %9020 = vmatpush3.bf16.msra.mxu0 %v10613_v33  ;;  %8753 = vmatprep.mubr.msk.f32.mxu0 %vm9925_vm0, %v9926_v1 }
0x934d   :  { %9024 = vmatprep.subr.bf16.mxu0 %v9924_v0 }
0x941e   :  { %v7100_v2 = vpop.f32.mrb[70].mxu0 }
0x941f   :  { %v7105_v31 = vrot.slane %v7100_v2, 3  ;;  %v8741_v42 = vpop.f32.mrb[71].mxu0 }
0x9421   :  { %v7107_v46 = vadd.f32 %v7105_v31, %v11107_v60 }
0x9423   :  { %9519 = vtanh.f32 %v7107_v46  ;;  %v7996_v24 = vmul.f32 -1.442695, %v7107_v46 }
0x9425   :  { %9521 = vpow2.f32 %v7996_v24 }
0x942d   :  { %v9520_v45 = vpop.eup %9519 }
0x942e   :  { %7120 = vrot.lane.b32.xlu0 %v9520_v45, %s9927_s3 }
0x942f   :  { %v9522_v35 = vpop.eup %9521 }
0x9430   :  { %v7111_v26 = vadd.f32 1.0, %v9522_v35 }
0x9432   :  { %9523 = vrcp.f32 %v7111_v26 }
0x943c   :  { %v9524_v27 = vpop.eup %9523 }
0x943d   :  { %v7118_v39 = vmul.f32 %v9524_v27, %v7116_v44 }
0x94a0   :  { %v7121_v50 = vpop.permute.xlu0 %7120 }
0x94a1   :  { %v7123_v29 = vmul.f32 %v9524_v27, %v7121_v50 }
0x94a3   :  { %7125 = vrot.lane.b32.xlu1 %v7123_v29, %s9928_s23 }
0x9515   :  { %v7126_v47 = vpop.permute.xlu1 %7125 }
0x9516   :  { %v7128_v4 = vadd.f32 %v7126_v47, %v7118_v39 }
0x9518   :  { %9525 = vtanh.f32 %v7128_v4  ;;  %v7223_v3 = vrot.slane %v7128_v4, 1 }
0x9522   :  { %v9526_v36 = vpop.eup %9525 }
0x9523   :  { %7131 = vrot.lane.b32.xlu0 %v9526_v36, %s9929_s28 }
0x9595   :  { %v7132_v7 = vpop.permute.xlu0 %7131 }
0x9596   :  { %v11159_v11 = vmul.f32 %v9524_v27, %v7132_v7 }
0x9598   :  { %v7136_v34 = vrot.slane %v11159_v11, 5 }
0x959a   :  { %7137 = vrot.lane.b32.xlu1 %v7136_v34, %s9930_s19 }
0x960c   :  { %v7138_v43 = vpop.permute.xlu1 %7137 }
0x960d   :  { %8747 = vmatmul.mubr.msk.f32.vlgmr.msra.gmra.mrb[60].mxu1 %vm270_vm1, %v7138_v43 }
0x960e   :  { %9023 = vmatpush3.bf16.msra.mxu1 %v10613_v33  ;;  %8760 = vmatprep.mubr.msk.f32.mxu1 %vm9925_vm0, %v9926_v1 }
0x960f   :  { %9027 = vmatprep.subr.bf16.mxu1 %v9924_v0 }
0x96e0   :  { %v7207_v32 = vpop.f32.mrb[60].mxu1 }
0x96e1   :  { %v7212_v54 = vrot.slane %v7207_v32, 4  ;;  %v8748_v49 = vpop.f32.mrb[61].mxu1 }
0x96e3   :  { %v7214_v8 = vadd.f32 %v7212_v54, %v11107_v60 }
0x96e5   :  { %9527 = vtanh.f32 %v7214_v8  ;;  %v7998_v10 = vmul.f32 -1.442695, %v7214_v8 }
0x96e7   :  { %9529 = vpow2.f32 %v7998_v10 }
0x96ef   :  { %v9528_v48 = vpop.eup %9527 }
0x96f0   :  { %7227 = vrot.lane.b32.xlu0 %v9528_v48, %s9927_s3 }
0x96f1   :  { %v9530_v63 = vpop.eup %9529 }
0x96f2   :  { %v7218_v22 = vadd.f32 1.0, %v9530_v63 }
0x96f4   :  { %9531 = vrcp.f32 %v7218_v22 }
0x96fe   :  { %v9532_v37 = vpop.eup %9531 }
0x96ff   :  { %v7225_v58 = vmul.f32 %v9532_v37, %v7223_v3 }
0x9762   :  { %v7228_v21 = vpop.permute.xlu0 %7227 }
0x9763   :  { %v7230_v38 = vmul.f32 %v9532_v37, %v7228_v21 }
0x9765   :  { %7232 = vrot.lane.b32.xlu1 %v7230_v38, %s9928_s23 }
0x97d7   :  { %v7233_v56 = vpop.permute.xlu1 %7232 }
0x97d8   :  { %v7235_v9 = vadd.f32 %v7233_v56, %v7225_v58 }
0x97da   :  { %9533 = vtanh.f32 %v7235_v9  ;;  %v7330_v30 = vrot.slane %v7235_v9, 1 }
0x97e4   :  { %v9534_v59 = vpop.eup %9533 }
0x97e5   :  { %7238 = vrot.lane.b32.xlu0 %v9534_v59, %s9929_s28 }
0x9857   :  { %v7239_v20 = vpop.permute.xlu0 %7238 }
0x9858   :  { %v11172_v53 = vmul.f32 %v9532_v37, %v7239_v20 }
0x985a   :  { %v7243_v57 = vrot.slane %v11172_v53, 4 }
0x985c   :  { %7244 = vrot.lane.b32.xlu1 %v7243_v57, %s9930_s19 }
0x98ce   :  { %v7245_v61 = vpop.permute.xlu1 %7244 }
0x98cf   :  { %8754 = vmatmul.mubr.msk.f32.vlgmr.msra.gmra.mrb[72].mxu0 %vm270_vm1, %v7245_v61 }
0x98d0   :  { %9026 = vmatpush3.bf16.msra.mxu0 %v10613_v33  ;;  %8767 = vmatprep.mubr.msk.f32.mxu0 %vm9925_vm0, %v9926_v1 }
0x98d1   :  { %9030 = vmatprep.subr.bf16.mxu0 %v9924_v0 }
0x99a2   :  { %v7314_v51 = vpop.f32.mrb[72].mxu0 }
0x99a3   :  { %v7319_v5 = vrot.slane %v7314_v51, 5  ;;  %v8755_v14 = vpop.f32.mrb[73].mxu0 }
0x99a4   :  { %v6789_v14 = vrot.slane %v11140_v40, 1 }
0x99a5   :  { %v7321_v17 = vadd.f32 %v7319_v5, %v11107_v60 }
0x99a7   :  { %9535 = vtanh.f32 %v7321_v17  ;;  %v8000_v52 = vmul.f32 -1.442695, %v7321_v17  ;;  %v6791_v17 = vadd.f32 %v6789_v14, %v11021_v12 }
0x99a9   :  { %9537 = vpow2.f32 %v8000_v52 }
0x99b1   :  { %v9536_v41 = vpop.eup %9535 }
0x99b2   :  { %7334 = vrot.lane.b32.xlu0 %v9536_v41, %s9927_s3 }
0x99b3   :  { %v9538_v23 = vpop.eup %9537 }
0x99b4   :  { %v7325_v18 = vadd.f32 1.0, %v9538_v23 }
0x99b6   :  { %9539 = vrcp.f32 %v7325_v18 }
0x99c0   :  { %v9540_v62 = vpop.eup %9539 }
0x99c1   :  { %v7332_v2 = vmul.f32 %v9540_v62, %v7330_v30 }
0x9a24   :  { %v7335_v28 = vpop.permute.xlu0 %7334 }
0x9a25   :  { %v7337_v25 = vmul.f32 %v9540_v62, %v7335_v28 }
0x9a27   :  { %7339 = vrot.lane.b32.xlu1 %v7337_v25, %s9928_s23 }
0x9a99   :  { %v7340_v31 = vpop.permute.xlu1 %7339 }
0x9a9a   :  { %v7342_v42 = vadd.f32 %v7340_v31, %v7332_v2  ;;  %v6800_v31 = vrot.slane %v11116_v19, 7 }
0x9a9c   :  { %9541 = vtanh.f32 %v7342_v42  ;;  %v7437_v43 = vrot.slane %v7342_v42, 1 }
0x9aa6   :  { %v9542_v46 = vpop.eup %9541 }
0x9aa7   :  { %7345 = vrot.lane.b32.xlu0 %v9542_v46, %s9929_s28 }
0x9b19   :  { %v7346_v45 = vpop.permute.xlu0 %7345 }
0x9b1a   :  { %v11185_v24 = vmul.f32 %v9540_v62, %v7346_v45  ;;  %v7990_v62 = vmul.f32 -1.442695, %v6791_v17 }
0x9b1c   :  { %v7350_v35 = vrot.slane %v11185_v24, 3 }
0x9b1e   :  { %7351 = vrot.lane.b32.xlu1 %v7350_v35, %s9930_s19 }
0x9b90   :  { %v7352_v26 = vpop.permute.xlu1 %7351 }
0x9b91   :  { %8761 = vmatmul.mubr.msk.f32.vlgmr.msra.gmra.mrb[62].mxu1 %vm270_vm1, %v7352_v26 }
0x9b92   :  { %9029 = vmatpush3.bf16.msra.mxu1 %v10613_v33  ;;  %8774 = vmatprep.mubr.msk.f32.mxu1 %vm9925_vm0, %v9926_v1 }
0x9b93   :  { %8788 = vmatprep.subr.mxu1 %v9926_v1 }
0x9c64   :  { %v7421_v27 = vpop.f32.mrb[62].mxu1 }
0x9c65   :  { %v7426_v50 = vrot.slane %v7421_v27, 6  ;;  %v8762_v29 = vpop.f32.mrb[63].mxu1 }
0x9c67   :  { %v7428_v44 = vadd.f32 %v7426_v50, %v11107_v60 }
0x9c69   :  { %9543 = vtanh.f32 %v7428_v44  ;;  %v8002_v47 = vmul.f32 -1.442695, %v7428_v44 }
0x9c6b   :  { %9545 = vpow2.f32 %v8002_v47 }
0x9c73   :  { %v9544_v39 = vpop.eup %9543 }
0x9c74   :  { %7441 = vrot.lane.b32.xlu0 %v9544_v39, %s9927_s3 }
0x9c75   :  { %v9546_v4 = vpop.eup %9545 }
0x9c76   :  { %v7432_v36 = vadd.f32 1.0, %v9546_v4 }
0x9c78   :  { %9547 = vrcp.f32 %v7432_v36 }
0x9c82   :  { %v9548_v33 = vpop.eup %9547 }
0x9c83   :  { %v7439_v32 = vmul.f32 %v9548_v33, %v7437_v43 }
0x9ce6   :  { %v7442_v7 = vpop.permute.xlu0 %7441 }
0x9ce7   :  { %v7444_v34 = vmul.f32 %v9548_v33, %v7442_v7 }
0x9ce9   :  { %7446 = vrot.lane.b32.xlu1 %v7444_v34, %s9928_s23 }
0x9d5b   :  { %v7447_v54 = vpop.permute.xlu1 %7446 }
0x9d5c   :  { %v7449_v49 = vadd.f32 %v7447_v54, %v7439_v32 }
0x9d5e   :  { %9549 = vtanh.f32 %v7449_v49 }
0x9d68   :  { %v9550_v8 = vpop.eup %9549 }
0x9d69   :  { %7452 = vrot.lane.b32.xlu0 %v9550_v8, %s9929_s28 }
0x9ddb   :  { %v7453_v48 = vpop.permute.xlu0 %7452 }
0x9ddc   :  { %v11198_v10 = vmul.f32 %v9548_v33, %v7453_v48 }
0x9dde   :  { %v7457_v63 = vrot.slane %v11198_v10, 2 }
0x9de0   :  { %7458 = vrot.lane.b32.xlu1 %v7457_v63, %s9930_s19 }
0x9e52   :  { %v7459_v22 = vpop.permute.xlu1 %7458 }
0x9e53   :  { %8768 = vmatmul.mubr.msk.f32.vlgmr.msra.gmra.mrb[74].mxu0 %vm270_vm1, %v7459_v22 }
0x9e54   :  { %9032 = vmatpush3.bf16.msra.mxu0 %v10754_v55  ;;  %8785 = vmatprep.mubr.msk.f32.mxu0 %vm9925_vm0, %v9926_v1 }
0x9e55   :  { %9033 = vmatprep.subr.bf16.mxu0 %v9924_v0  ;;  %v7544_v0 = vrot.slane %v7449_v49, 1 }
0x9e58   :  { %9035 = vmatpush3.bf16.msra.mxu0 %v10758_v15 }
0x9f26   :  { %v7528_v37 = vpop.f32.mrb[74].mxu0 }
0x9f27   :  { %v7533_v21 = vrot.slane %v7528_v37, 7  ;;  %v8769_v38 = vpop.f32.mrb[75].mxu0 }
0x9f29   :  { %v7535_v3 = vadd.f32 %v7533_v21, %v11107_v60 }
0x9f2b   :  { %9551 = vtanh.f32 %v7535_v3  ;;  %v8004_v56 = vmul.f32 -1.442695, %v7535_v3 }
0x9f2d   :  { %9553 = vpow2.f32 %v8004_v56 }
0x9f35   :  { %v9552_v58 = vpop.eup %9551 }
0x9f36   :  { %7548 = vrot.lane.b32.xlu0 %v9552_v58, %s9927_s3 }
0x9f37   :  { %v9554_v9 = vpop.eup %9553 }
0x9f38   :  { %v7539_v55 = vadd.f32 1.0, %v9554_v9 }
0x9f3a   :  { %9555 = vrcp.f32 %v7539_v55 }
0x9f44   :  { %v9556_v59 = vpop.eup %9555 }
0x9f45   :  { %v7546_v15 = vmul.f32 %v9556_v59, %v7544_v0 }
0x9fa8   :  { %v7549_v20 = vpop.permute.xlu0 %7548 }
0x9fa9   :  { %v7551_v57 = vmul.f32 %v9556_v59, %v7549_v20 }
0x9fab   :  { %7553 = vrot.lane.b32.xlu1 %v7551_v57, %s9928_s23 }
0xa01d   :  { %v7554_v61 = vpop.permute.xlu1 %7553 }
0xa01e   :  { %v7556_v51 = vadd.f32 %v7554_v61, %v7546_v15 }
0xa020   :  { %9557 = vtanh.f32 %v7556_v51  ;;  %v7648_v36 = vrot.slane %v7556_v51, 1 }
0xa021   :  { %9559 = vtanh.f32 %v6791_v17 }
0xa022   :  { %9561 = vpow2.f32 %v7990_v62 }
0xa02a   :  { %v9558_v5 = vpop.eup %9557 }
0xa02b   :  { %7559 = vrot.lane.b32.xlu0 %v9558_v5, %s9929_s28  ;;  %v9560_v18 = vpop.eup %9559 }
0xa02c   :  { %v9562_v28 = vpop.eup %9561 }
0xa02d   :  { %v6795_v25 = vadd.f32 1.0, %v9562_v28 }
0xa02f   :  { %9563 = vrcp.f32 %v6795_v25  ;;  %v9583_v25 = vld [vmem:[#allocation5] sm:$0xff] }
0xa039   :  { %v9564_v12 = vpop.eup %9563 }
0xa03a   :  { %v6802_v42 = vmul.f32 %v9564_v12, %v6800_v31 }
0xa09d   :  { %v7560_v41 = vpop.permute.xlu0 %7559 }
0xa09e   :  { %v7562_v52 = vmul.f32 %v9556_v59, %v7560_v41 }
0xa0a0   :  { %v7564_v23 = vrot.slane %v7562_v52, 1 }
0xa0a2   :  { %7565 = vrot.lane.b32.xlu1 %v7564_v23, %s9930_s19 }
0xa0a6   :  { %6804 = vrot.lane.b32.xlu1 %v9560_v18, %s9927_s3 }
0xa114   :  { %v7566_v30 = vpop.permute.xlu1 %7565 }
0xa115   :  { %8775 = vmatmul.mubr.msk.f32.vlgmr.msra.gmra.mrb[64].mxu1 %vm270_vm1, %v7566_v30 }
0xa116   :  { %8790 = vmatprep.mubr.msk.f32.mxu1 %vm9925_vm0, %v9926_v1 }
0xa118   :  { %v6805_v40 = vpop.permute.xlu1 %6804 }
0xa119   :  { %v6807_v2 = vmul.f32 %v9564_v12, %v6805_v40 }
0xa11b   :  { %6809 = vrot.lane.b32.xlu1 %v6807_v2, %s9928_s23 }
0xa18d   :  { %v6810_v46 = vpop.permute.xlu1 %6809 }
0xa18e   :  { %v6812_v45 = vadd.f32 %v6810_v46, %v6802_v42 }
0xa190   :  { %9565 = vtanh.f32 %v6812_v45 }
0xa19a   :  { %v9566_v35 = vpop.eup %9565 }
0xa19b   :  { %6815 = vrot.lane.b32.xlu1 %v9566_v35, %s9929_s28 }
0xa1e8   :  { %v7635_v26 = vpop.f32.mrb[64].mxu1 }
0xa1e9   :  { %v7639_v27 = vadd.f32 %v7635_v26, %v11107_v60  ;;  %v8776_v50 = vpop.f32.mrb[65].mxu1 }
0xa1eb   :  { %9567 = vtanh.f32 %v7639_v27  ;;  %v8006_v29 = vmul.f32 -1.442695, %v7639_v27 }
0xa1ed   :  { %9569 = vpow2.f32 %v8006_v29 }
0xa1f5   :  { %v9568_v1 = vpop.eup %9567 }
0xa1f6   :  { %7652 = vrot.lane.b32.xlu0 %v9568_v1, %s9927_s3 }
0xa1f7   :  { %v9570_v44 = vpop.eup %9569 }
0xa1f8   :  { %v7643_v39 = vadd.f32 1.0, %v9570_v44 }
0xa1fa   :  { %9571 = vrcp.f32 %v7643_v39 }
0xa204   :  { %v9572_v19 = vpop.eup %9571 }
0xa205   :  { %v7650_v33 = vmul.f32 %v9572_v19, %v7648_v36 }
0xa20d   :  { %v6816_v60 = vpop.permute.xlu1 %6815 }
0xa20e   :  { %v6818_v32 = vmul.f32 %v9564_v12, %v6816_v60  ;;  %v9584_v12 = vld [vmem:[%s11281_s17] ss:$0 sm:$0xff] }
0xa210   :  { %v6825_v54 = vsel %vm1283_vm9, %v11123_v6, %v6818_v32 }
0xa268   :  { %v7653_v47 = vpop.permute.xlu0 %7652 }
0xa269   :  { %v7655_v4 = vmul.f32 %v9572_v19, %v7653_v47 }
0xa26b   :  { %7657 = vrot.lane.b32.xlu0 %v7655_v4, %s9928_s23 }
0xa2dd   :  { %v7658_v7 = vpop.permute.xlu0 %7657 }
0xa2de   :  { %v7660_v34 = vadd.f32 %v7658_v7, %v7650_v33 }
0xa2e0   :  { %9573 = vtanh.f32 %v7660_v34 }
0xa2ea   :  { %v9574_v43 = vpop.eup %9573 }
0xa2eb   :  { %7663 = vrot.lane.b32.xlu0 %v9574_v43, %s9929_s28 }
0xa2ef   :  { %7675 = vrot.lane.b32.xlu0 %v6825_v54, %s9930_s19 }
0xa35d   :  { %v7664_v49 = vpop.permute.xlu0 %7663 }
0xa35e   :  { %v7666_v8 = vmul.f32 %v9572_v19, %v7664_v49 }
0xa360   :  { %v7667_v48 = vsel %vm1271_vm3, %v7666_v8, %v7562_v52 }
0xa361   :  { %v7668_v63 = vsel %vm1273_vm4, %v7667_v48, %v11198_v10  ;;  %v7676_v3 = vpop.permute.xlu0 %7675 }
0xa362   :  { %v7669_v22 = vsel %vm1275_vm5, %v7668_v63, %v11185_v24 }
0xa363   :  { %v7670_v37 = vsel %vm1277_vm6, %v7669_v22, %v11172_v53 }
0xa364   :  { %v7671_v21 = vsel %vm1279_vm7, %v7670_v37, %v11159_v11 }
0xa365   :  { %v7672_v6 = vsel %vm1281_vm8, %v7671_v21, %v11146_v13 }
0xa366   :  { %v7673_v38 = vsel %vm1283_vm9, %v7672_v6, %v11126_v16 }
0xa367   :  { %7679 = vrot.lane.b32.xlu1 %v7673_v38, %s9927_s3 }
0xa3d9   :  { %v7680_v58 = vpop.permute.xlu1 %7679 }
0xa3da   :  { %v7682_v10 = vsel %vm270_vm1, %v7676_v3, %v7680_v58 }
0xa3db   :  { %v7683_v56 = vmax.f32 %v7682_v10, 0.0 }
0xa3dd   :  { %v7684_v24 = vsel %vm351_vm2, %v7683_v56, -inf }
0xa3de   :  { %v7685_v9 = vrot.slane %v7684_v24, 4 }
0xa3e0   :  { %v7686_v53 = vmax.f32 %v7684_v24, %v7685_v9 }
0xa3e2   :  { %v7687_v55 = vrot.slane %v7686_v53, 2 }
0xa3e4   :  { %v7688_v59 = vmax.f32 %v7686_v53, %v7687_v55 }
0xa3e6   :  { %v7689_v11 = vrot.slane %v7688_v59, 1 }
0xa3e8   :  { %v7690_v20 = vmax.f32 %v7688_v59, %v7689_v11 }
0xa3ea   :  { %v7691_v57 = vsub.f32 %v7683_v56, %v7690_v20 }
0xa3ec   :  { %v7692_v13 = vmul.f32 1.442695, %v7691_v57 }
0xa3ee   :  { %9575 = vpow2.f32 %v7692_v13 }
0xa3f8   :  { %v9576_v0 = vpop.eup %9575 }
0xa3f9   :  { %v7694_v16 = vsel %vm351_vm2, %v9576_v0, 0.0 }
0xa3fa   :  { %v7695_v15 = vrot.slane %v7694_v16, 4 }
0xa3fc   :  { %v7696_v61 = vadd.f32 %v7695_v15, %v7694_v16 }
0xa3fe   :  { %v7697_v51 = vrot.slane %v7696_v61, 2 }
0xa400   :  { %v7698_v5 = vadd.f32 %v7697_v51, %v7696_v61 }
0xa402   :  { %v7699_v14 = vrot.slane %v7698_v5, 1 }
0xa404   :  { %v7700_v17 = vadd.f32 %v7699_v14, %v7698_v5 }
0xa406   :  { %9577 = vrcp.f32 %v7700_v17 }
0xa410   :  { %v9578_v41 = vpop.eup %9577 }
0xa411   :  { %v7702_v52 = vmul.f32 %v9578_v41, %v9576_v0 }
0xa413   :  { %v7703_v23 = vmul.f32 %v7702_v52, %v7683_v56 }
0xa415   :  { %v7704_v18 = vadd.f32 %v7703_v23, %v7683_v56 }
0xa417   :  { %8786 = vmatmul.mubr.msk.f32.vlgmr.msra.gmra.mrb[76].mxu0 %vm351_vm2, %v7704_v18 }
0xa4ea   :  { %v7774_v62 = vpop.f32.mrb[76].mxu0 }
0xa4eb   :  { %v8787_v28 = vpop.f32.mrb[77].mxu0  ;;  %8789 = vmatpush3.msra.mxu1 %v7774_v62 }
0xa4ec   :  { %8791 = vmatmul.mubr.msk.f32.vlgmr.msra.gmra.mrb[66].mxu1 %vm4187_vm10, %v9583_v25 }
0xa5bf   :  { %v7844_v30 = vpop.f32.mrb[66].mxu1 }
0xa5c0   :  { %v7845_v40 = vadd.f32 %v9584_v12, %v7844_v30  ;;  %v8792_v2 = vpop.f32.mrb[67].mxu1 }
0xa5c2   :  { %7848 = vst.msk [vmem:[#allocation23] sm:$0xff] %vm351_vm2, %v7845_v40 }
0xa5c3   :  { %9882 = shalt.err (!%p9879_p10)
}
0xa5c4   :  { %s9883_s3 = scalar_lea.hbm %s11282_s18, 128 }
0xa5c5   :  { %p9884_p11 = scmp.ne.s32.totalorder %s11282_s18, %s9883_s3  ;;  %p9887_p12 = scmp.lt.u32.totalorder %s9883_s3, %s11282_s18 }
0xa5c7   :  { %p9889_p13 = pnand %p9887_p12, %p9884_p11 }
0xa5c9   :  { %9892 = shalt.err (!%p9889_p13)
}
0xa5ca   :  { %7858 = dma.vmem_to_hbm [thread:$0]  %s7856_s24, 128, %s11282_s18, [#allocation4]  }
0xa5cb   :  { %9907 = dma.done.wait [#allocation4], 128  }
0xa5cc   :  { %9908 = vsyncadd [#allocation4], 4294967168 }
0xa5cd   :  { %7862 = vsyncpa [#allocation3], 1 }
0xa5ce   :  { %7863 = vsyncpa [#allocation6], 1 }
0xa5cf   :  { %7864 = vsyncpa [#allocation9], 1 }
0xa5d0   :  { %7865 = vsyncpa [#allocation12], 1 }
0xa5d1   :  { %7866 = vsyncpa [#allocation15], 1 }
0xa5d2   :  { %7867 = vsyncpa [#allocation18], 1 }
0xa5d3   :  { %7868 = vsyncpa [#allocation21], 1 }
0xa5d4   :  { %7869 = vsyncpa [#allocation4], 1 }

</bundles_post_ra>
